<compile_context>
chip_gen: v7x
topology: tpu7x:2x2x1
jax: 0.10.0
libtpu: 0.0.40
codegen_flags: <defaults>
</compile_context>

<pallas_src>
import functools

import jax
import jax.numpy as jnp
from jax.experimental import pallas as pl
from jax.experimental.pallas import tpu as pltpu


ALIGN = 16        # row alignment (2 packed bf16 sublanes)
TILE_ROWS = 512   # output pixel-rows per grid step


def _round_up(x, m):
    return ((x + m - 1) // m) * m


@functools.lru_cache(maxsize=1)
def _vmem_limit_bytes():
    # ~100 MiB on 128-MiB parts (v5e/v6e), ~48 MiB on v7x; safe fallback = 48 MiB.
    try:
        cap = int(pltpu.get_tpu_info().vmem_capacity_bytes)
        return max(min(cap - 16 * 1024 * 1024, 100 * 1024 * 1024), 48 * 1024 * 1024)
    except Exception:
        return 48 * 1024 * 1024


# ----------------------------------------------------------------------------- #
# Pallas kernel: fused block of [3x3 conv (9 tap matmuls) + folded BN + act] x L,
# row-tiled with a per-tile halo.
# ----------------------------------------------------------------------------- #
def _make_block_kernel(n_layers, acts, couts, tm, tap, g2, ext, m_ext,
                       ext_in, m_in, wp, hpad, himg, wimg, m_pad):
    # Row offset of tap (dh, dw) in the flattened padded layout.
    offs = [dh * wp + dw for dh in (-1, 0, 1) for dw in (-1, 0, 1)]

    def kernel(*refs):
        x_ref = refs[0]                                     # (slab_rows, Cin)   bf16 resident
        w_refs = refs[1:1 + n_layers]                       # (9, Cin_l, Cout_l) bf16 resident
        s_refs = refs[1 + n_layers:1 + 2 * n_layers]        # (1, Cout_l)        f32
        b_refs = refs[1 + 2 * n_layers:1 + 3 * n_layers]    # (1, Cout_l)        f32
        out_ref = refs[1 + 3 * n_layers]                    # (tm, Cout_last)    bf16
        win_ref = refs[2 + 3 * n_layers]                    # (m_in, Cin)        bf16 scratch
        acc_refs = refs[3 + 3 * n_layers:3 + 4 * n_layers]  # (M_l, Cout_l)      f32 scratch
        act_refs = refs[3 + 4 * n_layers:]                  # (2*g2+M_l, Cout_l) bf16 scratch

        t = pl.program_id(0)
        base = pl.multiple_of(t * tm, ALIGN)

        # Stage this tile's haloed input window with ONE aligned dynamic copy; every
        # later tap slice is then a static offset into VMEM scratch.
        win_ref[...] = x_ref[pl.ds(base, m_in), :]

        # Interior (non-padding pixel) mask over the widest computed extent, built
        # in-kernel from an iota.  Row i <-> flat padded pixel (base - ext[0] + i).
        # The +0.5 makes the floor-divisions robust to f32 division rounding.
        ri = jax.lax.broadcasted_iota(jnp.int32, (m_ext[0], 1), 0).astype(jnp.float32)
        r = ri + (base - ext[0]).astype(jnp.float32)
        g = jnp.floor((r + 0.5) / wp)
        wq = r - g * wp
        gi = jnp.floor((g + 0.5) / hpad)
        hr = g - gi * hpad
        interior = ((r >= 0.0) & (r < m_pad)
                    & (hr >= 1.0) & (hr <= float(himg))
                    & (wq >= 1.0) & (wq <= float(wimg)))

        # Zero only the guard slabs of the intermediate scratch (not whole buffers).
        for l in range(n_layers - 1):
            zer = jnp.zeros((g2, couts[l]), act_refs[l].dtype)
            act_refs[l][0:g2, :] = zer
            act_refs[l][g2 + m_ext[l]:2 * g2 + m_ext[l], :] = zer

        cur = win_ref
        for l in range(n_layers):
            prev_ext = ext_in if l == 0 else ext[l - 1]
            start0 = (0 if l == 0 else g2) + prev_ext - ext[l]
            rows = m_ext[l]
            wk = w_refs[l]
            acc = acc_refs[l]
            # 9 tap matmuls on the MXU: bf16 in, f32 accumulate into a VMEM scratch ref.
            for k in range(9):
                lhs = cur[pl.ds(start0 + offs[k], rows), :]
                contrib = jnp.dot(lhs, wk[k], preferred_element_type=jnp.float32)
                if k == 0:
                    acc[...] = contrib
                else:
                    acc[...] += contrib
            y = acc[...] * s_refs[l][...] + b_refs[l][...]   # folded BatchNorm
            a = acts[l]
            if a == "relu":
                y = jnp.maximum(y, 0.0)
            elif a == "tanh":
                y = jnp.tanh(y)
            elif a == "sigmoid":
                y = jax.nn.sigmoid(y)

            if l < n_layers - 1:
                # Zero spatial-padding pixels so the next conv sees true zero padding.
                off = ext[0] - ext[l]
                y = jnp.where(interior[off:off + rows, :], y, 0.0)
                act_refs[l][pl.ds(g2, rows), :] = y.astype(act_refs[l].dtype)
                cur = act_refs[l]
            else:
                out_ref[...] = y.astype(out_ref.dtype)

    return kernel


def conv_block(x_nhwc, layers, acts, tile_rows=TILE_ROWS):
    """Fused (conv3x3 'same' + folded BN + act) x len(layers) in one row-tiled pallas_call."""
    N, H, W, Cin = x_nhwc.shape
    Hp, Wp = H + 2, W + 2
    L = len(layers)
    m_pad = N * Hp * Wp
    tap = Wp + 1                                  # max |row offset| of a 3x3 tap

    tm = min(_round_up(m_pad, ALIGN), _round_up(tile_rows, ALIGN))
    n_tiles = pl.cdiv(m_pad, tm)
    m_rows = n_tiles * tm

    # Per-layer halo (rows each side of the output tile over which layer l is computed).
    ext = [_round_up((L - 1 - l) * tap, ALIGN) for l in range(L)]
    m_ext = [tm + 2 * e for e in ext]
    ext_in = _round_up(ext[0] + tap, ALIGN)       # halo of the staged input window
    m_in = tm + 2 * ext_in
    g2 = ALIGN                                    # guard rows around intermediate scratch

    # Flattened, zero-padded input slab (1px conv border per image + halo guards at ends).
    xp = jnp.pad(x_nhwc, ((0, 0), (1, 1), (1, 1), (0, 0))).reshape(m_pad, Cin)
    x_slab = jnp.pad(xp, ((ext_in, ext_in + m_rows - m_pad), (0, 0))).astype(jnp.bfloat16)
    slab_rows = x_slab.shape[0]

    couts = [int(p["taps"].shape[-1]) for p in layers]
    cout_last = couts[-1]

    kernel = _make_block_kernel(L, tuple(acts), couts, tm, tap, g2, ext, m_ext,
                                ext_in, m_in, Wp, Hp, H, W, m_pad)

    # Grid-invariant operands (constant index_maps -> stay VMEM resident across tiles).
    in_specs = [pl.BlockSpec((slab_rows, Cin), lambda t: (0, 0))]
    args = [x_slab]
    for p in layers:
        in_specs.append(pl.BlockSpec(p["taps"].shape, lambda t: (0, 0, 0)))
        args.append(p["taps"])
    for p in layers:
        in_specs.append(pl.BlockSpec(p["scale"].shape, lambda t: (0, 0)))
        args.append(p["scale"])
    for p in layers:
        in_specs.append(pl.BlockSpec(p["bias"].shape, lambda t: (0, 0)))
        args.append(p["bias"])

    scratch_shapes = [pltpu.VMEM((m_in, Cin), jnp.bfloat16)]                       # input window
    scratch_shapes += [pltpu.VMEM((m_ext[l], couts[l]), jnp.float32)               # accumulators
                       for l in range(L)]
    scratch_shapes += [pltpu.VMEM((2 * g2 + m_ext[l], couts[l]), jnp.bfloat16)     # activations
                       for l in range(L - 1)]

    out = pl.pallas_call(
        kernel,
        out_shape=jax.ShapeDtypeStruct((m_rows, cout_last), jnp.bfloat16),
        grid_spec=pltpu.PrefetchScalarGridSpec(
            num_scalar_prefetch=0,
            grid=(n_tiles,),
            in_specs=in_specs,
            out_specs=pl.BlockSpec((tm, cout_last), lambda t: (t, 0)),
            scratch_shapes=scratch_shapes),
        compiler_params=pltpu.CompilerParams(
            dimension_semantics=("parallel",),
            vmem_limit_bytes=_vmem_limit_bytes()),
    )(*args)

    # Strip tail rows and spatial padding positions.
    out = out[:m_pad].reshape(N, Hp, Wp, cout_last)[:, 1:H + 1, 1:W + 1, :]
    return out


# ----------------------------------------------------------------------------- #
# Parameter construction (deterministic synthetic init, BN folded at build time)
# ----------------------------------------------------------------------------- #
def _make_layer(key, cin, cout, transpose, cout_pad=None):
    ks = jax.random.split(key, 6)
    fan_in = float(cin * 9)
    if transpose:
        w = jax.random.normal(ks[0], (cin, cout, 3, 3), jnp.float32) / jnp.sqrt(fan_in)
    else:
        w = jax.random.normal(ks[0], (cout, cin, 3, 3), jnp.float32) / jnp.sqrt(fan_in)
    conv_b = 0.01 * jax.random.normal(ks[1], (cout,), jnp.float32)
    gamma = 1.0 + 0.1 * jax.random.normal(ks[2], (cout,), jnp.float32)
    beta = 0.1 * jax.random.normal(ks[3], (cout,), jnp.float32)
    rmean = 0.1 * jax.random.normal(ks[4], (cout,), jnp.float32)
    rvar = 1.0 + 0.1 * jax.random.uniform(ks[5], (cout,), jnp.float32)

    eps = 1e-5
    scale = gamma / jnp.sqrt(rvar + eps)
    bias = beta + (conv_b - rmean) * scale

    taps = []
    if transpose:
        # ConvTranspose2d(k=3,s=1,p=1) == Conv2d(flipped kernel, swapped io, p=1)
        for kh in range(3):
            for kw in range(3):
                taps.append(w[:, :, 2 - kh, 2 - kw])                 # (Cin, Cout)
    else:
        for kh in range(3):
            for kw in range(3):
                taps.append(jnp.transpose(w[:, :, kh, kw], (1, 0)))  # (Cin, Cout)
    taps = jnp.stack(taps, 0)                                        # (9, Cin, Cout)

    if cout_pad is not None and cout_pad > cout:                     # lane-dense output
        pad = cout_pad - cout
        taps = jnp.pad(taps, ((0, 0), (0, 0), (0, pad)))
        scale = jnp.pad(scale, (0, pad), constant_values=1.0)
        bias = jnp.pad(bias, (0, pad))

    return {"taps": taps.astype(jnp.bfloat16),
            "scale": scale.reshape(1, -1).astype(jnp.float32),
            "bias": bias.reshape(1, -1).astype(jnp.float32)}


VGG_CFG = [
    [(3, 64), (64, 64)],
    [(64, 128), (128, 128)],
    [(128, 256), (256, 256), (256, 256)],
    [(256, 512), (512, 512), (512, 512)],
    [(512, 512), (512, 512), (512, 512)],
]
DEC_CFG = [(512, 512, True), (512, 256, True), (256, 128, True), (128, 64, False)]


def _dec_block_channels(cin, cout, large):
    return [(cin, cin), (cin, cin), (cin, cout)] if large else [(cin, cin), (cin, cout)]


def build_params(key):
    counter = [0]

    def nxt():
        k = jax.random.fold_in(key, counter[0])
        counter[0] += 1
        return k

    params = {"enc": [], "sn": [], "depth": []}
    for block in VGG_CFG:
        params["enc"].append([_make_layer(nxt(), ci, co, transpose=False)
                              for ci, co in block])
    for name, last_out in (("sn", 3), ("depth", 1)):  # surface normals: 3 ch, depth: 1 ch
        blocks = []
        for cin, cout, large in DEC_CFG:
            blocks.append([_make_layer(nxt(), ci, co, transpose=True)
                           for ci, co in _dec_block_channels(cin, cout, large)])
        final_layers = _dec_block_channels(64, last_out, False)
        final_block = []
        for idx, (ci, co) in enumerate(final_layers):
            pad_to = 128 if idx == len(final_layers) - 1 else None
            final_block.append(_make_layer(nxt(), ci, co, transpose=True, cout_pad=pad_to))
        blocks.append(final_block)
        params[name] = blocks
    return params


# ----------------------------------------------------------------------------- #
# Pool / unpool glue (int8 argmax indices, first-max row-major tie-break = PyTorch)
# ----------------------------------------------------------------------------- #
def maxpool_with_idx(x):
    N, H, W, C = x.shape
    wnd = (x.reshape(N, H // 2, 2, W // 2, 2, C)
            .transpose(0, 1, 3, 2, 4, 5)
            .reshape(N, H // 2, W // 2, 4, C))
    pooled = wnd.max(axis=3)
    idx = jnp.argmax(wnd, axis=3).astype(jnp.int8)   # first max within the 2x2 window
    return pooled, idx


def maxunpool(y, idx):
    N, Hq, Wq, C = y.shape
    sel = (idx[:, :, :, None, :] ==
           jnp.arange(4, dtype=jnp.int32).reshape(1, 1, 1, 4, 1)).astype(y.dtype)
    out = y[:, :, :, None, :] * sel
    return (out.reshape(N, Hq, Wq, 2, 2, C)
               .transpose(0, 1, 3, 2, 4, 5)
               .reshape(N, Hq * 2, Wq * 2, C))


# ----------------------------------------------------------------------------- #
# Forward pass
# ----------------------------------------------------------------------------- #
def _block_acts(n_layers, last_act):
    return ["relu"] * (n_layers - 1) + [last_act]


def surface_normal_depth_forward(params, image_nchw):
    x = jnp.transpose(image_nchw, (0, 2, 3, 1)).astype(jnp.bfloat16)  # NCHW -> NHWC

    # Encoder (PyTorch runs it twice with identical results -> compute once, share).
    idxs = []
    for block in params["enc"]:
        x = conv_block(x, block, _block_acts(len(block), "relu"))
        x, i = maxpool_with_idx(x)
        idxs.append(i)

    def decode(dec_blocks, final_act, out_ch):
        y = x
        nb = len(dec_blocks)
        for i, blk in enumerate(dec_blocks):
            y = maxunpool(y, idxs[4 - i])
            last = final_act if i == nb - 1 else "relu"
            y = conv_block(y, blk, _block_acts(len(blk), last))
        return y[..., :out_ch]   # strip lane-padded output channels

    sn = decode(params["sn"], "tanh", 3)            # Surface_Normal: last act = Tanh
    depth = decode(params["depth"], "sigmoid", 1)   # Depth decoder: last act = Sigmoid

    # Return NCHW (f32) to match the PyTorch module's output convention.
    return (jnp.transpose(sn, (0, 3, 1, 2)).astype(jnp.float32),
            jnp.transpose(depth, (0, 3, 1, 2)).astype(jnp.float32))


# ----------------------------------------------------------------------------- #
if __name__ == "__main__":
    key = jax.random.PRNGKey(0)
    pkey, ikey = jax.random.split(key)

    params = build_params(pkey)

    # batch=2 (exercises the cross-image boundary), 3 channels, 32x32 (divisible by 2^5).
    image = jax.random.normal(ikey, (2, 3, 32, 32), jnp.float32)

    # Tiling self-consistency check: many small row-tiles vs. a single tile must agree
    # (validates the halo logic independently of bf16-vs-f32 reference tolerances).
    x_nhwc = jnp.transpose(image, (0, 2, 3, 1)).astype(jnp.bfloat16)
    blk0 = params["enc"][0]
    a = conv_block(x_nhwc, blk0, _block_acts(len(blk0), "relu"), tile_rows=256)
    b = conv_block(x_nhwc, blk0, _block_acts(len(blk0), "relu"), tile_rows=1 << 20)
    assert bool(jnp.allclose(a.astype(jnp.float32), b.astype(jnp.float32),
                             atol=1e-2, rtol=1e-2))

    fwd = jax.jit(surface_normal_depth_forward)
    sn_out, depth_out = fwd(params, image)
    jax.block_until_ready(sn_out)
    jax.block_until_ready(depth_out)

    assert sn_out.shape == (2, 3, 32, 32)
    assert depth_out.shape == (2, 1, 32, 32)
    assert bool(jnp.all(jnp.isfinite(sn_out))) and bool(jnp.all(jnp.isfinite(depth_out)))
    assert bool(jnp.all(jnp.abs(sn_out) <= 1.0))                # tanh range
    assert bool(jnp.all((depth_out >= 0) & (depth_out <= 1)))   # sigmoid range

    print("KERNEL_OK")
</pallas_src>

<mosaic_0001>
module attributes {stable_mosaic.version = 11 : i64} {
  func.func @kernel(%arg0: i32, %arg1: memref<2752x3xbf16, #tpu.memory_space<vmem>>, %arg2: memref<9x3x64xbf16, #tpu.memory_space<vmem>>, %arg3: memref<9x64x64xbf16, #tpu.memory_space<vmem>>, %arg4: memref<1x64xf32, #tpu.memory_space<vmem>>, %arg5: memref<1x64xf32, #tpu.memory_space<vmem>>, %arg6: memref<1x64xf32, #tpu.memory_space<vmem>>, %arg7: memref<1x64xf32, #tpu.memory_space<vmem>>, %arg8: memref<256x64xbf16, #tpu.memory_space<vmem>>, %arg9: memref<448x3xbf16, #tpu.memory_space<vmem>>, %arg10: memref<352x64xf32, #tpu.memory_space<vmem>>, %arg11: memref<256x64xf32, #tpu.memory_space<vmem>>, %arg12: memref<384x64xbf16, #tpu.memory_space<vmem>>) attributes {dimension_semantics = [#tpu.dimension_semantics<parallel>], iteration_bounds = array<i64: 10>, scalar_prefetch = 0 : i64, scratch_operands = 4 : i64, tpu.core_type = #tpu.core_type<tc>, window_params = [{pipeline_mode = #tpu.pipeline_mode<synchronous>, transform_indices = @transform_0, window_bounds = array<i64: 2752, 3>}, {pipeline_mode = #tpu.pipeline_mode<synchronous>, transform_indices = @transform_1, window_bounds = array<i64: 9, 3, 64>}, {pipeline_mode = #tpu.pipeline_mode<synchronous>, transform_indices = @transform_2, window_bounds = array<i64: 9, 64, 64>}, {pipeline_mode = #tpu.pipeline_mode<synchronous>, transform_indices = @transform_3, window_bounds = array<i64: 1, 64>}, {pipeline_mode = #tpu.pipeline_mode<synchronous>, transform_indices = @transform_4, window_bounds = array<i64: 1, 64>}, {pipeline_mode = #tpu.pipeline_mode<synchronous>, transform_indices = @transform_5, window_bounds = array<i64: 1, 64>}, {pipeline_mode = #tpu.pipeline_mode<synchronous>, transform_indices = @transform_6, window_bounds = array<i64: 1, 64>}, {transform_indices = @transform_7, window_bounds = array<i64: 256, 64>}]} {
    %c256_i32 = arith.constant 256 : i32
    %0 = arith.muli %arg0, %c256_i32 : i32
    %1 = tpu.assume_multiple %0, 16 : i32
    %2 = arith.index_cast %1 : i32 to index
    %c0 = arith.constant 0 : index
    %3 = vector.load %arg1[%2, %c0] : memref<2752x3xbf16, #tpu.memory_space<vmem>>, vector<448x3xbf16>
    %c0_0 = arith.constant 0 : index
    %c0_1 = arith.constant 0 : index
    %4 = vector.load %arg9[%c0_0, %c0_1] : memref<448x3xbf16, #tpu.memory_space<vmem>>, vector<448x3xbf16>
    tpu.vector_store %arg9[%c0_0, %c0_1], %3 {strides = array<i32>} : memref<448x3xbf16, #tpu.memory_space<vmem>>, vector<448x3xbf16>,
    %5 = tpu.iota {dimensions = array<i32: 0>} : vector<352x1xi32>
    %6 = arith.sitofp %5 : vector<352x1xi32> to vector<352x1xf32>
    %c48_i32 = arith.constant 48 : i32
    %7 = arith.subi %1, %c48_i32 : i32
    %8 = arith.sitofp %7 : i32 to f32
    %9 = vector.broadcast %8 : f32 to vector<352x1xf32>
    %10 = arith.addf %6, %9 : vector<352x1xf32>
    %cst = arith.constant 5.000000e-01 : f32
    %11 = vector.broadcast %cst : f32 to vector<352x1xf32>
    %12 = arith.addf %10, %11 : vector<352x1xf32>
    %cst_2 = arith.constant 3.400000e+01 : f32
    %13 = vector.broadcast %cst_2 : f32 to vector<352x1xf32>
    %14 = arith.divf %12, %13 : vector<352x1xf32>
    %15 = math.floor %14 : vector<352x1xf32>
    %cst_3 = arith.constant 3.400000e+01 : f32
    %16 = vector.broadcast %cst_3 : f32 to vector<352x1xf32>
    %17 = arith.mulf %15, %16 : vector<352x1xf32>
    %18 = arith.subf %10, %17 : vector<352x1xf32>
    %cst_4 = arith.constant 5.000000e-01 : f32
    %19 = vector.broadcast %cst_4 : f32 to vector<352x1xf32>
    %20 = arith.addf %15, %19 : vector<352x1xf32>
    %cst_5 = arith.constant 3.400000e+01 : f32
    %21 = vector.broadcast %cst_5 : f32 to vector<352x1xf32>
    %22 = arith.divf %20, %21 : vector<352x1xf32>
    %23 = math.floor %22 : vector<352x1xf32>
    %cst_6 = arith.constant 3.400000e+01 : f32
    %24 = vector.broadcast %cst_6 : f32 to vector<352x1xf32>
    %25 = arith.mulf %23, %24 : vector<352x1xf32>
    %26 = arith.subf %15, %25 : vector<352x1xf32>
    %cst_7 = arith.constant 0.000000e+00 : f32
    %27 = vector.broadcast %cst_7 : f32 to vector<352x1xf32>
    %28 = arith.cmpf oge, %10, %27 : vector<352x1xf32>
    %cst_8 = arith.constant 2.312000e+03 : f32
    %29 = vector.broadcast %cst_8 : f32 to vector<352x1xf32>
    %30 = arith.cmpf olt, %10, %29 : vector<352x1xf32>
    %31 = arith.andi %28, %30 : vector<352x1xi1>
    %cst_9 = arith.constant 1.000000e+00 : f32
    %32 = vector.broadcast %cst_9 : f32 to vector<352x1xf32>
    %33 = arith.cmpf oge, %26, %32 : vector<352x1xf32>
    %34 = arith.andi %31, %33 : vector<352x1xi1>
    %cst_10 = arith.constant 3.200000e+01 : f32
    %35 = vector.broadcast %cst_10 : f32 to vector<352x1xf32>
    %36 = arith.cmpf ole, %26, %35 : vector<352x1xf32>
    %37 = arith.andi %34, %36 : vector<352x1xi1>
    %cst_11 = arith.constant 1.000000e+00 : f32
    %38 = vector.broadcast %cst_11 : f32 to vector<352x1xf32>
    %39 = arith.cmpf oge, %18, %38 : vector<352x1xf32>
    %40 = arith.andi %37, %39 : vector<352x1xi1>
    %cst_12 = arith.constant 3.200000e+01 : f32
    %41 = vector.broadcast %cst_12 : f32 to vector<352x1xf32>
    %42 = arith.cmpf ole, %18, %41 : vector<352x1xf32>
    %43 = arith.andi %40, %42 : vector<352x1xi1>
    %cst_13 = arith.constant 0.000000e+00 : bf16
    %44 = vector.broadcast %cst_13 : bf16 to vector<16x64xbf16>
    %c0_14 = arith.constant 0 : index
    %c0_15 = arith.constant 0 : index
    %45 = vector.load %arg12[%c0_14, %c0_15] : memref<384x64xbf16, #tpu.memory_space<vmem>>, vector<16x64xbf16>
    tpu.vector_store %arg12[%c0_14, %c0_15], %44 {strides = array<i32>} : memref<384x64xbf16, #tpu.memory_space<vmem>>, vector<16x64xbf16>,
    %c368 = arith.constant 368 : index
    %c0_16 = arith.constant 0 : index
    %46 = vector.load %arg12[%c368, %c0_16] : memref<384x64xbf16, #tpu.memory_space<vmem>>, vector<16x64xbf16>
    tpu.vector_store %arg12[%c368, %c0_16], %44 {strides = array<i32>} : memref<384x64xbf16, #tpu.memory_space<vmem>>, vector<16x64xbf16>,
    %c13 = arith.constant 13 : index
    %c0_17 = arith.constant 0 : index
    %47 = vector.load %arg9[%c13, %c0_17] : memref<448x3xbf16, #tpu.memory_space<vmem>>, vector<352x3xbf16>
    %c0_18 = arith.constant 0 : index
    %c0_19 = arith.constant 0 : index
    %c0_20 = arith.constant 0 : index
    %48 = vector.load %arg2[%c0_18, %c0_19, %c0_20] : memref<9x3x64xbf16, #tpu.memory_space<vmem>>, vector<1x3x64xbf16>
    %49 = vector.shape_cast %48 : vector<1x3x64xbf16> to vector<3x64xbf16>
    %cst_21 = arith.constant dense<0.000000e+00> : vector<352x64xf32>
    %50 = tpu.matmul %47, %49, %cst_21 {dimension_numbers = #tpu.dot_dimension_numbers<[1], [0], [0], [1], [0, 0, 1, 1], [], []>} : vector<352x3xbf16>, vector<3x64xbf16>, vector<352x64xf32> -> vector<352x64xf32>
    %c0_22 = arith.constant 0 : index
    %c0_23 = arith.constant 0 : index
    %51 = vector.load %arg10[%c0_22, %c0_23] : memref<352x64xf32, #tpu.memory_space<vmem>>, vector<352x64xf32>
    tpu.vector_store %arg10[%c0_22, %c0_23], %50 {strides = array<i32>} : memref<352x64xf32, #tpu.memory_space<vmem>>, vector<352x64xf32>,
    %c14 = arith.constant 14 : index
    %c0_24 = arith.constant 0 : index
    %52 = vector.load %arg9[%c14, %c0_24] : memref<448x3xbf16, #tpu.memory_space<vmem>>, vector<352x3xbf16>
    %c1 = arith.constant 1 : index
    %c0_25 = arith.constant 0 : index
    %c0_26 = arith.constant 0 : index
    %53 = vector.load %arg2[%c1, %c0_25, %c0_26] : memref<9x3x64xbf16, #tpu.memory_space<vmem>>, vector<1x3x64xbf16>
    %54 = vector.shape_cast %53 : vector<1x3x64xbf16> to vector<3x64xbf16>
    %cst_27 = arith.constant dense<0.000000e+00> : vector<352x64xf32>
    %55 = tpu.matmul %52, %54, %cst_27 {dimension_numbers = #tpu.dot_dimension_numbers<[1], [0], [0], [1], [0, 0, 1, 1], [], []>} : vector<352x3xbf16>, vector<3x64xbf16>, vector<352x64xf32> -> vector<352x64xf32>
    %c0_28 = arith.constant 0 : index
    %c0_29 = arith.constant 0 : index
    %56 = vector.load %arg10[%c0_28, %c0_29] : memref<352x64xf32, #tpu.memory_space<vmem>>, vector<352x64xf32>
    %57 = arith.addf %56, %55 : vector<352x64xf32>
    %c0_30 = arith.constant 0 : index
    %c0_31 = arith.constant 0 : index
    %58 = vector.load %arg10[%c0_30, %c0_31] : memref<352x64xf32, #tpu.memory_space<vmem>>, vector<352x64xf32>
    tpu.vector_store %arg10[%c0_30, %c0_31], %57 {strides = array<i32>} : memref<352x64xf32, #tpu.memory_space<vmem>>, vector<352x64xf32>,
    %c15 = arith.constant 15 : index
    %c0_32 = arith.constant 0 : index
    %59 = vector.load %arg9[%c15, %c0_32] : memref<448x3xbf16, #tpu.memory_space<vmem>>, vector<352x3xbf16>
    %c2 = arith.constant 2 : index
    %c0_33 = arith.constant 0 : index
    %c0_34 = arith.constant 0 : index
    %60 = vector.load %arg2[%c2, %c0_33, %c0_34] : memref<9x3x64xbf16, #tpu.memory_space<vmem>>, vector<1x3x64xbf16>
    %61 = vector.shape_cast %60 : vector<1x3x64xbf16> to vector<3x64xbf16>
    %cst_35 = arith.constant dense<0.000000e+00> : vector<352x64xf32>
    %62 = tpu.matmul %59, %61, %cst_35 {dimension_numbers = #tpu.dot_dimension_numbers<[1], [0], [0], [1], [0, 0, 1, 1], [], []>} : vector<352x3xbf16>, vector<3x64xbf16>, vector<352x64xf32> -> vector<352x64xf32>
    %c0_36 = arith.constant 0 : index
    %c0_37 = arith.constant 0 : index
    %63 = vector.load %arg10[%c0_36, %c0_37] : memref<352x64xf32, #tpu.memory_space<vmem>>, vector<352x64xf32>
    %64 = arith.addf %63, %62 : vector<352x64xf32>
    %c0_38 = arith.constant 0 : index
    %c0_39 = arith.constant 0 : index
    %65 = vector.load %arg10[%c0_38, %c0_39] : memref<352x64xf32, #tpu.memory_space<vmem>>, vector<352x64xf32>
    tpu.vector_store %arg10[%c0_38, %c0_39], %64 {strides = array<i32>} : memref<352x64xf32, #tpu.memory_space<vmem>>, vector<352x64xf32>,
    %c47 = arith.constant 47 : index
    %c0_40 = arith.constant 0 : index
    %66 = vector.load %arg9[%c47, %c0_40] : memref<448x3xbf16, #tpu.memory_space<vmem>>, vector<352x3xbf16>
    %c3 = arith.constant 3 : index
    %c0_41 = arith.constant 0 : index
    %c0_42 = arith.constant 0 : index
    %67 = vector.load %arg2[%c3, %c0_41, %c0_42] : memref<9x3x64xbf16, #tpu.memory_space<vmem>>, vector<1x3x64xbf16>
    %68 = vector.shape_cast %67 : vector<1x3x64xbf16> to vector<3x64xbf16>
    %cst_43 = arith.constant dense<0.000000e+00> : vector<352x64xf32>
    %69 = tpu.matmul %66, %68, %cst_43 {dimension_numbers = #tpu.dot_dimension_numbers<[1], [0], [0], [1], [0, 0, 1, 1], [], []>} : vector<352x3xbf16>, vector<3x64xbf16>, vector<352x64xf32> -> vector<352x64xf32>
    %c0_44 = arith.constant 0 : index
    %c0_45 = arith.constant 0 : index
    %70 = vector.load %arg10[%c0_44, %c0_45] : memref<352x64xf32, #tpu.memory_space<vmem>>, vector<352x64xf32>
    %71 = arith.addf %70, %69 : vector<352x64xf32>
    %c0_46 = arith.constant 0 : index
    %c0_47 = arith.constant 0 : index
    %72 = vector.load %arg10[%c0_46, %c0_47] : memref<352x64xf32, #tpu.memory_space<vmem>>, vector<352x64xf32>
    tpu.vector_store %arg10[%c0_46, %c0_47], %71 {strides = array<i32>} : memref<352x64xf32, #tpu.memory_space<vmem>>, vector<352x64xf32>,
    %c48 = arith.constant 48 : index
    %c0_48 = arith.constant 0 : index
    %73 = vector.load %arg9[%c48, %c0_48] : memref<448x3xbf16, #tpu.memory_space<vmem>>, vector<352x3xbf16>
    %c4 = arith.constant 4 : index
    %c0_49 = arith.constant 0 : index
    %c0_50 = arith.constant 0 : index
    %74 = vector.load %arg2[%c4, %c0_49, %c0_50] : memref<9x3x64xbf16, #tpu.memory_space<vmem>>, vector<1x3x64xbf16>
    %75 = vector.shape_cast %74 : vector<1x3x64xbf16> to vector<3x64xbf16>
    %cst_51 = arith.constant dense<0.000000e+00> : vector<352x64xf32>
    %76 = tpu.matmul %73, %75, %cst_51 {dimension_numbers = #tpu.dot_dimension_numbers<[1], [0], [0], [1], [0, 0, 1, 1], [], []>} : vector<352x3xbf16>, vector<3x64xbf16>, vector<352x64xf32> -> vector<352x64xf32>
    %c0_52 = arith.constant 0 : index
    %c0_53 = arith.constant 0 : index
    %77 = vector.load %arg10[%c0_52, %c0_53] : memref<352x64xf32, #tpu.memory_space<vmem>>, vector<352x64xf32>
    %78 = arith.addf %77, %76 : vector<352x64xf32>
    %c0_54 = arith.constant 0 : index
    %c0_55 = arith.constant 0 : index
    %79 = vector.load %arg10[%c0_54, %c0_55] : memref<352x64xf32, #tpu.memory_space<vmem>>, vector<352x64xf32>
    tpu.vector_store %arg10[%c0_54, %c0_55], %78 {strides = array<i32>} : memref<352x64xf32, #tpu.memory_space<vmem>>, vector<352x64xf32>,
    %c49 = arith.constant 49 : index
    %c0_56 = arith.constant 0 : index
    %80 = vector.load %arg9[%c49, %c0_56] : memref<448x3xbf16, #tpu.memory_space<vmem>>, vector<352x3xbf16>
    %c5 = arith.constant 5 : index
    %c0_57 = arith.constant 0 : index
    %c0_58 = arith.constant 0 : index
    %81 = vector.load %arg2[%c5, %c0_57, %c0_58] : memref<9x3x64xbf16, #tpu.memory_space<vmem>>, vector<1x3x64xbf16>
    %82 = vector.shape_cast %81 : vector<1x3x64xbf16> to vector<3x64xbf16>
    %cst_59 = arith.constant dense<0.000000e+00> : vector<352x64xf32>
    %83 = tpu.matmul %80, %82, %cst_59 {dimension_numbers = #tpu.dot_dimension_numbers<[1], [0], [0], [1], [0, 0, 1, 1], [], []>} : vector<352x3xbf16>, vector<3x64xbf16>, vector<352x64xf32> -> vector<352x64xf32>
    %c0_60 = arith.constant 0 : index
    %c0_61 = arith.constant 0 : index
    %84 = vector.load %arg10[%c0_60, %c0_61] : memref<352x64xf32, #tpu.memory_space<vmem>>, vector<352x64xf32>
    %85 = arith.addf %84, %83 : vector<352x64xf32>
    %c0_62 = arith.constant 0 : index
    %c0_63 = arith.constant 0 : index
    %86 = vector.load %arg10[%c0_62, %c0_63] : memref<352x64xf32, #tpu.memory_space<vmem>>, vector<352x64xf32>
    tpu.vector_store %arg10[%c0_62, %c0_63], %85 {strides = array<i32>} : memref<352x64xf32, #tpu.memory_space<vmem>>, vector<352x64xf32>,
    %c81 = arith.constant 81 : index
    %c0_64 = arith.constant 0 : index
    %87 = vector.load %arg9[%c81, %c0_64] : memref<448x3xbf16, #tpu.memory_space<vmem>>, vector<352x3xbf16>
    %c6 = arith.constant 6 : index
    %c0_65 = arith.constant 0 : index
    %c0_66 = arith.constant 0 : index
    %88 = vector.load %arg2[%c6, %c0_65, %c0_66] : memref<9x3x64xbf16, #tpu.memory_space<vmem>>, vector<1x3x64xbf16>
    %89 = vector.shape_cast %88 : vector<1x3x64xbf16> to vector<3x64xbf16>
    %cst_67 = arith.constant dense<0.000000e+00> : vector<352x64xf32>
    %90 = tpu.matmul %87, %89, %cst_67 {dimension_numbers = #tpu.dot_dimension_numbers<[1], [0], [0], [1], [0, 0, 1, 1], [], []>} : vector<352x3xbf16>, vector<3x64xbf16>, vector<352x64xf32> -> vector<352x64xf32>
    %c0_68 = arith.constant 0 : index
    %c0_69 = arith.constant 0 : index
    %91 = vector.load %arg10[%c0_68, %c0_69] : memref<352x64xf32, #tpu.memory_space<vmem>>, vector<352x64xf32>
    %92 = arith.addf %91, %90 : vector<352x64xf32>
    %c0_70 = arith.constant 0 : index
    %c0_71 = arith.constant 0 : index
    %93 = vector.load %arg10[%c0_70, %c0_71] : memref<352x64xf32, #tpu.memory_space<vmem>>, vector<352x64xf32>
    tpu.vector_store %arg10[%c0_70, %c0_71], %92 {strides = array<i32>} : memref<352x64xf32, #tpu.memory_space<vmem>>, vector<352x64xf32>,
    %c82 = arith.constant 82 : index
    %c0_72 = arith.constant 0 : index
    %94 = vector.load %arg9[%c82, %c0_72] : memref<448x3xbf16, #tpu.memory_space<vmem>>, vector<352x3xbf16>
    %c7 = arith.constant 7 : index
    %c0_73 = arith.constant 0 : index
    %c0_74 = arith.constant 0 : index
    %95 = vector.load %arg2[%c7, %c0_73, %c0_74] : memref<9x3x64xbf16, #tpu.memory_space<vmem>>, vector<1x3x64xbf16>
    %96 = vector.shape_cast %95 : vector<1x3x64xbf16> to vector<3x64xbf16>
    %cst_75 = arith.constant dense<0.000000e+00> : vector<352x64xf32>
    %97 = tpu.matmul %94, %96, %cst_75 {dimension_numbers = #tpu.dot_dimension_numbers<[1], [0], [0], [1], [0, 0, 1, 1], [], []>} : vector<352x3xbf16>, vector<3x64xbf16>, vector<352x64xf32> -> vector<352x64xf32>
    %c0_76 = arith.constant 0 : index
    %c0_77 = arith.constant 0 : index
    %98 = vector.load %arg10[%c0_76, %c0_77] : memref<352x64xf32, #tpu.memory_space<vmem>>, vector<352x64xf32>
    %99 = arith.addf %98, %97 : vector<352x64xf32>
    %c0_78 = arith.constant 0 : index
    %c0_79 = arith.constant 0 : index
    %100 = vector.load %arg10[%c0_78, %c0_79] : memref<352x64xf32, #tpu.memory_space<vmem>>, vector<352x64xf32>
    tpu.vector_store %arg10[%c0_78, %c0_79], %99 {strides = array<i32>} : memref<352x64xf32, #tpu.memory_space<vmem>>, vector<352x64xf32>,
    %c83 = arith.constant 83 : index
    %c0_80 = arith.constant 0 : index
    %101 = vector.load %arg9[%c83, %c0_80] : memref<448x3xbf16, #tpu.memory_space<vmem>>, vector<352x3xbf16>
    %c8 = arith.constant 8 : index
    %c0_81 = arith.constant 0 : index
    %c0_82 = arith.constant 0 : index
    %102 = vector.load %arg2[%c8, %c0_81, %c0_82] : memref<9x3x64xbf16, #tpu.memory_space<vmem>>, vector<1x3x64xbf16>
    %103 = vector.shape_cast %102 : vector<1x3x64xbf16> to vector<3x64xbf16>
    %cst_83 = arith.constant dense<0.000000e+00> : vector<352x64xf32>
    %104 = tpu.matmul %101, %103, %cst_83 {dimension_numbers = #tpu.dot_dimension_numbers<[1], [0], [0], [1], [0, 0, 1, 1], [], []>} : vector<352x3xbf16>, vector<3x64xbf16>, vector<352x64xf32> -> vector<352x64xf32>
    %c0_84 = arith.constant 0 : index
    %c0_85 = arith.constant 0 : index
    %105 = vector.load %arg10[%c0_84, %c0_85] : memref<352x64xf32, #tpu.memory_space<vmem>>, vector<352x64xf32>
    %106 = arith.addf %105, %104 : vector<352x64xf32>
    %c0_86 = arith.constant 0 : index
    %c0_87 = arith.constant 0 : index
    %107 = vector.load %arg10[%c0_86, %c0_87] : memref<352x64xf32, #tpu.memory_space<vmem>>, vector<352x64xf32>
    tpu.vector_store %arg10[%c0_86, %c0_87], %106 {strides = array<i32>} : memref<352x64xf32, #tpu.memory_space<vmem>>, vector<352x64xf32>,
    %c0_88 = arith.constant 0 : index
    %c0_89 = arith.constant 0 : index
    %108 = vector.load %arg10[%c0_88, %c0_89] : memref<352x64xf32, #tpu.memory_space<vmem>>, vector<352x64xf32>
    %c0_90 = arith.constant 0 : index
    %c0_91 = arith.constant 0 : index
    %109 = vector.load %arg4[%c0_90, %c0_91] : memref<1x64xf32, #tpu.memory_space<vmem>>, vector<1x64xf32>
    %110 = vector.broadcast %109 : vector<1x64xf32> to vector<352x64xf32>
    %111 = arith.mulf %108, %110 : vector<352x64xf32>
    %c0_92 = arith.constant 0 : index
    %c0_93 = arith.constant 0 : index
    %112 = vector.load %arg6[%c0_92, %c0_93] : memref<1x64xf32, #tpu.memory_space<vmem>>, vector<1x64xf32>
    %113 = vector.broadcast %112 : vector<1x64xf32> to vector<352x64xf32>
    %114 = arith.addf %111, %113 : vector<352x64xf32>
    %cst_94 = arith.constant 0.000000e+00 : f32
    %115 = vector.broadcast %cst_94 : f32 to vector<352x64xf32>
    %116 = arith.maximumf %114, %115 : vector<352x64xf32>
    %cst_95 = arith.constant 0.000000e+00 : f32
    %117 = vector.shape_cast %43 : vector<352x1xi1> to vector<352x1xi1>
    %118 = vector.broadcast %117 : vector<352x1xi1> to vector<352x64xi1>
    %119 = vector.broadcast %cst_95 : f32 to vector<352x64xf32>
    %120 = arith.select %118, %116, %119 : vector<352x64xi1>, vector<352x64xf32>
    %121 = arith.truncf %120 : vector<352x64xf32> to vector<352x64xbf16>
    %c16 = arith.constant 16 : index
    %c0_96 = arith.constant 0 : index
    %122 = vector.load %arg12[%c16, %c0_96] : memref<384x64xbf16, #tpu.memory_space<vmem>>, vector<352x64xbf16>
    tpu.vector_store %arg12[%c16, %c0_96], %121 {strides = array<i32>} : memref<384x64xbf16, #tpu.memory_space<vmem>>, vector<352x64xbf16>,
    %c29 = arith.constant 29 : index
    %c0_97 = arith.constant 0 : index
    %123 = vector.load %arg12[%c29, %c0_97] : memref<384x64xbf16, #tpu.memory_space<vmem>>, vector<256x64xbf16>
    %c0_98 = arith.constant 0 : index
    %c0_99 = arith.constant 0 : index
    %c0_100 = arith.constant 0 : index
    %124 = vector.load %arg3[%c0_98, %c0_99, %c0_100] : memref<9x64x64xbf16, #tpu.memory_space<vmem>>, vector<1x64x64xbf16>
    %125 = vector.shape_cast %124 : vector<1x64x64xbf16> to vector<64x64xbf16>
    %cst_101 = arith.constant dense<0.000000e+00> : vector<256x64xf32>
    %126 = tpu.matmul %123, %125, %cst_101 {dimension_numbers = #tpu.dot_dimension_numbers<[1], [0], [0], [1], [0, 0, 1, 1], [], []>} : vector<256x64xbf16>, vector<64x64xbf16>, vector<256x64xf32> -> vector<256x64xf32>
    %c0_102 = arith.constant 0 : index
    %c0_103 = arith.constant 0 : index
    %127 = vector.load %arg11[%c0_102, %c0_103] : memref<256x64xf32, #tpu.memory_space<vmem>>, vector<256x64xf32>
    tpu.vector_store %arg11[%c0_102, %c0_103], %126 {strides = array<i32>} : memref<256x64xf32, #tpu.memory_space<vmem>>, vector<256x64xf32>,
    %c30 = arith.constant 30 : index
    %c0_104 = arith.constant 0 : index
    %128 = vector.load %arg12[%c30, %c0_104] : memref<384x64xbf16, #tpu.memory_space<vmem>>, vector<256x64xbf16>
    %c1_105 = arith.constant 1 : index
    %c0_106 = arith.constant 0 : index
    %c0_107 = arith.constant 0 : index
    %129 = vector.load %arg3[%c1_105, %c0_106, %c0_107] : memref<9x64x64xbf16, #tpu.memory_space<vmem>>, vector<1x64x64xbf16>
    %130 = vector.shape_cast %129 : vector<1x64x64xbf16> to vector<64x64xbf16>
    %cst_108 = arith.constant dense<0.000000e+00> : vector<256x64xf32>
    %131 = tpu.matmul %128, %130, %cst_108 {dimension_numbers = #tpu.dot_dimension_numbers<[1], [0], [0], [1], [0, 0, 1, 1], [], []>} : vector<256x64xbf16>, vector<64x64xbf16>, vector<256x64xf32> -> vector<256x64xf32>
    %c0_109 = arith.constant 0 : index
    %c0_110 = arith.constant 0 : index
    %132 = vector.load %arg11[%c0_109, %c0_110] : memref<256x64xf32, #tpu.memory_space<vmem>>, vector<256x64xf32>
    %133 = arith.addf %132, %131 : vector<256x64xf32>
    %c0_111 = arith.constant 0 : index
    %c0_112 = arith.constant 0 : index
    %134 = vector.load %arg11[%c0_111, %c0_112] : memref<256x64xf32, #tpu.memory_space<vmem>>, vector<256x64xf32>
    tpu.vector_store %arg11[%c0_111, %c0_112], %133 {strides = array<i32>} : memref<256x64xf32, #tpu.memory_space<vmem>>, vector<256x64xf32>,
    %c31 = arith.constant 31 : index
    %c0_113 = arith.constant 0 : index
    %135 = vector.load %arg12[%c31, %c0_113] : memref<384x64xbf16, #tpu.memory_space<vmem>>, vector<256x64xbf16>
    %c2_114 = arith.constant 2 : index
    %c0_115 = arith.constant 0 : index
    %c0_116 = arith.constant 0 : index
    %136 = vector.load %arg3[%c2_114, %c0_115, %c0_116] : memref<9x64x64xbf16, #tpu.memory_space<vmem>>, vector<1x64x64xbf16>
    %137 = vector.shape_cast %136 : vector<1x64x64xbf16> to vector<64x64xbf16>
    %cst_117 = arith.constant dense<0.000000e+00> : vector<256x64xf32>
    %138 = tpu.matmul %135, %137, %cst_117 {dimension_numbers = #tpu.dot_dimension_numbers<[1], [0], [0], [1], [0, 0, 1, 1], [], []>} : vector<256x64xbf16>, vector<64x64xbf16>, vector<256x64xf32> -> vector<256x64xf32>
    %c0_118 = arith.constant 0 : index
    %c0_119 = arith.constant 0 : index
    %139 = vector.load %arg11[%c0_118, %c0_119] : memref<256x64xf32, #tpu.memory_space<vmem>>, vector<256x64xf32>
    %140 = arith.addf %139, %138 : vector<256x64xf32>
    %c0_120 = arith.constant 0 : index
    %c0_121 = arith.constant 0 : index
    %141 = vector.load %arg11[%c0_120, %c0_121] : memref<256x64xf32, #tpu.memory_space<vmem>>, vector<256x64xf32>
    tpu.vector_store %arg11[%c0_120, %c0_121], %140 {strides = array<i32>} : memref<256x64xf32, #tpu.memory_space<vmem>>, vector<256x64xf32>,
    %c63 = arith.constant 63 : index
    %c0_122 = arith.constant 0 : index
    %142 = vector.load %arg12[%c63, %c0_122] : memref<384x64xbf16, #tpu.memory_space<vmem>>, vector<256x64xbf16>
    %c3_123 = arith.constant 3 : index
    %c0_124 = arith.constant 0 : index
    %c0_125 = arith.constant 0 : index
    %143 = vector.load %arg3[%c3_123, %c0_124, %c0_125] : memref<9x64x64xbf16, #tpu.memory_space<vmem>>, vector<1x64x64xbf16>
    %144 = vector.shape_cast %143 : vector<1x64x64xbf16> to vector<64x64xbf16>
    %cst_126 = arith.constant dense<0.000000e+00> : vector<256x64xf32>
    %145 = tpu.matmul %142, %144, %cst_126 {dimension_numbers = #tpu.dot_dimension_numbers<[1], [0], [0], [1], [0, 0, 1, 1], [], []>} : vector<256x64xbf16>, vector<64x64xbf16>, vector<256x64xf32> -> vector<256x64xf32>
    %c0_127 = arith.constant 0 : index
    %c0_128 = arith.constant 0 : index
    %146 = vector.load %arg11[%c0_127, %c0_128] : memref<256x64xf32, #tpu.memory_space<vmem>>, vector<256x64xf32>
    %147 = arith.addf %146, %145 : vector<256x64xf32>
    %c0_129 = arith.constant 0 : index
    %c0_130 = arith.constant 0 : index
    %148 = vector.load %arg11[%c0_129, %c0_130] : memref<256x64xf32, #tpu.memory_space<vmem>>, vector<256x64xf32>
    tpu.vector_store %arg11[%c0_129, %c0_130], %147 {strides = array<i32>} : memref<256x64xf32, #tpu.memory_space<vmem>>, vector<256x64xf32>,
    %c64 = arith.constant 64 : index
    %c0_131 = arith.constant 0 : index
    %149 = vector.load %arg12[%c64, %c0_131] : memref<384x64xbf16, #tpu.memory_space<vmem>>, vector<256x64xbf16>
    %c4_132 = arith.constant 4 : index
    %c0_133 = arith.constant 0 : index
    %c0_134 = arith.constant 0 : index
    %150 = vector.load %arg3[%c4_132, %c0_133, %c0_134] : memref<9x64x64xbf16, #tpu.memory_space<vmem>>, vector<1x64x64xbf16>
    %151 = vector.shape_cast %150 : vector<1x64x64xbf16> to vector<64x64xbf16>
    %cst_135 = arith.constant dense<0.000000e+00> : vector<256x64xf32>
    %152 = tpu.matmul %149, %151, %cst_135 {dimension_numbers = #tpu.dot_dimension_numbers<[1], [0], [0], [1], [0, 0, 1, 1], [], []>} : vector<256x64xbf16>, vector<64x64xbf16>, vector<256x64xf32> -> vector<256x64xf32>
    %c0_136 = arith.constant 0 : index
    %c0_137 = arith.constant 0 : index
    %153 = vector.load %arg11[%c0_136, %c0_137] : memref<256x64xf32, #tpu.memory_space<vmem>>, vector<256x64xf32>
    %154 = arith.addf %153, %152 : vector<256x64xf32>
    %c0_138 = arith.constant 0 : index
    %c0_139 = arith.constant 0 : index
    %155 = vector.load %arg11[%c0_138, %c0_139] : memref<256x64xf32, #tpu.memory_space<vmem>>, vector<256x64xf32>
    tpu.vector_store %arg11[%c0_138, %c0_139], %154 {strides = array<i32>} : memref<256x64xf32, #tpu.memory_space<vmem>>, vector<256x64xf32>,
    %c65 = arith.constant 65 : index
    %c0_140 = arith.constant 0 : index
    %156 = vector.load %arg12[%c65, %c0_140] : memref<384x64xbf16, #tpu.memory_space<vmem>>, vector<256x64xbf16>
    %c5_141 = arith.constant 5 : index
    %c0_142 = arith.constant 0 : index
    %c0_143 = arith.constant 0 : index
    %157 = vector.load %arg3[%c5_141, %c0_142, %c0_143] : memref<9x64x64xbf16, #tpu.memory_space<vmem>>, vector<1x64x64xbf16>
    %158 = vector.shape_cast %157 : vector<1x64x64xbf16> to vector<64x64xbf16>
    %cst_144 = arith.constant dense<0.000000e+00> : vector<256x64xf32>
    %159 = tpu.matmul %156, %158, %cst_144 {dimension_numbers = #tpu.dot_dimension_numbers<[1], [0], [0], [1], [0, 0, 1, 1], [], []>} : vector<256x64xbf16>, vector<64x64xbf16>, vector<256x64xf32> -> vector<256x64xf32>
    %c0_145 = arith.constant 0 : index
    %c0_146 = arith.constant 0 : index
    %160 = vector.load %arg11[%c0_145, %c0_146] : memref<256x64xf32, #tpu.memory_space<vmem>>, vector<256x64xf32>
    %161 = arith.addf %160, %159 : vector<256x64xf32>
    %c0_147 = arith.constant 0 : index
    %c0_148 = arith.constant 0 : index
    %162 = vector.load %arg11[%c0_147, %c0_148] : memref<256x64xf32, #tpu.memory_space<vmem>>, vector<256x64xf32>
    tpu.vector_store %arg11[%c0_147, %c0_148], %161 {strides = array<i32>} : memref<256x64xf32, #tpu.memory_space<vmem>>, vector<256x64xf32>,
    %c97 = arith.constant 97 : index
    %c0_149 = arith.constant 0 : index
    %163 = vector.load %arg12[%c97, %c0_149] : memref<384x64xbf16, #tpu.memory_space<vmem>>, vector<256x64xbf16>
    %c6_150 = arith.constant 6 : index
    %c0_151 = arith.constant 0 : index
    %c0_152 = arith.constant 0 : index
    %164 = vector.load %arg3[%c6_150, %c0_151, %c0_152] : memref<9x64x64xbf16, #tpu.memory_space<vmem>>, vector<1x64x64xbf16>
    %165 = vector.shape_cast %164 : vector<1x64x64xbf16> to vector<64x64xbf16>
    %cst_153 = arith.constant dense<0.000000e+00> : vector<256x64xf32>
    %166 = tpu.matmul %163, %165, %cst_153 {dimension_numbers = #tpu.dot_dimension_numbers<[1], [0], [0], [1], [0, 0, 1, 1], [], []>} : vector<256x64xbf16>, vector<64x64xbf16>, vector<256x64xf32> -> vector<256x64xf32>
    %c0_154 = arith.constant 0 : index
    %c0_155 = arith.constant 0 : index
    %167 = vector.load %arg11[%c0_154, %c0_155] : memref<256x64xf32, #tpu.memory_space<vmem>>, vector<256x64xf32>
    %168 = arith.addf %167, %166 : vector<256x64xf32>
    %c0_156 = arith.constant 0 : index
    %c0_157 = arith.constant 0 : index
    %169 = vector.load %arg11[%c0_156, %c0_157] : memref<256x64xf32, #tpu.memory_space<vmem>>, vector<256x64xf32>
    tpu.vector_store %arg11[%c0_156, %c0_157], %168 {strides = array<i32>} : memref<256x64xf32, #tpu.memory_space<vmem>>, vector<256x64xf32>,
    %c98 = arith.constant 98 : index
    %c0_158 = arith.constant 0 : index
    %170 = vector.load %arg12[%c98, %c0_158] : memref<384x64xbf16, #tpu.memory_space<vmem>>, vector<256x64xbf16>
    %c7_159 = arith.constant 7 : index
    %c0_160 = arith.constant 0 : index
    %c0_161 = arith.constant 0 : index
    %171 = vector.load %arg3[%c7_159, %c0_160, %c0_161] : memref<9x64x64xbf16, #tpu.memory_space<vmem>>, vector<1x64x64xbf16>
    %172 = vector.shape_cast %171 : vector<1x64x64xbf16> to vector<64x64xbf16>
    %cst_162 = arith.constant dense<0.000000e+00> : vector<256x64xf32>
    %173 = tpu.matmul %170, %172, %cst_162 {dimension_numbers = #tpu.dot_dimension_numbers<[1], [0], [0], [1], [0, 0, 1, 1], [], []>} : vector<256x64xbf16>, vector<64x64xbf16>, vector<256x64xf32> -> vector<256x64xf32>
    %c0_163 = arith.constant 0 : index
    %c0_164 = arith.constant 0 : index
    %174 = vector.load %arg11[%c0_163, %c0_164] : memref<256x64xf32, #tpu.memory_space<vmem>>, vector<256x64xf32>
    %175 = arith.addf %174, %173 : vector<256x64xf32>
    %c0_165 = arith.constant 0 : index
    %c0_166 = arith.constant 0 : index
    %176 = vector.load %arg11[%c0_165, %c0_166] : memref<256x64xf32, #tpu.memory_space<vmem>>, vector<256x64xf32>
    tpu.vector_store %arg11[%c0_165, %c0_166], %175 {strides = array<i32>} : memref<256x64xf32, #tpu.memory_space<vmem>>, vector<256x64xf32>,
    %c99 = arith.constant 99 : index
    %c0_167 = arith.constant 0 : index
    %177 = vector.load %arg12[%c99, %c0_167] : memref<384x64xbf16, #tpu.memory_space<vmem>>, vector<256x64xbf16>
    %c8_168 = arith.constant 8 : index
    %c0_169 = arith.constant 0 : index
    %c0_170 = arith.constant 0 : index
    %178 = vector.load %arg3[%c8_168, %c0_169, %c0_170] : memref<9x64x64xbf16, #tpu.memory_space<vmem>>, vector<1x64x64xbf16>
    %179 = vector.shape_cast %178 : vector<1x64x64xbf16> to vector<64x64xbf16>
    %cst_171 = arith.constant dense<0.000000e+00> : vector<256x64xf32>
    %180 = tpu.matmul %177, %179, %cst_171 {dimension_numbers = #tpu.dot_dimension_numbers<[1], [0], [0], [1], [0, 0, 1, 1], [], []>} : vector<256x64xbf16>, vector<64x64xbf16>, vector<256x64xf32> -> vector<256x64xf32>
    %c0_172 = arith.constant 0 : index
    %c0_173 = arith.constant 0 : index
    %181 = vector.load %arg11[%c0_172, %c0_173] : memref<256x64xf32, #tpu.memory_space<vmem>>, vector<256x64xf32>
    %182 = arith.addf %181, %180 : vector<256x64xf32>
    %c0_174 = arith.constant 0 : index
    %c0_175 = arith.constant 0 : index
    %183 = vector.load %arg11[%c0_174, %c0_175] : memref<256x64xf32, #tpu.memory_space<vmem>>, vector<256x64xf32>
    tpu.vector_store %arg11[%c0_174, %c0_175], %182 {strides = array<i32>} : memref<256x64xf32, #tpu.memory_space<vmem>>, vector<256x64xf32>,
    %c0_176 = arith.constant 0 : index
    %c0_177 = arith.constant 0 : index
    %184 = vector.load %arg11[%c0_176, %c0_177] : memref<256x64xf32, #tpu.memory_space<vmem>>, vector<256x64xf32>
    %c0_178 = arith.constant 0 : index
    %c0_179 = arith.constant 0 : index
    %185 = vector.load %arg5[%c0_178, %c0_179] : memref<1x64xf32, #tpu.memory_space<vmem>>, vector<1x64xf32>
    %186 = vector.broadcast %185 : vector<1x64xf32> to vector<256x64xf32>
    %187 = arith.mulf %184, %186 : vector<256x64xf32>
    %c0_180 = arith.constant 0 : index
    %c0_181 = arith.constant 0 : index
    %188 = vector.load %arg7[%c0_180, %c0_181] : memref<1x64xf32, #tpu.memory_space<vmem>>, vector<1x64xf32>
    %189 = vector.broadcast %188 : vector<1x64xf32> to vector<256x64xf32>
    %190 = arith.addf %187, %189 : vector<256x64xf32>
    %cst_182 = arith.constant 0.000000e+00 : f32
    %191 = vector.broadcast %cst_182 : f32 to vector<256x64xf32>
    %192 = arith.maximumf %190, %191 : vector<256x64xf32>
    %193 = arith.truncf %192 : vector<256x64xf32> to vector<256x64xbf16>
    %c0_183 = arith.constant 0 : index
    %c0_184 = arith.constant 0 : index
    %194 = vector.load %arg8[%c0_183, %c0_184] : memref<256x64xbf16, #tpu.memory_space<vmem>>, vector<256x64xbf16>
    tpu.vector_store %arg8[%c0_183, %c0_184], %193 {strides = array<i32>} : memref<256x64xbf16, #tpu.memory_space<vmem>>, vector<256x64xbf16>,
    return
  }
  func.func @transform_0(%arg0: i32) -> (i32, i32) {
    %c0_i32 = arith.constant 0 : i32
    %c0_i32_0 = arith.constant 0 : i32
    %c0_i32_1 = arith.constant 0 : i32
    return %c0_i32, %c0_i32_0 : i32, i32
  }
  func.func @transform_1(%arg0: i32) -> (i32, i32, i32) {
    %c0_i32 = arith.constant 0 : i32
    %c0_i32_0 = arith.constant 0 : i32
    %c0_i32_1 = arith.constant 0 : i32
    %c0_i32_2 = arith.constant 0 : i32
    return %c0_i32, %c0_i32_0, %c0_i32_1 : i32, i32, i32
  }
  func.func @transform_2(%arg0: i32) -> (i32, i32, i32) {
    %c0_i32 = arith.constant 0 : i32
    %c0_i32_0 = arith.constant 0 : i32
    %c0_i32_1 = arith.constant 0 : i32
    %c0_i32_2 = arith.constant 0 : i32
    return %c0_i32, %c0_i32_0, %c0_i32_1 : i32, i32, i32
  }
  func.func @transform_3(%arg0: i32) -> (i32, i32) {
    %c0_i32 = arith.constant 0 : i32
    %c0_i32_0 = arith.constant 0 : i32
    %c0_i32_1 = arith.constant 0 : i32
    return %c0_i32, %c0_i32_0 : i32, i32
  }
  func.func @transform_4(%arg0: i32) -> (i32, i32) {
    %c0_i32 = arith.constant 0 : i32
    %c0_i32_0 = arith.constant 0 : i32
    %c0_i32_1 = arith.constant 0 : i32
    return %c0_i32, %c0_i32_0 : i32, i32
  }
  func.func @transform_5(%arg0: i32) -> (i32, i32) {
    %c0_i32 = arith.constant 0 : i32
    %c0_i32_0 = arith.constant 0 : i32
    %c0_i32_1 = arith.constant 0 : i32
    return %c0_i32, %c0_i32_0 : i32, i32
  }
  func.func @transform_6(%arg0: i32) -> (i32, i32) {
    %c0_i32 = arith.constant 0 : i32
    %c0_i32_0 = arith.constant 0 : i32
    %c0_i32_1 = arith.constant 0 : i32
    return %c0_i32, %c0_i32_0 : i32, i32
  }
  func.func @transform_7(%arg0: i32) -> (i32, i32) {
    %c0_i32 = arith.constant 0 : i32
    %c0_i32_0 = arith.constant 0 : i32
    return %arg0, %c0_i32 : i32, i32
  }
}

</mosaic_0001>

<bundles_post_ra>
// kernel: tpu_custom_call.1
= control target key start
LH: loop header
LB: loop body
LE: loop exit
PB: predicated region body
PF: predicated region fallthrough
CT: control target
= control target key end

     0   :  { %s13314_s24 = smov 0   ;;  %s18946_s0 = inlined_call_operand.vmem [shape: bf16[2752,3], index: 0, kind: input, shape index: {}]   ;;  %s18947_s1 = inlined_call_operand.vmem [shape: bf16[9,3,64], index: 1, kind: input, shape index: {}]   ;;  %s18948_s2 = inlined_call_operand.vmem [shape: bf16[9,64,64], index: 2, kind: input, shape index: {}]   ;;  %s18949_s3 = inlined_call_operand.vmem [shape: f32[1,64], index: 3, kind: input, shape index: {}]   ;;  %s18950_s4 = inlined_call_operand.vmem [shape: f32[1,64], index: 4, kind: input, shape index: {}]   ;;  %s18951_s5 = inlined_call_operand.vmem [shape: f32[1,64], index: 5, kind: input, shape index: {}]   ;;  %s18952_s6 = inlined_call_operand.vmem [shape: f32[1,64], index: 6, kind: input, shape index: {}]   ;;  %s18953_s7 = inlined_call_operand.vmem [shape: bf16[2560,64], index: 7, kind: output, shape index: {}]  }
   0x1 LB: > { %s11462_s25 = sadd.s32 4294967295, %s13270_s24   ;;  %p11465_p0 = scmp.ge.s32.totalorder %s13270_s24, 1  ;;  %s13270_s24 = sphi %s13314_s24, %s17_s24  }
   0x2   : > { %p227_p1 = scmp.lt.s32.totalorder %s13270_s24, 11 }
   0x4   : > { %p228_p2 = pnand %p11465_p0, %p227_p1 }
   0x6   : > { %231 = sbr.rel (%p228_p2) target bundleno = 1348 (0x544), region = 48 }
   0xd   : > { %v1606_v0 = vld [vmem:[%s18947_s1] sm:$0x3]  ;;  %vm18981_vm0 = vcmask 1040384   ;;  %vm1881_vm1 = vcmask 1041408   ;;  %s13327_s28 = sshll.u32 %s11462_s25, 8  ;;  %v13272_v1 = vmov 65535  }
   0xe   : > { %v1882_v2 = vsel %vm18981_vm0, 4294967295, %v13272_v1  ;;  %s262_s29 = sshra.s32 %s13327_s28, 3  ;;  %v11544_v4 = vld [vmem:[%s18947_s1 + $0x4] sm:$0x3]  ;;  %v11521_v5 = vld [vmem:[%s18947_s1 + $0x2] sm:$0x3] }
   0xf   : > { %v13331_v3 = vsel %vm1881_vm1, %v1882_v2, 0  ;;  %s11469_s30 = sshll.u32 %s262_s29, 2  ;;  %vm490_vm2 = vcmask 23552   ;;  %vm18982_vm3 = vsmask.f32 1280  ;;  %vm18984_vm6 = vcmask 523264  }
  0x10   : > { %v1885_v6 = vand.u32 %v13331_v3, %v1606_v0  ;;  %s13343_s14 = scalar_lea.vmem %s18946_s0, %s11469_s30  ;;  %v13346_v7 = vand.u32 %v11544_v4, %v13331_v3  ;;  %v13349_v8 = vand.u32 %v11521_v5, %v13331_v3  ;;  %v11590_v41 = vld [vmem:[%s18947_s1 + $0x8] sm:$0x3]  ;;  %v11567_v0 = vld [vmem:[%s18947_s1 + $0x6] sm:$0x3]  ;;  %vm18983_vm4 = vsmask.f32 256 }
  0x11   : > { %v13192_v9 = vld [vmem:[%s13343_s14] sm:$0xff]   ;;  %v13193_v10 = vld [vmem:[%s13343_s14 + $0x8] sm:$0xff]   ;;  %v13196_v13 = vld [vmem:[%s13343_s14 + $0x10] sm:$0xff]   ;;  %v13427_v5 = vand.u32 %v11590_v41, %v13331_v3  ;;  %vm18980_vm5 = vsmask.f32 7424  ;;  %vm18979_vm7 = vcmask 1046528  }
  0x12   : > { %12406 = vmatprep.subr.bf16.mxu0 %v1885_v6  ;;  %13180 = vmatprep.subr.bf16.mxu1 %v1885_v6  ;;  %491 = vst.msk [vmem:[#allocation2] sm:$0xff] %vm490_vm2, %v13192_v9  ;;  %492 = vst.msk [vmem:[#allocation2 + $0x8] sm:$0xff] %vm490_vm2, %v13193_v10  ;;  %v13194_v11 = vld [vmem:[%s13343_s14 + $0xa0] sm:$0xff]   ;;  %v13195_v12 = vld [vmem:[%s13343_s14 + $0xa8] sm:$0xff]   ;;  %vm18978_vm8 = vsmask.f32 6400 }
  0x13   : > { %12407 = vmatpush3.bf16.msra.mxu0 %v1885_v6  ;;  %13181 = vmatpush3.bf16.msra.mxu1 %v1885_v6  ;;  %511 = vst.msk [vmem:[#allocation2 + $0xa0] sm:$0xff] %vm490_vm2, %v13194_v11  ;;  %512 = vst.msk [vmem:[#allocation2 + $0xa8] sm:$0xff] %vm490_vm2, %v13195_v12  ;;  %v13197_v14 = vld [vmem:[%s13343_s14 + $0xb0] sm:$0xff]   ;;  %v13198_v15 = vld [vmem:[%s13343_s14 + $0x18] sm:$0xff]   ;;  %s11498_s11 = sadd.s32 4294967248, %s13327_s28  ;;  %s11466_s28 = sshll.u32 %s11462_s25, 5 }
  0x14   : > { %12498 = vmatprep.subr.bf16.mxu0 %v13346_v7  ;;  %12452 = vmatprep.subr.bf16.mxu1 %v13349_v8  ;;  %493 = vst.msk [vmem:[#allocation2 + $0x10] sm:$0xff] %vm490_vm2, %v13196_v13  ;;  %513 = vst.msk [vmem:[#allocation2 + $0xb0] sm:$0xff] %vm490_vm2, %v13197_v14  ;;  %v13199_v16 = vld [vmem:[%s13343_s14 + $0x20] sm:$0xff]   ;;  %v13200_v17 = vld [vmem:[%s13343_s14 + $0x28] sm:$0xff]   ;;  %s609_s12 = scvt.s32.f32 %s11498_s11  ;;  %p255_p3 = scmp.lt.s32.totalorder %s11466_s28, 319 }
  0x15   : > { %494 = vst.msk [vmem:[#allocation2 + $0x18] sm:$0xff] %vm490_vm2, %v13198_v15  ;;  %495 = vst.msk [vmem:[#allocation2 + $0x20] sm:$0xff] %vm490_vm2, %v13199_v16  ;;  %v13201_v18 = vld [vmem:[%s13343_s14 + $0x30] sm:$0xff]   ;;  %v13202_v35 = vld [vmem:[%s13343_s14 + $0x38] sm:$0xff]  }
  0x16   : > { %496 = vst.msk [vmem:[#allocation2 + $0x28] sm:$0xff] %vm490_vm2, %v13200_v17  ;;  %497 = vst.msk [vmem:[#allocation2 + $0x30] sm:$0xff] %vm490_vm2, %v13201_v18  ;;  %v13203_v47 = vld [vmem:[%s13343_s14 + $0x40] sm:$0xff]   ;;  %v13204_v52 = vld [vmem:[%s13343_s14 + $0x48] sm:$0xff]   ;;  %s19835_s28 = smov (!%p255_p3, %s11466_s28), 319 }
  0x17   : > { %498 = vst.msk [vmem:[#allocation2 + $0x38] sm:$0xff] %vm490_vm2, %v13202_v35  ;;  %499 = vst.msk [vmem:[#allocation2 + $0x40] sm:$0xff] %vm490_vm2, %v13203_v47  ;;  %v13205_v63 = vld [vmem:[%s13343_s14 + $0x50] sm:$0xff]   ;;  %v13206_v12 = vld [vmem:[%s13343_s14 + $0x58] sm:$0xff]   ;;  %v3532_v35 = vand.u32 %v11567_v0, %v13331_v3  ;;  %s11467_s16 = sshll.u32 %s19835_s28, 2 }
  0x18   : > { %500 = vst.msk [vmem:[#allocation2 + $0x48] sm:$0xff] %vm490_vm2, %v13204_v52  ;;  %501 = vst.msk [vmem:[#allocation2 + $0x50] sm:$0xff] %vm490_vm2, %v13205_v63  ;;  %v13207_v17 = vld [vmem:[%s13343_s14 + $0x60] sm:$0xff]   ;;  %s18752_s19 = scalar_lea.vmem %s18953_s7, %s11467_s16 }
  0x19   : > { %v1583_v19 = vld [vmem:[#allocation2] sm:$0xc0]  ;;  %v13371_v20 = vld [vmem:[#allocation2 + $0x8] sm:$0xff]  ;;  %502 = vst.msk [vmem:[#allocation2 + $0x58] sm:$0xff] %vm490_vm2, %v13206_v12  ;;  %503 = vst.msk [vmem:[#allocation2 + $0x60] sm:$0xff] %vm490_vm2, %v13207_v17 }
  0x1a   : > { %v13373_v21 = vld [vmem:[#allocation2] sm:$0x80]  ;;  %v1609_v22 = vshrl.u32 %v1583_v19, 16  ;;  %v1612_v23 = vshll.u32 %v1583_v19, 16  ;;  %v1617_v24 = vshrl.u32 %v13371_v20, 16  ;;  %v1620_v25 = vshll.u32 %v13371_v20, 16 }
  0x1b   : > { %v13379_v26 = vld [vmem:[#allocation2 + $0xa0] sm:$0xff]  ;;  %v13381_v27 = vld [vmem:[#allocation2 + $0xa8] sm:$0xff]  ;;  %v2189_v28 = vrot.slane %v13373_v21, 7  ;;  %v2190_v29 = vrot.slane %v13371_v20, 7  ;;  %v13389_v34 = vld [vmem:[#allocation2 + $0x10] sm:$0xff] }
  0x1c   : > { %v1611_v30 = vrot.slane %v1609_v22, 6  ;;  %v1614_v31 = vrot.slane %v1612_v23, 7  ;;  %v1619_v32 = vrot.slane %v1617_v24, 6  ;;  %v1622_v33 = vrot.slane %v1620_v25, 7  ;;  %v1605_v40 = vld [vmem:[#allocation2 + $0xb0] sm:$0x7f] }
  0x1d   : > { %v1788_v36 = vshrl.u32 %v13379_v26, 16  ;;  %v1791_v37 = vshll.u32 %v13379_v26, 16  ;;  %v1797_v38 = vshrl.u32 %v13381_v27, 16  ;;  %v1800_v39 = vshll.u32 %v13381_v27, 16  ;;  %v13401_v46 = vld [vmem:[#allocation2 + $0x18] sm:$0xff]  ;;  %v13411_v57 = vld [vmem:[#allocation2 + $0x20] sm:$0xff] }
  0x1e   : > { %v1615_v42 = vor.u32 %v1614_v31, %v1611_v30  ;;  %v1623_v43 = vor.u32 %v1622_v33, %v1619_v32  ;;  %v1626_v44 = vshrl.u32 %v13389_v34, 16  ;;  %v1629_v45 = vshll.u32 %v13389_v34, 16  ;;  %v13418_v62 = vld [vmem:[#allocation2 + $0x28] sm:$0xff]  ;;  %v13441_v16 = vld [vmem:[#allocation2 + $0x30] sm:$0xff]  ;;  %v13458_v33 = vld [vmem:[#allocation2 + $0x38] sm:$0xff] }
  0x1f   : > { %v1790_v48 = vrot.slane %v1788_v36, 6  ;;  %v1793_v49 = vrot.slane %v1791_v37, 7  ;;  %v1799_v50 = vrot.slane %v1797_v38, 6  ;;  %v1802_v51 = vrot.slane %v1800_v39, 7  ;;  %v13486_v52 = vld [vmem:[#allocation2 + $0x40] sm:$0xff]  ;;  %v13213_v17 = vld [vmem:[%s13343_s14 + $0x90] sm:$0xff]  }
  0x20   : > { %v1624_v53 = vsel %vm18982_vm3, %v1615_v42, %v1623_v43  ;;  %v1628_v54 = vrot.slane %v1626_v44, 6  ;;  %v1631_v55 = vrot.slane %v1629_v45, 7  ;;  %v1806_v56 = vshrl.u32 %v1605_v40, 16  ;;  %509 = vst.msk [vmem:[#allocation2 + $0x90] sm:$0xff] %vm490_vm2, %v13213_v17 }
  0x21   : > { %12408 = vmatprep.mubr.msk.bf16.mxu0 %vm490_vm2, %v1624_v53  ;;  %v13415_v58 = vor.u32 %v1793_v49, %v1790_v48  ;;  %v1803_v59 = vor.u32 %v1802_v51, %v1799_v50  ;;  %v1809_v60 = vshll.u32 %v1605_v40, 16  ;;  %v1635_v61 = vshrl.u32 %v13401_v46, 16  ;;  %v13208_v40 = vld [vmem:[%s13343_s14 + $0x68] sm:$0xff]   ;;  %v13209_v48 = vld [vmem:[%s13343_s14 + $0x70] sm:$0xff]  }
  0x22   : > { %v1632_v1 = vor.u32 %v1631_v55, %v1628_v54  ;;  %v1808_v2 = vrot.slane %v1806_v56, 6  ;;  %v1638_v4 = vshll.u32 %v13401_v46, 16  ;;  %v1644_v11 = vshrl.u32 %v13411_v57, 16  ;;  %504 = vst.msk [vmem:[#allocation2 + $0x68] sm:$0xff] %vm490_vm2, %v13208_v40  ;;  %v13492_v55 = vld [vmem:[#allocation2 + $0x48] sm:$0xff]  ;;  %505 = vst.msk [vmem:[#allocation2 + $0x70] sm:$0xff] %vm490_vm2, %v13209_v48 }
  0x23   : > { %v1804_v6 = vsel %vm18982_vm3, %v13415_v58, %v1803_v59  ;;  %v1811_v9 = vrot.slane %v1809_v60, 7  ;;  %v1637_v10 = vrot.slane %v1635_v61, 6  ;;  %v1647_v15 = vshll.u32 %v13411_v57, 16 }
  0x24   : > { %12448 = vmatprep.mubr.msk.bf16.mxu1 %vm490_vm2, %v1804_v6  ;;  %v1633_v13 = vsel %vm18982_vm3, %v1623_v43, %v1632_v1  ;;  %v1640_v14 = vrot.slane %v1638_v4, 7  ;;  %v1646_v19 = vrot.slane %v1644_v11, 6  ;;  %v1653_v22 = vshrl.u32 %v13418_v62, 16 }
  0x25   : > { %12409 = vmatmul.mubr.msk.bf16.vlgmr.msra.gmra.mrb[0].mxu0 %vm490_vm2, %v1633_v13  ;;  %v1812_v18 = vor.u32 %v1811_v9, %v1808_v2  ;;  %v18977_v23 = vshll.u32 %v13418_v62, 16  ;;  %v2191_v31 = vsel %vm18981_vm0, %v2189_v28, %v2190_v29  ;;  %v1649_v32 = vrot.slane %v1647_v15, 7  ;;  %v13510_v13 = vld [vmem:[#allocation2 + $0x50] sm:$0xff] }
  0x26   : > { %12499 = vmatpush3.bf16.msra.mxu0 %v13346_v7  ;;  %v1641_v30 = vor.u32 %v1640_v14, %v1637_v10  ;;  %v1655_v7 = vrot.slane %v1653_v22, 6  ;;  %v1662_v28 = vshrl.u32 %v13441_v16, 16  ;;  %v18972_v39 = vshll.u32 %v13441_v16, 16 }
  0x27   : > { %v1813_v36 = vsel %vm18982_vm3, %v1803_v59, %v1812_v18  ;;  %v1658_v21 = vrot.slane %v18977_v23, 7  ;;  %12590 = vmatprep.subr.bf16.mxu0 %v13427_v5  ;;  %v1650_v38 = vor.u32 %v1649_v32, %v1646_v19  ;;  %v2192_v41 = vrot.slane %v13389_v34, 7  ;;  %v13210_v59 = vld [vmem:[%s13343_s14 + $0x78] sm:$0xff]  }
  0x28   : > { %12449 = vmatmul.mubr.msk.bf16.vlgmr.msra.gmra.mrb[0].mxu1 %vm490_vm2, %v1813_v36  ;;  %v1642_v37 = vsel %vm18982_vm3, %v1632_v1, %v1641_v30  ;;  %v2194_v43 = vrot.slane %v13401_v46, 7  ;;  %v18971_v47 = vshrl.u32 %v13458_v33, 16  ;;  %v1664_v50 = vrot.slane %v1662_v28, 6  ;;  %v13211_v1 = vld [vmem:[%s13343_s14 + $0x80] sm:$0xff]   ;;  %506 = vst.msk [vmem:[#allocation2 + $0x78] sm:$0xff] %vm490_vm2, %v13210_v59 }
  0x29   : > { %12453 = vmatpush3.bf16.msra.mxu1 %v13349_v8  ;;  %12412 = vmatprep.mubr.msk.bf16.mxu0 %vm490_vm2, %v1642_v37  ;;  %v1659_v42 = vor.u32 %v1658_v21, %v1655_v7  ;;  %v1651_v49 = vsel %vm18982_vm3, %v1641_v30, %v1650_v38  ;;  %v1667_v8 = vrot.slane %v18972_v39, 7  ;;  %v18962_v51 = vshll.u32 %v13458_v33, 16  ;;  %507 = vst.msk [vmem:[#allocation2 + $0x80] sm:$0xff] %vm490_vm2, %v13211_v1  ;;  %v13521_v30 = vld [vmem:[#allocation2 + $0x58] sm:$0xff]  ;;  %v13531_v21 = vld [vmem:[#allocation2 + $0x60] sm:$0xff]  ;;  %v13537_v40 = vld [vmem:[#allocation2 + $0x68] sm:$0xff] }
  0x2a   : > { %12454 = vmatprep.mubr.msk.bf16.mxu1 %vm490_vm2, %v2191_v31  ;;  %12544 = vmatprep.subr.bf16.mxu1 %v3532_v35  ;;  %v1673_v54 = vrot.slane %v18971_v47, 6  ;;  %v2193_v60 = vsel %vm18981_vm0, %v2190_v29, %v2192_v41  ;;  %v18965_v63 = vshrl.u32 %v13486_v52, 16  ;;  %v18961_v0 = vshll.u32 %v13486_v52, 16  ;;  %v13212_v29 = vld [vmem:[%s13343_s14 + $0x88] sm:$0xff]   ;;  %v13614_v39 = vld [vmem:[#allocation2 + $0x90] sm:$0xff] }
  0x2b   : > { %v1660_v53 = vsel %vm18982_vm3, %v1650_v38, %v1659_v42  ;;  %v1676_v56 = vrot.slane %v18962_v51, 7  ;;  %v2195_v2 = vsel %vm18981_vm0, %v2192_v41, %v2194_v43  ;;  %v1668_v6 = vor.u32 %v1667_v8, %v1664_v50  ;;  %508 = vst.msk [vmem:[#allocation2 + $0x88] sm:$0xff] %vm490_vm2, %v13212_v29  ;;  %v13214_v41 = vld [vmem:[%s13343_s14 + $0x98] sm:$0xff]  }
  0x2c   : > { %v18960_v9 = vshrl.u32 %v13492_v55, 16  ;;  %v18957_v10 = vshll.u32 %v13492_v55, 16  ;;  %v2196_v14 = vrot.slane %v13411_v57, 7  ;;  %v2198_v18 = vrot.slane %v13418_v62, 7  ;;  %510 = vst.msk [vmem:[#allocation2 + $0x98] sm:$0xff] %vm490_vm2, %v13214_v41 }
  0x2d   : > { %12413 = vmatmul.mubr.msk.bf16.gmra.mrb[4].mxu0 %vm490_vm2, %v1651_v49  ;;  %v1677_v12 = vor.u32 %v1676_v56, %v1673_v54  ;;  %v1682_v19 = vrot.slane %v18965_v63, 6  ;;  %v1669_v31 = vsel %vm18982_vm3, %v1659_v42, %v1668_v6  ;;  %v1685_v32 = vrot.slane %v18961_v0, 7  ;;  %v13548_v56 = vld [vmem:[#allocation2 + $0x70] sm:$0xff] }
  0x2e   : > { %12416 = vmatprep.mubr.msk.bf16.mxu0 %vm490_vm2, %v1660_v53  ;;  %v1691_v36 = vrot.slane %v18960_v9, 6  ;;  %v1694_v7 = vrot.slane %v18957_v10, 7  ;;  %v18958_v38 = vshrl.u32 %v13510_v13, 16  ;;  %v2197_v42 = vsel %vm18981_vm0, %v2194_v43, %v2196_v14 }
  0x2f   : > { %v1678_v37 = vsel %vm18982_vm3, %v1668_v6, %v1677_v12  ;;  %v18954_v48 = vshrl.u32 %v13521_v30, 16  ;;  %v18955_v49 = vshll.u32 %v13521_v30, 16  ;;  %v2199_v50 = vsel %vm18981_vm0, %v2196_v14, %v2198_v18 }
  0x30   : > { %12455 = vmatmul.mubr.msk.bf16.vlgmr.msra.gmra.mrb[4].mxu1 %vm490_vm2, %v2193_v60  ;;  %v2200_v8 = vrot.slane %v13441_v16, 7  ;;  %v2202_v53 = vrot.slane %v13458_v33, 7  ;;  %v18959_v54 = vshrl.u32 %v13531_v21, 16  ;;  %v1686_v43 = vor.u32 %v1685_v32, %v1682_v19 }
  0x31   : > { %12458 = vmatprep.mubr.msk.bf16.mxu1 %vm490_vm2, %v2195_v2  ;;  %12545 = vmatpush3.bf16.msra.mxu1 %v3532_v35  ;;  %v18956_v35 = vshll.u32 %v13510_v13, 16  ;;  %v1695_v59 = vor.u32 %v1694_v7, %v1691_v36  ;;  %v18963_v60 = vshll.u32 %v13531_v21, 16  ;;  %v18964_v1 = vshrl.u32 %v13537_v40, 16  ;;  %v13554_v2 = vld [vmem:[#allocation2 + $0x78] sm:$0xff] }
  0x32   : > { %v1700_v6 = vrot.slane %v18958_v38, 6  ;;  %v2204_v14 = vrot.slane %v13486_v52, 7  ;;  %v18967_v17 = vshll.u32 %v13537_v40, 16  ;;  %v1709_v19 = vrot.slane %v18954_v48, 6  ;;  %v13587_v51 = vld [vmem:[#allocation2 + $0x88] sm:$0xff] }
  0x33   : > { %v1703_v29 = vrot.slane %v18956_v35, 7  ;;  %v18969_v32 = vshrl.u32 %v13548_v56, 16  ;;  %v18966_v36 = vshll.u32 %v13548_v56, 16  ;;  %v2206_v7 = vrot.slane %v13492_v55, 7 }
  0x34   : > { %v2208_v41 = vrot.slane %v13510_v13, 7  ;;  %v1687_v48 = vsel %vm18982_vm3, %v1677_v12, %v1686_v43  ;;  %v1727_v35 = vrot.slane %v18964_v1, 6  ;;  %v18970_v10 = vshll.u32 %v13554_v2, 16 }
  0x35   : > { %12417 = vmatmul.mubr.msk.bf16.gmra.mrb[8].mxu0 %vm490_vm2, %v1669_v31  ;;  %v1712_v31 = vrot.slane %v18955_v49, 7  ;;  %v1721_v49 = vrot.slane %v18963_v60, 7  ;;  %v2201_v38 = vsel %vm18981_vm0, %v2198_v18, %v2200_v8  ;;  %v1704_v9 = vor.u32 %v1703_v29, %v1700_v6 }
  0x36   : > { %12420 = vmatprep.mubr.msk.bf16.mxu0 %vm490_vm2, %v1678_v37  ;;  %v1718_v37 = vrot.slane %v18959_v54, 6  ;;  %v1696_v54 = vsel %vm18982_vm3, %v1686_v43, %v1695_v59  ;;  %v1730_v0 = vrot.slane %v18967_v17, 7  ;;  %v2210_v60 = vrot.slane %v13521_v30, 7 }
  0x37   : > { %v1713_v12 = vor.u32 %v1712_v31, %v1709_v19  ;;  %v1736_v1 = vrot.slane %v18969_v32, 6  ;;  %v1739_v63 = vrot.slane %v18966_v36, 7  ;;  %v1748_v43 = vrot.slane %v18970_v10, 7 }
  0x38   : > { %12459 = vmatmul.mubr.msk.bf16.gmra.mrb[8].mxu1 %vm490_vm2, %v2197_v42  ;;  %v18968_v42 = vshrl.u32 %v13554_v2, 16  ;;  %v2203_v19 = vsel %vm18981_vm0, %v2200_v8, %v2202_v53  ;;  %v2205_v31 = vsel %vm18981_vm0, %v2202_v53, %v2204_v14  ;;  %v18974_v36 = vshrl.u32 %v13587_v51, 16 }
  0x39   : > { %12462 = vmatprep.mubr.msk.bf16.mxu1 %vm490_vm2, %v2199_v50  ;;  %v13581_v50 = vld [vmem:[#allocation2 + $0x80] sm:$0xff]  ;;  %v2207_v17 = vsel %vm18981_vm0, %v2204_v14, %v2206_v7  ;;  %v1731_v32 = vor.u32 %v1730_v0, %v1727_v35  ;;  %v2212_v10 = vrot.slane %v13531_v21, 7  ;;  %v1705_v47 = vsel %vm18982_vm3, %v1695_v59, %v1704_v9 }
  0x3a   : > { %v1745_v18 = vrot.slane %v18968_v42, 6  ;;  %v18976_v6 = vshrl.u32 %v13581_v50, 16  ;;  %v18975_v29 = vshll.u32 %v13581_v50, 16  ;;  %v1722_v42 = vor.u32 %v1721_v49, %v1718_v37 }
  0x3b   : > { %v1740_v8 = vor.u32 %v1739_v63, %v1736_v1  ;;  %v2214_v53 = vrot.slane %v13537_v40, 7  ;;  %v1714_v49 = vsel %vm18982_vm3, %v1704_v9, %v1713_v12  ;;  %v13619_v0 = vsel %vm18981_vm0, %v2208_v41, %v2210_v60 }
  0x3c   : > { %v1757_v35 = vrot.slane %v18975_v29, 7  ;;  %v1749_v59 = vor.u32 %v1748_v43, %v1745_v18  ;;  %v2216_v63 = vrot.slane %v13548_v56, 7  ;;  %v1763_v1 = vrot.slane %v18974_v36, 6 }
  0x3d   : > { %12421 = vmatmul.mubr.msk.bf16.gmra.mrb[12].mxu0 %vm490_vm2, %v1687_v48  ;;  %v18973_v48 = vshll.u32 %v13587_v51, 16  ;;  %v1723_v9 = vsel %vm18982_vm3, %v1713_v12, %v1722_v42  ;;  %v1732_v37 = vsel %vm18982_vm3, %v1722_v42, %v1731_v32  ;;  %v1770_v18 = vshrl.u32 %v13614_v39, 16 }
  0x3e   : > { %12424 = vmatprep.mubr.msk.bf16.mxu0 %vm490_vm2, %v1696_v54  ;;  %v13611_v54 = vsel %vm18981_vm0, %v2206_v7, %v2208_v41  ;;  %v13630_v7 = vld [vmem:[#allocation2 + $0x98] sm:$0xff]  ;;  %v13635_v41 = vsel %vm18981_vm0, %v2210_v60, %v2212_v10  ;;  %v13639_v43 = vsel %vm18982_vm3, %v1731_v32, %v1740_v8  ;;  %v1773_v36 = vshll.u32 %v13614_v39, 16 }
  0x3f   : > { %v1766_v14 = vrot.slane %v18973_v48, 7  ;;  %v2218_v48 = vrot.slane %v13554_v2, 7  ;;  %v1779_v60 = vshrl.u32 %v13630_v7, 16  ;;  %v1782_v12 = vshll.u32 %v13630_v7, 16 }
  0x40   : > { %12463 = vmatmul.mubr.msk.bf16.gmra.mrb[12].mxu1 %vm490_vm2, %v2201_v38  ;;  %v1754_v38 = vrot.slane %v18976_v6, 6  ;;  %v2677_v29 = vrot.slane %v1617_v24, 7  ;;  %v13654_v32 = vsel %vm18981_vm0, %v2214_v53, %v2216_v63  ;;  %v2228_v24 = vrot.slane %v13379_v26, 7 }
  0x41   : > { %12466 = vmatprep.mubr.msk.bf16.mxu1 %vm490_vm2, %v2203_v19  ;;  %v13642_v19 = vsel %vm18981_vm0, %v2212_v10, %v2214_v53  ;;  %v1750_v10 = vsel %vm18982_vm3, %v1740_v8, %v1749_v59  ;;  %v13656_v6 = vor.u32 %v1766_v14, %v1763_v1  ;;  %v2230_v8 = vrot.slane %v13381_v27, 7  ;;  %v13932_v27 = vld [vmem:[#allocation2 + $0xa0] sm:$0xff] }
  0x42   : > { %v1758_v42 = vor.u32 %v1757_v35, %v1754_v38  ;;  %v13215_v38 = vld [vmem:[%s13343_s14 + $0xb8] sm:$0xff]   ;;  %v1772_v35 = vrot.slane %v1770_v18, 6  ;;  %v13665_v23 = vor.u32 %v2677_v29, %v1620_v25  ;;  %v13674_v53 = vsel %vm18981_vm0, %v2216_v63, %v2218_v48 }
  0x43   : > { %v2693_v25 = vrot.slane %v1635_v61, 7  ;;  %514 = vst.msk [vmem:[#allocation2 + $0xb8] sm:$0xff] %vm490_vm2, %v13215_v38  ;;  %v1781_v1 = vrot.slane %v1779_v60, 6  ;;  %v13692_v63 = vsel %vm18981_vm0, %v2228_v24, %v2230_v8  ;;  %v2701_v34 = vrot.slane %v1644_v11, 7 }
  0x44   : > { %v1768_v14 = vsel %vm18982_vm3, %v1758_v42, %v13656_v6  ;;  %v2717_v38 = vrot.slane %v1662_v28, 7  ;;  %v18994_v46 = vshll.u32 %v13418_v62, 16  ;;  %v18995_v57 = vshll.u32 %v13441_v16, 16 }
  0x45   : > { %12425 = vmatmul.mubr.msk.bf16.gmra.mrb[16].mxu0 %vm490_vm2, %v1705_v47  ;;  %v2685_v47 = vrot.slane %v1626_v44, 7  ;;  %v1775_v44 = vrot.slane %v1773_v36, 7  ;;  %v2704_v11 = vor.u32 %v2701_v34, %v1647_v15 }
  0x46   : > { %12428 = vmatprep.mubr.msk.bf16.mxu0 %vm490_vm2, %v1714_v49  ;;  %v13216_v49 = vld [vmem:[%s13343_s14 + $0xc0] sm:$0xff]   ;;  %v2720_v15 = vor.u32 %v2717_v38, %v18995_v57  ;;  %v19004_v57 = vshrl.u32 %v13521_v30, 16 }
  0x47   : > { %v2688_v20 = vor.u32 %v2685_v47, %v1629_v45  ;;  %515 = vst.msk [vmem:[#allocation2 + $0xc0] sm:$0xff] %vm490_vm2, %v13216_v49  ;;  %v1784_v45 = vrot.slane %v1782_v12, 7  ;;  %v13714_v49 = vor.u32 %v1775_v44, %v1772_v35 }
  0x48   : > { %12467 = vmatmul.mubr.msk.bf16.gmra.mrb[16].mxu1 %vm490_vm2, %v2205_v31  ;;  %v1759_v31 = vsel %vm18982_vm3, %v1749_v59, %v1758_v42  ;;  %v2709_v59 = vrot.slane %v1653_v22, 7  ;;  %v13724_v22 = vsel %vm18983_vm4, %v2693_v25, %v2704_v11  ;;  %v18996_v42 = vshrl.u32 %v13458_v33, 16 }
  0x49   : > { %12470 = vmatprep.mubr.msk.bf16.mxu1 %vm490_vm2, %v2207_v17  ;;  %v13700_v61 = vsel %vm18983_vm4, %v2677_v29, %v2688_v20  ;;  %v13704_v17 = vor.u32 %v2693_v25, %v1638_v4  ;;  %v13736_v44 = vor.u32 %v1784_v45, %v1781_v1  ;;  %v18998_v20 = vshll.u32 %v13458_v33, 16 }
  0x4a   : > { %v2712_v4 = vor.u32 %v2709_v59, %v18994_v46  ;;  %v2725_v28 = vrot.slane %v18996_v42, 7  ;;  %v18999_v25 = vshll.u32 %v13486_v52, 16  ;;  %v19001_v45 = vshrl.u32 %v13510_v13, 16 }
  0x4b   : > { %v13718_v29 = vsel %vm18983_vm4, %v2685_v47, %v13704_v17  ;;  %v18997_v47 = vshrl.u32 %v13486_v52, 16  ;;  %v19003_v52 = vshll.u32 %v13510_v13, 16  ;;  %v19007_v13 = vshll.u32 %v13531_v21, 16 }
  0x4c   : > { %v13732_v35 = vsel %vm18983_vm4, %v2701_v34, %v2712_v4  ;;  %v2728_v16 = vor.u32 %v2725_v28, %v18998_v20  ;;  %v19000_v34 = vshrl.u32 %v13492_v55, 16 }
  0x4d   : > { %12429 = vmatmul.mubr.msk.bf16.gmra.mrb[20].mxu0 %vm490_vm2, %v1723_v9  ;;  %v2733_v62 = vrot.slane %v18997_v47, 7  ;;  %v13739_v9 = vsel %vm18983_vm4, %v2709_v59, %v2720_v15  ;;  %v2749_v59 = vrot.slane %v19001_v45, 7  ;;  %v2757_v15 = vrot.slane %v19004_v57, 7 }
  0x4e   : > { %12432 = vmatprep.mubr.msk.bf16.mxu0 %vm490_vm2, %v1732_v37  ;;  %v2741_v11 = vrot.slane %v19000_v34, 7  ;;  %v13752_v1 = vsel %vm18983_vm4, %v2717_v38, %v2728_v16  ;;  %v19005_v38 = vshrl.u32 %v13531_v21, 16  ;;  %v19011_v21 = vshll.u32 %v13548_v56, 16 }
  0x4f   : > { %v2736_v37 = vor.u32 %v2733_v62, %v18999_v25  ;;  %v2752_v4 = vor.u32 %v2749_v59, %v19003_v52  ;;  %v19012_v45 = vshrl.u32 %v13554_v2, 16 }
  0x50   : > { %12471 = vmatmul.mubr.msk.bf16.gmra.mrb[20].mxu1 %vm490_vm2, %v13611_v54  ;;  %v19002_v54 = vshll.u32 %v13492_v55, 16  ;;  %v2765_v42 = vrot.slane %v19005_v38, 7  ;;  %v19006_v55 = vshll.u32 %v13521_v30, 16 }
  0x51   : > { %12474 = vmatprep.mubr.msk.bf16.mxu1 %vm490_vm2, %v13619_v0  ;;  %v13757_v33 = vsel %vm18983_vm4, %v2725_v28, %v2736_v37  ;;  %v13773_v28 = vsel %vm18983_vm4, %v2741_v11, %v2752_v4  ;;  %v19009_v37 = vshrl.u32 %v13548_v56, 16  ;;  %v19016_v56 = vshrl.u32 %v13587_v51, 16 }
  0x52   : > { %v2744_v46 = vor.u32 %v2741_v11, %v19002_v54  ;;  %v2760_v47 = vor.u32 %v2757_v15, %v19006_v55  ;;  %v2768_v20 = vor.u32 %v2765_v42, %v19007_v13  ;;  %v2644_v55 = vld [vmem:[#allocation2] sm:$0x80]  ;;  %v19017_v13 = vshll.u32 %v13587_v51, 16 }
  0x54   : > { %v13766_v0 = vsel %vm18983_vm4, %v2733_v62, %v2744_v46  ;;  %v19008_v62 = vshrl.u32 %v13537_v40, 16  ;;  %v13783_v25 = vsel %vm18983_vm4, %v2749_v59, %v2760_v47  ;;  %v13790_v30 = vsel %vm18983_vm4, %v2757_v15, %v2768_v20 }
  0x55   : > { %12433 = vmatmul.mubr.msk.bf16.gmra.mrb[24].mxu0 %vm490_vm2, %v13639_v43  ;;  %v2781_v43 = vrot.slane %v19009_v37, 7  ;;  %v2789_v59 = vrot.slane %v19012_v45, 7  ;;  %v2805_v15 = vrot.slane %v19016_v56, 7  ;;  %v1786_v37 = vsel %vm18982_vm3, %v13714_v49, %v13736_v44 }
  0x56   : > { %12436 = vmatprep.mubr.msk.bf16.mxu0 %vm490_vm2, %v1750_v10  ;;  %v2773_v16 = vrot.slane %v19008_v62, 7  ;;  %v19010_v10 = vshll.u32 %v13537_v40, 16  ;;  %v19014_v40 = vshll.u32 %v13554_v2, 16  ;;  %v2226_v2 = vrot.slane %v13630_v7, 7 }
  0x57   : > { %v2784_v11 = vor.u32 %v2781_v43, %v19011_v21  ;;  %v2808_v20 = vor.u32 %v2805_v15, %v19017_v13  ;;  %v13984_v13 = vld [vmem:[#allocation2 + $0xc0] sm:$0xff] }
  0x58   : > { %12475 = vmatmul.mubr.msk.bf16.gmra.mrb[24].mxu1 %vm490_vm2, %v13635_v41  ;;  %v2776_v34 = vor.u32 %v2773_v16, %v19010_v10  ;;  %v19013_v41 = vshrl.u32 %v13581_v50, 16  ;;  %v2792_v4 = vor.u32 %v2789_v59, %v19014_v40 }
  0x59   : > { %12478 = vmatprep.mubr.msk.bf16.mxu1 %vm490_vm2, %v13642_v19  ;;  %v13806_v52 = vsel %vm18983_vm4, %v2773_v16, %v2784_v11  ;;  %v19015_v19 = vshll.u32 %v13581_v50, 16  ;;  %v11613_v16 = vld [vmem:[%s18947_s1 + $0xa] sm:$0x3] }
  0x5a   : > { %v13801_v54 = vsel %vm18983_vm4, %v2765_v42, %v2776_v34  ;;  %v2797_v46 = vrot.slane %v19013_v41, 7  ;;  %v13816_v38 = vsel %vm18983_vm4, %v2781_v43, %v2792_v4  ;;  %v2813_v42 = vrot.slane %v1770_v18, 7  ;;  %v13966_v4 = vld [vmem:[#allocation2 + $0xb8] sm:$0xff] }
  0x5b   : > { %v2220_v18 = vrot.slane %v13581_v50, 7  ;;  %v1777_v50 = vsel %vm18982_vm3, %v13656_v6, %v13714_v49  ;;  %v2671_v43 = vshrl.u32 %v2644_v55, 16  ;;  %v2224_v49 = vrot.slane %v13614_v39, 7  ;;  %v11636_v39 = vld [vmem:[%s18947_s1 + $0xc] sm:$0x3] }
  0x5c   : > { %v2800_v57 = vor.u32 %v2797_v46, %v19015_v19  ;;  %v2816_v62 = vor.u32 %v2813_v42, %v1773_v36  ;;  %v2222_v36 = vrot.slane %v13587_v51, 7  ;;  %v4582_v51 = vand.u32 %v11613_v16, %v13331_v3 }
  0x5d   : > { %12437 = vmatmul.mubr.msk.bf16.gmra.mrb[28].mxu0 %vm490_vm2, %v1759_v31  ;;  %v13830_v31 = vrot.slane %v1779_v60, 7  ;;  %v2673_v10 = vrot.slane %v2671_v43, 7  ;;  %v1795_v34 = vsel %vm18982_vm3, %v13736_v44, %v13415_v58  ;;  %v2227_v11 = vsel %vm18981_vm0, %v2224_v49, %v2226_v2  ;;  %v3260_v58 = vld [vmem:[#allocation2 + $0x10] sm:$0x80]  ;;  %v2162_v44 = vld [vmem:[#allocation2 + $0xb0] sm:$0x7f] }
  0x5e   : > { %12440 = vmatprep.mubr.msk.bf16.mxu0 %vm490_vm2, %v1768_v14  ;;  %v13822_v47 = vsel %vm18983_vm4, %v2789_v59, %v2800_v57  ;;  %v13836_v14 = vsel %vm18983_vm4, %v2797_v46, %v2808_v20  ;;  %v13845_v60 = vsel %vm18983_vm4, %v2805_v15, %v2816_v62  ;;  %12636 = vmatprep.subr.bf16.mxu1 %v4582_v51  ;;  %v3286_v45 = vshrl.u32 %v3260_v58, 16  ;;  %v13217_v46 = vld [vmem:[%s13343_s14 + $0xc8] sm:$0xff]  }
  0x5f   : > { %v2223_v6 = vsel %vm18981_vm0, %v2220_v18, %v2222_v36  ;;  %v2225_v21 = vsel %vm18981_vm0, %v2222_v36, %v2224_v49  ;;  %v13885_v7 = vand.u32 %v11636_v39, %v13331_v3  ;;  %v2232_v26 = vrot.slane %v2162_v44, 7  ;;  %516 = vst.msk [vmem:[#allocation2 + $0xc8] sm:$0xff] %vm490_vm2, %v13217_v46  ;;  %v14042_v39 = vld [vmem:[#allocation2 + $0x30] sm:$0xff]  ;;  %v14044_v44 = vld [vmem:[#allocation2 + $0x38] sm:$0xff] }
  0x60   : > { %12479 = vmatmul.mubr.msk.bf16.gmra.mrb[28].mxu1 %vm490_vm2, %v13654_v32  ;;  %v2824_v32 = vor.u32 %v13830_v31, %v1782_v12  ;;  %v2221_v12 = vsel %vm18981_vm0, %v2218_v48, %v2220_v18  ;;  %v2681_v48 = vsel %vm18983_vm4, %v2673_v10, %v13665_v23  ;;  %v2229_v23 = vsel %vm18981_vm0, %v2226_v2, %v2228_v24  ;;  %v3877_v10 = vld [vmem:[#allocation2 + $0x28] sm:$0xff] }
  0x61   : > { %12482 = vmatprep.mubr.msk.bf16.mxu1 %vm490_vm2, %v13674_v53  ;;  %v3288_v59 = vrot.slane %v3286_v45, 7  ;;  %v2233_v24 = vsel %vm18981_vm0, %v2230_v8, %v2232_v26  ;;  %v2830_v8 = vshll.u32 %v13932_v27, 16  ;;  %v3453_v19 = vshll.u32 %v13966_v4, 16 }
  0x62   : > { %v13857_v53 = vsel %vm18983_vm4, %v2813_v42, %v2824_v32  ;;  %v3461_v20 = vshll.u32 %v13984_v13, 16  ;;  %v3450_v62 = vshrl.u32 %v13966_v4, 16 }
  0x63   : > { %v4497_v15 = vrot.slane %v3453_v19, 1 }
  0x64   : > { %v13990_v18 = vrot.slane %v3461_v20, 1 }
  0x65   : > { %12441 = vmatmul.mubr.msk.bf16.gmra.mrb[32].mxu0 %vm490_vm2, %v1777_v50  ;;  %v4501_v16 = vor.u32 %v4497_v15, %v3450_v62 }
  0x66   : > { %12444 = vmatprep.mubr.msk.bf16.mxu0 %vm490_vm2, %v1786_v37 }
  0x68   : > { %12483 = vmatmul.mubr.msk.bf16.gmra.mrb[32].mxu1 %vm490_vm2, %v2221_v12  ;;  %v3876_v12 = vld [vmem:[#allocation2 + $0x20] sm:$0xff] }
  0x69   : > { %12486 = vmatprep.mubr.msk.bf16.mxu1 %vm490_vm2, %v2223_v6  ;;  %v4347_v26 = vshrl.u32 %v3876_v12, 16 }
  0x6d   : > { %12445 = vmatmul.mubr.msk.bf16.gmra.mrb[36].mxu0 %vm490_vm2, %v1795_v34 }
  0x6e   : > { %12500 = vmatprep.mubr.msk.bf16.mxu0 %vm490_vm2, %v2681_v48 }
  0x70   : > { %12487 = vmatmul.mubr.msk.bf16.gmra.mrb[36].mxu1 %vm490_vm2, %v2225_v21 }
  0x71   : > { %12490 = vmatprep.mubr.msk.bf16.mxu1 %vm490_vm2, %v2227_v11  ;;  %v4343_v11 = vshll.u32 %v3876_v12, 16 }
  0x75   : > { %12501 = vmatmul.mubr.msk.bf16.vlgmr.msra.gmra.mrb[40].mxu0 %vm490_vm2, %v13700_v61  ;;  %v2827_v61 = vshrl.u32 %v13932_v27, 16 }
  0x76   : > { %12591 = vmatpush3.bf16.msra.mxu0 %v13427_v5  ;;  %12504 = vmatprep.mubr.msk.bf16.mxu0 %vm490_vm2, %v13718_v29  ;;  %v3296_v5 = vsel %vm18983_vm4, %v3288_v59, %v13704_v17  ;;  %v13941_v29 = vrot.slane %v2830_v8, 1 }
  0x77   : > { %12682 = vmatprep.subr.bf16.mxu0 %v13885_v7 }
  0x78   : > { %12491 = vmatmul.mubr.msk.bf16.gmra.mrb[40].mxu1 %vm490_vm2, %v2229_v23  ;;  %v4345_v23 = vrot.slane %v4343_v11, 1 }
  0x79   : > { %12494 = vmatprep.mubr.msk.bf16.mxu1 %vm490_vm2, %v13692_v63  ;;  %v13937_v63 = vld [vmem:[#allocation2 + $0xa8] sm:$0xff] }
  0x7a   : > { %v2838_v17 = vshll.u32 %v13937_v63, 16  ;;  %v2835_v40 = vshrl.u32 %v13937_v63, 16 }
  0x7c   : > { %v2837_v36 = vrot.slane %v2835_v40, 7 }
  0x7d   : > { %12505 = vmatmul.mubr.msk.bf16.gmra.mrb[44].mxu0 %vm490_vm2, %v13724_v22 }
  0x7e   : > { %12508 = vmatprep.mubr.msk.bf16.mxu0 %vm490_vm2, %v13732_v35  ;;  %v2840_v50 = vor.u32 %v2838_v17, %v2837_v36 }
  0x80   : > { %12495 = vmatmul.mubr.msk.bf16.gmra.mrb[44].mxu1 %vm490_vm2, %v2233_v24  ;;  %v4355_v24 = vshrl.u32 %v3877_v10, 16 }
  0x81   : > { %12546 = vmatprep.mubr.msk.bf16.mxu1 %vm490_vm2, %v3296_v5  ;;  %v4359_v5 = vshll.u32 %v14042_v39, 16 }
  0x85   : > { %12509 = vmatmul.mubr.msk.bf16.gmra.mrb[48].mxu0 %vm490_vm2, %v13739_v9 }
  0x86   : > { %12512 = vmatprep.mubr.msk.bf16.mxu0 %vm490_vm2, %v13752_v1 }
  0x88   : > { %12547 = vmatmul.mubr.msk.bf16.vlgmr.msra.gmra.mrb[48].mxu1 %vm490_vm2, %v13724_v22  ;;  %v4477_v22 = vor.u32 %v13941_v29, %v2827_v61 }
  0x89   : > { %12550 = vmatprep.mubr.msk.bf16.mxu1 %vm490_vm2, %v13732_v35  ;;  %12637 = vmatpush3.bf16.msra.mxu1 %v4582_v51  ;;  %v4481_v35 = vrot.slane %v2838_v17, 1  ;;  %v11682_v51 = vld [vmem:[%s18947_s1 + $0x10] sm:$0x3]  ;;  %v14055_v17 = vld [vmem:[#allocation2 + $0x40] sm:$0xff] }
  0x8a   : > { %v14031_v49 = vand.u32 %v11682_v51, %v13331_v3 }
  0x8d   : > { %12513 = vmatmul.mubr.msk.bf16.gmra.mrb[52].mxu0 %vm490_vm2, %v13757_v33 }
  0x8e   : > { %12516 = vmatprep.mubr.msk.bf16.mxu0 %vm490_vm2, %v13766_v0 }
  0x90   : > { %12551 = vmatmul.mubr.msk.bf16.gmra.mrb[52].mxu1 %vm490_vm2, %v13739_v9  ;;  %v13949_v9 = vsel %vm18980_vm5, %v4477_v22, %v4481_v35 }
  0x91   : > { %12554 = vmatprep.mubr.msk.bf16.mxu1 %vm490_vm2, %v13752_v1  ;;  %v13953_v1 = vld [vmem:[#allocation2 + $0xb0] sm:$0xff] }
  0x95   : > { %12517 = vmatmul.mubr.msk.bf16.gmra.mrb[56].mxu0 %vm490_vm2, %v13773_v28 }
  0x96   : > { %12520 = vmatprep.mubr.msk.bf16.mxu0 %vm490_vm2, %v13783_v25 }
  0x98   : > { %12555 = vmatmul.mubr.msk.bf16.gmra.mrb[56].mxu1 %vm490_vm2, %v13757_v33  ;;  %v11659_v33 = vld [vmem:[%s18947_s1 + $0xe] sm:$0x3] }
  0x99   : > { %12558 = vmatprep.mubr.msk.bf16.mxu1 %vm490_vm2, %v13766_v0  ;;  %v2846_v0 = vshll.u32 %v13953_v1, 16  ;;  %v13962_v41 = vand.u32 %v11659_v33, %v13331_v3  ;;  %v14057_v33 = vld [vmem:[#allocation2 + $0x48] sm:$0xff] }
  0x9b   : > { %12728 = vmatprep.subr.bf16.mxu1 %v13962_v41  ;;  %v4489_v57 = vrot.slane %v2846_v0, 1 }
  0x9d   : > { %12521 = vmatmul.mubr.msk.bf16.gmra.mrb[60].mxu0 %vm490_vm2, %v13790_v30 }
  0x9e   : > { %12524 = vmatprep.mubr.msk.bf16.mxu0 %vm490_vm2, %v13801_v54 }
  0xa0   : > { %12559 = vmatmul.mubr.msk.bf16.gmra.mrb[60].mxu1 %vm490_vm2, %v13773_v28  ;;  %v2843_v28 = vshrl.u32 %v13953_v1, 16 }
  0xa1   : > { %12562 = vmatprep.mubr.msk.bf16.mxu1 %vm490_vm2, %v13783_v25  ;;  %v4485_v25 = vor.u32 %v4481_v35, %v2835_v40  ;;  %v4361_v35 = vrot.slane %v4359_v5, 1  ;;  %v4363_v40 = vshrl.u32 %v14042_v39, 16 }
  0xa2   : > { %v4493_v56 = vor.u32 %v4489_v57, %v2843_v28 }
  0xa3   : > { %v13977_v42 = vsel %vm18980_vm5, %v4485_v25, %v4489_v57  ;;  %v4375_v57 = vshll.u32 %v14055_v17, 16 }
  0xa4   : > { %v13980_v55 = vsel %vm18980_vm5, %v4493_v56, %v4497_v15  ;;  %v4365_v56 = vor.u32 %v4363_v40, %v4361_v35  ;;  %v14075_v15 = vld [vmem:[#allocation2 + $0x50] sm:$0xff]  ;;  %v14130_v40 = vld [vmem:[#allocation2 + $0x80] sm:$0xff] }
  0xa5   : > { %12525 = vmatmul.mubr.msk.bf16.gmra.mrb[64].mxu0 %vm490_vm2, %v13806_v52 }
  0xa6   : > { %12528 = vmatprep.mubr.msk.bf16.mxu0 %vm490_vm2, %v13816_v38 }
  0xa8   : > { %12563 = vmatmul.mubr.msk.bf16.gmra.mrb[64].mxu1 %vm490_vm2, %v13790_v30  ;;  %v13998_v30 = vsel %vm18980_vm5, %v4501_v16, %v13990_v18  ;;  %v14077_v16 = vld [vmem:[#allocation2 + $0x58] sm:$0xff] }
  0xa9   : > { %12566 = vmatprep.mubr.msk.bf16.mxu1 %vm490_vm2, %v13801_v54  ;;  %v2829_v54 = vrot.slane %v2827_v61, 7  ;;  %v4349_v61 = vor.u32 %v4347_v26, %v4345_v23 }
  0xab   : > { %v2832_v32 = vor.u32 %v2830_v8, %v2829_v54  ;;  %v2841_v37 = vsel %vm18983_vm4, %v2829_v54, %v2840_v50  ;;  %v4383_v54 = vshll.u32 %v14057_v33, 16  ;;  %v4387_v50 = vshrl.u32 %v14057_v33, 16 }
  0xad   : > { %12529 = vmatmul.mubr.msk.bf16.gmra.mrb[68].mxu0 %vm490_vm2, %v13822_v47 }
  0xae   : > { %12532 = vmatprep.mubr.msk.bf16.mxu0 %vm490_vm2, %v13836_v14 }
  0xb0   : > { %12567 = vmatmul.mubr.msk.bf16.gmra.mrb[68].mxu1 %vm490_vm2, %v13806_v52  ;;  %v2833_v52 = vsel %vm18983_vm4, %v13830_v31, %v2832_v32  ;;  %v3452_v31 = vrot.slane %v3450_v62, 7  ;;  %v4377_v62 = vrot.slane %v4375_v57, 1  ;;  %v4379_v32 = vshrl.u32 %v14055_v17, 16 }
  0xb1   : > { %12570 = vmatprep.mubr.msk.bf16.mxu1 %vm490_vm2, %v13816_v38  ;;  %v2845_v38 = vrot.slane %v2843_v28, 7 }
  0xb3   : > { %v2848_v43 = vor.u32 %v2846_v0, %v2845_v38  ;;  %v4367_v0 = vshll.u32 %v14044_v44, 16 }
  0xb5   : > { %12533 = vmatmul.mubr.msk.bf16.gmra.mrb[72].mxu0 %vm490_vm2, %v13845_v60  ;;  %v4369_v25 = vrot.slane %v4367_v0, 1 }
  0xb6   : > { %12536 = vmatprep.mubr.msk.bf16.mxu0 %vm490_vm2, %v13857_v53 }
  0xb8   : > { %12571 = vmatmul.mubr.msk.bf16.gmra.mrb[72].mxu1 %vm490_vm2, %v13822_v47  ;;  %v2849_v47 = vsel %vm18983_vm4, %v2837_v36, %v2848_v43  ;;  %v14083_v36 = vsel %vm18980_vm5, %v4365_v56, %v4369_v25  ;;  %v4381_v43 = vor.u32 %v4379_v32, %v4377_v62 }
  0xb9   : > { %12574 = vmatprep.mubr.msk.bf16.mxu1 %vm490_vm2, %v13836_v14  ;;  %v3875_v14 = vld [vmem:[#allocation2 + $0x18] sm:$0xff] }
  0xba   : > { %v4338_v6 = vshll.u32 %v3875_v14, 16  ;;  %v4336_v48 = vshrl.u32 %v3875_v14, 16 }
  0xbc   : > { %v4340_v21 = vrot.slane %v4338_v6, 1 }
  0xbd   : > { %12537 = vmatmul.mubr.msk.bf16.gmra.mrb[76].mxu0 %vm490_vm2, %v2833_v52 }
  0xbe   : > { %12540 = vmatprep.mubr.msk.bf16.mxu0 %vm490_vm2, %v2841_v37  ;;  %v4341_v58 = vor.u32 %v4340_v21, %v4336_v48 }
  0xc0   : > { %12575 = vmatmul.mubr.msk.bf16.gmra.mrb[76].mxu1 %vm490_vm2, %v13845_v60  ;;  %v3458_v60 = vshrl.u32 %v13984_v13, 16  ;;  %v4346_v59 = vsel %vm18980_vm5, %v4341_v58, %v4345_v23 }
  0xc1   : > { %12578 = vmatprep.mubr.msk.bf16.mxu1 %vm490_vm2, %v13857_v53  ;;  %v3455_v53 = vor.u32 %v3453_v19, %v3452_v31  ;;  %v4371_v19 = vshrl.u32 %v14044_v44, 16 }
  0xc2   : > { %v3460_v34 = vrot.slane %v3458_v60, 7 }
  0xc3   : > { %v3456_v2 = vsel %vm18983_vm4, %v2845_v38, %v3455_v53  ;;  %v13218_v38 = vld [vmem:[%s13343_s14 + $0xd0] sm:$0xff]   ;;  %v4399_v53 = vshll.u32 %v14077_v16, 16 }
  0xc4   : > { %v3463_v3 = vor.u32 %v3461_v20, %v3460_v34  ;;  %v4373_v20 = vor.u32 %v4371_v19, %v4369_v25  ;;  %517 = vst.msk [vmem:[#allocation2 + $0xd0] sm:$0xff] %vm490_vm2, %v13218_v38 }
  0xc5   : > { %12541 = vmatmul.mubr.msk.bf16.gmra.mrb[80].mxu0 %vm490_vm2, %v2849_v47  ;;  %v4401_v21 = vrot.slane %v4399_v53, 1 }
  0xc6   : > { %12592 = vmatprep.mubr.msk.bf16.mxu0 %vm490_vm2, %v3875_v14  ;;  %v3464_v45 = vsel %vm18983_vm4, %v3452_v31, %v3463_v3  ;;  %v3884_v14 = vld [vmem:[#allocation2 + $0x60] sm:$0xff]  ;;  %v3886_v3 = vld [vmem:[#allocation2 + $0x70] sm:$0xff] }
  0xc7   : > { %v4407_v48 = vshll.u32 %v3884_v14, 16 }
  0xc8   : > { %12579 = vmatmul.mubr.msk.bf16.gmra.mrb[80].mxu1 %vm490_vm2, %v2833_v52  ;;  %v4391_v52 = vshll.u32 %v14075_v15, 16 }
  0xc9   : > { %12582 = vmatprep.mubr.msk.bf16.mxu1 %vm490_vm2, %v2841_v37  ;;  %v4385_v37 = vrot.slane %v4383_v54, 1  ;;  %v4409_v23 = vrot.slane %v4407_v48, 1  ;;  %v14157_v48 = vld [vmem:[#allocation2 + $0x90] sm:$0xff] }
  0xca   : > { %v4393_v51 = vrot.slane %v4391_v52, 1  ;;  %v4427_v52 = vshrl.u32 %v3886_v3, 16 }
  0xcb   : > { %v4389_v31 = vor.u32 %v4387_v50, %v4385_v37  ;;  %v14104_v6 = vsel %vm18980_vm5, %v4381_v43, %v4385_v37 }
  0xcd   : > { %12593 = vmatmul.mubr.msk.bf16.vlgmr.msra.gmra.mrb[84].mxu0 %vm490_vm2, %v3876_v12  ;;  %v3885_v12 = vld [vmem:[#allocation2 + $0x68] sm:$0xff]  ;;  %v14109_v34 = vsel %vm18980_vm5, %v4389_v31, %v4393_v51 }
  0xce   : > { %12683 = vmatpush3.bf16.msra.mxu0 %v13885_v7  ;;  %12596 = vmatprep.mubr.msk.bf16.mxu0 %vm490_vm2, %v3877_v10  ;;  %v4351_v7 = vshll.u32 %v3877_v10, 16  ;;  %v4395_v10 = vshrl.u32 %v14075_v15, 16  ;;  %v4419_v5 = vshrl.u32 %v3885_v12, 16 }
  0xcf   : > { %12774 = vmatprep.subr.bf16.mxu0 %v14031_v49 }
  0xd0   : > { %12583 = vmatmul.mubr.msk.bf16.gmra.mrb[84].mxu1 %vm490_vm2, %v2849_v47  ;;  %v4353_v8 = vrot.slane %v4351_v7, 1  ;;  %v13219_v47 = vld [vmem:[%s13343_s14 + $0xd8] sm:$0xff]   ;;  %v4397_v11 = vor.u32 %v4395_v10, %v4393_v51 }
  0xd1   : > { %12586 = vmatprep.mubr.msk.bf16.mxu1 %vm490_vm2, %v3456_v2  ;;  %518 = vst.msk [vmem:[#allocation2 + $0xd8] sm:$0xff] %vm490_vm2, %v13219_v47  ;;  %v4403_v2 = vshrl.u32 %v14077_v16, 16  ;;  %v3887_v7 = vld [vmem:[#allocation2 + $0x78] sm:$0xff]  ;;  %v4439_v47 = vshll.u32 %v14130_v40, 16 }
  0xd2   : > { %v4357_v22 = vor.u32 %v4355_v24, %v4353_v8  ;;  %v4354_v46 = vsel %vm18980_vm5, %v4349_v61, %v4353_v8  ;;  %v14118_v26 = vsel %vm18980_vm5, %v4397_v11, %v4401_v21  ;;  %v4423_v8 = vshll.u32 %v3886_v3, 16 }
  0xd3   : > { %v4405_v58 = vor.u32 %v4403_v2, %v4401_v21  ;;  %v4431_v54 = vshll.u32 %v3887_v7, 16  ;;  %v4435_v43 = vshrl.u32 %v3887_v7, 16  ;;  %v4441_v11 = vrot.slane %v4439_v47, 1 }
  0xd4   : > { %v14067_v28 = vsel %vm18980_vm5, %v4357_v22, %v4361_v35  ;;  %v4425_v57 = vrot.slane %v4423_v8, 1 }
  0xd5   : > { %12597 = vmatmul.mubr.msk.bf16.gmra.mrb[88].mxu0 %vm490_vm2, %v14042_v39  ;;  %v14122_v24 = vsel %vm18980_vm5, %v4405_v58, %v4409_v23  ;;  %v4433_v31 = vrot.slane %v4431_v54, 1 }
  0xd6   : > { %12600 = vmatprep.mubr.msk.bf16.mxu0 %vm490_vm2, %v14044_v44  ;;  %v4429_v53 = vor.u32 %v4427_v52, %v4425_v57 }
  0xd7   : > { %v4437_v21 = vor.u32 %v4435_v43, %v4433_v31 }
  0xd8   : > { %12587 = vmatmul.mubr.msk.bf16.gmra.mrb[88].mxu1 %vm490_vm2, %v3464_v45  ;;  %v4415_v45 = vshll.u32 %v3885_v12, 16 }
  0xd9   : > { %12638 = vmatprep.mubr.msk.bf16.mxu1 %vm490_vm2, %v4346_v59  ;;  %v4411_v59 = vshrl.u32 %v3884_v14, 16 }
  0xda   : > { %v4417_v22 = vrot.slane %v4415_v45, 1 }
  0xdb   : > { %v4413_v0 = vor.u32 %v4411_v59, %v4409_v23 }
  0xdc   : > { %v4421_v19 = vor.u32 %v4419_v5, %v4417_v22 }
  0xdd   : > { %12601 = vmatmul.mubr.msk.bf16.gmra.mrb[92].mxu0 %vm490_vm2, %v14055_v17  ;;  %v14141_v32 = vsel %vm18980_vm5, %v4413_v0, %v4417_v22  ;;  %v4443_v0 = vshrl.u32 %v14130_v40, 16 }
  0xde   : > { %12604 = vmatprep.mubr.msk.bf16.mxu0 %vm490_vm2, %v14057_v33  ;;  %v14147_v37 = vsel %vm18980_vm5, %v4421_v19, %v4425_v57  ;;  %v14174_v57 = vsel %vm18980_vm5, %v4437_v21, %v4441_v11 }
  0xe0   : > { %12639 = vmatmul.mubr.msk.bf16.vlgmr.msra.gmra.mrb[92].mxu1 %vm490_vm2, %v4354_v46 }
  0xe1   : > { %12642 = vmatprep.mubr.msk.bf16.mxu1 %vm490_vm2, %v14067_v28  ;;  %12729 = vmatpush3.bf16.msra.mxu1 %v13962_v41  ;;  %v14089_v41 = vsel %vm18980_vm5, %v4373_v20, %v4377_v62  ;;  %v14133_v20 = vld [vmem:[#allocation2 + $0x88] sm:$0xff] }
  0xe2   : > { %v4447_v8 = vshll.u32 %v14133_v20, 16 }
  0xe4   : > { %v4449_v54 = vrot.slane %v4447_v8, 1 }
  0xe5   : > { %12605 = vmatmul.mubr.msk.bf16.gmra.mrb[96].mxu0 %vm490_vm2, %v14075_v15 }
  0xe6   : > { %12608 = vmatprep.mubr.msk.bf16.mxu0 %vm490_vm2, %v14077_v16 }
  0xe8   : > { %12643 = vmatmul.mubr.msk.bf16.gmra.mrb[96].mxu1 %vm490_vm2, %v14083_v36 }
  0xe9   : > { %12646 = vmatprep.mubr.msk.bf16.mxu1 %vm490_vm2, %v14089_v41 }
  0xed   : > { %12609 = vmatmul.mubr.msk.bf16.gmra.mrb[100].mxu0 %vm490_vm2, %v3884_v14 }
  0xee   : > { %12612 = vmatprep.mubr.msk.bf16.mxu0 %vm490_vm2, %v3885_v12 }
  0xf0   : > { %12647 = vmatmul.mubr.msk.bf16.gmra.mrb[100].mxu1 %vm490_vm2, %v14104_v6 }
  0xf1   : > { %12650 = vmatprep.mubr.msk.bf16.mxu1 %vm490_vm2, %v14109_v34 }
  0xf5   : > { %12613 = vmatmul.mubr.msk.bf16.gmra.mrb[104].mxu0 %vm490_vm2, %v3886_v3 }
  0xf6   : > { %12616 = vmatprep.mubr.msk.bf16.mxu0 %vm490_vm2, %v3887_v7  ;;  %v14160_v7 = vld [vmem:[#allocation2 + $0x98] sm:$0xff] }
  0xf7   : > { %v4463_v21 = vshll.u32 %v14160_v7, 16  ;;  %v4467_v8 = vshrl.u32 %v14160_v7, 16 }
  0xf8   : > { %12651 = vmatmul.mubr.msk.bf16.gmra.mrb[104].mxu1 %vm490_vm2, %v14118_v26  ;;  %v12410_v61 = vpop.f32.mrb[0].mxu0 }
  0xf9   : > { %2098 = vst.msk [vmem:[#allocation3 + $0x10] sm:$0xff] %vm18984_vm6, %v12410_v61  ;;  %v1921_v35 = vpop.f32.mrb[1].mxu0  ;;  %12654 = vmatprep.mubr.msk.bf16.mxu1 %vm490_vm2, %v14122_v24 }
  0xfa   : > { %2096 = vst.msk [vmem:[#allocation3] sm:$0xff] %vm18984_vm6, %v1921_v35  ;;  %v12411_v46 = vpop.f32.mrb[2].mxu0  ;;  %v14167_v35 = vsel %vm18980_vm5, %v4429_v53, %v4433_v31 }
  0xfb   : > { %2099 = vst.msk [vmem:[#allocation3 + $0x18] sm:$0xff] %vm18984_vm6, %v12411_v46  ;;  %v1924_v25 = vpop.f32.mrb[3].mxu0  ;;  %v12450_v56 = vpop.f32.mrb[0].mxu1 }
  0xfc   : > { %2097 = vst.msk [vmem:[#allocation3 + $0x8] sm:$0xff] %vm18984_vm6, %v1924_v25  ;;  %2138 = vst.msk [vmem:[#allocation3 + $0x150] sm:$0xff] %vm18984_vm6, %v12450_v56  ;;  %v2081_v62 = vpop.f32.mrb[1].mxu1  ;;  %v4451_v25 = vshrl.u32 %v14133_v20, 16  ;;  %v4455_v56 = vshll.u32 %v14157_v48, 16 }
  0xfd   : > { %2136 = vst.msk [vmem:[#allocation3 + $0x140] sm:$0xff] %vm18984_vm6, %v2081_v62  ;;  %12617 = vmatmul.mubr.msk.bf16.gmra.mrb[108].mxu0 %vm490_vm2, %v14130_v40  ;;  %v12451_v50 = vpop.f32.mrb[2].mxu1 }
  0xfe   : > { %2139 = vst.msk [vmem:[#allocation3 + $0x158] sm:$0xff] %vm18984_vm6, %v12451_v50  ;;  %v2084_v38 = vpop.f32.mrb[3].mxu1  ;;  %12620 = vmatprep.mubr.msk.bf16.mxu0 %vm490_vm2, %v14133_v20  ;;  %v4445_v20 = vor.u32 %v4443_v0, %v4441_v11  ;;  %v4453_v47 = vor.u32 %v4451_v25, %v4449_v54 }
  0xff   : > { %2137 = vst.msk [vmem:[#allocation3 + $0x148] sm:$0xff] %vm18984_vm6, %v2084_v38 }
 0x100   : > { %12655 = vmatmul.mubr.msk.bf16.gmra.mrb[108].mxu1 %vm490_vm2, %v14141_v32  ;;  %v12414_v14 = vpop.f32.mrb[4].mxu0  ;;  %v2514_v51 = vld [vmem:[#allocation3 + $0x10] sm:$0xff] }
 0x101   : > { %2102 = vst.msk [vmem:[#allocation3 + $0x30] sm:$0xff] %vm18984_vm6, %v12414_v14  ;;  %v1937_v12 = vpop.f32.mrb[5].mxu0  ;;  %12658 = vmatprep.mubr.msk.bf16.mxu1 %vm490_vm2, %v14147_v37  ;;  %v2512_v10 = vld [vmem:[#allocation3] sm:$0xff]  ;;  %v4457_v14 = vrot.slane %v4455_v56, 1 }
 0x102   : > { %2100 = vst.msk [vmem:[#allocation3 + $0x20] sm:$0xff] %vm18984_vm6, %v1937_v12  ;;  %v12415_v2 = vpop.f32.mrb[6].mxu0  ;;  %v2515_v58 = vld [vmem:[#allocation3 + $0x18] sm:$0xff] }
 0x103   : > { %v12456_v3 = vpop.f32.mrb[4].mxu1  ;;  %2103 = vst.msk [vmem:[#allocation3 + $0x38] sm:$0xff] %vm18984_vm6, %v12415_v2  ;;  %v1940_v23 = vpop.f32.mrb[7].mxu0  ;;  %v2513_v5 = vld [vmem:[#allocation3 + $0x8] sm:$0xff] }
 0x104   : > { %v2558_v45 = vadd.f32 %v12456_v3, %v2514_v51  ;;  %v2337_v59 = vpop.f32.mrb[5].mxu1  ;;  %2101 = vst.msk [vmem:[#allocation3 + $0x28] sm:$0xff] %vm18984_vm6, %v1940_v23  ;;  %v4459_v23 = vshrl.u32 %v14157_v48, 16 }
 0x105   : > { %v2556_v61 = vadd.f32 %v2512_v10, %v2337_v59  ;;  %v12457_v22 = vpop.f32.mrb[6].mxu1  ;;  %12621 = vmatmul.mubr.msk.bf16.gmra.mrb[112].mxu0 %vm490_vm2, %v14157_v48 }
 0x106   : > { %2602 = vst.msk [vmem:[#allocation3 + $0x10] sm:$0xff] %vm18984_vm6, %v2558_v45  ;;  %v2559_v46 = vadd.f32 %v12457_v22, %v2515_v58  ;;  %v2340_v19 = vpop.f32.mrb[7].mxu1  ;;  %12624 = vmatprep.mubr.msk.bf16.mxu0 %vm490_vm2, %v14160_v7  ;;  %v14193_v58 = vsel %vm18980_vm5, %v4445_v20, %v4449_v54  ;;  %v4461_v7 = vor.u32 %v4459_v23, %v4457_v14 }
 0x107   : > { %2600 = vst.msk [vmem:[#allocation3] sm:$0xff] %vm18984_vm6, %v2556_v61  ;;  %v2557_v62 = vadd.f32 %v2513_v5, %v2340_v19  ;;  %v14200_v5 = vsel %vm18980_vm5, %v4453_v47, %v4457_v14  ;;  %v4465_v61 = vrot.slane %v4463_v21, 1 }
 0x108   : > { %2603 = vst.msk [vmem:[#allocation3 + $0x18] sm:$0xff] %vm18984_vm6, %v2559_v46  ;;  %12659 = vmatmul.mubr.msk.bf16.gmra.mrb[112].mxu1 %vm490_vm2, %v14167_v35  ;;  %v12418_v40 = vpop.f32.mrb[8].mxu0  ;;  %v2518_v50 = vld [vmem:[#allocation3 + $0x30] sm:$0xff] }
 0x109   : > { %2601 = vst.msk [vmem:[#allocation3 + $0x8] sm:$0xff] %vm18984_vm6, %v2557_v62  ;;  %2106 = vst.msk [vmem:[#allocation3 + $0x50] sm:$0xff] %vm18984_vm6, %v12418_v40  ;;  %v1953_v52 = vpop.f32.mrb[9].mxu0  ;;  %12662 = vmatprep.mubr.msk.bf16.mxu1 %vm490_vm2, %v14174_v57  ;;  %v2516_v38 = vld [vmem:[#allocation3 + $0x20] sm:$0xff]  ;;  %v14212_v19 = vor.u32 %v4467_v8, %v4465_v61 }
 0x10a   : > { %2104 = vst.msk [vmem:[#allocation3 + $0x40] sm:$0xff] %vm18984_vm6, %v1953_v52  ;;  %v12419_v43 = vpop.f32.mrb[10].mxu0  ;;  %v2519_v51 = vld [vmem:[#allocation3 + $0x38] sm:$0xff] }
 0x10b   : > { %v12460_v31 = vpop.f32.mrb[8].mxu1  ;;  %2107 = vst.msk [vmem:[#allocation3 + $0x58] sm:$0xff] %vm18984_vm6, %v12419_v43  ;;  %v1956_v12 = vpop.f32.mrb[11].mxu0  ;;  %v2517_v2 = vld [vmem:[#allocation3 + $0x28] sm:$0xff]  ;;  %v4474_v14 = vsel %vm18980_vm5, %v14212_v19, %v13941_v29 }
 0x10c   : > { %v2562_v53 = vadd.f32 %v12460_v31, %v2518_v50  ;;  %v2353_v10 = vpop.f32.mrb[9].mxu1  ;;  %2105 = vst.msk [vmem:[#allocation3 + $0x48] sm:$0xff] %vm18984_vm6, %v1956_v12 }
 0x10d   : > { %v2560_v3 = vadd.f32 %v2516_v38, %v2353_v10  ;;  %v12461_v11 = vpop.f32.mrb[10].mxu1  ;;  %12625 = vmatmul.mubr.msk.bf16.gmra.mrb[116].mxu0 %vm490_vm2, %v13932_v27  ;;  %v14219_v38 = vsel %vm18980_vm5, %v4461_v7, %v4465_v61  ;;  %v4331_v7 = vld [vmem:[#allocation2 + $0xc8] sm:$0x1] }
 0x10e   : > { %2606 = vst.msk [vmem:[#allocation3 + $0x30] sm:$0xff] %vm18984_vm6, %v2562_v53  ;;  %v2563_v45 = vadd.f32 %v12461_v11, %v2519_v51  ;;  %v2356_v59 = vpop.f32.mrb[11].mxu1  ;;  %12628 = vmatprep.mubr.msk.bf16.mxu0 %vm490_vm2, %v13937_v63 }
 0x10f   : > { %2604 = vst.msk [vmem:[#allocation3 + $0x20] sm:$0xff] %vm18984_vm6, %v2560_v3  ;;  %v2561_v27 = vadd.f32 %v2517_v2, %v2356_v59 }
 0x110   : > { %2607 = vst.msk [vmem:[#allocation3 + $0x38] sm:$0xff] %vm18984_vm6, %v2563_v45  ;;  %12663 = vmatmul.mubr.msk.bf16.gmra.mrb[116].mxu1 %vm490_vm2, %v14193_v58  ;;  %v12422_v48 = vpop.f32.mrb[12].mxu0  ;;  %v2522_v63 = vld [vmem:[#allocation3 + $0x50] sm:$0xff] }
 0x111   : > { %2605 = vst.msk [vmem:[#allocation3 + $0x28] sm:$0xff] %vm18984_vm6, %v2561_v27  ;;  %2110 = vst.msk [vmem:[#allocation3 + $0x70] sm:$0xff] %vm18984_vm6, %v12422_v48  ;;  %v1969_v22 = vpop.f32.mrb[13].mxu0  ;;  %12666 = vmatprep.mubr.msk.bf16.mxu1 %vm490_vm2, %v14200_v5  ;;  %v2520_v0 = vld [vmem:[#allocation3 + $0x40] sm:$0xff] }
 0x112   : > { %2108 = vst.msk [vmem:[#allocation3 + $0x60] sm:$0xff] %vm18984_vm6, %v1969_v22  ;;  %v12423_v46 = vpop.f32.mrb[14].mxu0  ;;  %v2523_v56 = vld [vmem:[#allocation3 + $0x58] sm:$0xff] }
 0x113   : > { %v12464_v25 = vpop.f32.mrb[12].mxu1  ;;  %2111 = vst.msk [vmem:[#allocation3 + $0x78] sm:$0xff] %vm18984_vm6, %v12423_v46  ;;  %v1972_v62 = vpop.f32.mrb[15].mxu0  ;;  %v2521_v50 = vld [vmem:[#allocation3 + $0x48] sm:$0xff] }
 0x114   : > { %v2566_v40 = vadd.f32 %v12464_v25, %v2522_v63  ;;  %v2369_v54 = vpop.f32.mrb[13].mxu1  ;;  %2109 = vst.msk [vmem:[#allocation3 + $0x68] sm:$0xff] %vm18984_vm6, %v1972_v62 }
 0x115   : > { %v2564_v52 = vadd.f32 %v2520_v0, %v2369_v54  ;;  %v12465_v20 = vpop.f32.mrb[14].mxu1  ;;  %12629 = vmatmul.mubr.msk.bf16.gmra.mrb[120].mxu0 %vm490_vm2, %v13953_v1 }
 0x116   : > { %2610 = vst.msk [vmem:[#allocation3 + $0x50] sm:$0xff] %vm18984_vm6, %v2566_v40  ;;  %v2567_v43 = vadd.f32 %v12465_v20, %v2523_v56  ;;  %v2372_v47 = vpop.f32.mrb[15].mxu1  ;;  %12632 = vmatprep.mubr.msk.bf16.mxu0 %vm490_vm2, %v13966_v4 }
 0x117   : > { %2608 = vst.msk [vmem:[#allocation3 + $0x40] sm:$0xff] %vm18984_vm6, %v2564_v52  ;;  %v2565_v31 = vadd.f32 %v2521_v50, %v2372_v47 }
 0x118   : > { %2611 = vst.msk [vmem:[#allocation3 + $0x58] sm:$0xff] %vm18984_vm6, %v2567_v43  ;;  %12667 = vmatmul.mubr.msk.bf16.gmra.mrb[120].mxu1 %vm490_vm2, %v14219_v38  ;;  %v12426_v1 = vpop.f32.mrb[16].mxu0  ;;  %v2526_v51 = vld [vmem:[#allocation3 + $0x70] sm:$0xff]  ;;  %v5540_v43 = vld [vmem:[#allocation2 + $0x28] sm:$0xfe] }
 0x119   : > { %2609 = vst.msk [vmem:[#allocation3 + $0x48] sm:$0xff] %vm18984_vm6, %v2565_v31  ;;  %2114 = vst.msk [vmem:[#allocation3 + $0x90] sm:$0xff] %vm18984_vm6, %v12426_v1  ;;  %v1985_v12 = vpop.f32.mrb[17].mxu0  ;;  %12670 = vmatprep.mubr.msk.bf16.mxu1 %vm490_vm2, %v4474_v14  ;;  %v2524_v29 = vld [vmem:[#allocation3 + $0x60] sm:$0xff] }
 0x11a   : > { %2112 = vst.msk [vmem:[#allocation3 + $0x80] sm:$0xff] %vm18984_vm6, %v1985_v12  ;;  %v12427_v4 = vpop.f32.mrb[18].mxu0  ;;  %v2527_v10 = vld [vmem:[#allocation3 + $0x78] sm:$0xff] }
 0x11b   : > { %v12468_v53 = vpop.f32.mrb[16].mxu1  ;;  %2115 = vst.msk [vmem:[#allocation3 + $0x98] sm:$0xff] %vm18984_vm6, %v12427_v4  ;;  %v1988_v2 = vpop.f32.mrb[19].mxu0  ;;  %v2525_v11 = vld [vmem:[#allocation3 + $0x68] sm:$0xff] }
 0x11c   : > { %v2570_v21 = vadd.f32 %v12468_v53, %v2526_v51  ;;  %v2385_v3 = vpop.f32.mrb[17].mxu1  ;;  %2113 = vst.msk [vmem:[#allocation3 + $0x88] sm:$0xff] %vm18984_vm6, %v1988_v2  ;;  %v5590_v51 = vrot.slane %v14042_v39, 1 }
 0x11d   : > { %v2568_v23 = vadd.f32 %v2524_v29, %v2385_v3  ;;  %v12469_v45 = vpop.f32.mrb[18].mxu1  ;;  %12633 = vmatmul.mubr.msk.bf16.gmra.mrb[124].mxu0 %vm490_vm2, %v13984_v13 }
 0x11e   : > { %2614 = vst.msk [vmem:[#allocation3 + $0x70] sm:$0xff] %vm18984_vm6, %v2570_v21  ;;  %v2571_v59 = vadd.f32 %v12469_v45, %v2527_v10  ;;  %v2388_v8 = vpop.f32.mrb[19].mxu1  ;;  %12684 = vmatprep.mubr.msk.bf16.mxu0 %vm490_vm2, %v14067_v28 }
 0x11f   : > { %2612 = vst.msk [vmem:[#allocation3 + $0x60] sm:$0xff] %vm18984_vm6, %v2568_v23  ;;  %v2569_v27 = vadd.f32 %v2525_v11, %v2388_v8  ;;  %v5594_v8 = vrot.slane %v14055_v17, 1 }
 0x120   : > { %2615 = vst.msk [vmem:[#allocation3 + $0x78] sm:$0xff] %vm18984_vm6, %v2571_v59  ;;  %12671 = vmatmul.mubr.msk.bf16.gmra.mrb[124].mxu1 %vm490_vm2, %v13949_v9  ;;  %v12430_v48 = vpop.f32.mrb[20].mxu0  ;;  %v2530_v61 = vld [vmem:[#allocation3 + $0x90] sm:$0xff] }
 0x121   : > { %2613 = vst.msk [vmem:[#allocation3 + $0x68] sm:$0xff] %vm18984_vm6, %v2569_v27  ;;  %2118 = vst.msk [vmem:[#allocation3 + $0xb0] sm:$0xff] %vm18984_vm6, %v12430_v48  ;;  %v2001_v63 = vpop.f32.mrb[21].mxu0  ;;  %12674 = vmatprep.mubr.msk.bf16.mxu1 %vm490_vm2, %v13977_v42  ;;  %v2528_v28 = vld [vmem:[#allocation3 + $0x80] sm:$0xff]  ;;  %v4511_v42 = vshll.u32 %v4331_v7, 16 }
 0x122   : > { %2116 = vst.msk [vmem:[#allocation3 + $0xa0] sm:$0xff] %vm18984_vm6, %v2001_v63  ;;  %v12431_v22 = vpop.f32.mrb[22].mxu0  ;;  %v2531_v46 = vld [vmem:[#allocation3 + $0x98] sm:$0xff] }
 0x123   : > { %v12472_v0 = vpop.f32.mrb[20].mxu1  ;;  %2119 = vst.msk [vmem:[#allocation3 + $0xb8] sm:$0xff] %vm18984_vm6, %v12431_v22  ;;  %v2004_v9 = vpop.f32.mrb[23].mxu0  ;;  %v2529_v62 = vld [vmem:[#allocation3 + $0x88] sm:$0xff] }
 0x124   : > { %v2574_v25 = vadd.f32 %v12472_v0, %v2530_v61  ;;  %v2401_v56 = vpop.f32.mrb[21].mxu1  ;;  %2117 = vst.msk [vmem:[#allocation3 + $0xa8] sm:$0xff] %vm18984_vm6, %v2004_v9 }
 0x125   : > { %v2572_v40 = vadd.f32 %v2528_v28, %v2401_v56  ;;  %v12473_v54 = vpop.f32.mrb[22].mxu1  ;;  %12685 = vmatmul.mubr.msk.bf16.vlgmr.msra.gmra.mrb[128].mxu0 %vm490_vm2, %v14083_v36 }
 0x126   : > { %2618 = vst.msk [vmem:[#allocation3 + $0x90] sm:$0xff] %vm18984_vm6, %v2574_v25  ;;  %v2575_v50 = vadd.f32 %v12473_v54, %v2531_v46  ;;  %v2404_v52 = vpop.f32.mrb[23].mxu1  ;;  %12775 = vmatpush3.bf16.msra.mxu0 %v14031_v49  ;;  %12688 = vmatprep.mubr.msk.bf16.mxu0 %vm490_vm2, %v14089_v41  ;;  %v4509_v49 = vor.u32 %v13990_v18, %v3458_v60  ;;  %v4513_v41 = vrot.slane %v4511_v42, 1  ;;  %v5598_v42 = vrot.slane %v14075_v15, 1 }
 0x127   : > { %2616 = vst.msk [vmem:[#allocation3 + $0x80] sm:$0xff] %vm18984_vm6, %v2572_v40  ;;  %v2573_v20 = vadd.f32 %v2529_v62, %v2404_v52 }
 0x128   : > { %2619 = vst.msk [vmem:[#allocation3 + $0x98] sm:$0xff] %vm18984_vm6, %v2575_v50  ;;  %12675 = vmatmul.mubr.msk.bf16.gmra.mrb[128].mxu1 %vm490_vm2, %v13980_v55  ;;  %v12434_v36 = vpop.f32.mrb[24].mxu0  ;;  %v2534_v47 = vld [vmem:[#allocation3 + $0xb0] sm:$0xff]  ;;  %v5589_v55 = vrot.slane %v5540_v43, 1  ;;  %v4514_v10 = vsel %vm18980_vm5, %v4509_v49, %v4513_v41 }
 0x129   : > { %2617 = vst.msk [vmem:[#allocation3 + $0x88] sm:$0xff] %vm18984_vm6, %v2573_v20  ;;  %2122 = vst.msk [vmem:[#allocation3 + $0xd0] sm:$0xff] %vm18984_vm6, %v12434_v36  ;;  %v2017_v14 = vpop.f32.mrb[25].mxu0  ;;  %12678 = vmatprep.mubr.msk.bf16.mxu1 %vm490_vm2, %v13998_v30  ;;  %v2532_v31 = vld [vmem:[#allocation3 + $0xa0] sm:$0xff] }
 0x12a   : > { %2120 = vst.msk [vmem:[#allocation3 + $0xc0] sm:$0xff] %vm18984_vm6, %v2017_v14  ;;  %v12435_v1 = vpop.f32.mrb[26].mxu0  ;;  %v2535_v29 = vld [vmem:[#allocation3 + $0xb8] sm:$0xff]  ;;  %v5591_v21 = vsel %vm18979_vm7, %v5589_v55, %v5590_v51  ;;  %v14318_v55 = vld [vmem:[#allocation2 + $0x60] sm:$0xff] }
 0x12b   : > { %v12476_v12 = vpop.f32.mrb[24].mxu1  ;;  %2123 = vst.msk [vmem:[#allocation3 + $0xd8] sm:$0xff] %vm18984_vm6, %v12435_v1  ;;  %v2020_v4 = vpop.f32.mrb[27].mxu0  ;;  %v2533_v13 = vld [vmem:[#allocation3 + $0xa8] sm:$0xff] }
 0x12c   : > { %v2578_v53 = vadd.f32 %v12476_v12, %v2534_v47  ;;  %v2417_v30 = vpop.f32.mrb[25].mxu1  ;;  %2121 = vst.msk [vmem:[#allocation3 + $0xc8] sm:$0xff] %vm18984_vm6, %v2020_v4 }
 0x12d   : > { %v2576_v18 = vadd.f32 %v2532_v31, %v2417_v30  ;;  %v12477_v60 = vpop.f32.mrb[26].mxu1  ;;  %12689 = vmatmul.mubr.msk.bf16.gmra.mrb[132].mxu0 %vm490_vm2, %v14104_v6 }
 0x12e   : > { %2622 = vst.msk [vmem:[#allocation3 + $0xb0] sm:$0xff] %vm18984_vm6, %v2578_v53  ;;  %v2579_v39 = vadd.f32 %v12477_v60, %v2535_v29  ;;  %v2420_v2 = vpop.f32.mrb[27].mxu1  ;;  %12692 = vmatprep.mubr.msk.bf16.mxu0 %vm490_vm2, %v14109_v34  ;;  %v5592_v34 = vrot.slane %v14044_v44, 1  ;;  %v5602_v53 = vrot.slane %v14318_v55, 1 }
 0x12f   : > { %2620 = vst.msk [vmem:[#allocation3 + $0xa0] sm:$0xff] %vm18984_vm6, %v2576_v18  ;;  %v2577_v3 = vadd.f32 %v2533_v13, %v2420_v2 }
 0x130   : > { %2623 = vst.msk [vmem:[#allocation3 + $0xb8] sm:$0xff] %vm18984_vm6, %v2579_v39  ;;  %12679 = vmatmul.mubr.msk.bf16.gmra.mrb[132].mxu1 %vm490_vm2, %v4514_v10  ;;  %v12438_v11 = vpop.f32.mrb[28].mxu0  ;;  %v2538_v6 = vld [vmem:[#allocation3 + $0xd0] sm:$0xff]  ;;  %v5593_v44 = vsel %vm18979_vm7, %v5590_v51, %v5592_v34  ;;  %v5595_v9 = vsel %vm18979_vm7, %v5592_v34, %v5594_v8 }
 0x131   : > { %2621 = vst.msk [vmem:[#allocation3 + $0xa8] sm:$0xff] %vm18984_vm6, %v2577_v3  ;;  %2126 = vst.msk [vmem:[#allocation3 + $0xf0] sm:$0xff] %vm18984_vm6, %v12438_v11  ;;  %v2033_v23 = vpop.f32.mrb[29].mxu0  ;;  %12730 = vmatprep.mubr.msk.bf16.mxu1 %vm490_vm2, %v5591_v21  ;;  %v2536_v45 = vld [vmem:[#allocation3 + $0xc0] sm:$0xff] }
 0x132   : > { %2124 = vst.msk [vmem:[#allocation3 + $0xe0] sm:$0xff] %vm18984_vm6, %v2033_v23  ;;  %v12439_v59 = vpop.f32.mrb[30].mxu0  ;;  %v2539_v48 = vld [vmem:[#allocation3 + $0xd8] sm:$0xff]  ;;  %v14337_v23 = vld [vmem:[#allocation2 + $0x68] sm:$0xff] }
 0x133   : > { %v12480_v27 = vpop.f32.mrb[28].mxu1  ;;  %2127 = vst.msk [vmem:[#allocation3 + $0xf8] sm:$0xff] %vm18984_vm6, %v12439_v59  ;;  %v2036_v61 = vpop.f32.mrb[31].mxu0  ;;  %v2537_v22 = vld [vmem:[#allocation3 + $0xc8] sm:$0xff]  ;;  %v3130_v59 = vld [vmem:[#allocation3 + $0x10] sm:$0xff] }
 0x134   : > { %v2582_v63 = vadd.f32 %v12480_v27, %v2538_v6  ;;  %v2433_v28 = vpop.f32.mrb[29].mxu1  ;;  %2125 = vst.msk [vmem:[#allocation3 + $0xe8] sm:$0xff] %vm18984_vm6, %v2036_v61  ;;  %v3128_v61 = vld [vmem:[#allocation3] sm:$0xff] }
 0x135   : > { %v2580_v7 = vadd.f32 %v2536_v45, %v2433_v28  ;;  %v12481_v0 = vpop.f32.mrb[30].mxu1  ;;  %12693 = vmatmul.mubr.msk.bf16.gmra.mrb[136].mxu0 %vm490_vm2, %v14118_v26  ;;  %v14340_v45 = vld [vmem:[#allocation2 + $0x70] sm:$0xff] }
 0x136   : > { %2626 = vst.msk [vmem:[#allocation3 + $0xd0] sm:$0xff] %vm18984_vm6, %v2582_v63  ;;  %v2583_v17 = vadd.f32 %v12481_v0, %v2539_v48  ;;  %v2436_v46 = vpop.f32.mrb[31].mxu1  ;;  %12696 = vmatprep.mubr.msk.bf16.mxu0 %vm490_vm2, %v14122_v24  ;;  %v5596_v24 = vrot.slane %v14057_v33, 1  ;;  %v5604_v63 = vrot.slane %v14337_v23, 1  ;;  %v3131_v0 = vld [vmem:[#allocation3 + $0x18] sm:$0xff] }
 0x137   : > { %2624 = vst.msk [vmem:[#allocation3 + $0xc0] sm:$0xff] %vm18984_vm6, %v2580_v7  ;;  %v2581_v25 = vadd.f32 %v2537_v22, %v2436_v46 }
 0x138   : > { %2627 = vst.msk [vmem:[#allocation3 + $0xd8] sm:$0xff] %vm18984_vm6, %v2583_v17  ;;  %12731 = vmatmul.mubr.msk.bf16.vlgmr.msra.gmra.mrb[136].mxu1 %vm490_vm2, %v5593_v44  ;;  %v12442_v56 = vpop.f32.mrb[32].mxu0  ;;  %v2542_v26 = vld [vmem:[#allocation3 + $0xf0] sm:$0xff]  ;;  %v5597_v33 = vsel %vm18979_vm7, %v5594_v8, %v5596_v24  ;;  %v5599_v31 = vsel %vm18979_vm7, %v5596_v24, %v5598_v42  ;;  %v14344_v8 = vld [vmem:[#allocation2 + $0xa0] sm:$0xff]  ;;  %v5606_v44 = vrot.slane %v14340_v45, 1 }
 0x139   : > { %2625 = vst.msk [vmem:[#allocation3 + $0xc8] sm:$0xff] %vm18984_vm6, %v2581_v25  ;;  %2130 = vst.msk [vmem:[#allocation3 + $0x110] sm:$0xff] %vm18984_vm6, %v12442_v56  ;;  %v2049_v62 = vpop.f32.mrb[33].mxu0  ;;  %12734 = vmatprep.mubr.msk.bf16.mxu1 %vm490_vm2, %v5595_v9  ;;  %v2540_v40 = vld [vmem:[#allocation3 + $0xe0] sm:$0xff]  ;;  %v3129_v56 = vld [vmem:[#allocation3 + $0x8] sm:$0xff] }
 0x13a   : > { %2128 = vst.msk [vmem:[#allocation3 + $0x100] sm:$0xff] %vm18984_vm6, %v2049_v62  ;;  %v12443_v54 = vpop.f32.mrb[34].mxu0  ;;  %v2543_v52 = vld [vmem:[#allocation3 + $0xf8] sm:$0xff] }
 0x13b   : > { %v12484_v50 = vpop.f32.mrb[32].mxu1  ;;  %2131 = vst.msk [vmem:[#allocation3 + $0x118] sm:$0xff] %vm18984_vm6, %v12443_v54  ;;  %v2052_v20 = vpop.f32.mrb[35].mxu0  ;;  %v2541_v47 = vld [vmem:[#allocation3 + $0xe8] sm:$0xff] }
 0x13c   : > { %v2586_v43 = vadd.f32 %v12484_v50, %v2542_v26  ;;  %v2449_v36 = vpop.f32.mrb[33].mxu1  ;;  %2129 = vst.msk [vmem:[#allocation3 + $0x108] sm:$0xff] %vm18984_vm6, %v2052_v20  ;;  %v5070_v26 = vshll.u32 %v14344_v8, 16 }
 0x13d   : > { %v2584_v14 = vadd.f32 %v2540_v40, %v2449_v36  ;;  %v12485_v49 = vpop.f32.mrb[34].mxu1  ;;  %12697 = vmatmul.mubr.msk.bf16.gmra.mrb[140].mxu0 %vm490_vm2, %v14141_v32  ;;  %v5607_v36 = vsel %vm18979_vm7, %v5604_v63, %v5606_v44 }
 0x13e   : > { %2630 = vst.msk [vmem:[#allocation3 + $0xf0] sm:$0xff] %vm18984_vm6, %v2586_v43  ;;  %v2587_v15 = vadd.f32 %v12485_v49, %v2543_v52  ;;  %v2452_v41 = vpop.f32.mrb[35].mxu1  ;;  %12700 = vmatprep.mubr.msk.bf16.mxu0 %vm490_vm2, %v14147_v37  ;;  %v5600_v37 = vrot.slane %v14077_v16, 1  ;;  %v5605_v52 = vsel %vm18979_vm7, %v5602_v53, %v5604_v63  ;;  %v5072_v49 = vrot.slane %v5070_v26, 1  ;;  %v2553_v63 = vld [vmem:[#allocation3 + $0x148] sm:$0xff] }
 0x13f   : > { %2628 = vst.msk [vmem:[#allocation3 + $0xe0] sm:$0xff] %vm18984_vm6, %v2584_v14  ;;  %v2585_v1 = vadd.f32 %v2541_v47, %v2452_v41  ;;  %v14364_v47 = vld [vmem:[#allocation2 + $0x78] sm:$0xff]  ;;  %v14366_v14 = vld [vmem:[#allocation2 + $0xa8] sm:$0xff]  ;;  %v14373_v41 = vld [vmem:[#allocation2 + $0xb0] sm:$0xff] }
 0x140   : > { %2631 = vst.msk [vmem:[#allocation3 + $0xf8] sm:$0xff] %vm18984_vm6, %v2587_v15  ;;  %12735 = vmatmul.mubr.msk.bf16.gmra.mrb[140].mxu1 %vm490_vm2, %v5597_v33  ;;  %v12446_v32 = vpop.f32.mrb[36].mxu0  ;;  %v2546_v51 = vld [vmem:[#allocation3 + $0x110] sm:$0xff]  ;;  %v5601_v16 = vsel %vm18979_vm7, %v5598_v42, %v5600_v37  ;;  %v5603_v6 = vsel %vm18979_vm7, %v5600_v37, %v5602_v53  ;;  %v14369_v33 = vld [vmem:[#allocation2 + $0x80] sm:$0xff] }
 0x141   : > { %2629 = vst.msk [vmem:[#allocation3 + $0xe8] sm:$0xff] %vm18984_vm6, %v2585_v1  ;;  %2134 = vst.msk [vmem:[#allocation3 + $0x130] sm:$0xff] %vm18984_vm6, %v12446_v32  ;;  %v2065_v12 = vpop.f32.mrb[37].mxu0  ;;  %12738 = vmatprep.mubr.msk.bf16.mxu1 %vm490_vm2, %v5599_v31  ;;  %v2544_v29 = vld [vmem:[#allocation3 + $0x100] sm:$0xff]  ;;  %v5610_v53 = vrot.slane %v14369_v33, 1 }
 0x142   : > { %2132 = vst.msk [vmem:[#allocation3 + $0x120] sm:$0xff] %vm18984_vm6, %v2065_v12  ;;  %v12447_v4 = vpop.f32.mrb[38].mxu0  ;;  %v2547_v13 = vld [vmem:[#allocation3 + $0x118] sm:$0xff]  ;;  %v3132_v32 = vld [vmem:[#allocation3 + $0x20] sm:$0xff]  ;;  %v5078_v12 = vshll.u32 %v14366_v14, 16 }
 0x143   : > { %v12488_v30 = vpop.f32.mrb[36].mxu1  ;;  %2135 = vst.msk [vmem:[#allocation3 + $0x138] sm:$0xff] %vm18984_vm6, %v12447_v4  ;;  %v2068_v18 = vpop.f32.mrb[39].mxu0  ;;  %v2545_v39 = vld [vmem:[#allocation3 + $0x108] sm:$0xff]  ;;  %v3135_v4 = vld [vmem:[#allocation3 + $0x38] sm:$0xff] }
 0x144   : > { %v2590_v60 = vadd.f32 %v12488_v30, %v2546_v51  ;;  %v2465_v10 = vpop.f32.mrb[37].mxu1  ;;  %2133 = vst.msk [vmem:[#allocation3 + $0x128] sm:$0xff] %vm18984_vm6, %v2068_v18  ;;  %v5608_v51 = vrot.slane %v14364_v47, 1  ;;  %v5074_v30 = vshrl.u32 %v14344_v8, 16  ;;  %v2554_v18 = vld [vmem:[#allocation3 + $0x150] sm:$0xff] }
 0x145   : > { %v2588_v2 = vadd.f32 %v2544_v29, %v2465_v10  ;;  %v12489_v21 = vpop.f32.mrb[38].mxu1  ;;  %12701 = vmatmul.mubr.msk.bf16.gmra.mrb[144].mxu0 %vm490_vm2, %v14167_v35 }
 0x146   : > { %2634 = vst.msk [vmem:[#allocation3 + $0x110] sm:$0xff] %vm18984_vm6, %v2590_v60  ;;  %v2591_v3 = vadd.f32 %v12489_v21, %v2547_v13  ;;  %v2468_v11 = vpop.f32.mrb[39].mxu1  ;;  %12704 = vmatprep.mubr.msk.bf16.mxu0 %vm490_vm2, %v14174_v57  ;;  %v5082_v21 = vshrl.u32 %v14366_v14, 16 }
 0x147   : > { %2632 = vst.msk [vmem:[#allocation3 + $0x100] sm:$0xff] %vm18984_vm6, %v2588_v2  ;;  %v2589_v34 = vadd.f32 %v2545_v39, %v2468_v11  ;;  %v3133_v39 = vld [vmem:[#allocation3 + $0x28] sm:$0xff]  ;;  %v5073_v2 = vsel %vm18980_vm5, %v14212_v19, %v5072_v49  ;;  %v5609_v19 = vsel %vm18979_vm7, %v5606_v44, %v5608_v51 }
 0x148   : > { %2635 = vst.msk [vmem:[#allocation3 + $0x118] sm:$0xff] %vm18984_vm6, %v2591_v3  ;;  %12739 = vmatmul.mubr.msk.bf16.gmra.mrb[144].mxu1 %vm490_vm2, %v5601_v16  ;;  %v12502_v35 = vpop.f32.mrb[40].mxu0  ;;  %v2550_v57 = vld [vmem:[#allocation3 + $0x130] sm:$0xff]  ;;  %v5086_v16 = vshll.u32 %v14373_v41, 16 }
 0x149   : > { %2633 = vst.msk [vmem:[#allocation3 + $0x108] sm:$0xff] %vm18984_vm6, %v2589_v34  ;;  %v3174_v27 = vadd.f32 %v12502_v35, %v3130_v59  ;;  %v2953_v48 = vpop.f32.mrb[41].mxu0  ;;  %12742 = vmatprep.mubr.msk.bf16.mxu1 %vm490_vm2, %v5603_v6  ;;  %v2548_v28 = vld [vmem:[#allocation3 + $0x120] sm:$0xff] }
 0x14a   : > { %v3172_v22 = vadd.f32 %v3128_v61, %v2953_v48  ;;  %v12503_v7 = vpop.f32.mrb[42].mxu0  ;;  %v2551_v46 = vld [vmem:[#allocation3 + $0x138] sm:$0xff]  ;;  %v2552_v6 = vld [vmem:[#allocation3 + $0x140] sm:$0xff] }
 0x14b   : > { %v12492_v17 = vpop.f32.mrb[40].mxu1  ;;  %3218 = vst.msk [vmem:[#allocation3 + $0x10] sm:$0xff] %vm18984_vm6, %v3174_v27  ;;  %v3175_v9 = vadd.f32 %v12503_v7, %v3131_v0  ;;  %v2956_v25 = vpop.f32.mrb[43].mxu0  ;;  %v2549_v40 = vld [vmem:[#allocation3 + $0x128] sm:$0xff]  ;;  %v5080_v27 = vrot.slane %v5078_v12, 1  ;;  %v14401_v7 = vld [vmem:[#allocation2 + $0xb8] sm:$0xff] }
 0x14c   : > { %v2594_v62 = vadd.f32 %v12492_v17, %v2550_v57  ;;  %v2481_v24 = vpop.f32.mrb[41].mxu1  ;;  %3216 = vst.msk [vmem:[#allocation3] sm:$0xff] %vm18984_vm6, %v3172_v22  ;;  %v3173_v54 = vadd.f32 %v3129_v56, %v2956_v25  ;;  %v2555_v57 = vld [vmem:[#allocation3 + $0x158] sm:$0xff]  ;;  %v5076_v22 = vor.u32 %v5074_v30, %v5072_v49  ;;  %v5088_v17 = vrot.slane %v5086_v16, 1  ;;  %v3138_v25 = vld [vmem:[#allocation3 + $0x50] sm:$0xff]  ;;  %v14408_v56 = vld [vmem:[#allocation2 + $0xc0] sm:$0xff] }
 0x14d   : > { %v2592_v42 = vadd.f32 %v2548_v28, %v2481_v24  ;;  %v12493_v50 = vpop.f32.mrb[42].mxu1  ;;  %3219 = vst.msk [vmem:[#allocation3 + $0x18] sm:$0xff] %vm18984_vm6, %v3175_v9  ;;  %12705 = vmatmul.mubr.msk.bf16.gmra.mrb[148].mxu0 %vm490_vm2, %v14193_v58  ;;  %v5611_v28 = vsel %vm18979_vm7, %v5608_v51, %v5610_v53  ;;  %v5084_v44 = vor.u32 %v5082_v21, %v5080_v27  ;;  %v3136_v24 = vld [vmem:[#allocation3 + $0x40] sm:$0xff]  ;;  %v5102_v51 = vshll.u32 %v14408_v56, 16 }
 0x14e   : > { %2638 = vst.msk [vmem:[#allocation3 + $0x130] sm:$0xff] %vm18984_vm6, %v2594_v62  ;;  %v2595_v20 = vadd.f32 %v12493_v50, %v2551_v46  ;;  %v2484_v43 = vpop.f32.mrb[43].mxu1  ;;  %3217 = vst.msk [vmem:[#allocation3 + $0x8] sm:$0xff] %vm18984_vm6, %v3173_v54  ;;  %12708 = vmatprep.mubr.msk.bf16.mxu0 %vm490_vm2, %v14200_v5  ;;  %v3134_v5 = vld [vmem:[#allocation3 + $0x30] sm:$0xff]  ;;  %v5094_v54 = vshll.u32 %v14401_v7, 16 }
 0x14f   : > { %2636 = vst.msk [vmem:[#allocation3 + $0x120] sm:$0xff] %vm18984_vm6, %v2592_v42  ;;  %v2593_v58 = vadd.f32 %v2549_v40, %v2484_v43  ;;  %v14404_v46 = vld [vmem:[#allocation2 + $0x90] sm:$0xff] }
 0x150   : > { %2639 = vst.msk [vmem:[#allocation3 + $0x138] sm:$0xff] %vm18984_vm6, %v2595_v20  ;;  %12743 = vmatmul.mubr.msk.bf16.gmra.mrb[148].mxu1 %vm490_vm2, %v5605_v52  ;;  %v12506_v15 = vpop.f32.mrb[44].mxu0  ;;  %v3139_v52 = vld [vmem:[#allocation3 + $0x58] sm:$0xff]  ;;  %v5081_v20 = vsel %vm18980_vm5, %v5076_v22, %v5080_v27  ;;  %v5614_v43 = vrot.slane %v14404_v46, 1  ;;  %v5106_v22 = vshrl.u32 %v14408_v56, 16 }
 0x151   : > { %2637 = vst.msk [vmem:[#allocation3 + $0x128] sm:$0xff] %vm18984_vm6, %v2593_v58  ;;  %v3178_v31 = vadd.f32 %v12506_v15, %v3134_v5  ;;  %v2969_v1 = vpop.f32.mrb[45].mxu0  ;;  %12746 = vmatprep.mubr.msk.bf16.mxu1 %vm490_vm2, %v5607_v36  ;;  %v5090_v36 = vshrl.u32 %v14373_v41, 16 }
 0x152   : > { %v3176_v37 = vadd.f32 %v3132_v32, %v2969_v1  ;;  %v12507_v29 = vpop.f32.mrb[46].mxu0  ;;  %v3745_v49 = vld [vmem:[#allocation3 + $0x10] sm:$0xff]  ;;  %v5089_v1 = vsel %vm18980_vm5, %v5084_v44, %v5088_v17  ;;  %v5098_v32 = vshrl.u32 %v14401_v7, 16 }
 0x153   : > { %v12496_v13 = vpop.f32.mrb[44].mxu1  ;;  %3222 = vst.msk [vmem:[#allocation3 + $0x30] sm:$0xff] %vm18984_vm6, %v3178_v31  ;;  %v3179_v60 = vadd.f32 %v12507_v29, %v3135_v4  ;;  %v2972_v10 = vpop.f32.mrb[47].mxu0  ;;  %v3137_v31 = vld [vmem:[#allocation3 + $0x48] sm:$0xff]  ;;  %v3743_v29 = vld [vmem:[#allocation3] sm:$0xff] }
 0x154   : > { %v2598_v3 = vadd.f32 %v12496_v13, %v2554_v18  ;;  %v2497_v11 = vpop.f32.mrb[45].mxu1  ;;  %3220 = vst.msk [vmem:[#allocation3 + $0x20] sm:$0xff] %vm18984_vm6, %v3176_v37  ;;  %v3177_v34 = vadd.f32 %v3133_v39, %v2972_v10  ;;  %v3746_v18 = vld [vmem:[#allocation3 + $0x18] sm:$0xff]  ;;  %v5096_v10 = vrot.slane %v5094_v54, 1 }
 0x155   : > { %v2596_v35 = vadd.f32 %v2552_v6, %v2497_v11  ;;  %v12497_v59 = vpop.f32.mrb[46].mxu1  ;;  %3223 = vst.msk [vmem:[#allocation3 + $0x38] sm:$0xff] %vm18984_vm6, %v3179_v60  ;;  %12709 = vmatmul.mubr.msk.bf16.gmra.mrb[152].mxu0 %vm490_vm2, %v14219_v38  ;;  %v14399_v38 = vld [vmem:[#allocation2 + $0x88] sm:$0xff]  ;;  %v14427_v39 = vld [vmem:[#allocation2 + $0x98] sm:$0xff]  ;;  %v5092_v11 = vor.u32 %v5090_v36, %v5088_v17 }
 0x156   : > { %2642 = vst.msk [vmem:[#allocation3 + $0x150] sm:$0xff] %vm18984_vm6, %v2598_v3  ;;  %v2599_v48 = vadd.f32 %v12497_v59, %v2555_v57  ;;  %v2500_v61 = vpop.f32.mrb[47].mxu1  ;;  %3221 = vst.msk [vmem:[#allocation3 + $0x28] sm:$0xff] %vm18984_vm6, %v3177_v34  ;;  %12712 = vmatprep.mubr.msk.bf16.mxu0 %vm490_vm2, %v5073_v2  ;;  %v5612_v40 = vrot.slane %v14399_v38, 1  ;;  %v3744_v16 = vld [vmem:[#allocation3 + $0x8] sm:$0xff]  ;;  %v5100_v34 = vor.u32 %v5098_v32, %v5096_v10  ;;  %v14438_v59 = vld [vmem:[#allocation2 + $0xd0] sm:$0xff] }
 0x157   : > { %2640 = vst.msk [vmem:[#allocation3 + $0x140] sm:$0xff] %vm18984_vm6, %v2596_v35  ;;  %v2597_v0 = vadd.f32 %v2553_v63, %v2500_v61  ;;  %v14435_v6 = vld [vmem:[#allocation2 + $0xc8] sm:$0xff]  ;;  %v5104_v35 = vrot.slane %v5102_v51, 1  ;;  %v5616_v27 = vrot.slane %v14427_v39, 1  ;;  %v3140_v63 = vld [vmem:[#allocation3 + $0x60] sm:$0xff] }
 0x158   : > { %2643 = vst.msk [vmem:[#allocation3 + $0x158] sm:$0xff] %vm18984_vm6, %v2599_v48  ;;  %12747 = vmatmul.mubr.msk.bf16.gmra.mrb[152].mxu1 %vm490_vm2, %v5609_v19  ;;  %v12510_v9 = vpop.f32.mrb[48].mxu0  ;;  %v5613_v60 = vsel %vm18979_vm7, %v5610_v53, %v5612_v40  ;;  %v5615_v3 = vsel %vm18979_vm7, %v5612_v40, %v5614_v43  ;;  %v3142_v19 = vld [vmem:[#allocation3 + $0x70] sm:$0xff] }
 0x159   : > { %2641 = vst.msk [vmem:[#allocation3 + $0x148] sm:$0xff] %vm18984_vm6, %v2597_v0  ;;  %v3182_v26 = vadd.f32 %v12510_v9, %v3138_v25  ;;  %v2985_v62 = vpop.f32.mrb[49].mxu0  ;;  %12750 = vmatprep.mubr.msk.bf16.mxu1 %vm490_vm2, %v5611_v28  ;;  %v5618_v28 = vrot.slane %v14344_v8, 1  ;;  %v5110_v0 = vshll.u32 %v14435_v6, 16  ;;  %v3143_v9 = vld [vmem:[#allocation3 + $0x78] sm:$0xff]  ;;  %v5097_v25 = vsel %vm18980_vm5, %v5092_v11, %v5096_v10 }
 0x15a   : > { %v3180_v42 = vadd.f32 %v3136_v24, %v2985_v62  ;;  %v12511_v50 = vpop.f32.mrb[50].mxu0  ;;  %v5118_v62 = vshll.u32 %v14438_v59, 16  ;;  %v3749_v40 = vld [vmem:[#allocation3 + $0x30] sm:$0xff] }
 0x15b   : > { %3226 = vst.msk [vmem:[#allocation3 + $0x50] sm:$0xff] %vm18984_vm6, %v3182_v26  ;;  %v12548_v58 = vpop.f32.mrb[48].mxu1  ;;  %v3183_v15 = vadd.f32 %v12511_v50, %v3139_v52  ;;  %v2988_v5 = vpop.f32.mrb[51].mxu0  ;;  %v5114_v26 = vshrl.u32 %v14435_v6, 16  ;;  %v3141_v50 = vld [vmem:[#allocation3 + $0x68] sm:$0xff]  ;;  %v5105_v52 = vsel %vm18980_vm5, %v5100_v34, %v5104_v35  ;;  %v5620_v34 = vrot.slane %v14366_v14, 1 }
 0x15c   : > { %v3789_v12 = vadd.f32 %v12548_v58, %v3745_v49  ;;  %3224 = vst.msk [vmem:[#allocation3 + $0x40] sm:$0xff] %vm18984_vm6, %v3180_v42  ;;  %v3568_v37 = vpop.f32.mrb[49].mxu1  ;;  %v3181_v4 = vadd.f32 %v3137_v31, %v2988_v5  ;;  %v3747_v49 = vld [vmem:[#allocation3 + $0x20] sm:$0xff]  ;;  %v5617_v5 = vsel %vm18979_vm7, %v5614_v43, %v5616_v27  ;;  %v6045_v31 = vld [vmem:[#allocation2 + $0x30] sm:$0xff]  ;;  %v3750_v51 = vld [vmem:[#allocation3 + $0x38] sm:$0xff] }
 0x15d   : > { %v3787_v30 = vadd.f32 %v3743_v29, %v3568_v37  ;;  %3227 = vst.msk [vmem:[#allocation3 + $0x58] sm:$0xff] %vm18984_vm6, %v3183_v15  ;;  %v12549_v13 = vpop.f32.mrb[50].mxu1  ;;  %12713 = vmatmul.mubr.msk.bf16.gmra.mrb[156].mxu0 %vm490_vm2, %v5081_v20  ;;  %v6044_v20 = vld [vmem:[#allocation2 + $0x28] sm:$0xfe]  ;;  %v5108_v37 = vor.u32 %v5106_v22, %v5104_v35  ;;  %v5112_v29 = vrot.slane %v5110_v0, 1  ;;  %v3147_v0 = vld [vmem:[#allocation3 + $0x98] sm:$0xff] }
 0x15e   : > { %3833 = vst.msk [vmem:[#allocation3 + $0x10] sm:$0xff] %vm18984_vm6, %v3789_v12  ;;  %v3790_v2 = vadd.f32 %v12549_v13, %v3746_v18  ;;  %3225 = vst.msk [vmem:[#allocation3 + $0x48] sm:$0xff] %vm18984_vm6, %v3181_v4  ;;  %v3571_v21 = vpop.f32.mrb[51].mxu1  ;;  %12716 = vmatprep.mubr.msk.bf16.mxu0 %vm490_vm2, %v5089_v1  ;;  %v5619_v12 = vsel %vm18979_vm7, %v5616_v27, %v5618_v28  ;;  %v4947_v4 = vld [vmem:[#allocation2 + $0xd8] sm:$0x1]  ;;  %v3748_v13 = vld [vmem:[#allocation3 + $0x28] sm:$0xff] }
 0x15f   : > { %3831 = vst.msk [vmem:[#allocation3] sm:$0xff] %vm18984_vm6, %v3787_v30  ;;  %v3788_v53 = vadd.f32 %v3744_v16, %v3571_v21  ;;  %v5120_v18 = vrot.slane %v5118_v62, 1  ;;  %v6074_v10 = vshll.u32 %v6044_v20, 16  ;;  %v5116_v21 = vor.u32 %v5114_v26, %v5112_v29 }
 0x160   : > { %3834 = vst.msk [vmem:[#allocation3 + $0x18] sm:$0xff] %vm18984_vm6, %v3790_v2  ;;  %12751 = vmatmul.mubr.msk.bf16.gmra.mrb[156].mxu1 %vm490_vm2, %v5613_v60  ;;  %v12514_v57 = vpop.f32.mrb[52].mxu0  ;;  %v6071_v60 = vshrl.u32 %v6044_v20, 16  ;;  %v6079_v16 = vshrl.u32 %v6045_v31, 16  ;;  %v5622_v27 = vrot.slane %v14373_v41, 1 }
 0x161   : > { %3832 = vst.msk [vmem:[#allocation3 + $0x8] sm:$0xff] %vm18984_vm6, %v3788_v53  ;;  %v3186_v48 = vadd.f32 %v12514_v57, %v3142_v19  ;;  %v3001_v61 = vpop.f32.mrb[53].mxu0  ;;  %12754 = vmatprep.mubr.msk.bf16.mxu1 %vm490_vm2, %v5615_v3  ;;  %v6082_v3 = vshll.u32 %v6045_v31, 16  ;;  %v3146_v53 = vld [vmem:[#allocation3 + $0x90] sm:$0xff]  ;;  %v3144_v19 = vld [vmem:[#allocation3 + $0x80] sm:$0xff]  ;;  %v14476_v14 = vrot.slane %v6074_v10, 2 }
 0x162   : > { %v3184_v44 = vadd.f32 %v3140_v63, %v3001_v61  ;;  %v12515_v17 = vpop.f32.mrb[54].mxu0  ;;  %v5126_v61 = vshll.u32 %v4947_v4, 16  ;;  %v3753_v26 = vld [vmem:[#allocation3 + $0x50] sm:$0xff] }
 0x163   : > { %3230 = vst.msk [vmem:[#allocation3 + $0x70] sm:$0xff] %vm18984_vm6, %v3186_v48  ;;  %v12552_v24 = vpop.f32.mrb[52].mxu1  ;;  %v3187_v54 = vadd.f32 %v12515_v17, %v3143_v9  ;;  %v3004_v42 = vpop.f32.mrb[55].mxu0  ;;  %v5122_v48 = vshrl.u32 %v14438_v59, 16  ;;  %v14474_v17 = vrot.slane %v6071_v60, 1  ;;  %v6046_v9 = vld [vmem:[#allocation2 + $0x38] sm:$0xff] }
 0x164   : > { %v3793_v36 = vadd.f32 %v12552_v24, %v3749_v40  ;;  %3228 = vst.msk [vmem:[#allocation3 + $0x60] sm:$0xff] %vm18984_vm6, %v3184_v44  ;;  %v3584_v58 = vpop.f32.mrb[53].mxu1  ;;  %v3185_v15 = vadd.f32 %v3141_v50, %v3004_v42  ;;  %v5113_v44 = vsel %vm18980_vm5, %v5108_v37, %v5112_v29  ;;  %v3145_v40 = vld [vmem:[#allocation3 + $0x88] sm:$0xff]  ;;  %v6081_v42 = vrot.slane %v6079_v16, 1 }
 0x165   : > { %v3791_v1 = vadd.f32 %v3747_v49, %v3584_v58  ;;  %3231 = vst.msk [vmem:[#allocation3 + $0x78] sm:$0xff] %vm18984_vm6, %v3187_v54  ;;  %v12553_v32 = vpop.f32.mrb[54].mxu1  ;;  %12717 = vmatmul.mubr.msk.bf16.gmra.mrb[160].mxu0 %vm490_vm2, %v5097_v25  ;;  %v5121_v54 = vsel %vm18980_vm5, %v5116_v21, %v5120_v18  ;;  %v6084_v50 = vrot.slane %v6082_v3, 2  ;;  %v5621_v49 = vsel %vm18979_vm7, %v5618_v28, %v5620_v34  ;;  %v3752_v28 = vld [vmem:[#allocation3 + $0x48] sm:$0xff]  ;;  %v3148_v3 = vld [vmem:[#allocation3 + $0xa0] sm:$0xff] }
 0x166   : > { %3837 = vst.msk [vmem:[#allocation3 + $0x30] sm:$0xff] %vm18984_vm6, %v3793_v36  ;;  %v3794_v30 = vadd.f32 %v12553_v32, %v3750_v51  ;;  %3229 = vst.msk [vmem:[#allocation3 + $0x68] sm:$0xff] %vm18984_vm6, %v3185_v15  ;;  %v3587_v43 = vpop.f32.mrb[55].mxu1  ;;  %12720 = vmatprep.mubr.msk.bf16.mxu0 %vm490_vm2, %v5105_v52  ;;  %v3751_v36 = vld [vmem:[#allocation3 + $0x40] sm:$0xff]  ;;  %v5623_v32 = vsel %vm18979_vm7, %v5620_v34, %v5622_v27  ;;  %v5124_v51 = vor.u32 %v5122_v48, %v5120_v18 }
 0x167   : > { %3835 = vst.msk [vmem:[#allocation3 + $0x20] sm:$0xff] %vm18984_vm6, %v3791_v1  ;;  %v3792_v2 = vadd.f32 %v3748_v13, %v3587_v43  ;;  %v6047_v15 = vld [vmem:[#allocation2 + $0x40] sm:$0xff]  ;;  %v3754_v1 = vld [vmem:[#allocation3 + $0x58] sm:$0xff]  ;;  %v6077_v29 = vor.u32 %v14476_v14, %v14474_v17  ;;  %v6088_v4 = vshrl.u32 %v6046_v9, 16  ;;  %v14495_v13 = vor.u32 %v6084_v50, %v6081_v42  ;;  %v3149_v14 = vld [vmem:[#allocation3 + $0xa8] sm:$0xff] }
 0x168   : > { %3838 = vst.msk [vmem:[#allocation3 + $0x38] sm:$0xff] %vm18984_vm6, %v3794_v30  ;;  %12755 = vmatmul.mubr.msk.bf16.gmra.mrb[160].mxu1 %vm490_vm2, %v5617_v5  ;;  %v12518_v11 = vpop.f32.mrb[56].mxu0  ;;  %v6091_v30 = vshll.u32 %v6046_v9, 16  ;;  %v6097_v18 = vshrl.u32 %v6047_v15, 16  ;;  %v6100_v60 = vshll.u32 %v6047_v15, 16 }
 0x169   : > { %3836 = vst.msk [vmem:[#allocation3 + $0x28] sm:$0xff] %vm18984_vm6, %v3792_v2  ;;  %v3190_v35 = vadd.f32 %v12518_v11, %v3146_v53  ;;  %v3017_v57 = vpop.f32.mrb[57].mxu0  ;;  %12758 = vmatprep.mubr.msk.bf16.mxu1 %vm490_vm2, %v5619_v12  ;;  %v5128_v12 = vrot.slane %v5126_v61, 1  ;;  %v3150_v2 = vld [vmem:[#allocation3 + $0xb0] sm:$0xff]  ;;  %v5624_v53 = vrot.slane %v14401_v7, 1  ;;  %v6090_v48 = vrot.slane %v6088_v4, 1 }
 0x16a   : > { %v3188_v63 = vadd.f32 %v3144_v19, %v3017_v57  ;;  %v12519_v22 = vpop.f32.mrb[58].mxu0  ;;  %v3151_v57 = vld [vmem:[#allocation3 + $0xb8] sm:$0xff]  ;;  %v5626_v19 = vrot.slane %v14408_v56, 1  ;;  %v6093_v61 = vrot.slane %v6091_v30, 2  ;;  %v6086_v9 = vsel %vm18978_vm8, %v6077_v29, %v14495_v13  ;;  %v3152_v29 = vld [vmem:[#allocation3 + $0xc0] sm:$0xff] }
 0x16b   : > { %3234 = vst.msk [vmem:[#allocation3 + $0x90] sm:$0xff] %vm18984_vm6, %v3190_v35  ;;  %v12556_v25 = vpop.f32.mrb[56].mxu1  ;;  %v3191_v62 = vadd.f32 %v12519_v22, %v3147_v0  ;;  %v3020_v24 = vpop.f32.mrb[59].mxu0  ;;  %v5129_v11 = vsel %vm18980_vm5, %v5124_v51, %v5128_v12  ;;  %v3757_v0 = vld [vmem:[#allocation3 + $0x70] sm:$0xff]  ;;  %v6102_v7 = vrot.slane %v6100_v60, 2  ;;  %v5628_v4 = vrot.slane %v14435_v6, 1 }
 0x16c   : > { %v3797_v52 = vadd.f32 %v12556_v25, %v3753_v26  ;;  %3232 = vst.msk [vmem:[#allocation3 + $0x80] sm:$0xff] %vm18984_vm6, %v3188_v63  ;;  %v3600_v20 = vpop.f32.mrb[57].mxu1  ;;  %v3189_v58 = vadd.f32 %v3145_v40, %v3020_v24  ;;  %v6048_v63 = vld [vmem:[#allocation2 + $0x48] sm:$0xff]  ;;  %v6099_v25 = vrot.slane %v6097_v18, 1  ;;  %v3755_v24 = vld [vmem:[#allocation3 + $0x60] sm:$0xff] }
 0x16d   : > { %v3795_v5 = vadd.f32 %v3751_v36, %v3600_v20  ;;  %3235 = vst.msk [vmem:[#allocation3 + $0x98] sm:$0xff] %vm18984_vm6, %v3191_v62  ;;  %v12557_v31 = vpop.f32.mrb[58].mxu1  ;;  %12721 = vmatmul.mubr.msk.bf16.gmra.mrb[164].mxu0 %vm490_vm2, %v5113_v44  ;;  %v5625_v20 = vsel %vm18979_vm7, %v5622_v27, %v5624_v53  ;;  %v6106_v36 = vshrl.u32 %v6048_v63, 16 }
 0x16e   : > { %3841 = vst.msk [vmem:[#allocation3 + $0x50] sm:$0xff] %vm18984_vm6, %v3797_v52  ;;  %v3798_v37 = vadd.f32 %v12557_v31, %v3754_v1  ;;  %3233 = vst.msk [vmem:[#allocation3 + $0x88] sm:$0xff] %vm18984_vm6, %v3189_v58  ;;  %v3603_v8 = vpop.f32.mrb[59].mxu1  ;;  %12724 = vmatprep.mubr.msk.bf16.mxu0 %vm490_vm2, %v5121_v54  ;;  %v6049_v54 = vld [vmem:[#allocation2 + $0x50] sm:$0xff]  ;;  %v3758_v52 = vld [vmem:[#allocation3 + $0x78] sm:$0xff]  ;;  %v6109_v58 = vshll.u32 %v6048_v63, 16  ;;  %v5627_v31 = vsel %vm18979_vm7, %v5624_v53, %v5626_v19 }
 0x16f   : > { %3839 = vst.msk [vmem:[#allocation3 + $0x40] sm:$0xff] %vm18984_vm6, %v3795_v5  ;;  %v3796_v43 = vadd.f32 %v3752_v28, %v3603_v8  ;;  %v3756_v5 = vld [vmem:[#allocation3 + $0x68] sm:$0xff]  ;;  %v6094_v1 = vor.u32 %v6093_v61, %v6090_v48  ;;  %v14520_v27 = vor.u32 %v6102_v7, %v6099_v25  ;;  %v6118_v51 = vshll.u32 %v6049_v54, 16 }
 0x170   : > { %3842 = vst.msk [vmem:[#allocation3 + $0x58] sm:$0xff] %vm18984_vm6, %v3798_v37  ;;  %12759 = vmatmul.mubr.msk.bf16.gmra.mrb[164].mxu1 %vm490_vm2, %v5621_v49  ;;  %v12522_v10 = vpop.f32.mrb[60].mxu0  ;;  %v3154_v37 = vld [vmem:[#allocation3 + $0xd0] sm:$0xff]  ;;  %v6108_v30 = vrot.slane %v6106_v36, 1 }
 0x171   : > { %3840 = vst.msk [vmem:[#allocation3 + $0x48] sm:$0xff] %vm18984_vm6, %v3796_v43  ;;  %v3194_v21 = vadd.f32 %v12522_v10, %v3150_v2  ;;  %v3033_v16 = vpop.f32.mrb[61].mxu0  ;;  %12762 = vmatprep.mubr.msk.bf16.mxu1 %vm490_vm2, %v5623_v32  ;;  %v6115_v32 = vshrl.u32 %v6049_v54, 16  ;;  %v6111_v43 = vrot.slane %v6109_v58, 2  ;;  %v3155_v10 = vld [vmem:[#allocation3 + $0xd8] sm:$0xff]  ;;  %v6095_v2 = vsel %vm18978_vm8, %v14495_v13, %v6094_v1 }
 0x172   : > { %v3192_v34 = vadd.f32 %v3148_v3, %v3033_v16  ;;  %v12523_v35 = vpop.f32.mrb[62].mxu0  ;;  %v6050_v16 = vld [vmem:[#allocation2 + $0x58] sm:$0xff]  ;;  %v6104_v6 = vsel %vm18978_vm8, %v6094_v1, %v14520_v27  ;;  %v6120_v48 = vrot.slane %v6118_v51, 2 }
 0x173   : > { %3238 = vst.msk [vmem:[#allocation3 + $0xb0] sm:$0xff] %vm18984_vm6, %v3194_v21  ;;  %v12560_v22 = vpop.f32.mrb[60].mxu1  ;;  %v3195_v44 = vadd.f32 %v12523_v35, %v3151_v57  ;;  %v3036_v17 = vpop.f32.mrb[63].mxu0  ;;  %v5630_v21 = vrot.slane %v14438_v59, 1  ;;  %v3153_v35 = vld [vmem:[#allocation3 + $0xc8] sm:$0xff]  ;;  %v6117_v57 = vrot.slane %v6115_v32, 1 }
 0x174   : > { %v3801_v26 = vadd.f32 %v12560_v22, %v3757_v0  ;;  %3236 = vst.msk [vmem:[#allocation3 + $0xa0] sm:$0xff] %vm18984_vm6, %v3192_v34  ;;  %v3616_v62 = vpop.f32.mrb[61].mxu1  ;;  %v3193_v40 = vadd.f32 %v3149_v14, %v3036_v17  ;;  %v3759_v13 = vld [vmem:[#allocation3 + $0x80] sm:$0xff]  ;;  %v3762_v17 = vld [vmem:[#allocation3 + $0x98] sm:$0xff]  ;;  %v5629_v14 = vsel %vm18979_vm7, %v5626_v19, %v5628_v4  ;;  %v6124_v56 = vshrl.u32 %v6050_v16, 16 }
 0x175   : > { %v3799_v42 = vadd.f32 %v3755_v24, %v3616_v62  ;;  %3239 = vst.msk [vmem:[#allocation3 + $0xb8] sm:$0xff] %vm18984_vm6, %v3195_v44  ;;  %v12561_v50 = vpop.f32.mrb[62].mxu1  ;;  %12725 = vmatmul.mubr.msk.bf16.gmra.mrb[168].mxu0 %vm490_vm2, %v5129_v11  ;;  %v3761_v11 = vld [vmem:[#allocation3 + $0x90] sm:$0xff]  ;;  %v5631_v62 = vsel %vm18979_vm7, %v5628_v4, %v5630_v21  ;;  %v5562_v24 = vld [vmem:[#allocation2 + $0xd8] sm:$0x1]  ;;  %v14546_v54 = vor.u32 %v6120_v48, %v6117_v57  ;;  %v6145_v57 = vshll.u32 %v14337_v23, 16 }
 0x176   : > { %3845 = vst.msk [vmem:[#allocation3 + $0x70] sm:$0xff] %vm18984_vm6, %v3801_v26  ;;  %v3802_v49 = vadd.f32 %v12561_v50, %v3758_v52  ;;  %3237 = vst.msk [vmem:[#allocation3 + $0xa8] sm:$0xff] %vm18984_vm6, %v3193_v40  ;;  %v3619_v15 = vpop.f32.mrb[63].mxu1  ;;  %12776 = vmatprep.mubr.msk.bf16.mxu0 %vm490_vm2, %v6086_v9  ;;  %v6112_v9 = vor.u32 %v6111_v43, %v6108_v30  ;;  %v3760_v26 = vld [vmem:[#allocation3 + $0x88] sm:$0xff]  ;;  %v6127_v40 = vshll.u32 %v6050_v16, 16  ;;  %v6136_v50 = vshll.u32 %v14318_v55, 16 }
 0x177   : > { %3843 = vst.msk [vmem:[#allocation3 + $0x60] sm:$0xff] %vm18984_vm6, %v3799_v42  ;;  %v3800_v41 = vadd.f32 %v3756_v5, %v3619_v15  ;;  %v6133_v42 = vshrl.u32 %v14318_v55, 16  ;;  %v5632_v15 = vrot.slane %v5562_v24, 1  ;;  %v3159_v1 = vld [vmem:[#allocation3 + $0xf8] sm:$0xff]  ;;  %v6151_v48 = vshrl.u32 %v14340_v45, 16 }
 0x178   : > { %3846 = vst.msk [vmem:[#allocation3 + $0x78] sm:$0xff] %vm18984_vm6, %v3802_v49  ;;  %12763 = vmatmul.mubr.msk.bf16.gmra.mrb[168].mxu1 %vm490_vm2, %v5625_v20  ;;  %v12526_v12 = vpop.f32.mrb[64].mxu0  ;;  %v3158_v20 = vld [vmem:[#allocation3 + $0xf0] sm:$0xff]  ;;  %v3156_v49 = vld [vmem:[#allocation3 + $0xe0] sm:$0xff]  ;;  %v6113_v55 = vsel %vm18978_vm8, %v14520_v27, %v6112_v9  ;;  %v6129_v32 = vrot.slane %v6127_v40, 2  ;;  %v6138_v30 = vrot.slane %v6136_v50, 2 }
 0x179   : > { %3844 = vst.msk [vmem:[#allocation3 + $0x68] sm:$0xff] %vm18984_vm6, %v3800_v41  ;;  %v3198_v8 = vadd.f32 %v12526_v12, %v3154_v37  ;;  %v3049_v28 = vpop.f32.mrb[65].mxu0  ;;  %12766 = vmatprep.mubr.msk.bf16.mxu1 %vm490_vm2, %v5627_v31  ;;  %v6126_v41 = vrot.slane %v6124_v56, 1  ;;  %v6135_v4 = vrot.slane %v6133_v42, 1  ;;  %v3161_v56 = vld [vmem:[#allocation3 + $0x108] sm:$0xff] }
 0x17a   : > { %v3196_v18 = vadd.f32 %v3152_v29, %v3049_v28  ;;  %v12527_v60 = vpop.f32.mrb[66].mxu0  ;;  %v3765_v12 = vld [vmem:[#allocation3 + $0xb0] sm:$0xff]  ;;  %v3157_v28 = vld [vmem:[#allocation3 + $0xe8] sm:$0xff]  ;;  %v6122_v29 = vsel %vm18978_vm8, %v6112_v9, %v14546_v54 }
 0x17b   : > { %3242 = vst.msk [vmem:[#allocation3 + $0xd0] sm:$0xff] %vm18984_vm6, %v3198_v8  ;;  %v12564_v3 = vpop.f32.mrb[64].mxu1  ;;  %v3199_v53 = vadd.f32 %v12527_v60, %v3155_v10  ;;  %v3052_v34 = vpop.f32.mrb[67].mxu0  ;;  %v3763_v60 = vld [vmem:[#allocation3 + $0xa0] sm:$0xff] }
 0x17c   : > { %v3805_v61 = vadd.f32 %v12564_v3, %v3761_v11  ;;  %3240 = vst.msk [vmem:[#allocation3 + $0xc0] sm:$0xff] %vm18984_vm6, %v3196_v18  ;;  %v3632_v63 = vpop.f32.mrb[65].mxu1  ;;  %v3197_v22 = vadd.f32 %v3153_v35, %v3052_v34  ;;  %v3766_v16 = vld [vmem:[#allocation3 + $0xb8] sm:$0xff]  ;;  %v5633_v3 = vsel %vm18979_vm7, %v5630_v21, %v5632_v15  ;;  %v6130_v35 = vor.u32 %v6129_v32, %v6126_v41 }
 0x17d   : > { %v3803_v0 = vadd.f32 %v3759_v13, %v3632_v63  ;;  %3243 = vst.msk [vmem:[#allocation3 + $0xd8] sm:$0xff] %vm18984_vm6, %v3199_v53  ;;  %v12565_v44 = vpop.f32.mrb[66].mxu1  ;;  %12777 = vmatmul.mubr.msk.bf16.vlgmr.msra.gmra.mrb[172].mxu0 %vm490_vm2, %v6095_v2  ;;  %v3764_v34 = vld [vmem:[#allocation3 + $0xa8] sm:$0xff]  ;;  %v6139_v21 = vor.u32 %v6138_v30, %v6135_v4  ;;  %v3162_v13 = vld [vmem:[#allocation3 + $0x110] sm:$0xff]  ;;  %v6163_v41 = vshll.u32 %v14364_v47, 16  ;;  %v3164_v30 = vld [vmem:[#allocation3 + $0x120] sm:$0xff] }
 0x17e   : > { %3849 = vst.msk [vmem:[#allocation3 + $0x90] sm:$0xff] %vm18984_vm6, %v3805_v61  ;;  %v3806_v25 = vadd.f32 %v12565_v44, %v3762_v17  ;;  %3241 = vst.msk [vmem:[#allocation3 + $0xc8] sm:$0xff] %vm18984_vm6, %v3197_v22  ;;  %v3635_v7 = vpop.f32.mrb[67].mxu1  ;;  %12780 = vmatprep.mubr.msk.bf16.mxu0 %vm490_vm2, %v6104_v6  ;;  %v6142_v6 = vshrl.u32 %v14337_v23, 16  ;;  %v6154_v61 = vshll.u32 %v14340_v45, 16  ;;  %v3160_v44 = vld [vmem:[#allocation3 + $0x100] sm:$0xff]  ;;  %v6131_v9 = vsel %vm18978_vm8, %v14546_v54, %v6130_v35 }
 0x17f   : > { %3847 = vst.msk [vmem:[#allocation3 + $0x80] sm:$0xff] %vm18984_vm6, %v3803_v0  ;;  %v3804_v19 = vadd.f32 %v3760_v26, %v3635_v7  ;;  %v6147_v7 = vrot.slane %v6145_v57, 2  ;;  %v6140_v40 = vsel %vm18978_vm8, %v6130_v35, %v6139_v21 }
 0x180   : > { %3850 = vst.msk [vmem:[#allocation3 + $0x98] sm:$0xff] %vm18984_vm6, %v3806_v25  ;;  %12767 = vmatmul.mubr.msk.bf16.gmra.mrb[172].mxu1 %vm490_vm2, %v5629_v14  ;;  %v12530_v52 = vpop.f32.mrb[68].mxu0  ;;  %v3163_v14 = vld [vmem:[#allocation3 + $0x118] sm:$0xff]  ;;  %v6144_v25 = vrot.slane %v6142_v6, 1  ;;  %v6156_v42 = vrot.slane %v6154_v61, 2 }
 0x181   : > { %3848 = vst.msk [vmem:[#allocation3 + $0x88] sm:$0xff] %vm18984_vm6, %v3804_v19  ;;  %v3202_v36 = vadd.f32 %v12530_v52, %v3158_v20  ;;  %v3065_v58 = vpop.f32.mrb[69].mxu0  ;;  %12770 = vmatprep.mubr.msk.bf16.mxu1 %vm490_vm2, %v5631_v62  ;;  %v6153_v19 = vrot.slane %v6151_v48, 1 }
 0x182   : > { %v3200_v5 = vadd.f32 %v3156_v49, %v3065_v58  ;;  %v12531_v31 = vpop.f32.mrb[70].mxu0  ;;  %v3769_v26 = vld [vmem:[#allocation3 + $0xd0] sm:$0xff] }
 0x183   : > { %3246 = vst.msk [vmem:[#allocation3 + $0xf0] sm:$0xff] %vm18984_vm6, %v3202_v36  ;;  %v12568_v51 = vpop.f32.mrb[68].mxu1  ;;  %v3203_v37 = vadd.f32 %v12531_v31, %v3159_v1  ;;  %v3068_v8 = vpop.f32.mrb[71].mxu0  ;;  %v3767_v20 = vld [vmem:[#allocation3 + $0xc0] sm:$0xff]  ;;  %v6148_v1 = vor.u32 %v6147_v7, %v6144_v25  ;;  %v6187_v25 = vshrl.u32 %v14404_v46, 16  ;;  %v6190_v7 = vshll.u32 %v14404_v46, 16 }
 0x184   : > { %v3809_v43 = vadd.f32 %v12568_v51, %v3765_v12  ;;  %3244 = vst.msk [vmem:[#allocation3 + $0xe0] sm:$0xff] %vm18984_vm6, %v3200_v5  ;;  %v3648_v18 = vpop.f32.mrb[69].mxu1  ;;  %v3201_v27 = vadd.f32 %v3157_v28, %v3068_v8  ;;  %v3770_v49 = vld [vmem:[#allocation3 + $0xd8] sm:$0xff]  ;;  %v6157_v51 = vor.u32 %v6156_v42, %v6153_v19  ;;  %v6169_v12 = vshrl.u32 %v14369_v33, 16  ;;  %v3166_v28 = vld [vmem:[#allocation3 + $0x130] sm:$0xff] }
 0x185   : > { %v3807_v10 = vadd.f32 %v3763_v60, %v3648_v18  ;;  %3247 = vst.msk [vmem:[#allocation3 + $0xf8] sm:$0xff] %vm18984_vm6, %v3203_v37  ;;  %v12569_v2 = vpop.f32.mrb[70].mxu1  ;;  %12781 = vmatmul.mubr.msk.bf16.gmra.mrb[176].mxu0 %vm490_vm2, %v6113_v55  ;;  %v3768_v31 = vld [vmem:[#allocation3 + $0xc8] sm:$0xff]  ;;  %v6160_v55 = vshrl.u32 %v14364_v47, 16  ;;  %v6172_v37 = vshll.u32 %v14369_v33, 16  ;;  %v3167_v47 = vld [vmem:[#allocation3 + $0x138] sm:$0xff]  ;;  %v6149_v60 = vsel %vm18978_vm8, %v6139_v21, %v6148_v1 }
 0x186   : > { %3853 = vst.msk [vmem:[#allocation3 + $0xb0] sm:$0xff] %vm18984_vm6, %v3809_v43  ;;  %v3810_v11 = vadd.f32 %v12569_v2, %v3766_v16  ;;  %3245 = vst.msk [vmem:[#allocation3 + $0xe8] sm:$0xff] %vm18984_vm6, %v3201_v27  ;;  %v3651_v53 = vpop.f32.mrb[71].mxu1  ;;  %12784 = vmatprep.mubr.msk.bf16.mxu0 %vm490_vm2, %v6122_v29 }
 0x187   : > { %3851 = vst.msk [vmem:[#allocation3 + $0xa0] sm:$0xff] %vm18984_vm6, %v3807_v10  ;;  %v3808_v59 = vadd.f32 %v3764_v34, %v3651_v53  ;;  %v6162_v27 = vrot.slane %v6160_v55, 1  ;;  %v6165_v10 = vrot.slane %v6163_v41, 2  ;;  %v6158_v53 = vsel %vm18978_vm8, %v6148_v1, %v6157_v51 }
 0x188   : > { %3854 = vst.msk [vmem:[#allocation3 + $0xb8] sm:$0xff] %vm18984_vm6, %v3810_v11  ;;  %12771 = vmatmul.mubr.msk.bf16.gmra.mrb[176].mxu1 %vm490_vm2, %v5633_v3  ;;  %v12534_v63 = vpop.f32.mrb[72].mxu0  ;;  %v3165_v11 = vld [vmem:[#allocation3 + $0x128] sm:$0xff]  ;;  %v6171_v34 = vrot.slane %v6169_v12, 1  ;;  %v6174_v35 = vrot.slane %v6172_v37, 2 }
 0x189   : > { %3852 = vst.msk [vmem:[#allocation3 + $0xa8] sm:$0xff] %vm18984_vm6, %v3808_v59  ;;  %v3206_v22 = vadd.f32 %v12534_v63, %v3162_v13  ;;  %v3081_v0 = vpop.f32.mrb[73].mxu0 }
 0x18a   : > { %v3204_v23 = vadd.f32 %v3160_v44, %v3081_v0  ;;  %v12535_v17 = vpop.f32.mrb[74].mxu0  ;;  %v3773_v33 = vld [vmem:[#allocation3 + $0xf0] sm:$0xff]  ;;  %v6166_v44 = vor.u32 %v6165_v10, %v6162_v27 }
 0x18b   : > { %3250 = vst.msk [vmem:[#allocation3 + $0x110] sm:$0xff] %vm18984_vm6, %v3206_v22  ;;  %v12572_v45 = vpop.f32.mrb[72].mxu1  ;;  %v3207_v62 = vadd.f32 %v12535_v17, %v3163_v14  ;;  %v3084_v24 = vpop.f32.mrb[75].mxu0  ;;  %v3771_v59 = vld [vmem:[#allocation3 + $0xe0] sm:$0xff]  ;;  %v6181_v17 = vshll.u32 %v14399_v38, 16 }
 0x18c   : > { %v3813_v50 = vadd.f32 %v12572_v45, %v3769_v26  ;;  %3248 = vst.msk [vmem:[#allocation3 + $0x100] sm:$0xff] %vm18984_vm6, %v3204_v23  ;;  %v3664_v52 = vpop.f32.mrb[73].mxu1  ;;  %v3205_v36 = vadd.f32 %v3161_v56, %v3084_v24  ;;  %v3774_v63 = vld [vmem:[#allocation3 + $0xf8] sm:$0xff]  ;;  %v6178_v23 = vshrl.u32 %v14399_v38, 16  ;;  %v3170_v26 = vld [vmem:[#allocation3 + $0x150] sm:$0xff]  ;;  %v3168_v56 = vld [vmem:[#allocation3 + $0x140] sm:$0xff]  ;;  %v6167_v42 = vsel %vm18978_vm8, %v6157_v51, %v6166_v44 }
 0x18d   : > { %v3811_v54 = vadd.f32 %v3767_v20, %v3664_v52  ;;  %3251 = vst.msk [vmem:[#allocation3 + $0x118] sm:$0xff] %vm18984_vm6, %v3207_v62  ;;  %v12573_v58 = vpop.f32.mrb[74].mxu1  ;;  %12785 = vmatmul.mubr.msk.bf16.gmra.mrb[180].mxu0 %vm490_vm2, %v6131_v9  ;;  %v3772_v0 = vld [vmem:[#allocation3 + $0xe8] sm:$0xff]  ;;  %v6175_v9 = vor.u32 %v6174_v35, %v6171_v34  ;;  %v3171_v38 = vld [vmem:[#allocation3 + $0x158] sm:$0xff]  ;;  %v6183_v52 = vrot.slane %v6181_v17, 2 }
 0x18e   : > { %3857 = vst.msk [vmem:[#allocation3 + $0xd0] sm:$0xff] %vm18984_vm6, %v3813_v50  ;;  %v3814_v15 = vadd.f32 %v12573_v58, %v3770_v49  ;;  %3249 = vst.msk [vmem:[#allocation3 + $0x108] sm:$0xff] %vm18984_vm6, %v3205_v36  ;;  %v3667_v5 = vpop.f32.mrb[75].mxu1  ;;  %12788 = vmatprep.mubr.msk.bf16.mxu0 %vm490_vm2, %v6140_v40  ;;  %v6180_v50 = vrot.slane %v6178_v23, 1  ;;  %v3169_v58 = vld [vmem:[#allocation3 + $0x148] sm:$0xff]  ;;  %v4180_v34 = vld [vmem:[#allocation3 + $0x18] sm:$0xff] }
 0x18f   : > { %3855 = vst.msk [vmem:[#allocation3 + $0xc0] sm:$0xff] %vm18984_vm6, %v3811_v54  ;;  %v3812_v32 = vadd.f32 %v3768_v31, %v3667_v5  ;;  %v6176_v49 = vsel %vm18978_vm8, %v6166_v44, %v6175_v9  ;;  %v6192_v5 = vrot.slane %v6190_v7, 2 }
 0x190   : > { %3858 = vst.msk [vmem:[#allocation3 + $0xd8] sm:$0xff] %vm18984_vm6, %v3814_v15  ;;  %v12538_v8 = vpop.f32.mrb[76].mxu0  ;;  %v6189_v15 = vrot.slane %v6187_v25, 1 }
 0x191   : > { %3856 = vst.msk [vmem:[#allocation3 + $0xc8] sm:$0xff] %vm18984_vm6, %v3812_v32  ;;  %v3210_v29 = vadd.f32 %v12538_v8, %v3166_v28  ;;  %v3097_v4 = vpop.f32.mrb[77].mxu0  ;;  %v6059_v32 = vld [vmem:[#allocation2 + $0xa0] sm:$0xff] }
 0x192   : > { %v3208_v43 = vadd.f32 %v3164_v30, %v3097_v4  ;;  %v12539_v18 = vpop.f32.mrb[78].mxu0  ;;  %v3777_v46 = vld [vmem:[#allocation3 + $0x110] sm:$0xff]  ;;  %v6184_v4 = vor.u32 %v6183_v52, %v6180_v50  ;;  %v6196_v30 = vshrl.u32 %v14427_v39, 16  ;;  %v6208_v27 = vshll.u32 %v6059_v32, 16 }
 0x193   : > { %3254 = vst.msk [vmem:[#allocation3 + $0x130] sm:$0xff] %vm18984_vm6, %v3210_v29  ;;  %v12576_v2 = vpop.f32.mrb[76].mxu1  ;;  %v3211_v16 = vadd.f32 %v12539_v18, %v3167_v47  ;;  %v3100_v3 = vpop.f32.mrb[79].mxu0  ;;  %v3775_v55 = vld [vmem:[#allocation3 + $0x100] sm:$0xff]  ;;  %v14621_v47 = vor.u32 %v6192_v5, %v6189_v15 }
 0x194   : > { %v3817_v6 = vadd.f32 %v12576_v2, %v3773_v33  ;;  %3252 = vst.msk [vmem:[#allocation3 + $0x120] sm:$0xff] %vm18984_vm6, %v3208_v43  ;;  %v3680_v57 = vpop.f32.mrb[77].mxu1  ;;  %v3209_v48 = vadd.f32 %v3165_v11, %v3100_v3  ;;  %v3778_v37 = vld [vmem:[#allocation3 + $0x118] sm:$0xff]  ;;  %v6199_v43 = vshll.u32 %v14427_v39, 16  ;;  %v4179_v2 = vld [vmem:[#allocation3 + $0x10] sm:$0xff]  ;;  %v4177_v3 = vld [vmem:[#allocation3] sm:$0xff]  ;;  %v6185_v39 = vsel %vm18978_vm8, %v6175_v9, %v6184_v4 }
 0x195   : > { %v3815_v21 = vadd.f32 %v3771_v59, %v3680_v57  ;;  %3255 = vst.msk [vmem:[#allocation3 + $0x138] sm:$0xff] %vm18984_vm6, %v3211_v16  ;;  %v12577_v61 = vpop.f32.mrb[78].mxu1  ;;  %12789 = vmatmul.mubr.msk.bf16.gmra.mrb[184].mxu0 %vm490_vm2, %v6149_v60  ;;  %v3776_v29 = vld [vmem:[#allocation3 + $0x108] sm:$0xff]  ;;  %v6205_v60 = vshrl.u32 %v6059_v32, 16  ;;  %v6198_v35 = vrot.slane %v6196_v30, 1  ;;  %v6061_v9 = vld [vmem:[#allocation2 + $0xb0] sm:$0xff] }
 0x196   : > { %3861 = vst.msk [vmem:[#allocation3 + $0xf0] sm:$0xff] %vm18984_vm6, %v3817_v6  ;;  %v3818_v13 = vadd.f32 %v12577_v61, %v3774_v63  ;;  %3253 = vst.msk [vmem:[#allocation3 + $0x128] sm:$0xff] %vm18984_vm6, %v3209_v48  ;;  %v3683_v22 = vpop.f32.mrb[79].mxu1  ;;  %12792 = vmatprep.mubr.msk.bf16.mxu0 %vm490_vm2, %v6158_v53  ;;  %v6201_v6 = vrot.slane %v6199_v43, 2  ;;  %v6060_v57 = vld [vmem:[#allocation2 + $0xa8] sm:$0xff]  ;;  %v6223_v50 = vshrl.u32 %v6061_v9, 16 }
 0x197   : > { %3859 = vst.msk [vmem:[#allocation3 + $0xe0] sm:$0xff] %vm18984_vm6, %v3815_v21  ;;  %v3816_v14 = vadd.f32 %v3772_v0, %v3683_v22  ;;  %v4178_v63 = vld [vmem:[#allocation3 + $0x8] sm:$0xff]  ;;  %v6207_v22 = vrot.slane %v6205_v60, 1  ;;  %v6210_v0 = vrot.slane %v6208_v27, 2  ;;  %v6226_v52 = vshll.u32 %v6061_v9, 16  ;;  %v6062_v32 = vld [vmem:[#allocation2 + $0xb8] sm:$0xff] }
 0x198   : > { %3862 = vst.msk [vmem:[#allocation3 + $0xf8] sm:$0xff] %vm18984_vm6, %v3818_v13  ;;  %v12542_v45 = vpop.f32.mrb[80].mxu0  ;;  %v6194_v13 = vsel %vm18978_vm8, %v6184_v4, %v14621_v47  ;;  %v6225_v4 = vrot.slane %v6223_v50, 1  ;;  %v6063_v27 = vld [vmem:[#allocation2 + $0xc0] sm:$0xff]  ;;  %v6064_v9 = vld [vmem:[#allocation2 + $0xc8] sm:$0xff] }
 0x199   : > { %3860 = vst.msk [vmem:[#allocation3 + $0xe8] sm:$0xff] %vm18984_vm6, %v3816_v14  ;;  %v3214_v62 = vadd.f32 %v12542_v45, %v3170_v26  ;;  %v3113_v24 = vpop.f32.mrb[81].mxu0  ;;  %v6228_v30 = vrot.slane %v6226_v52, 2  ;;  %v6065_v52 = vld [vmem:[#allocation2 + $0xd0] sm:$0xff] }
 0x19a   : > { %v3212_v40 = vadd.f32 %v3168_v56, %v3113_v24  ;;  %v12543_v19 = vpop.f32.mrb[82].mxu0  ;;  %v3781_v48 = vld [vmem:[#allocation3 + $0x130] sm:$0xff]  ;;  %v6202_v56 = vor.u32 %v6201_v6, %v6198_v35 }
 0x19b   : > { %3258 = vst.msk [vmem:[#allocation3 + $0x150] sm:$0xff] %vm18984_vm6, %v3214_v62  ;;  %v12580_v20 = vpop.f32.mrb[80].mxu1  ;;  %v3215_v36 = vadd.f32 %v12543_v19, %v3171_v38  ;;  %v3116_v54 = vpop.f32.mrb[83].mxu0  ;;  %v3779_v17 = vld [vmem:[#allocation3 + $0x120] sm:$0xff]  ;;  %v6217_v19 = vshll.u32 %v6060_v57, 16  ;;  %v6229_v6 = vor.u32 %v6228_v30, %v6225_v4  ;;  %v4192_v30 = vld [vmem:[#allocation3 + $0x78] sm:$0xff] }
 0x19c   : > { %v3821_v31 = vadd.f32 %v12580_v20, %v3777_v46  ;;  %3256 = vst.msk [vmem:[#allocation3 + $0x140] sm:$0xff] %vm18984_vm6, %v3212_v40  ;;  %v3696_v1 = vpop.f32.mrb[81].mxu1  ;;  %v3213_v41 = vadd.f32 %v3169_v58, %v3116_v54  ;;  %v3782_v45 = vld [vmem:[#allocation3 + $0x138] sm:$0xff]  ;;  %v6214_v40 = vshrl.u32 %v6060_v57, 16  ;;  %v4183_v46 = vld [vmem:[#allocation3 + $0x30] sm:$0xff]  ;;  %v4181_v58 = vld [vmem:[#allocation3 + $0x20] sm:$0xff] }
 0x19d   : > { %v3819_v51 = vadd.f32 %v3775_v55, %v3696_v1  ;;  %3259 = vst.msk [vmem:[#allocation3 + $0x158] sm:$0xff] %vm18984_vm6, %v3215_v36  ;;  %v12581_v12 = vpop.f32.mrb[82].mxu1  ;;  %12793 = vmatmul.mubr.msk.bf16.gmra.mrb[188].mxu0 %vm490_vm2, %v6167_v42  ;;  %v3780_v24 = vld [vmem:[#allocation3 + $0x128] sm:$0xff]  ;;  %v14636_v42 = vor.u32 %v6210_v0, %v6207_v22  ;;  %v6203_v1 = vsel %vm18978_vm8, %v14621_v47, %v6202_v56  ;;  %v6241_v57 = vshrl.u32 %v6063_v27, 16 }
 0x19e   : > { %3865 = vst.msk [vmem:[#allocation3 + $0x110] sm:$0xff] %vm18984_vm6, %v3821_v31  ;;  %v3822_v8 = vadd.f32 %v12581_v12, %v3778_v37  ;;  %3257 = vst.msk [vmem:[#allocation3 + $0x148] sm:$0xff] %vm18984_vm6, %v3213_v41  ;;  %v3699_v28 = vpop.f32.mrb[83].mxu1  ;;  %12796 = vmatprep.mubr.msk.bf16.mxu0 %vm490_vm2, %v6176_v49  ;;  %v13220_v49 = vld [vmem:[%s18948_s2] sm:$0xff]   ;;  %v4184_v31 = vld [vmem:[#allocation3 + $0x38] sm:$0xff]  ;;  %v6216_v55 = vrot.slane %v6214_v40, 1 }
 0x19f   : > { %3863 = vst.msk [vmem:[#allocation3 + $0x100] sm:$0xff] %vm18984_vm6, %v3819_v51  ;;  %v3820_v18 = vadd.f32 %v3776_v29, %v3699_v28  ;;  %v6219_v41 = vrot.slane %v6217_v19, 2  ;;  %v4182_v28 = vld [vmem:[#allocation3 + $0x28] sm:$0xff]  ;;  %v6212_v29 = vsel %vm18978_vm8, %v6202_v56, %v14636_v42  ;;  %12820 = vmatprep.subr.bf16.mxu1 %v13220_v49  ;;  %v6243_v56 = vrot.slane %v6241_v57, 1 }
 0x1a0   : > { %3866 = vst.msk [vmem:[#allocation3 + $0x118] sm:$0xff] %vm18984_vm6, %v3822_v8  ;;  %v12594_v10 = vpop.f32.mrb[84].mxu0  ;;  %12821 = vmatpush3.bf16.msra.mxu1 %v13220_v49 }
 0x1a1   : > { %3864 = vst.msk [vmem:[#allocation3 + $0x108] sm:$0xff] %vm18984_vm6, %v3820_v18  ;;  %v4223_v33 = vadd.f32 %v12594_v10, %v4179_v2  ;;  %v4002_v16 = vpop.f32.mrb[85].mxu0 }
 0x1a2   : > { %v4221_v11 = vadd.f32 %v4177_v3, %v4002_v16  ;;  %v12595_v53 = vpop.f32.mrb[86].mxu0  ;;  %v3785_v12 = vld [vmem:[#allocation3 + $0x150] sm:$0xff] }
 0x1a3   : > { %v12584_v59 = vpop.f32.mrb[84].mxu1  ;;  %4267 = vst.msk [vmem:[#allocation3 + $0x10] sm:$0xff] %vm18984_vm6, %v4223_v33  ;;  %v4224_v21 = vadd.f32 %v12595_v53, %v4180_v34  ;;  %v4005_v61 = vpop.f32.mrb[87].mxu0  ;;  %v3783_v60 = vld [vmem:[#allocation3 + $0x140] sm:$0xff]  ;;  %v6220_v53 = vor.u32 %v6219_v41, %v6216_v55  ;;  %v6232_v34 = vshrl.u32 %v6062_v32, 16  ;;  %v6259_v41 = vshrl.u32 %v6065_v52, 16 }
 0x1a4   : > { %v3825_v44 = vadd.f32 %v12584_v59, %v3781_v48  ;;  %v3712_v23 = vpop.f32.mrb[85].mxu1  ;;  %4265 = vst.msk [vmem:[#allocation3] sm:$0xff] %vm18984_vm6, %v4221_v11  ;;  %v4222_v14 = vadd.f32 %v4178_v63, %v4005_v61  ;;  %v3786_v33 = vld [vmem:[#allocation3 + $0x158] sm:$0xff]  ;;  %v6244_v59 = vshll.u32 %v6063_v27, 16 }
 0x1a5   : > { %v3823_v25 = vadd.f32 %v3779_v17, %v3712_v23  ;;  %v12585_v7 = vpop.f32.mrb[86].mxu1  ;;  %4268 = vst.msk [vmem:[#allocation3 + $0x18] sm:$0xff] %vm18984_vm6, %v4224_v21  ;;  %12797 = vmatmul.mubr.msk.bf16.gmra.mrb[192].mxu0 %vm490_vm2, %v6185_v39  ;;  %v3784_v11 = vld [vmem:[#allocation3 + $0x148] sm:$0xff]  ;;  %v6235_v39 = vshll.u32 %v6062_v32, 16  ;;  %v4187_v21 = vld [vmem:[#allocation3 + $0x50] sm:$0xff]  ;;  %v6221_v23 = vsel %vm18978_vm8, %v14636_v42, %v6220_v53  ;;  %v6234_v17 = vrot.slane %v6232_v34, 1 }
 0x1a6   : > { %3869 = vst.msk [vmem:[#allocation3 + $0x130] sm:$0xff] %vm18984_vm6, %v3825_v44  ;;  %v3826_v26 = vadd.f32 %v12585_v7, %v3782_v45  ;;  %v3715_v62 = vpop.f32.mrb[87].mxu1  ;;  %4266 = vst.msk [vmem:[#allocation3 + $0x8] sm:$0xff] %vm18984_vm6, %v4222_v14  ;;  %12800 = vmatprep.mubr.msk.bf16.mxu0 %vm490_vm2, %v6194_v13  ;;  %v4185_v13 = vld [vmem:[#allocation3 + $0x40] sm:$0xff]  ;;  %v4188_v44 = vld [vmem:[#allocation3 + $0x58] sm:$0xff]  ;;  %v6246_v40 = vrot.slane %v6244_v59, 2 }
 0x1a7   : > { %3867 = vst.msk [vmem:[#allocation3 + $0x120] sm:$0xff] %vm18984_vm6, %v3823_v25  ;;  %v3824_v38 = vadd.f32 %v3780_v24, %v3715_v62  ;;  %v6237_v14 = vrot.slane %v6235_v39, 2  ;;  %v4186_v62 = vld [vmem:[#allocation3 + $0x48] sm:$0xff]  ;;  %v6230_v24 = vsel %vm18978_vm8, %v6220_v53, %v6229_v6  ;;  %v6262_v32 = vshll.u32 %v6065_v52, 16 }
 0x1a8   : > { %3870 = vst.msk [vmem:[#allocation3 + $0x138] sm:$0xff] %vm18984_vm6, %v3826_v26  ;;  %v12598_v20 = vpop.f32.mrb[88].mxu0  ;;  %v6247_v55 = vor.u32 %v6246_v40, %v6243_v56  ;;  %v4196_v40 = vld [vmem:[#allocation3 + $0x98] sm:$0xff] }
 0x1a9   : > { %3868 = vst.msk [vmem:[#allocation3 + $0x128] sm:$0xff] %vm18984_vm6, %v3824_v38  ;;  %v4227_v36 = vadd.f32 %v12598_v20, %v4183_v46  ;;  %v4018_v54 = vpop.f32.mrb[89].mxu0  ;;  %v6264_v53 = vrot.slane %v6262_v32, 2 }
 0x1aa   : > { %v4225_v15 = vadd.f32 %v4181_v58, %v4018_v54  ;;  %v12599_v5 = vpop.f32.mrb[90].mxu0  ;;  %v4795_v7 = vld [vmem:[#allocation3 + $0x10] sm:$0xff] }
 0x1ab   : > { %v12588_v51 = vpop.f32.mrb[88].mxu1  ;;  %4271 = vst.msk [vmem:[#allocation3 + $0x30] sm:$0xff] %vm18984_vm6, %v4227_v36  ;;  %v4228_v37 = vadd.f32 %v12599_v5, %v4184_v31  ;;  %v4021_v8 = vpop.f32.mrb[91].mxu0  ;;  %v4793_v50 = vld [vmem:[#allocation3] sm:$0xff]  ;;  %v6250_v5 = vshrl.u32 %v6064_v9, 16  ;;  %v6253_v31 = vshll.u32 %v6064_v9, 16 }
 0x1ac   : > { %v3829_v43 = vadd.f32 %v12588_v51, %v3785_v12  ;;  %v3728_v18 = vpop.f32.mrb[89].mxu1  ;;  %4269 = vst.msk [vmem:[#allocation3 + $0x20] sm:$0xff] %vm18984_vm6, %v4225_v15  ;;  %v4226_v47 = vadd.f32 %v4182_v28, %v4021_v8  ;;  %v4796_v36 = vld [vmem:[#allocation3 + $0x18] sm:$0xff]  ;;  %v6238_v15 = vor.u32 %v6237_v14, %v6234_v17  ;;  %v4191_v12 = vld [vmem:[#allocation3 + $0x70] sm:$0xff]  ;;  %v4189_v28 = vld [vmem:[#allocation3 + $0x60] sm:$0xff] }
 0x1ad   : > { %v3827_v10 = vadd.f32 %v3783_v60, %v3728_v18  ;;  %v12589_v2 = vpop.f32.mrb[90].mxu1  ;;  %4272 = vst.msk [vmem:[#allocation3 + $0x38] sm:$0xff] %vm18984_vm6, %v4228_v37  ;;  %12801 = vmatmul.mubr.msk.bf16.gmra.mrb[196].mxu0 %vm490_vm2, %v6203_v1  ;;  %v4794_v49 = vld [vmem:[#allocation3 + $0x8] sm:$0xff]  ;;  %v6252_v18 = vrot.slane %v6250_v5, 1  ;;  %v6255_v60 = vrot.slane %v6253_v31, 2  ;;  %v4195_v14 = vld [vmem:[#allocation3 + $0x90] sm:$0xff] }
 0x1ae   : > { %3873 = vst.msk [vmem:[#allocation3 + $0x150] sm:$0xff] %vm18984_vm6, %v3829_v43  ;;  %v3830_v16 = vadd.f32 %v12589_v2, %v3786_v33  ;;  %v3731_v3 = vpop.f32.mrb[91].mxu1  ;;  %4270 = vst.msk [vmem:[#allocation3 + $0x28] sm:$0xff] %vm18984_vm6, %v4226_v47  ;;  %12804 = vmatprep.mubr.msk.bf16.mxu0 %vm490_vm2, %v6212_v29  ;;  %v6239_v43 = vsel %vm18978_vm8, %v6229_v6, %v6238_v15  ;;  %v6066_v47 = vld [vmem:[#allocation2 + $0xd8] sm:$0x3] }
 0x1af   : > { %3871 = vst.msk [vmem:[#allocation3 + $0x140] sm:$0xff] %vm18984_vm6, %v3827_v10  ;;  %v3828_v35 = vadd.f32 %v3784_v11, %v3731_v3  ;;  %v6248_v3 = vsel %vm18978_vm8, %v6238_v15, %v6247_v55  ;;  %v6261_v11 = vrot.slane %v6259_v41, 1 }
 0x1b0   : > { %3874 = vst.msk [vmem:[#allocation3 + $0x158] sm:$0xff] %vm18984_vm6, %v3830_v16  ;;  %v12602_v48 = vpop.f32.mrb[92].mxu0  ;;  %v4190_v16 = vld [vmem:[#allocation3 + $0x68] sm:$0xff] }
 0x1b1   : > { %3872 = vst.msk [vmem:[#allocation3 + $0x148] sm:$0xff] %vm18984_vm6, %v3828_v35  ;;  %v4231_v61 = vadd.f32 %v12602_v48, %v4187_v21  ;;  %v4034_v63 = vpop.f32.mrb[93].mxu0  ;;  %v6268_v21 = vshrl.u32 %v6066_v47, 16 }
 0x1b2   : > { %v4229_v22 = vadd.f32 %v4185_v13, %v4034_v63  ;;  %v12603_v0 = vpop.f32.mrb[94].mxu0  ;;  %v4799_v10 = vld [vmem:[#allocation3 + $0x30] sm:$0xff] }
 0x1b3   : > { %4275 = vst.msk [vmem:[#allocation3 + $0x50] sm:$0xff] %vm18984_vm6, %v4231_v61  ;;  %v12640_v25 = vpop.f32.mrb[92].mxu1  ;;  %v4232_v45 = vadd.f32 %v12603_v0, %v4188_v44  ;;  %v4037_v26 = vpop.f32.mrb[95].mxu0  ;;  %v4797_v35 = vld [vmem:[#allocation3 + $0x20] sm:$0xff]  ;;  %v6271_v61 = vshll.u32 %v6066_v47, 16  ;;  %v6256_v0 = vor.u32 %v6255_v60, %v6252_v18 }
 0x1b4   : > { %v4839_v19 = vadd.f32 %v12640_v25, %v4795_v7  ;;  %4273 = vst.msk [vmem:[#allocation3 + $0x40] sm:$0xff] %vm18984_vm6, %v4229_v22  ;;  %v4618_v38 = vpop.f32.mrb[93].mxu1  ;;  %v4230_v42 = vadd.f32 %v4186_v62, %v4037_v26  ;;  %v4800_v48 = vld [vmem:[#allocation3 + $0x38] sm:$0xff]  ;;  %v4193_v7 = vld [vmem:[#allocation3 + $0x80] sm:$0xff]  ;;  %v13221_v62 = vld [vmem:[%s18948_s2 + $0x8] sm:$0xff]  }
 0x1b5   : > { %v4837_v20 = vadd.f32 %v4793_v50, %v4618_v38  ;;  %4276 = vst.msk [vmem:[#allocation3 + $0x58] sm:$0xff] %vm18984_vm6, %v4232_v45  ;;  %v12641_v46 = vpop.f32.mrb[94].mxu1  ;;  %12805 = vmatmul.mubr.msk.bf16.gmra.mrb[200].mxu0 %vm490_vm2, %v6221_v23  ;;  %v4798_v22 = vld [vmem:[#allocation3 + $0x28] sm:$0xff]  ;;  %v6265_v23 = vor.u32 %v6264_v53, %v6261_v11  ;;  %v6270_v45 = vrot.slane %v6268_v21, 1  ;;  %v6273_v26 = vrot.slane %v6271_v61, 2  ;;  %12822 = vmatprep.subr.bf16.mxu1 %v13221_v62 }
 0x1b6   : > { %4883 = vst.msk [vmem:[#allocation3 + $0x10] sm:$0xff] %vm18984_vm6, %v4839_v19  ;;  %v4840_v54 = vadd.f32 %v12641_v46, %v4796_v36  ;;  %4274 = vst.msk [vmem:[#allocation3 + $0x48] sm:$0xff] %vm18984_vm6, %v4230_v42  ;;  %v4621_v58 = vpop.f32.mrb[95].mxu1  ;;  %12808 = vmatprep.mubr.msk.bf16.mxu0 %vm490_vm2, %v6230_v24  ;;  %v6257_v19 = vsel %vm18978_vm8, %v6247_v55, %v6256_v0  ;;  %v519_v36 = vlaneseq  ;;  %12823 = vmatpush3.bf16.msra.mxu1 %v13221_v62 }
 0x1b7   : > { %4881 = vst.msk [vmem:[#allocation3] sm:$0xff] %vm18984_vm6, %v4837_v20  ;;  %v4838_v1 = vadd.f32 %v4794_v49, %v4621_v58  ;;  %v4194_v20 = vld [vmem:[#allocation3 + $0x88] sm:$0xff]  ;;  %v6266_v46 = vsel %vm18978_vm8, %v6256_v0, %v6265_v23  ;;  %v6274_v55 = vor.u32 %v6273_v26, %v6270_v45 }
 0x1b8   : > { %4884 = vst.msk [vmem:[#allocation3 + $0x18] sm:$0xff] %vm18984_vm6, %v4840_v54  ;;  %v12606_v51 = vpop.f32.mrb[96].mxu0  ;;  %v14691_v41 = vshrl.u32 %v519_v36, 7 }
 0x1b9   : > { %4882 = vst.msk [vmem:[#allocation3 + $0x8] sm:$0xff] %vm18984_vm6, %v4838_v1  ;;  %v4235_v37 = vadd.f32 %v12606_v51, %v4191_v12  ;;  %v4050_v8 = vpop.f32.mrb[97].mxu0  ;;  %v6275_v18 = vsel %vm18978_vm8, %v6265_v23, %v6274_v55 }
 0x1ba   : > { %v4233_v29 = vadd.f32 %v4189_v28, %v4050_v8  ;;  %v12607_v4 = vpop.f32.mrb[98].mxu0  ;;  %v4803_v50 = vld [vmem:[#allocation3 + $0x50] sm:$0xff]  ;;  %v522_v8 = vadd.s32 16, %v14691_v41  ;;  %v523_v47 = vadd.s32 24, %v14691_v41 }
 0x1bb   : > { %4279 = vst.msk [vmem:[#allocation3 + $0x70] sm:$0xff] %vm18984_vm6, %v4235_v37  ;;  %v12644_v27 = vpop.f32.mrb[96].mxu1  ;;  %v4236_v2 = vadd.f32 %v12607_v4, %v4192_v30  ;;  %v4053_v33 = vpop.f32.mrb[99].mxu0  ;;  %v4801_v49 = vld [vmem:[#allocation3 + $0x40] sm:$0xff] }
 0x1bc   : > { %v4843_v34 = vadd.f32 %v12644_v27, %v4799_v10  ;;  %4277 = vst.msk [vmem:[#allocation3 + $0x60] sm:$0xff] %vm18984_vm6, %v4233_v29  ;;  %v4634_v39 = vpop.f32.mrb[97].mxu1  ;;  %v4234_v6 = vadd.f32 %v4190_v16, %v4053_v33  ;;  %v4804_v1 = vld [vmem:[#allocation3 + $0x58] sm:$0xff]  ;;  %v4199_v29 = vld [vmem:[#allocation3 + $0xb0] sm:$0xff]  ;;  %v566_v60 = vcvt.s32.f32 %v522_v8  ;;  %v14703_v33 = vstv %s609_s12 }
 0x1bd   : > { %v4841_v57 = vadd.f32 %v4797_v35, %v4634_v39  ;;  %4280 = vst.msk [vmem:[#allocation3 + $0x78] sm:$0xff] %vm18984_vm6, %v4236_v2  ;;  %v12645_v59 = vpop.f32.mrb[98].mxu1  ;;  %12809 = vmatmul.mubr.msk.bf16.gmra.mrb[204].mxu0 %vm490_vm2, %v6239_v43  ;;  %v4802_v12 = vld [vmem:[#allocation3 + $0x48] sm:$0xff]  ;;  %v4197_v43 = vld [vmem:[#allocation3 + $0xa0] sm:$0xff]  ;;  %v4200_v2 = vld [vmem:[#allocation3 + $0xb8] sm:$0xff]  ;;  %v564_v16 = vcvt.s32.f32 %v14691_v41 }
 0x1be   : > { %4887 = vst.msk [vmem:[#allocation3 + $0x30] sm:$0xff] %vm18984_vm6, %v4843_v34  ;;  %v4844_v63 = vadd.f32 %v12645_v59, %v4800_v48  ;;  %4278 = vst.msk [vmem:[#allocation3 + $0x68] sm:$0xff] %vm18984_vm6, %v4234_v6  ;;  %v4637_v13 = vpop.f32.mrb[99].mxu1  ;;  %12812 = vmatprep.mubr.msk.bf16.mxu0 %vm490_vm2, %v6248_v3  ;;  %v521_v3 = vadd.s32 8, %v14691_v41  ;;  %v4198_v35 = vld [vmem:[#allocation3 + $0xa8] sm:$0xff]  ;;  %v14709_v6 = vadd.f32 %v14703_v33, %v566_v60 }
 0x1bf   : > { %4885 = vst.msk [vmem:[#allocation3 + $0x20] sm:$0xff] %vm18984_vm6, %v4841_v57  ;;  %v4842_v44 = vadd.f32 %v4798_v22, %v4637_v13  ;;  %v567_v57 = vcvt.s32.f32 %v523_v47 }
 0x1c0   : > { %4888 = vst.msk [vmem:[#allocation3 + $0x38] sm:$0xff] %vm18984_vm6, %v4844_v63  ;;  %v12610_v17 = vpop.f32.mrb[100].mxu0  ;;  %v14713_v63 = vadd.f32 %v14703_v33, %v564_v16  ;;  %v524_v16 = vadd.s32 32, %v14691_v41  ;;  %vm1098_vm9 = vcmp.ge.f32.partialorder %v14709_v6, 0.0  ;;  %vm1142_vm10 = vcmp.lt.f32.partialorder %v14709_v6, 2312.0 }
 0x1c1   : > { %4886 = vst.msk [vmem:[#allocation3 + $0x28] sm:$0xff] %vm18984_vm6, %v4842_v44  ;;  %v4239_v9 = vadd.f32 %v12610_v17, %v4195_v14  ;;  %v4066_v25 = vpop.f32.mrb[101].mxu0  ;;  %v657_v44 = vadd.f32 0.5, %v14709_v6  ;;  %v14719_v23 = vadd.f32 %v14703_v33, %v567_v57  ;;  %vm14775_vm11 = vmand %vm1098_vm9, %vm1142_vm10 }
 0x1c2   : > { %v4237_v24 = vadd.f32 %v4193_v7, %v4066_v25  ;;  %v12611_v56 = vpop.f32.mrb[102].mxu0  ;;  %v4807_v53 = vld [vmem:[#allocation3 + $0x70] sm:$0xff]  ;;  %v655_v25 = vadd.f32 0.5, %v14713_v63  ;;  %v565_v7 = vcvt.s32.f32 %v521_v3  ;;  %vm1096_vm15 = vcmp.ge.f32.partialorder %v14713_v63, 0.0 }
 0x1c3   : > { %4283 = vst.msk [vmem:[#allocation3 + $0x90] sm:$0xff] %vm18984_vm6, %v4239_v9  ;;  %v12648_v38 = vpop.f32.mrb[100].mxu1  ;;  %v4240_v42 = vadd.f32 %v12611_v56, %v4196_v40  ;;  %v4069_v52 = vpop.f32.mrb[103].mxu0  ;;  %v4805_v21 = vld [vmem:[#allocation3 + $0x60] sm:$0xff]  ;;  %v702_v26 = vmul.f32 0.029411765, %v657_v44 }
 0x1c4   : > { %v4847_v54 = vadd.f32 %v12648_v38, %v4803_v50  ;;  %4281 = vst.msk [vmem:[#allocation3 + $0x80] sm:$0xff] %vm18984_vm6, %v4237_v24  ;;  %v4650_v58 = vpop.f32.mrb[101].mxu1  ;;  %v4238_v15 = vadd.f32 %v4194_v20, %v4069_v52  ;;  %v4808_v0 = vld [vmem:[#allocation3 + $0x78] sm:$0xff]  ;;  %v4203_v24 = vld [vmem:[#allocation3 + $0xd0] sm:$0xff]  ;;  %v700_v56 = vmul.f32 0.029411765, %v655_v25  ;;  %v568_v25 = vcvt.s32.f32 %v524_v16 }
 0x1c5   : > { %v4845_v5 = vadd.f32 %v4801_v49, %v4650_v58  ;;  %4284 = vst.msk [vmem:[#allocation3 + $0x98] sm:$0xff] %vm18984_vm6, %v4240_v42  ;;  %v12649_v31 = vpop.f32.mrb[102].mxu1  ;;  %12813 = vmatmul.mubr.msk.bf16.gmra.mrb[208].mxu0 %vm490_vm2, %v6257_v19  ;;  %v4806_v9 = vld [vmem:[#allocation3 + $0x68] sm:$0xff]  ;;  %v658_v40 = vadd.f32 0.5, %v14719_v23  ;;  %v4201_v50 = vld [vmem:[#allocation3 + $0xc0] sm:$0xff]  ;;  %v14728_v42 = vfloor.f32 %v702_v26  ;;  %vm1140_vm1 = vcmp.lt.f32.partialorder %v14713_v63, 2312.0 }
 0x1c6   : > { %4891 = vst.msk [vmem:[#allocation3 + $0x50] sm:$0xff] %vm18984_vm6, %v4847_v54  ;;  %v4848_v32 = vadd.f32 %v12649_v31, %v4804_v1  ;;  %4282 = vst.msk [vmem:[#allocation3 + $0x88] sm:$0xff] %vm18984_vm6, %v4238_v15  ;;  %v4653_v51 = vpop.f32.mrb[103].mxu1  ;;  %12816 = vmatprep.mubr.msk.bf16.mxu0 %vm490_vm2, %v6266_v46  ;;  %v4204_v46 = vld [vmem:[#allocation3 + $0xd8] sm:$0xff]  ;;  %v14730_v36 = vfloor.f32 %v700_v56  ;;  %v14733_v54 = vadd.f32 %v14703_v33, %v565_v7  ;;  %v4202_v31 = vld [vmem:[#allocation3 + $0xc8] sm:$0xff] }
 0x1c7   : > { %4889 = vst.msk [vmem:[#allocation3 + $0x40] sm:$0xff] %vm18984_vm6, %v4845_v5  ;;  %v4846_v37 = vadd.f32 %v4802_v12, %v4653_v51  ;;  %v878_v1 = vadd.f32 0.5, %v14728_v42 }
 0x1c8   : > { %4892 = vst.msk [vmem:[#allocation3 + $0x58] sm:$0xff] %vm18984_vm6, %v4848_v32  ;;  %v12614_v28 = vpop.f32.mrb[104].mxu0  ;;  %v656_v47 = vadd.f32 0.5, %v14733_v54 }
 0x1c9   : > { %4890 = vst.msk [vmem:[#allocation3 + $0x48] sm:$0xff] %vm18984_vm6, %v4846_v37  ;;  %v4243_v4 = vadd.f32 %v12614_v28, %v4199_v29  ;;  %v4082_v30 = vpop.f32.mrb[105].mxu0  ;;  %v703_v37 = vmul.f32 0.029411765, %v658_v40 }
 0x1ca   : > { %v4241_v27 = vadd.f32 %v4197_v43, %v4082_v30  ;;  %v12615_v10 = vpop.f32.mrb[106].mxu0  ;;  %v4811_v49 = vld [vmem:[#allocation3 + $0x90] sm:$0xff]  ;;  %v876_v30 = vadd.f32 0.5, %v14730_v36 }
 0x1cb   : > { %4287 = vst.msk [vmem:[#allocation3 + $0xb0] sm:$0xff] %vm18984_vm6, %v4243_v4  ;;  %v12652_v11 = vpop.f32.mrb[104].mxu1  ;;  %v4244_v34 = vadd.f32 %v12615_v10, %v4200_v2  ;;  %v4085_v39 = vpop.f32.mrb[107].mxu0  ;;  %v4809_v51 = vld [vmem:[#allocation3 + $0x80] sm:$0xff]  ;;  %v922_v4 = vmul.f32 0.029411765, %v878_v1 }
 0x1cc   : > { %v4851_v59 = vadd.f32 %v12652_v11, %v4807_v53  ;;  %4285 = vst.msk [vmem:[#allocation3 + $0xa0] sm:$0xff] %vm18984_vm6, %v4241_v27  ;;  %v4666_v48 = vpop.f32.mrb[105].mxu1  ;;  %v4242_v61 = vadd.f32 %v4198_v35, %v4085_v39  ;;  %v4812_v29 = vld [vmem:[#allocation3 + $0x98] sm:$0xff]  ;;  %v526_v27 = vadd.s32 48, %v14691_v41  ;;  %v4207_v11 = vld [vmem:[#allocation3 + $0xf0] sm:$0xff]  ;;  %v14747_v53 = vfloor.f32 %v703_v37  ;;  %v4205_v35 = vld [vmem:[#allocation3 + $0xe0] sm:$0xff] }
 0x1cd   : > { %v4849_v13 = vadd.f32 %v4805_v21, %v4666_v48  ;;  %4288 = vst.msk [vmem:[#allocation3 + $0xb8] sm:$0xff] %vm18984_vm6, %v4244_v34  ;;  %v12653_v22 = vpop.f32.mrb[106].mxu1  ;;  %12817 = vmatmul.mubr.msk.bf16.gmra.mrb[212].mxu0 %vm490_vm2, %v6275_v18  ;;  %v4810_v60 = vld [vmem:[#allocation3 + $0x88] sm:$0xff]  ;;  %v966_v2 = vfloor.f32 %v922_v4  ;;  %v4212_v4 = vld [vmem:[#allocation3 + $0x118] sm:$0xff]  ;;  %v527_v37 = vadd.s32 56, %v14691_v41 }
 0x1ce   : > { %4895 = vst.msk [vmem:[#allocation3 + $0x70] sm:$0xff] %vm18984_vm6, %v4851_v59  ;;  %v4852_v17 = vadd.f32 %v12653_v22, %v4808_v0  ;;  %4286 = vst.msk [vmem:[#allocation3 + $0xa8] sm:$0xff] %vm18984_vm6, %v4242_v61  ;;  %v4669_v14 = vpop.f32.mrb[107].mxu1  ;;  %v920_v59 = vmul.f32 0.029411765, %v876_v30  ;;  %v4208_v61 = vld [vmem:[#allocation3 + $0xf8] sm:$0xff] }
 0x1cf   : > { %4893 = vst.msk [vmem:[#allocation3 + $0x60] sm:$0xff] %vm18984_vm6, %v4849_v13  ;;  %v4850_v45 = vadd.f32 %v4806_v9, %v4669_v14  ;;  %v1010_v57 = vmul.f32 34.0, %v966_v2  ;;  %v701_v14 = vmul.f32 0.029411765, %v656_v47  ;;  %v570_v9 = vcvt.s32.f32 %v526_v27  ;;  %v4210_v30 = vld [vmem:[#allocation3 + $0x108] sm:$0xff] }
 0x1d0   : > { %4896 = vst.msk [vmem:[#allocation3 + $0x78] sm:$0xff] %vm18984_vm6, %v4852_v17  ;;  %v12618_v62 = vpop.f32.mrb[108].mxu0  ;;  %v4206_v17 = vld [vmem:[#allocation3 + $0xe8] sm:$0xff] }
 0x1d1   : > { %4894 = vst.msk [vmem:[#allocation3 + $0x68] sm:$0xff] %vm18984_vm6, %v4850_v45  ;;  %v4247_v19 = vadd.f32 %v12618_v62, %v4203_v24  ;;  %v4098_v38 = vpop.f32.mrb[109].mxu0  ;;  %v879_v24 = vadd.f32 0.5, %v14747_v53 }
 0x1d2   : > { %v4245_v52 = vadd.f32 %v4201_v50, %v4098_v38  ;;  %v12619_v20 = vpop.f32.mrb[110].mxu0  ;;  %v4815_v22 = vld [vmem:[#allocation3 + $0xb0] sm:$0xff]  ;;  %v14755_v38 = vsub.f32 %v14728_v42, %v1010_v57  ;;  %v964_v50 = vfloor.f32 %v920_v59 }
 0x1d3   : > { %4291 = vst.msk [vmem:[#allocation3 + $0xd0] sm:$0xff] %vm18984_vm6, %v4247_v19  ;;  %v12656_v58 = vpop.f32.mrb[108].mxu1  ;;  %v4248_v15 = vadd.f32 %v12619_v20, %v4204_v46  ;;  %v4101_v5 = vpop.f32.mrb[111].mxu0  ;;  %v4813_v26 = vld [vmem:[#allocation3 + $0xa0] sm:$0xff] }
 0x1d4   : > { %v4855_v55 = vadd.f32 %v12656_v58, %v4811_v49  ;;  %4289 = vst.msk [vmem:[#allocation3 + $0xc0] sm:$0xff] %vm18984_vm6, %v4245_v52  ;;  %v4682_v32 = vpop.f32.mrb[109].mxu1  ;;  %v4246_v12 = vadd.f32 %v4202_v31, %v4101_v5  ;;  %v4816_v19 = vld [vmem:[#allocation3 + $0xb8] sm:$0xff]  ;;  %v790_v58 = vmul.f32 34.0, %v14728_v42  ;;  %v14766_v5 = vadd.f32 %v14703_v33, %v570_v9 }
 0x1d5   : > { %v4853_v8 = vadd.f32 %v4809_v51, %v4682_v32  ;;  %4292 = vst.msk [vmem:[#allocation3 + $0xd8] sm:$0xff] %vm18984_vm6, %v4248_v15  ;;  %v12657_v28 = vpop.f32.mrb[110].mxu1  ;;  %v4814_v46 = vld [vmem:[#allocation3 + $0xa8] sm:$0xff]  ;;  %v14763_v15 = vfloor.f32 %v701_v14  ;;  %v14769_v31 = vadd.f32 %v14703_v33, %v568_v25  ;;  %v923_v42 = vmul.f32 0.029411765, %v879_v24 }
 0x1d6   : > { %4899 = vst.msk [vmem:[#allocation3 + $0x90] sm:$0xff] %vm18984_vm6, %v4855_v55  ;;  %v4856_v43 = vadd.f32 %v12657_v28, %v4812_v29  ;;  %4290 = vst.msk [vmem:[#allocation3 + $0xc8] sm:$0xff] %vm18984_vm6, %v4246_v12  ;;  %v4685_v18 = vpop.f32.mrb[111].mxu1  ;;  %v4211_v55 = vld [vmem:[#allocation3 + $0x110] sm:$0xff]  ;;  %v4209_v12 = vld [vmem:[#allocation3 + $0x100] sm:$0xff]  ;;  %vm1230_vm12 = vcmp.ge.f32.partialorder %v14755_v38, 1.0 }
 0x1d7   : > { %4897 = vst.msk [vmem:[#allocation3 + $0x80] sm:$0xff] %vm18984_vm6, %v4853_v8  ;;  %v4854_v10 = vadd.f32 %v4810_v60, %v4685_v18  ;;  %v1008_v8 = vmul.f32 34.0, %v964_v50  ;;  %v788_v18 = vmul.f32 34.0, %v14730_v36  ;;  %v13222_v60 = vld [vmem:[%s18948_s2 + $0x10] sm:$0xff]   ;;  %v877_v16 = vadd.f32 0.5, %v14763_v15  ;;  %vm14796_vm13 = vmand %vm14775_vm11, %vm1230_vm12 }
 0x1d8   : > { %4900 = vst.msk [vmem:[#allocation3 + $0x98] sm:$0xff] %vm18984_vm6, %v4856_v43  ;;  %v12622_v3 = vpop.f32.mrb[112].mxu0  ;;  %v14781_v43 = vsub.f32 %v14709_v6, %v790_v58  ;;  %vm1318_vm14 = vcmp.le.f32.partialorder %v14755_v38, 32.0  ;;  %12824 = vmatprep.subr.bf16.mxu1 %v13222_v60  ;;  %v967_v59 = vfloor.f32 %v923_v42  ;;  %vm14830_vm11 = vmand %vm1096_vm15, %vm1140_vm1 }
 0x1d9   : > { %4898 = vst.msk [vmem:[#allocation3 + $0x88] sm:$0xff] %vm18984_vm6, %v4854_v10  ;;  %v4251_v34 = vadd.f32 %v12622_v3, %v4207_v11  ;;  %v4114_v39 = vpop.f32.mrb[113].mxu0  ;;  %v661_v3 = vadd.f32 0.5, %v14766_v5  ;;  %v659_v11 = vadd.f32 0.5, %v14769_v31  ;;  %12825 = vmatpush3.bf16.msra.mxu1 %v13222_v60  ;;  %vm14817_vm2 = vmand %vm14796_vm13, %vm1318_vm14  ;;  %v921_v9 = vmul.f32 0.029411765, %v877_v16 }
 0x1da   : > { %v4249_v48 = vadd.f32 %v4205_v35, %v4114_v39  ;;  %v12623_v21 = vpop.f32.mrb[114].mxu0  ;;  %v4819_v27 = vld [vmem:[#allocation3 + $0xd0] sm:$0xff]  ;;  %vm1406_vm9 = vcmp.ge.f32.partialorder %v14781_v43, 1.0  ;;  %vm1494_vm10 = vcmp.le.f32.partialorder %v14781_v43, 32.0 }
 0x1db   : > { %4295 = vst.msk [vmem:[#allocation3 + $0xf0] sm:$0xff] %vm18984_vm6, %v4251_v34  ;;  %v12660_v13 = vpop.f32.mrb[112].mxu1  ;;  %v4252_v0 = vadd.f32 %v12623_v21, %v4208_v61  ;;  %v4117_v44 = vpop.f32.mrb[115].mxu0  ;;  %v4817_v39 = vld [vmem:[#allocation3 + $0xc0] sm:$0xff]  ;;  %v706_v25 = vmul.f32 0.029411765, %v661_v3  ;;  %vm14841_vm13 = vmand %vm14817_vm2, %vm1406_vm9 }
 0x1dc   : > { %v4859_v7 = vadd.f32 %v12660_v13, %v4815_v22  ;;  %4293 = vst.msk [vmem:[#allocation3 + $0xe0] sm:$0xff] %vm18984_vm6, %v4249_v48  ;;  %v4698_v45 = vpop.f32.mrb[113].mxu1  ;;  %v4250_v62 = vadd.f32 %v4206_v17, %v4117_v44  ;;  %v4820_v61 = vld [vmem:[#allocation3 + $0xd8] sm:$0xff]  ;;  %v14803_v13 = vsub.f32 %v14730_v36, %v1008_v8  ;;  %v14808_v17 = vsub.f32 %v14713_v63, %v788_v18  ;;  %vm14872_vm2 = vmand %vm14841_vm13, %vm1494_vm10  ;;  %v4217_v36 = vld [vmem:[#allocation3 + $0x140] sm:$0xff] }
 0x1dd   : > { %v4857_v56 = vadd.f32 %v4813_v26, %v4698_v45  ;;  %4296 = vst.msk [vmem:[#allocation3 + $0xf8] sm:$0xff] %vm18984_vm6, %v4252_v0  ;;  %v12661_v40 = vpop.f32.mrb[114].mxu1  ;;  %v4818_v44 = vld [vmem:[#allocation3 + $0xc8] sm:$0xff]  ;;  %v4215_v45 = vld [vmem:[#allocation3 + $0x130] sm:$0xff]  ;;  %v791_v26 = vmul.f32 34.0, %v14747_v53  ;;  %v14835_v50 = vfloor.f32 %v706_v25  ;;  %vm1099_vm9 = vcmp.ge.f32.partialorder %v14719_v23, 0.0 }
 0x1de   : > { %4903 = vst.msk [vmem:[#allocation3 + $0xb0] sm:$0xff] %vm18984_vm6, %v4859_v7  ;;  %v4860_v52 = vadd.f32 %v12661_v40, %v4816_v19  ;;  %4294 = vst.msk [vmem:[#allocation3 + $0xe8] sm:$0xff] %vm18984_vm6, %v4250_v62  ;;  %v4701_v20 = vpop.f32.mrb[115].mxu1  ;;  %v1011_v62 = vmul.f32 34.0, %v967_v59  ;;  %v704_v24 = vmul.f32 0.029411765, %v659_v11  ;;  %v571_v59 = vcvt.s32.f32 %v527_v37 }
 0x1df   : > { %4901 = vst.msk [vmem:[#allocation3 + $0xa0] sm:$0xff] %vm18984_vm6, %v4857_v56  ;;  %v4858_v49 = vadd.f32 %v4814_v46, %v4701_v20  ;;  %v4213_v19 = vld [vmem:[#allocation3 + $0x120] sm:$0xff]  ;;  %vm1228_vm12 = vcmp.ge.f32.partialorder %v14803_v13, 1.0  ;;  %v4216_v46 = vld [vmem:[#allocation3 + $0x138] sm:$0xff]  ;;  %vm1316_vm14 = vcmp.le.f32.partialorder %v14803_v13, 32.0  ;;  %vm1404_vm15 = vcmp.ge.f32.partialorder %v14808_v17, 1.0 }
 0x1e0   : > { %4904 = vst.msk [vmem:[#allocation3 + $0xb8] sm:$0xff] %vm18984_vm6, %v4860_v52  ;;  %v12626_v1 = vpop.f32.mrb[116].mxu0  ;;  %v14847_v63 = vfloor.f32 %v704_v24  ;;  %vm14857_vm1 = vmand %vm14830_vm11, %vm1228_vm12  ;;  %v14862_v18 = vsub.f32 %v14719_v23, %v791_v26  ;;  %v14865_v60 = vsub.f32 %v14747_v53, %v1011_v62  ;;  %vm1143_vm11 = vcmp.lt.f32.partialorder %v14719_v23, 2312.0  ;;  %v4220_v26 = vld [vmem:[#allocation3 + $0x158] sm:$0xff] }
 0x1e1   : > { %4902 = vst.msk [vmem:[#allocation3 + $0xa8] sm:$0xff] %vm18984_vm6, %v4858_v49  ;;  %v4255_v32 = vadd.f32 %v12626_v1, %v4211_v55  ;;  %v4130_v51 = vpop.f32.mrb[117].mxu0  ;;  %v14879_v53 = vadd.s32 40, %v14691_v41  ;;  %v789_v11 = vmul.f32 34.0, %v14763_v15  ;;  %vm14890_vm10 = vmand %vm14857_vm1, %vm1316_vm14  ;;  %vm1492_vm12 = vcmp.le.f32.partialorder %v14808_v17, 32.0  ;;  %v5414_v17 = vld [vmem:[#allocation3 + $0x30] sm:$0xff] }
 0x1e2   : > { %v4253_v28 = vadd.f32 %v4209_v12, %v4130_v51  ;;  %v12627_v29 = vpop.f32.mrb[118].mxu0  ;;  %v4823_v1 = vld [vmem:[#allocation3 + $0xf0] sm:$0xff]  ;;  %v965_v51 = vfloor.f32 %v921_v9  ;;  %v882_v12 = vadd.f32 0.5, %v14835_v50  ;;  %vm14908_vm13 = vmand %vm1099_vm9, %vm1143_vm11  ;;  %vm1231_vm14 = vcmp.ge.f32.partialorder %v14865_v60, 1.0 }
 0x1e3   : > { %4299 = vst.msk [vmem:[#allocation3 + $0x110] sm:$0xff] %vm18984_vm6, %v4255_v32  ;;  %v12664_v47 = vpop.f32.mrb[116].mxu1  ;;  %v4256_v10 = vadd.f32 %v12627_v29, %v4212_v4  ;;  %v4133_v2 = vpop.f32.mrb[119].mxu0  ;;  %v4214_v32 = vld [vmem:[#allocation3 + $0x128] sm:$0xff]  ;;  %v4821_v29 = vld [vmem:[#allocation3 + $0xe0] sm:$0xff]  ;;  %vm1319_vm1 = vcmp.le.f32.partialorder %v14865_v60, 32.0  ;;  %v14917_v25 = vadd.f32 %v14703_v33, %v571_v59  ;;  %v569_v23 = vcvt.s32.f32 %v14879_v53 }
 0x1e4   : > { %v4863_v6 = vadd.f32 %v12664_v47, %v4819_v27  ;;  %4297 = vst.msk [vmem:[#allocation3 + $0x100] sm:$0xff] %vm18984_vm6, %v4253_v28  ;;  %v4714_v34 = vpop.f32.mrb[117].mxu1  ;;  %v4254_v35 = vadd.f32 %v4210_v30, %v4133_v2  ;;  %v1009_v57 = vmul.f32 34.0, %v965_v51  ;;  %vm1407_vm8 = vcmp.ge.f32.partialorder %v14862_v18, 1.0  ;;  %v13225_v51 = vld [vmem:[%s18948_s2 + $0x48] sm:$0xff]  }
 0x1e5   : > { %v4861_v48 = vadd.f32 %v4817_v39, %v4714_v34  ;;  %4300 = vst.msk [vmem:[#allocation3 + $0x118] sm:$0xff] %vm18984_vm6, %v4256_v10  ;;  %v12665_v21 = vpop.f32.mrb[118].mxu1  ;;  %v4824_v10 = vld [vmem:[#allocation3 + $0xf8] sm:$0xff]  ;;  %v4822_v43 = vld [vmem:[#allocation3 + $0xe8] sm:$0xff]  ;;  %v880_v34 = vadd.f32 0.5, %v14847_v63  ;;  %vm1495_vm9 = vcmp.le.f32.partialorder %v14862_v18, 32.0  ;;  %v14930_v24 = vsub.f32 %v14733_v54, %v789_v11 }
 0x1e6   : > { %4907 = vst.msk [vmem:[#allocation3 + $0xd0] sm:$0xff] %vm18984_vm6, %v4863_v6  ;;  %v4864_v22 = vadd.f32 %v12665_v21, %v4820_v61  ;;  %4298 = vst.msk [vmem:[#allocation3 + $0x108] sm:$0xff] %vm18984_vm6, %v4254_v35  ;;  %v4717_v0 = vpop.f32.mrb[119].mxu1  ;;  %v926_v6 = vmul.f32 0.029411765, %v882_v12  ;;  %v4219_v61 = vld [vmem:[#allocation3 + $0x150] sm:$0xff]  ;;  %v14944_v58 = vsub.f32 %v14763_v15, %v1009_v57 }
 0x1e7   : > { %4905 = vst.msk [vmem:[#allocation3 + $0xc0] sm:$0xff] %vm18984_vm6, %v4861_v48  ;;  %v4862_v14 = vadd.f32 %v4818_v44, %v4717_v0  ;;  %v13224_v48 = vld [vmem:[%s18948_s2 + $0x40] sm:$0xff]   ;;  %vm1097_vm11 = vcmp.ge.f32.partialorder %v14733_v54, 0.0  ;;  %v14979_v2 = vadd.s32 80, %v14691_v41 }
 0x1e8   : > { %4908 = vst.msk [vmem:[#allocation3 + $0xd8] sm:$0xff] %vm18984_vm6, %v4864_v22  ;;  %v12630_v7 = vpop.f32.mrb[120].mxu0  ;;  %v13273_v22 = vmov 0   ;;  %v970_v9 = vfloor.f32 %v926_v6  ;;  %12900 = vmatprep.subr.bf16.mxu0 %v13224_v48  ;;  %v5410_v6 = vld [vmem:[#allocation3 + $0x10] sm:$0xff]  ;;  %v5408_v57 = vld [vmem:[#allocation3] sm:$0xff] }
 0x1e9   : > { %4906 = vst.msk [vmem:[#allocation3 + $0xc8] sm:$0xff] %vm18984_vm6, %v4862_v14  ;;  %v4259_v56 = vadd.f32 %v12630_v7, %v4215_v45  ;;  %v4146_v40 = vpop.f32.mrb[121].mxu0  ;;  %v14902_v13 = vsel %vm14872_vm2, 1, %v13273_v22  ;;  %vm14924_vm2 = vmand %vm14890_vm10, %vm1404_vm15  ;;  %12901 = vmatpush3.bf16.msra.mxu0 %v13224_v48  ;;  %vm1141_vm10 = vcmp.lt.f32.partialorder %v14733_v54, 2312.0 }
 0x1ea   : > { %v4257_v52 = vadd.f32 %v4213_v19, %v4146_v40  ;;  %v12631_v20 = vpop.f32.mrb[122].mxu0  ;;  %v4827_v19 = vld [vmem:[#allocation3 + $0x110] sm:$0xff]  ;;  %vm14939_vm15 = vmand %vm14908_vm13, %vm1231_vm14  ;;  %vm1102_vm13 = vcmp.ge.f32.partialorder %v14766_v5, 0.0  ;;  %12902 = vmatprep.subr.bf16.mxu0 %v13225_v51 }
 0x1eb   : > { %4303 = vst.msk [vmem:[#allocation3 + $0x130] sm:$0xff] %vm18984_vm6, %v4259_v56  ;;  %v12668_v49 = vpop.f32.mrb[120].mxu1  ;;  %v4260_v55 = vadd.f32 %v12631_v20, %v4216_v46  ;;  %v4149_v42 = vpop.f32.mrb[123].mxu0  ;;  %v14932_v56 = vmul.f32 0.029411765, %v880_v34  ;;  %v4218_v20 = vld [vmem:[#allocation3 + $0x148] sm:$0xff]  ;;  %vm14959_vm14 = vmand %vm14924_vm2, %vm1492_vm12 }
 0x1ec   : > { %v4867_v8 = vadd.f32 %v12668_v49, %v4823_v1  ;;  %4301 = vst.msk [vmem:[#allocation3 + $0x120] sm:$0xff] %vm18984_vm6, %v4257_v52  ;;  %v4730_v28 = vpop.f32.mrb[121].mxu1  ;;  %v4258_v4 = vadd.f32 %v4214_v32, %v4149_v42  ;;  %v662_v49 = vadd.f32 0.5, %v14917_v25  ;;  %v4825_v42 = vld [vmem:[#allocation3 + $0x100] sm:$0xff]  ;;  %v4828_v37 = vld [vmem:[#allocation3 + $0x118] sm:$0xff]  ;;  %vm14972_vm12 = vmand %vm14939_vm15, %vm1319_vm1  ;;  %vm1405_vm2 = vcmp.ge.f32.partialorder %v14930_v24, 1.0 }
 0x1ed   : > { %v4865_v47 = vadd.f32 %v4821_v29, %v4730_v28  ;;  %4304 = vst.msk [vmem:[#allocation3 + $0x138] sm:$0xff] %vm18984_vm6, %v4260_v55  ;;  %v12669_v27 = vpop.f32.mrb[122].mxu1  ;;  %v1014_v28 = vmul.f32 34.0, %v970_v9  ;;  %vm14986_vm7 = vmand %vm1097_vm11, %vm1141_vm10  ;;  %vm1229_vm1 = vcmp.ge.f32.partialorder %v14944_v58, 1.0  ;;  %12903 = vmatpush3.bf16.msra.mxu0 %v13225_v51  ;;  %v15001_v54 = vsel %vm14959_vm14, 1, %v13273_v22  ;;  %v5413_v9 = vld [vmem:[#allocation3 + $0x28] sm:$0xff] }
 0x1ee   : > { %4911 = vst.msk [vmem:[#allocation3 + $0xf0] sm:$0xff] %vm18984_vm6, %v4867_v8  ;;  %v4868_v16 = vadd.f32 %v12669_v27, %v4824_v10  ;;  %4302 = vst.msk [vmem:[#allocation3 + $0x128] sm:$0xff] %vm18984_vm6, %v4258_v4  ;;  %v4733_v3 = vpop.f32.mrb[123].mxu1  ;;  %v707_v29 = vmul.f32 0.029411765, %v662_v49  ;;  %v14964_v4 = vadd.f32 %v14703_v33, %v569_v23  ;;  %v4826_v27 = vld [vmem:[#allocation3 + $0x108] sm:$0xff]  ;;  %v968_v10 = vfloor.f32 %v14932_v56 }
 0x1ef   : > { %4909 = vst.msk [vmem:[#allocation3 + $0xe0] sm:$0xff] %vm18984_vm6, %v4865_v47  ;;  %v4866_v39 = vadd.f32 %v4822_v43, %v4733_v3  ;;  %v13223_v43 = vld [vmem:[%s18948_s2 + $0x18] sm:$0xff]   ;;  %vm1493_vm15 = vcmp.le.f32.partialorder %v14930_v24, 32.0  ;;  %v794_v34 = vmul.f32 34.0, %v14835_v50  ;;  %vm1146_vm11 = vcmp.lt.f32.partialorder %v14766_v5, 2312.0  ;;  %vm15011_vm10 = vmand %vm14972_vm12, %vm1407_vm8 }
 0x1f0   : > { %4912 = vst.msk [vmem:[#allocation3 + $0xf8] sm:$0xff] %vm18984_vm6, %v4868_v16  ;;  %v12634_v21 = vpop.f32.mrb[124].mxu0  ;;  %v14991_v16 = vfloor.f32 %v707_v29  ;;  %v660_v3 = vadd.f32 0.5, %v14964_v4  ;;  %v15016_v48 = vsub.f32 %v14835_v50, %v1014_v28  ;;  %12826 = vmatprep.subr.bf16.mxu1 %v13223_v43  ;;  %vm15023_vm14 = vmand %vm14986_vm7, %vm1229_vm1  ;;  %vm1317_vm8 = vcmp.le.f32.partialorder %v14944_v58, 32.0 }
 0x1f1   : > { %4910 = vst.msk [vmem:[#allocation3 + $0xe8] sm:$0xff] %vm18984_vm6, %v4866_v39  ;;  %v4263_v44 = vadd.f32 %v12634_v21, %v4219_v61  ;;  %v4162_v14 = vpop.f32.mrb[125].mxu0  ;;  %v1012_v50 = vmul.f32 34.0, %v968_v10  ;;  %v574_v23 = vcvt.s32.f32 %v14979_v2  ;;  %12827 = vmatpush3.bf16.msra.mxu1 %v13223_v43  ;;  %vm15038_vm7 = vmand %vm15011_vm10, %vm1495_vm9  ;;  %v15043_v49 = vsub.f32 %v14766_v5, %v794_v34  ;;  %v5423_v2 = vld [vmem:[#allocation3 + $0x78] sm:$0xff] }
 0x1f2   : > { %v4261_v7 = vadd.f32 %v4217_v36, %v4162_v14  ;;  %v12635_v45 = vpop.f32.mrb[126].mxu0  ;;  %v883_v21 = vadd.f32 0.5, %v14991_v16  ;;  %v705_v61 = vmul.f32 0.029411765, %v660_v3  ;;  %v5411_v14 = vld [vmem:[#allocation3 + $0x18] sm:$0xff]  ;;  %v5409_v36 = vld [vmem:[#allocation3 + $0x8] sm:$0xff]  ;;  %vm15055_vm9 = vmand %vm15023_vm14, %vm1317_vm8 }
 0x1f3   : > { %4307 = vst.msk [vmem:[#allocation3 + $0x150] sm:$0xff] %vm18984_vm6, %v4263_v44  ;;  %v12672_v40 = vpop.f32.mrb[124].mxu1  ;;  %v4264_v38 = vadd.f32 %v12635_v45, %v4220_v26  ;;  %v4165_v52 = vpop.f32.mrb[127].mxu0  ;;  %v4831_v45 = vld [vmem:[#allocation3 + $0x130] sm:$0xff]  ;;  %vm1234_vm12 = vcmp.ge.f32.partialorder %v15016_v48, 1.0  ;;  %vm15067_vm1 = vmand %vm1102_vm13, %vm1146_vm11  ;;  %v15072_v29 = vsub.f32 %v14847_v63, %v1012_v50  ;;  %vm1100_vm10 = vcmp.ge.f32.partialorder %v14769_v31, 0.0 }
 0x1f4   : > { %v4871_v1 = vadd.f32 %v12672_v40, %v4827_v19  ;;  %4305 = vst.msk [vmem:[#allocation3 + $0x140] sm:$0xff] %vm18984_vm6, %v4261_v7  ;;  %v4746_v55 = vpop.f32.mrb[125].mxu1  ;;  %v4262_v32 = vadd.f32 %v4218_v20, %v4165_v52  ;;  %v927_v56 = vmul.f32 0.029411765, %v883_v21  ;;  %v15031_v40 = vadd.s32 64, %v14691_v41  ;;  %v4829_v52 = vld [vmem:[#allocation3 + $0x120] sm:$0xff]  ;;  %vm15092_vm11 = vmand %vm15055_vm9, %vm1405_vm2 }
 0x1f5   : > { %v4869_v15 = vadd.f32 %v4825_v42, %v4746_v55  ;;  %4308 = vst.msk [vmem:[#allocation3 + $0x158] sm:$0xff] %vm18984_vm6, %v4264_v38  ;;  %v12673_v12 = vpop.f32.mrb[126].mxu1  ;;  %v13226_v55 = vld [vmem:[%s18948_s2 + $0x50] sm:$0xff]   ;;  %v4832_v51 = vld [vmem:[#allocation3 + $0x138] sm:$0xff]  ;;  %v4830_v28 = vld [vmem:[#allocation3 + $0x128] sm:$0xff]  ;;  %vm1144_vm13 = vcmp.lt.f32.partialorder %v14769_v31, 2312.0 }
 0x1f6   : > { %4915 = vst.msk [vmem:[#allocation3 + $0x110] sm:$0xff] %vm18984_vm6, %v4871_v1  ;;  %v4872_v30 = vadd.f32 %v12673_v12, %v4828_v37  ;;  %4306 = vst.msk [vmem:[#allocation3 + $0x148] sm:$0xff] %vm18984_vm6, %v4262_v32  ;;  %v4749_v47 = vpop.f32.mrb[127].mxu1  ;;  %v15045_v1 = vfloor.f32 %v705_v61  ;;  %v971_v12 = vfloor.f32 %v927_v56  ;;  %12904 = vmatprep.subr.bf16.mxu0 %v13226_v55  ;;  %v572_v5 = vcvt.s32.f32 %v15031_v40 }
 0x1f7   : > { %4913 = vst.msk [vmem:[#allocation3 + $0x100] sm:$0xff] %vm18984_vm6, %v4869_v15  ;;  %v4870_v53 = vadd.f32 %v4826_v27, %v4749_v47  ;;  %v792_v15 = vmul.f32 34.0, %v14847_v63  ;;  %v15076_v47 = vadd.f32 %v14703_v33, %v574_v23  ;;  %12905 = vmatpush3.bf16.msra.mxu0 %v13226_v55  ;;  %v15086_v10 = vsel %vm15038_vm7, 1, %v13273_v22  ;;  %vm15103_vm8 = vmand %vm15067_vm1, %vm1234_vm12 }
 0x1f8   : > { %4916 = vst.msk [vmem:[#allocation3 + $0x118] sm:$0xff] %vm18984_vm6, %v4872_v30  ;;  %v12686_v11 = vpop.f32.mrb[128].mxu0  ;;  %v881_v30 = vadd.f32 0.5, %v15045_v1  ;;  %vm1410_vm14 = vcmp.ge.f32.partialorder %v15043_v49, 1.0  ;;  %vm1322_vm2 = vcmp.le.f32.partialorder %v15016_v48, 32.0  ;;  %vm1498_vm7 = vcmp.le.f32.partialorder %v15043_v49, 32.0  ;;  %vm15116_vm9 = vmand %vm1100_vm10, %vm1144_vm13 }
 0x1f9   : > { %4914 = vst.msk [vmem:[#allocation3 + $0x108] sm:$0xff] %vm18984_vm6, %v4870_v53  ;;  %v5454_v39 = vadd.f32 %v12686_v11, %v5410_v6  ;;  %v5233_v35 = vpop.f32.mrb[129].mxu0  ;;  %v665_v60 = vadd.f32 0.5, %v15076_v47  ;;  %v5412_v11 = vld [vmem:[#allocation3 + $0x20] sm:$0xff]  ;;  %v1015_v34 = vmul.f32 34.0, %v971_v12  ;;  %v15110_v59 = vsub.f32 %v14769_v31, %v792_v15  ;;  %vm15129_vm1 = vmand %vm15092_vm11, %vm1493_vm15  ;;  %v13227_v15 = vld [vmem:[%s18948_s2 + $0x58] sm:$0xff]  }
 0x1fa   : > { %v5452_v0 = vadd.f32 %v5408_v57, %v5233_v35  ;;  %v12687_v44 = vpop.f32.mrb[130].mxu0  ;;  %v925_v53 = vmul.f32 0.029411765, %v881_v30  ;;  %v5415_v57 = vld [vmem:[#allocation3 + $0x38] sm:$0xff]  ;;  %vm1232_vm12 = vcmp.ge.f32.partialorder %v15072_v29, 1.0  ;;  %v15122_v61 = vadd.s32 88, %v14691_v41  ;;  %vm15142_vm15 = vmand %vm15103_vm8, %vm1322_vm2  ;;  %12906 = vmatprep.subr.bf16.mxu0 %v13227_v15 }
 0x1fb   : > { %v12676_v7 = vpop.f32.mrb[128].mxu1  ;;  %5498 = vst.msk [vmem:[#allocation3 + $0x10] sm:$0xff] %vm18984_vm6, %v5454_v39  ;;  %v5455_v26 = vadd.f32 %v12687_v44, %v5411_v14  ;;  %v5236_v62 = vpop.f32.mrb[131].mxu0  ;;  %v4835_v44 = vld [vmem:[#allocation3 + $0x150] sm:$0xff]  ;;  %vm1103_vm10 = vcmp.ge.f32.partialorder %v14917_v25, 0.0  ;;  %v15135_v23 = vadd.f32 %v14703_v33, %v572_v5  ;;  %vm1147_vm13 = vcmp.lt.f32.partialorder %v14917_v25, 2312.0  ;;  %vm15152_vm11 = vmand %vm15116_vm9, %vm1232_vm12  ;;  %12907 = vmatpush3.bf16.msra.mxu0 %v13227_v15 }
 0x1fc   : > { %v4875_v19 = vadd.f32 %v12676_v7, %v4831_v45  ;;  %v4762_v38 = vpop.f32.mrb[129].mxu1  ;;  %5496 = vst.msk [vmem:[#allocation3] sm:$0xff] %vm18984_vm6, %v5452_v0  ;;  %v5453_v20 = vadd.f32 %v5409_v36, %v5236_v62  ;;  %v969_v50 = vfloor.f32 %v925_v53  ;;  %v710_v56 = vmul.f32 0.029411765, %v665_v60  ;;  %vm15180_vm2 = vmand %vm15142_vm15, %vm1410_vm14  ;;  %v5418_v30 = vld [vmem:[#allocation3 + $0x50] sm:$0xff] }
 0x1fd   : > { %v4873_v42 = vadd.f32 %v4829_v52, %v4762_v38  ;;  %v12677_v32 = vpop.f32.mrb[130].mxu1  ;;  %5499 = vst.msk [vmem:[#allocation3 + $0x18] sm:$0xff] %vm18984_vm6, %v5455_v26  ;;  %v4833_v26 = vld [vmem:[#allocation3 + $0x140] sm:$0xff]  ;;  %v4836_v38 = vld [vmem:[#allocation3 + $0x158] sm:$0xff]  ;;  %vm1320_vm8 = vcmp.le.f32.partialorder %v15072_v29, 32.0  ;;  %v15158_v52 = vsub.f32 %v14991_v16, %v1015_v34  ;;  %v575_v18 = vcvt.s32.f32 %v15122_v61  ;;  %vm15204_vm15 = vmand %vm1103_vm10, %vm1147_vm13 }
 0x1fe   : > { %4919 = vst.msk [vmem:[#allocation3 + $0x130] sm:$0xff] %vm18984_vm6, %v4875_v19  ;;  %v4876_v37 = vadd.f32 %v12677_v32, %v4832_v51  ;;  %v4765_v8 = vpop.f32.mrb[131].mxu1  ;;  %5497 = vst.msk [vmem:[#allocation3 + $0x8] sm:$0xff] %vm18984_vm6, %v5453_v20  ;;  %v663_v20 = vadd.f32 0.5, %v15135_v23  ;;  %v795_v32 = vmul.f32 34.0, %v14991_v16  ;;  %v15164_v51 = vfloor.f32 %v710_v56 }
 0x1ff   : > { %4917 = vst.msk [vmem:[#allocation3 + $0x120] sm:$0xff] %vm18984_vm6, %v4873_v42  ;;  %v4874_v27 = vadd.f32 %v4830_v28, %v4765_v8  ;;  %v4834_v42 = vld [vmem:[#allocation3 + $0x148] sm:$0xff]  ;;  %v1013_v8 = vmul.f32 34.0, %v969_v50  ;;  %vm15189_vm9 = vmand %vm15152_vm11, %vm1320_vm8  ;;  %vm1408_vm12 = vcmp.ge.f32.partialorder %v15110_v59, 1.0  ;;  %vm1496_vm14 = vcmp.le.f32.partialorder %v15110_v59, 32.0  ;;  %v5431_v59 = vld [vmem:[#allocation3 + $0xb8] sm:$0xff] }
 0x200   : > { %4920 = vst.msk [vmem:[#allocation3 + $0x138] sm:$0xff] %vm18984_vm6, %v4876_v37  ;;  %v12690_v63 = vpop.f32.mrb[132].mxu0  ;;  %v15174_v37 = vsel %vm15129_vm1, 1, %v13273_v22  ;;  %v708_v28 = vmul.f32 0.029411765, %v663_v20  ;;  %vm1101_vm1 = vcmp.ge.f32.partialorder %v14964_v4, 0.0  ;;  %vm15215_vm5 = vmand %vm15180_vm2, %vm1498_vm7  ;;  %v15220_v34 = vsub.f32 %v14917_v25, %v795_v32 }
 0x201   : > { %4918 = vst.msk [vmem:[#allocation3 + $0x128] sm:$0xff] %vm18984_vm6, %v4874_v27  ;;  %v5458_v3 = vadd.f32 %v12690_v63, %v5414_v17  ;;  %v5249_v43 = vpop.f32.mrb[133].mxu0  ;;  %v15197_v17 = vadd.s32 72, %v14691_v41  ;;  %v5416_v63 = vld [vmem:[#allocation3 + $0x40] sm:$0xff]  ;;  %vm1235_vm11 = vcmp.ge.f32.partialorder %v15158_v52, 1.0  ;;  %vm1145_vm8 = vcmp.lt.f32.partialorder %v14964_v4, 2312.0  ;;  %vm15232_vm7 = vmand %vm15189_vm9, %vm1408_vm12 }
 0x202   : > { %v5456_v39 = vadd.f32 %v5412_v11, %v5249_v43  ;;  %v12691_v35 = vpop.f32.mrb[134].mxu0  ;;  %v886_v53 = vadd.f32 0.5, %v15164_v51  ;;  %v5419_v43 = vld [vmem:[#allocation3 + $0x58] sm:$0xff]  ;;  %v5417_v11 = vld [vmem:[#allocation3 + $0x48] sm:$0xff]  ;;  %v5914_v21 = vld [vmem:[#allocation3 + $0x10] sm:$0xff]  ;;  %v15237_v25 = vsub.f32 %v15045_v1, %v1013_v8  ;;  %vm1323_vm13 = vcmp.le.f32.partialorder %v15158_v52, 32.0 }
 0x203   : > { %v12680_v0 = vpop.f32.mrb[132].mxu1  ;;  %5502 = vst.msk [vmem:[#allocation3 + $0x30] sm:$0xff] %vm18984_vm6, %v5458_v3  ;;  %v5459_v14 = vadd.f32 %v12691_v35, %v5415_v57  ;;  %v5252_v36 = vpop.f32.mrb[135].mxu0  ;;  %v15225_v35 = vadd.f32 %v14703_v33, %v575_v18  ;;  %v5912_v31 = vld [vmem:[#allocation3] sm:$0xff]  ;;  %vm15247_vm10 = vmand %vm15204_vm15, %vm1235_vm11  ;;  %v15257_v56 = vsel %vm15215_vm5, 1, %v13273_v22  ;;  %vm1411_vm5 = vcmp.ge.f32.partialorder %v15220_v34, 1.0 }
 0x204   : > { %v4879_v7 = vadd.f32 %v12680_v0, %v4835_v44  ;;  %v4778_v45 = vpop.f32.mrb[133].mxu1  ;;  %5500 = vst.msk [vmem:[#allocation3 + $0x20] sm:$0xff] %vm18984_vm6, %v5456_v39  ;;  %v5457_v62 = vadd.f32 %v5413_v9, %v5252_v36  ;;  %v15222_v39 = vfloor.f32 %v708_v28  ;;  %v930_v44 = vmul.f32 0.029411765, %v886_v53  ;;  %v5915_v24 = vld [vmem:[#allocation3 + $0x18] sm:$0xff]  ;;  %vm15266_vm2 = vmand %vm15232_vm7, %vm1496_vm14  ;;  %v5422_v32 = vld [vmem:[#allocation3 + $0x70] sm:$0xff] }
 0x205   : > { %v4877_v40 = vadd.f32 %v4833_v26, %v4778_v45  ;;  %v12681_v19 = vpop.f32.mrb[134].mxu1  ;;  %5503 = vst.msk [vmem:[#allocation3 + $0x38] sm:$0xff] %vm18984_vm6, %v5459_v14  ;;  %v15240_v14 = vadd.s32 112, %v14691_v41  ;;  %v573_v45 = vcvt.s32.f32 %v15197_v17  ;;  %v5913_v20 = vld [vmem:[#allocation3 + $0x8] sm:$0xff]  ;;  %vm15278_vm9 = vmand %vm15247_vm10, %vm1323_vm13  ;;  %vm1499_vm12 = vcmp.le.f32.partialorder %v15220_v34, 32.0  ;;  %v5420_v27 = vld [vmem:[#allocation3 + $0x60] sm:$0xff] }
 0x206   : > { %4923 = vst.msk [vmem:[#allocation3 + $0x150] sm:$0xff] %vm18984_vm6, %v4879_v7  ;;  %v4880_v46 = vadd.f32 %v12681_v19, %v4836_v38  ;;  %v4781_v55 = vpop.f32.mrb[135].mxu1  ;;  %5501 = vst.msk [vmem:[#allocation3 + $0x28] sm:$0xff] %vm18984_vm6, %v5457_v62  ;;  %v974_v19 = vfloor.f32 %v930_v44  ;;  %vm1233_vm14 = vcmp.ge.f32.partialorder %v15237_v25, 1.0  ;;  %v15301_v17 = vsel %vm15266_vm2, 1, %v13273_v22  ;;  %v5424_v52 = vld [vmem:[#allocation3 + $0x80] sm:$0xff] }
 0x207   : > { %4921 = vst.msk [vmem:[#allocation3 + $0x140] sm:$0xff] %vm18984_vm6, %v4877_v40  ;;  %v4878_v12 = vadd.f32 %v4834_v42, %v4781_v55  ;;  %v793_v40 = vmul.f32 34.0, %v15045_v1  ;;  %v884_v1 = vadd.f32 0.5, %v15222_v39  ;;  %v666_v55 = vadd.f32 0.5, %v15225_v35  ;;  %vm15290_vm15 = vmand %vm1101_vm1, %vm1145_vm8  ;;  %v5430_v34 = vld [vmem:[#allocation3 + $0xb0] sm:$0xff] }
 0x208   : > { %4924 = vst.msk [vmem:[#allocation3 + $0x158] sm:$0xff] %vm18984_vm6, %v4880_v46  ;;  %v12694_v58 = vpop.f32.mrb[136].mxu0  ;;  %v578_v18 = vcvt.s32.f32 %v15240_v14  ;;  %v15295_v28 = vadd.f32 %v14703_v33, %v573_v45  ;;  %vm1106_vm1 = vcmp.ge.f32.partialorder %v15076_v47, 0.0  ;;  %vm15311_vm11 = vmand %vm15278_vm9, %vm1411_vm5  ;;  %vm1321_vm7 = vcmp.le.f32.partialorder %v15237_v25, 32.0 }
 0x209   : > { %4922 = vst.msk [vmem:[#allocation3 + $0x148] sm:$0xff] %vm18984_vm6, %v4878_v12  ;;  %v5462_v5 = vadd.f32 %v12694_v58, %v5418_v30  ;;  %v5265_v29 = vpop.f32.mrb[137].mxu0  ;;  %v1018_v12 = vmul.f32 34.0, %v974_v19  ;;  %v928_v16 = vmul.f32 0.029411765, %v884_v1  ;;  %vm15323_vm8 = vmand %vm15290_vm15, %vm1233_vm14  ;;  %vm1150_vm10 = vcmp.lt.f32.partialorder %v15076_v47, 2312.0 }
 0x20a   : > { %v5460_v60 = vadd.f32 %v5416_v63, %v5265_v29  ;;  %v12695_v3 = vpop.f32.mrb[138].mxu0  ;;  %v711_v8 = vmul.f32 0.029411765, %v666_v55  ;;  %vm15342_vm13 = vmand %vm15311_vm11, %vm1499_vm12  ;;  %vm1104_vm15 = vcmp.ge.f32.partialorder %v15135_v23, 0.0  ;;  %vm1148_vm11 = vcmp.lt.f32.partialorder %v15135_v23, 2312.0 }
 0x20b   : > { %5506 = vst.msk [vmem:[#allocation3 + $0x50] sm:$0xff] %vm18984_vm6, %v5462_v5  ;;  %v12732_v57 = vpop.f32.mrb[136].mxu1  ;;  %v5463_v61 = vadd.f32 %v12695_v3, %v5419_v43  ;;  %v5268_v49 = vpop.f32.mrb[139].mxu0  ;;  %v15304_v5 = vsub.f32 %v14964_v4, %v793_v40  ;;  %v664_v43 = vadd.f32 0.5, %v15295_v28  ;;  %v5916_v14 = vld [vmem:[#allocation3 + $0x20] sm:$0xff]  ;;  %vm15354_vm2 = vmand %vm15323_vm8, %vm1321_vm7 }
 0x20c   : > { %v5958_v36 = vadd.f32 %v12732_v57, %v5914_v21  ;;  %5504 = vst.msk [vmem:[#allocation3 + $0x40] sm:$0xff] %vm18984_vm6, %v5460_v60  ;;  %v5737_v9 = vpop.f32.mrb[137].mxu1  ;;  %v5461_v50 = vadd.f32 %v5417_v11, %v5268_v49  ;;  %v972_v60 = vfloor.f32 %v928_v16  ;;  %v15315_v3 = vfloor.f32 %v711_v8  ;;  %v5918_v11 = vld [vmem:[#allocation3 + $0x30] sm:$0xff]  ;;  %v5421_v21 = vld [vmem:[#allocation3 + $0x68] sm:$0xff]  ;;  %v5919_v45 = vld [vmem:[#allocation3 + $0x38] sm:$0xff] }
 0x20d   : > { %v5956_v26 = vadd.f32 %v5912_v31, %v5737_v9  ;;  %5507 = vst.msk [vmem:[#allocation3 + $0x58] sm:$0xff] %vm18984_vm6, %v5463_v61  ;;  %v12733_v62 = vpop.f32.mrb[138].mxu1  ;;  %v15330_v49 = vadd.f32 %v14703_v33, %v578_v18  ;;  %v798_v9 = vmul.f32 34.0, %v15164_v51  ;;  %v15335_v31 = vsub.f32 %v15164_v51, %v1018_v12  ;;  %vm15374_vm12 = vmand %vm1106_vm1, %vm1150_vm10 }
 0x20e   : > { %6002 = vst.msk [vmem:[#allocation3 + $0x10] sm:$0xff] %vm18984_vm6, %v5958_v36  ;;  %v5959_v38 = vadd.f32 %v12733_v62, %v5915_v24  ;;  %5505 = vst.msk [vmem:[#allocation3 + $0x48] sm:$0xff] %vm18984_vm6, %v5461_v50  ;;  %v5740_v48 = vpop.f32.mrb[139].mxu1  ;;  %v796_v62 = vmul.f32 34.0, %v15222_v39  ;;  %v887_v24 = vadd.f32 0.5, %v15315_v3  ;;  %vm1409_vm5 = vcmp.ge.f32.partialorder %v15304_v5, 1.0 }
 0x20f   : > { %6000 = vst.msk [vmem:[#allocation3] sm:$0xff] %vm18984_vm6, %v5956_v26  ;;  %v5957_v42 = vadd.f32 %v5913_v20, %v5740_v48  ;;  %v709_v40 = vmul.f32 0.029411765, %v664_v43  ;;  %vm1497_vm9 = vcmp.le.f32.partialorder %v15304_v5, 32.0  ;;  %v1016_v48 = vmul.f32 34.0, %v972_v60  ;;  %vm15386_vm8 = vmand %vm15354_vm2, %vm1409_vm5 }
 0x210   : > { %6003 = vst.msk [vmem:[#allocation3 + $0x18] sm:$0xff] %vm18984_vm6, %v5959_v38  ;;  %v12698_v15 = vpop.f32.mrb[140].mxu0  ;;  %v5917_v38 = vld [vmem:[#allocation3 + $0x28] sm:$0xff]  ;;  %v931_v46 = vmul.f32 0.029411765, %v887_v24  ;;  %v669_v55 = vadd.f32 0.5, %v15330_v49  ;;  %v15391_v16 = vsub.f32 %v15076_v47, %v798_v9  ;;  %v15394_v8 = vsub.f32 %v15135_v23, %v796_v62 }
 0x211   : > { %6001 = vst.msk [vmem:[#allocation3 + $0x8] sm:$0xff] %vm18984_vm6, %v5957_v42  ;;  %v5466_v58 = vadd.f32 %v12698_v15, %v5422_v32  ;;  %v5281_v30 = vpop.f32.mrb[141].mxu0  ;;  %v15361_v1 = vfloor.f32 %v709_v40  ;;  %v5426_v42 = vld [vmem:[#allocation3 + $0x90] sm:$0xff]  ;;  %v15368_v32 = vsel %vm15342_vm13, 1, %v13273_v22  ;;  %vm1238_vm14 = vcmp.ge.f32.partialorder %v15335_v31, 1.0  ;;  %v5425_v47 = vld [vmem:[#allocation3 + $0x88] sm:$0xff]  ;;  %vm15416_vm13 = vmand %vm15386_vm8, %vm1497_vm9 }
 0x212   : > { %v5464_v29 = vadd.f32 %v5420_v27, %v5281_v30  ;;  %v12699_v63 = vpop.f32.mrb[142].mxu0  ;;  %vm1107_vm1 = vcmp.ge.f32.partialorder %v15225_v35, 0.0  ;;  %v5922_v60 = vld [vmem:[#allocation3 + $0x50] sm:$0xff]  ;;  %vm15403_vm7 = vmand %vm15374_vm12, %vm1238_vm14  ;;  %vm1326_vm10 = vcmp.le.f32.partialorder %v15335_v31, 32.0  ;;  %vm1151_vm2 = vcmp.lt.f32.partialorder %v15225_v35, 2312.0 }
 0x213   : > { %5510 = vst.msk [vmem:[#allocation3 + $0x70] sm:$0xff] %vm18984_vm6, %v5466_v58  ;;  %v12736_v4 = vpop.f32.mrb[140].mxu1  ;;  %v5467_v6 = vadd.f32 %v12699_v63, %v5423_v2  ;;  %v5284_v57 = vpop.f32.mrb[143].mxu0  ;;  %v975_v58 = vfloor.f32 %v931_v46  ;;  %v885_v63 = vadd.f32 0.5, %v15361_v1  ;;  %v714_v2 = vmul.f32 0.029411765, %v669_v55  ;;  %vm15434_vm5 = vmand %vm15403_vm7, %vm1326_vm10 }
 0x214   : > { %v5962_v0 = vadd.f32 %v12736_v4, %v5918_v11  ;;  %5508 = vst.msk [vmem:[#allocation3 + $0x60] sm:$0xff] %vm18984_vm6, %v5464_v29  ;;  %v5753_v44 = vpop.f32.mrb[141].mxu1  ;;  %v5465_v36 = vadd.f32 %v5421_v21, %v5284_v57  ;;  %v5427_v29 = vld [vmem:[#allocation3 + $0x98] sm:$0xff]  ;;  %vm1414_vm9 = vcmp.ge.f32.partialorder %v15391_v16, 1.0  ;;  %vm1502_vm12 = vcmp.le.f32.partialorder %v15391_v16, 32.0  ;;  %vm15450_vm14 = vmand %vm1104_vm15, %vm1148_vm11 }
 0x215   : > { %v5960_v50 = vadd.f32 %v5916_v14, %v5753_v44  ;;  %5511 = vst.msk [vmem:[#allocation3 + $0x78] sm:$0xff] %vm18984_vm6, %v5467_v6  ;;  %v12737_v7 = vpop.f32.mrb[142].mxu1  ;;  %v15409_v6 = vsub.f32 %v15222_v39, %v1016_v48  ;;  %v1019_v57 = vmul.f32 34.0, %v975_v58  ;;  %v15426_v5 = vfloor.f32 %v714_v2  ;;  %v5921_v24 = vld [vmem:[#allocation3 + $0x48] sm:$0xff]  ;;  %vm15461_vm10 = vmand %vm1107_vm1, %vm1151_vm2  ;;  %v5434_v48 = vld [vmem:[#allocation3 + $0xd0] sm:$0xff] }
 0x216   : > { %6006 = vst.msk [vmem:[#allocation3 + $0x30] sm:$0xff] %vm18984_vm6, %v5962_v0  ;;  %v5963_v51 = vadd.f32 %v12737_v7, %v5919_v45  ;;  %5509 = vst.msk [vmem:[#allocation3 + $0x68] sm:$0xff] %vm18984_vm6, %v5465_v36  ;;  %v5756_v19 = vpop.f32.mrb[143].mxu1  ;;  %v5920_v0 = vld [vmem:[#allocation3 + $0x40] sm:$0xff]  ;;  %v929_v36 = vmul.f32 0.029411765, %v885_v63 }
 0x217   : > { %6004 = vst.msk [vmem:[#allocation3 + $0x20] sm:$0xff] %vm18984_vm6, %v5960_v50  ;;  %v5961_v20 = vadd.f32 %v5917_v38, %v5756_v19  ;;  %v5923_v50 = vld [vmem:[#allocation3 + $0x58] sm:$0xff]  ;;  %v799_v7 = vmul.f32 34.0, %v15315_v3  ;;  %v15424_v45 = vsub.f32 %v15315_v3, %v1019_v57  ;;  %v15444_v19 = vsel %vm15416_vm13, 1, %v13273_v22  ;;  %vm15473_vm11 = vmand %vm15434_vm5, %vm1414_vm9 }
 0x218   : > { %6007 = vst.msk [vmem:[#allocation3 + $0x38] sm:$0xff] %vm18984_vm6, %v5963_v51  ;;  %v12702_v25 = vpop.f32.mrb[144].mxu0  ;;  %v973_v3 = vfloor.f32 %v929_v36  ;;  %vm1236_vm8 = vcmp.ge.f32.partialorder %v15409_v6, 1.0  ;;  %vm1412_vm7 = vcmp.ge.f32.partialorder %v15394_v8, 1.0  ;;  %v532_v46 = vadd.s32 96, %v14691_v41  ;;  %vm15514_vm9 = vmand %vm15473_vm11, %vm1502_vm12 }
 0x219   : > { %6005 = vst.msk [vmem:[#allocation3 + $0x28] sm:$0xff] %vm18984_vm6, %v5961_v20  ;;  %v5470_v18 = vadd.f32 %v12702_v25, %v5426_v42  ;;  %v5297_v15 = vpop.f32.mrb[145].mxu0  ;;  %vm1239_vm15 = vcmp.ge.f32.partialorder %v15424_v45, 1.0  ;;  %v890_v20 = vadd.f32 0.5, %v15426_v5  ;;  %v5428_v42 = vld [vmem:[#allocation3 + $0xa0] sm:$0xff]  ;;  %v15482_v12 = vadd.s32 104, %v14691_v41  ;;  %vm15488_vm1 = vmand %vm15450_vm14, %vm1236_vm8 }
 0x21a   : > { %v5468_v30 = vadd.f32 %v5424_v52, %v5297_v15  ;;  %v12703_v27 = vpop.f32.mrb[146].mxu0  ;;  %v1017_v23 = vmul.f32 34.0, %v973_v3  ;;  %v15478_v15 = vsub.f32 %v15225_v35, %v799_v7  ;;  %v535_v52 = vadd.s32 120, %v14691_v41  ;;  %v5926_v2 = vld [vmem:[#allocation3 + $0x70] sm:$0xff]  ;;  %vm15502_vm5 = vmand %vm15461_vm10, %vm1239_vm15 }
 0x21b   : > { %5514 = vst.msk [vmem:[#allocation3 + $0x90] sm:$0xff] %vm18984_vm6, %v5470_v18  ;;  %v12740_v53 = vpop.f32.mrb[144].mxu1  ;;  %v5471_v43 = vadd.f32 %v12703_v27, %v5427_v29  ;;  %v5300_v4 = vpop.f32.mrb[147].mxu0  ;;  %vm1324_vm13 = vcmp.le.f32.partialorder %v15409_v6, 32.0  ;;  %vm1327_vm2 = vcmp.le.f32.partialorder %v15424_v45, 32.0  ;;  %v13228_v29 = vld [vmem:[%s18948_s2 + $0x20] sm:$0xff]   ;;  %v576_v11 = vcvt.s32.f32 %v532_v46 }
 0x21c   : > { %v5966_v21 = vadd.f32 %v12740_v53, %v5922_v60  ;;  %5512 = vst.msk [vmem:[#allocation3 + $0x80] sm:$0xff] %vm18984_vm6, %v5468_v30  ;;  %v5769_v61 = vpop.f32.mrb[145].mxu1  ;;  %v5469_v44 = vadd.f32 %v5425_v47, %v5300_v4  ;;  %v934_v35 = vmul.f32 0.029411765, %v890_v20  ;;  %v15507_v47 = vsub.f32 %v15361_v1, %v1017_v23  ;;  %12860 = vmatprep.subr.bf16.mxu1 %v13228_v29  ;;  %vm15525_vm10 = vmand %vm15488_vm1, %vm1324_vm13  ;;  %v5438_v6 = vld [vmem:[#allocation3 + $0xf0] sm:$0xff] }
 0x21d   : > { %v5964_v39 = vadd.f32 %v5920_v0, %v5769_v61  ;;  %5515 = vst.msk [vmem:[#allocation3 + $0x98] sm:$0xff] %vm18984_vm6, %v5471_v43  ;;  %v12741_v9 = vpop.f32.mrb[146].mxu1  ;;  %v5429_v43 = vld [vmem:[#allocation3 + $0xa8] sm:$0xff]  ;;  %v579_v57 = vcvt.s32.f32 %v535_v52  ;;  %v5924_v0 = vld [vmem:[#allocation3 + $0x60] sm:$0xff]  ;;  %vm1105_vm14 = vcmp.ge.f32.partialorder %v15295_v28, 0.0  ;;  %vm1149_vm8 = vcmp.lt.f32.partialorder %v15295_v28, 2312.0  ;;  %vm15537_vm12 = vmand %vm15502_vm5, %vm1327_vm2 }
 0x21e   : > { %6010 = vst.msk [vmem:[#allocation3 + $0x50] sm:$0xff] %vm18984_vm6, %v5966_v21  ;;  %v5967_v26 = vadd.f32 %v12741_v9, %v5923_v50  ;;  %5513 = vst.msk [vmem:[#allocation3 + $0x88] sm:$0xff] %vm18984_vm6, %v5469_v44  ;;  %v5772_v62 = vpop.f32.mrb[147].mxu1  ;;  %v5927_v9 = vld [vmem:[#allocation3 + $0x78] sm:$0xff]  ;;  %v797_v50 = vmul.f32 34.0, %v15361_v1  ;;  %v978_v7 = vfloor.f32 %v934_v35  ;;  %v5925_v40 = vld [vmem:[#allocation3 + $0x68] sm:$0xff]  ;;  %v15544_v3 = vadd.f32 %v14703_v33, %v576_v11 }
 0x21f   : > { %6008 = vst.msk [vmem:[#allocation3 + $0x40] sm:$0xff] %vm18984_vm6, %v5964_v39  ;;  %v5965_v51 = vadd.f32 %v5921_v24, %v5772_v62  ;;  %vm1415_vm15 = vcmp.ge.f32.partialorder %v15478_v15, 1.0  ;;  %v802_v1 = vmul.f32 34.0, %v15426_v5  ;;  %vm15551_vm11 = vmand %vm1105_vm14, %vm1149_vm8  ;;  %vm1237_vm1 = vcmp.ge.f32.partialorder %v15507_v47, 1.0 }
 0x220   : > { %6011 = vst.msk [vmem:[#allocation3 + $0x58] sm:$0xff] %vm18984_vm6, %v5967_v26  ;;  %v12706_v38 = vpop.f32.mrb[148].mxu0  ;;  %v577_v26 = vcvt.s32.f32 %v15482_v12  ;;  %v1022_v31 = vmul.f32 34.0, %v978_v7  ;;  %vm15564_vm13 = vmand %vm15525_vm10, %vm1412_vm7  ;;  %vm1500_vm2 = vcmp.le.f32.partialorder %v15394_v8, 32.0  ;;  %vm1503_vm5 = vcmp.le.f32.partialorder %v15478_v15, 32.0 }
 0x221   : > { %6009 = vst.msk [vmem:[#allocation3 + $0x48] sm:$0xff] %vm18984_vm6, %v5965_v51  ;;  %v5474_v55 = vadd.f32 %v12706_v38, %v5430_v34  ;;  %v5313_v25 = vpop.f32.mrb[149].mxu0  ;;  %v15557_v38 = vadd.f32 %v14703_v33, %v579_v57  ;;  %vm1110_vm14 = vcmp.ge.f32.partialorder %v15330_v49, 0.0  ;;  %v667_v20 = vadd.f32 0.5, %v15544_v3  ;;  %vm15577_vm7 = vmand %vm15537_vm12, %vm1415_vm15 }
 0x222   : > { %v5472_v58 = vadd.f32 %v5428_v42, %v5313_v25  ;;  %v12707_v30 = vpop.f32.mrb[150].mxu0  ;;  %v5432_v25 = vld [vmem:[#allocation3 + $0xc0] sm:$0xff]  ;;  %v15586_v52 = vadd.f32 %v14703_v33, %v577_v26  ;;  %vm15592_vm8 = vmand %vm15551_vm11, %vm1237_vm1  ;;  %vm1325_vm10 = vcmp.le.f32.partialorder %v15507_v47, 32.0  ;;  %v15610_v4 = vsub.f32 %v15330_v49, %v802_v1 }
 0x223   : > { %5518 = vst.msk [vmem:[#allocation3 + $0xb0] sm:$0xff] %vm18984_vm6, %v5474_v55  ;;  %v12744_v63 = vpop.f32.mrb[148].mxu1  ;;  %v5475_v53 = vadd.f32 %v12707_v30, %v5431_v59  ;;  %v5316_v60 = vpop.f32.mrb[151].mxu0  ;;  %v15582_v59 = vsub.f32 %v15295_v28, %v797_v50  ;;  %v670_v18 = vadd.f32 0.5, %v15557_v38  ;;  %v5435_v30 = vld [vmem:[#allocation3 + $0xd8] sm:$0xff]  ;;  %v15598_v28 = vsub.f32 %v15426_v5, %v1022_v31  ;;  %vm15605_vm12 = vmand %vm15564_vm13, %vm1500_vm2 }
 0x224   : > { %v5970_v21 = vadd.f32 %v12744_v63, %v5926_v2  ;;  %5516 = vst.msk [vmem:[#allocation3 + $0xa0] sm:$0xff] %vm18984_vm6, %v5472_v58  ;;  %v5785_v61 = vpop.f32.mrb[149].mxu1  ;;  %v5473_v44 = vadd.f32 %v5429_v43, %v5316_v60  ;;  %v712_v35 = vmul.f32 0.029411765, %v667_v20  ;;  %v5930_v63 = vld [vmem:[#allocation3 + $0x90] sm:$0xff]  ;;  %v5433_v60 = vld [vmem:[#allocation3 + $0xc8] sm:$0xff]  ;;  %vm15621_vm11 = vmand %vm15577_vm7, %vm1503_vm5 }
 0x225   : > { %v5968_v36 = vadd.f32 %v5924_v0, %v5785_v61  ;;  %5519 = vst.msk [vmem:[#allocation3 + $0xb8] sm:$0xff] %vm18984_vm6, %v5475_v53  ;;  %v12745_v39 = vpop.f32.mrb[150].mxu1  ;;  %vm1154_vm15 = vcmp.lt.f32.partialorder %v15330_v49, 2312.0  ;;  %v15614_v5 = vadd.s32 144, %v14691_v41  ;;  %v15631_v16 = vsel %vm15514_vm9, 1, %v13273_v22  ;;  %vm15637_vm1 = vmand %vm15592_vm8, %vm1325_vm10  ;;  %v5929_v26 = vld [vmem:[#allocation3 + $0x88] sm:$0xff] }
 0x226   : > { %6014 = vst.msk [vmem:[#allocation3 + $0x70] sm:$0xff] %vm18984_vm6, %v5970_v21  ;;  %v5971_v62 = vadd.f32 %v12745_v39, %v5927_v9  ;;  %5517 = vst.msk [vmem:[#allocation3 + $0xa8] sm:$0xff] %vm18984_vm6, %v5473_v44  ;;  %v5788_v24 = vpop.f32.mrb[151].mxu1  ;;  %v5928_v21 = vld [vmem:[#allocation3 + $0x80] sm:$0xff]  ;;  %v15625_v0 = vfloor.f32 %v712_v35  ;;  %v715_v44 = vmul.f32 0.029411765, %v670_v18 }
 0x227   : > { %6012 = vst.msk [vmem:[#allocation3 + $0x60] sm:$0xff] %vm18984_vm6, %v5968_v36  ;;  %v5969_v51 = vadd.f32 %v5925_v40, %v5788_v24  ;;  %v5931_v9 = vld [vmem:[#allocation3 + $0x98] sm:$0xff]  ;;  %vm1413_vm13 = vcmp.ge.f32.partialorder %v15582_v59, 1.0  ;;  %v668_v50 = vadd.f32 0.5, %v15586_v52  ;;  %vm15649_vm9 = vmand %vm1110_vm14, %vm1154_vm15  ;;  %vm1242_vm2 = vcmp.ge.f32.partialorder %v15598_v28, 1.0 }
 0x228   : > { %6015 = vst.msk [vmem:[#allocation3 + $0x78] sm:$0xff] %vm18984_vm6, %v5971_v62  ;;  %v12710_v34 = vpop.f32.mrb[152].mxu0  ;;  %v888_v62 = vadd.f32 0.5, %v15625_v0  ;;  %v15655_v24 = vfloor.f32 %v715_v44  ;;  %v15661_v1 = vsel %vm15605_vm12, 1, %v13273_v22  ;;  %v15668_v31 = vsel %vm15621_vm11, 1, %v13273_v22  ;;  %vm15674_vm5 = vmand %vm15637_vm1, %vm1413_vm13 }
 0x229   : > { %6013 = vst.msk [vmem:[#allocation3 + $0x68] sm:$0xff] %vm18984_vm6, %v5969_v51  ;;  %v5478_v46 = vadd.f32 %v12710_v34, %v5434_v48  ;;  %v5329_v55 = vpop.f32.mrb[153].mxu0  ;;  %v713_v49 = vmul.f32 0.029411765, %v668_v50  ;;  %v582_v51 = vcvt.s32.f32 %v15614_v5  ;;  %vm1501_vm14 = vcmp.le.f32.partialorder %v15582_v59, 32.0  ;;  %vm15685_vm8 = vmand %vm15649_vm9, %vm1242_vm2  ;;  %v5442_v34 = vld [vmem:[#allocation3 + $0x110] sm:$0xff] }
 0x22a   : > { %v5476_v12 = vadd.f32 %v5432_v25, %v5329_v55  ;;  %v12711_v58 = vpop.f32.mrb[154].mxu0  ;;  %vm1418_vm7 = vcmp.ge.f32.partialorder %v15610_v4, 1.0  ;;  %v932_v48 = vmul.f32 0.029411765, %v888_v62  ;;  %vm1330_vm10 = vcmp.le.f32.partialorder %v15598_v28, 32.0  ;;  %vm15700_vm11 = vmand %vm15674_vm5, %vm1501_vm14  ;;  %v5440_v55 = vld [vmem:[#allocation3 + $0x100] sm:$0xff] }
 0x22b   : > { %5522 = vst.msk [vmem:[#allocation3 + $0xd0] sm:$0xff] %vm18984_vm6, %v5478_v46  ;;  %v12748_v29 = vpop.f32.mrb[152].mxu1  ;;  %v5479_v2 = vadd.f32 %v12711_v58, %v5435_v30  ;;  %v5332_v53 = vpop.f32.mrb[155].mxu0  ;;  %v5436_v46 = vld [vmem:[#allocation3 + $0xe0] sm:$0xff]  ;;  %v891_v25 = vadd.f32 0.5, %v15655_v24  ;;  %v15691_v42 = vfloor.f32 %v713_v49  ;;  %v5439_v58 = vld [vmem:[#allocation3 + $0xf8] sm:$0xff]  ;;  %v15706_v43 = vadd.f32 %v14703_v33, %v582_v51  ;;  %vm15713_vm13 = vmand %vm15685_vm8, %vm1330_vm10 }
 0x22c   : > { %v5974_v11 = vadd.f32 %v12748_v29, %v5930_v63  ;;  %5520 = vst.msk [vmem:[#allocation3 + $0xc0] sm:$0xff] %vm18984_vm6, %v5476_v12  ;;  %v5801_v57 = vpop.f32.mrb[153].mxu1  ;;  %v5477_v8 = vadd.f32 %v5433_v60, %v5332_v53  ;;  %v5437_v30 = vld [vmem:[#allocation3 + $0xe8] sm:$0xff]  ;;  %vm1506_vm12 = vcmp.le.f32.partialorder %v15610_v4, 32.0  ;;  %v976_v27 = vfloor.f32 %v932_v48  ;;  %v5934_v29 = vld [vmem:[#allocation3 + $0xb0] sm:$0xff]  ;;  %vm15735_vm9 = vmand %vm15713_vm13, %vm1418_vm7 }
 0x22d   : > { %v5972_v36 = vadd.f32 %v5928_v21, %v5801_v57  ;;  %5523 = vst.msk [vmem:[#allocation3 + $0xd8] sm:$0xff] %vm18984_vm6, %v5479_v2  ;;  %v12749_v39 = vpop.f32.mrb[154].mxu1  ;;  %vm1108_vm15 = vcmp.ge.f32.partialorder %v15544_v3, 0.0  ;;  %vm1152_vm1 = vcmp.lt.f32.partialorder %v15544_v3, 2312.0  ;;  %v935_v60 = vmul.f32 0.029411765, %v891_v25  ;;  %vm15760_vm10 = vmand %vm15735_vm9, %vm1506_vm12 }
 0x22e   : > { %6018 = vst.msk [vmem:[#allocation3 + $0x90] sm:$0xff] %vm18984_vm6, %v5974_v11  ;;  %v5975_v7 = vadd.f32 %v12749_v39, %v5931_v9  ;;  %5521 = vst.msk [vmem:[#allocation3 + $0xc8] sm:$0xff] %vm18984_vm6, %v5477_v8  ;;  %v5804_v14 = vpop.f32.mrb[155].mxu1  ;;  %v5932_v57 = vld [vmem:[#allocation3 + $0xa0] sm:$0xff]  ;;  %v1020_v8 = vmul.f32 34.0, %v976_v27  ;;  %v889_v61 = vadd.f32 0.5, %v15691_v42 }
 0x22f   : > { %6016 = vst.msk [vmem:[#allocation3 + $0x80] sm:$0xff] %vm18984_vm6, %v5972_v36  ;;  %v5973_v40 = vadd.f32 %v5929_v26, %v5804_v14  ;;  %v5935_v39 = vld [vmem:[#allocation3 + $0xb8] sm:$0xff]  ;;  %v800_v9 = vmul.f32 34.0, %v15625_v0  ;;  %v979_v15 = vfloor.f32 %v935_v60  ;;  %v536_v50 = vadd.s32 128, %v14691_v41  ;;  %v5933_v14 = vld [vmem:[#allocation3 + $0xa8] sm:$0xff]  ;;  %vm15745_vm2 = vmand %vm1108_vm15, %vm1152_vm1 }
 0x230   : > { %6019 = vst.msk [vmem:[#allocation3 + $0x98] sm:$0xff] %vm18984_vm6, %v5975_v7  ;;  %v12714_v45 = vpop.f32.mrb[156].mxu0  ;;  %v1064_v26 = vsub.f32 %v15625_v0, %v1020_v8  ;;  %v803_v47 = vmul.f32 34.0, %v15655_v24  ;;  %v933_v62 = vmul.f32 0.029411765, %v889_v61  ;;  %v673_v51 = vadd.f32 0.5, %v15706_v43 }
 0x231   : > { %6017 = vst.msk [vmem:[#allocation3 + $0x88] sm:$0xff] %vm18984_vm6, %v5973_v40  ;;  %v5482_v23 = vadd.f32 %v12714_v45, %v5438_v6  ;;  %v5345_v20 = vpop.f32.mrb[157].mxu0  ;;  %v15729_v6 = vsel %vm15700_vm11, 1, %v13273_v22  ;;  %v1023_v0 = vmul.f32 34.0, %v979_v15  ;;  %vm1111_vm14 = vcmp.ge.f32.partialorder %v15557_v38, 0.0  ;;  %v5441_v4 = vld [vmem:[#allocation3 + $0x108] sm:$0xff] }
 0x232   : > { %v5480_v18 = vadd.f32 %v5436_v46, %v5345_v20  ;;  %v12715_v12 = vpop.f32.mrb[158].mxu0  ;;  %vm1240_vm5 = vcmp.ge.f32.partialorder %v1064_v26, 1.0  ;;  %vm1155_vm7 = vcmp.lt.f32.partialorder %v15557_v38, 2312.0  ;;  %v15753_v25 = vsub.f32 %v15544_v3, %v800_v9 }
 0x233   : > { %5526 = vst.msk [vmem:[#allocation3 + $0xf0] sm:$0xff] %vm18984_vm6, %v5482_v23  ;;  %v12752_v35 = vpop.f32.mrb[156].mxu1  ;;  %v5483_v63 = vadd.f32 %v12715_v12, %v5439_v58  ;;  %v5348_v2 = vpop.f32.mrb[159].mxu0  ;;  %v977_v23 = vfloor.f32 %v933_v62  ;;  %vm1109_vm8 = vcmp.ge.f32.partialorder %v15586_v52, 0.0  ;;  %v15768_v3 = vsub.f32 %v15655_v24, %v1023_v0  ;;  %vm15774_vm12 = vmand %vm15745_vm2, %vm1240_vm5  ;;  %v5936_v59 = vld [vmem:[#allocation3 + $0xc0] sm:$0xff] }
 0x234   : > { %v5978_v5 = vadd.f32 %v12752_v35, %v5934_v29  ;;  %5524 = vst.msk [vmem:[#allocation3 + $0xe0] sm:$0xff] %vm18984_vm6, %v5480_v18  ;;  %v5817_v11 = vpop.f32.mrb[157].mxu1  ;;  %v5481_v21 = vadd.f32 %v5437_v30, %v5348_v2  ;;  %v718_v18 = vmul.f32 0.029411765, %v673_v51  ;;  %v5443_v30 = vld [vmem:[#allocation3 + $0x118] sm:$0xff]  ;;  %v15765_v35 = vsub.f32 %v15557_v38, %v803_v47  ;;  %v5938_v2 = vld [vmem:[#allocation3 + $0xd0] sm:$0xff]  ;;  %vm15810_vm5 = vmand %vm1111_vm14, %vm1155_vm7 }
 0x235   : > { %v5976_v44 = vadd.f32 %v5932_v57, %v5817_v11  ;;  %5527 = vst.msk [vmem:[#allocation3 + $0xf8] sm:$0xff] %vm18984_vm6, %v5483_v63  ;;  %v12753_v36 = vpop.f32.mrb[158].mxu1  ;;  %v580_v29 = vcvt.s32.f32 %v536_v50  ;;  %vm1328_vm15 = vcmp.le.f32.partialorder %v1064_v26, 32.0  ;;  %v1021_v11 = vmul.f32 34.0, %v977_v23  ;;  %v5939_v9 = vld [vmem:[#allocation3 + $0xd8] sm:$0xff]  ;;  %v5444_v23 = vld [vmem:[#allocation3 + $0x120] sm:$0xff] }
 0x236   : > { %6022 = vst.msk [vmem:[#allocation3 + $0xb0] sm:$0xff] %vm18984_vm6, %v5978_v5  ;;  %v5979_v28 = vadd.f32 %v12753_v36, %v5935_v39  ;;  %5525 = vst.msk [vmem:[#allocation3 + $0xe8] sm:$0xff] %vm18984_vm6, %v5481_v21  ;;  %v5820_v7 = vpop.f32.mrb[159].mxu1  ;;  %v15778_v57 = vfloor.f32 %v718_v18  ;;  %v801_v61 = vmul.f32 34.0, %v15691_v42  ;;  %v15789_v15 = vsel %vm15760_vm10, 1, %v13273_v22 }
 0x237   : > { %6020 = vst.msk [vmem:[#allocation3 + $0xa0] sm:$0xff] %vm18984_vm6, %v5976_v44  ;;  %v5977_v40 = vadd.f32 %v5933_v14, %v5820_v7  ;;  %v15783_v44 = vadd.f32 %v14703_v33, %v580_v29  ;;  %vm1153_vm11 = vcmp.lt.f32.partialorder %v15586_v52, 2312.0  ;;  %v5937_v14 = vld [vmem:[#allocation3 + $0xc8] sm:$0xff]  ;;  %vm15798_vm1 = vmand %vm15774_vm12, %vm1328_vm15  ;;  %vm1416_vm13 = vcmp.ge.f32.partialorder %v15753_v25, 1.0 }
 0x238   : > { %6023 = vst.msk [vmem:[#allocation3 + $0xb8] sm:$0xff] %vm18984_vm6, %v5979_v28  ;;  %v12718_v45 = vpop.f32.mrb[160].mxu0  ;;  %v894_v50 = vadd.f32 0.5, %v15778_v57  ;;  %vm1504_vm9 = vcmp.le.f32.partialorder %v15753_v25, 32.0  ;;  %vm1243_vm2 = vcmp.ge.f32.partialorder %v15768_v3, 1.0  ;;  %vm1419_vm10 = vcmp.ge.f32.partialorder %v15765_v35, 1.0  ;;  %vm15830_vm14 = vmand %vm15798_vm1, %vm1416_vm13 }
 0x239   : > { %6021 = vst.msk [vmem:[#allocation3 + $0xa8] sm:$0xff] %vm18984_vm6, %v5977_v40  ;;  %v5486_v20 = vadd.f32 %v12718_v45, %v5442_v34  ;;  %v5361_v46 = vpop.f32.mrb[161].mxu0  ;;  %v15815_v40 = vsub.f32 %v15691_v42, %v1021_v11  ;;  %v671_v0 = vadd.f32 0.5, %v15783_v44  ;;  %v5446_v45 = vld [vmem:[#allocation3 + $0x130] sm:$0xff]  ;;  %vm1507_vm12 = vcmp.le.f32.partialorder %v15765_v35, 32.0  ;;  %vm15842_vm15 = vmand %vm15810_vm5, %vm1243_vm2 }
 0x23a   : > { %v5484_v12 = vadd.f32 %v5440_v55, %v5361_v46  ;;  %v12719_v58 = vpop.f32.mrb[162].mxu0  ;;  %v938_v49 = vmul.f32 0.029411765, %v894_v50  ;;  %v15822_v38 = vsub.f32 %v15586_v52, %v801_v61  ;;  %v539_v34 = vadd.s32 152, %v14691_v41  ;;  %vm15853_vm2 = vmand %vm1109_vm8, %vm1153_vm11 }
 0x23b   : > { %5530 = vst.msk [vmem:[#allocation3 + $0x110] sm:$0xff] %vm18984_vm6, %v5486_v20  ;;  %v12756_v63 = vpop.f32.mrb[160].mxu1  ;;  %v5487_v53 = vadd.f32 %v12719_v58, %v5443_v30  ;;  %v5364_v60 = vpop.f32.mrb[163].mxu0  ;;  %vm1114_vm7 = vcmp.ge.f32.partialorder %v15706_v43, 0.0  ;;  %v15836_v55 = vadd.s32 136, %v14691_v41  ;;  %v5447_v58 = vld [vmem:[#allocation3 + $0x138] sm:$0xff]  ;;  %vm15863_vm0 = vmand %vm15830_vm14, %vm1504_vm9 }
 0x23c   : > { %v5982_v24 = vadd.f32 %v12756_v63, %v5938_v2  ;;  %5528 = vst.msk [vmem:[#allocation3 + $0x100] sm:$0xff] %vm18984_vm6, %v5484_v12  ;;  %v5833_v21 = vpop.f32.mrb[161].mxu1  ;;  %v5485_v8 = vadd.f32 %v5441_v4, %v5364_v60  ;;  %v982_v46 = vfloor.f32 %v938_v49  ;;  %vm1331_vm1 = vcmp.le.f32.partialorder %v15768_v3, 32.0  ;;  %v5942_v63 = vld [vmem:[#allocation3 + $0xf0] sm:$0xff]  ;;  %v5445_v60 = vld [vmem:[#allocation3 + $0x128] sm:$0xff]  ;;  %v5943_v50 = vld [vmem:[#allocation3 + $0xf8] sm:$0xff] }
 0x23d   : > { %v5980_v36 = vadd.f32 %v5936_v59, %v5833_v21  ;;  %5531 = vst.msk [vmem:[#allocation3 + $0x118] sm:$0xff] %vm18984_vm6, %v5487_v53  ;;  %v12757_v39 = vpop.f32.mrb[162].mxu1  ;;  %vm1158_vm13 = vcmp.lt.f32.partialorder %v15706_v43, 2312.0  ;;  %v716_v27 = vmul.f32 0.029411765, %v671_v0  ;;  %vm1241_vm5 = vcmp.ge.f32.partialorder %v15815_v40, 1.0  ;;  %vm15875_vm8 = vmand %vm15842_vm15, %vm1331_vm1 }
 0x23e   : > { %6026 = vst.msk [vmem:[#allocation3 + $0xd0] sm:$0xff] %vm18984_vm6, %v5982_v24  ;;  %v5983_v28 = vadd.f32 %v12757_v39, %v5939_v9  ;;  %5529 = vst.msk [vmem:[#allocation3 + $0x108] sm:$0xff] %vm18984_vm6, %v5485_v8  ;;  %v5836_v7 = vpop.f32.mrb[163].mxu1  ;;  %v1026_v5 = vmul.f32 34.0, %v982_v46  ;;  %v583_v11 = vcvt.s32.f32 %v539_v34  ;;  %v5940_v59 = vld [vmem:[#allocation3 + $0xe0] sm:$0xff]  ;;  %v806_v61 = vmul.f32 34.0, %v15778_v57 }
 0x23f   : > { %6024 = vst.msk [vmem:[#allocation3 + $0xc0] sm:$0xff] %vm18984_vm6, %v5980_v36  ;;  %v5981_v62 = vadd.f32 %v5937_v14, %v5836_v7  ;;  %v15868_v36 = vfloor.f32 %v716_v27  ;;  %v581_v14 = vcvt.s32.f32 %v15836_v55  ;;  %vm15892_vm11 = vmand %vm15853_vm2, %vm1241_vm5  ;;  %vm1329_vm9 = vcmp.le.f32.partialorder %v15815_v40, 32.0  ;;  %v6557_v40 = vld [vmem:[#allocation3 + $0x18] sm:$0xff] }
 0x240   : > { %6027 = vst.msk [vmem:[#allocation3 + $0xd8] sm:$0xff] %vm18984_vm6, %v5983_v28  ;;  %v12722_v51 = vpop.f32.mrb[164].mxu0  ;;  %v15880_v28 = vsub.f32 %v15778_v57, %v1026_v5  ;;  %v15883_v7 = vadd.f32 %v14703_v33, %v583_v11  ;;  %vm1417_vm14 = vcmp.ge.f32.partialorder %v15822_v38, 1.0  ;;  %vm15904_vm15 = vmand %vm1114_vm7, %vm1158_vm13  ;;  %vm1505_vm7 = vcmp.le.f32.partialorder %v15822_v38, 32.0  ;;  %v5449_v11 = vld [vmem:[#allocation3 + $0x148] sm:$0xff]  ;;  %v6560_v38 = vld [vmem:[#allocation3 + $0x30] sm:$0xff] }
 0x241   : > { %6025 = vst.msk [vmem:[#allocation3 + $0xc8] sm:$0xff] %vm18984_vm6, %v5981_v62  ;;  %v5490_v42 = vadd.f32 %v12722_v51, %v5446_v45  ;;  %v5377_v48 = vpop.f32.mrb[165].mxu0  ;;  %v5941_v62 = vld [vmem:[#allocation3 + $0xe8] sm:$0xff]  ;;  %v892_v57 = vadd.f32 0.5, %v15868_v36  ;;  %v15911_v45 = vadd.s32 176, %v14691_v41  ;;  %vm15918_vm2 = vmand %vm15875_vm8, %vm1419_vm10  ;;  %v804_v20 = vmul.f32 34.0, %v15868_v36 }
 0x242   : > { %v5488_v18 = vadd.f32 %v5444_v23, %v5377_v48  ;;  %v12723_v12 = vpop.f32.mrb[166].mxu0  ;;  %vm1246_vm1 = vcmp.ge.f32.partialorder %v15880_v28, 1.0  ;;  %v674_v51 = vadd.f32 0.5, %v15883_v7  ;;  %v15924_v23 = vsub.f32 %v15706_v43, %v806_v61  ;;  %vm15932_vm10 = vmand %vm15892_vm11, %vm1329_vm9 }
 0x243   : > { %5534 = vst.msk [vmem:[#allocation3 + $0x130] sm:$0xff] %vm18984_vm6, %v5490_v42  ;;  %v12760_v29 = vpop.f32.mrb[164].mxu1  ;;  %v5491_v2 = vadd.f32 %v12723_v12, %v5447_v58  ;;  %v5380_v53 = vpop.f32.mrb[167].mxu0  ;;  %v5450_v42 = vld [vmem:[#allocation3 + $0x150] sm:$0xff]  ;;  %v936_v46 = vmul.f32 0.029411765, %v892_v57  ;;  %v15938_v30 = vadd.f32 %v14703_v33, %v581_v14  ;;  %vm15944_vm5 = vmand %vm15904_vm15, %vm1246_vm1  ;;  %v15973_v25 = vsub.f32 %v15783_v44, %v804_v20 }
 0x244   : > { %v5986_v24 = vadd.f32 %v12760_v29, %v5942_v63  ;;  %5532 = vst.msk [vmem:[#allocation3 + $0x120] sm:$0xff] %vm18984_vm6, %v5488_v18  ;;  %v5849_v21 = vpop.f32.mrb[165].mxu1  ;;  %v5489_v8 = vadd.f32 %v5445_v60, %v5380_v53  ;;  %v5448_v12 = vld [vmem:[#allocation3 + $0x140] sm:$0xff]  ;;  %vm1112_vm13 = vcmp.ge.f32.partialorder %v15783_v44, 0.0  ;;  %v719_v43 = vmul.f32 0.029411765, %v674_v51  ;;  %vm15955_vm9 = vmand %vm15918_vm2, %vm1507_vm12 }
 0x245   : > { %v5984_v39 = vadd.f32 %v5940_v59, %v5849_v21  ;;  %5535 = vst.msk [vmem:[#allocation3 + $0x138] sm:$0xff] %vm18984_vm6, %v5491_v2  ;;  %v12761_v9 = vpop.f32.mrb[166].mxu1  ;;  %v5451_v63 = vld [vmem:[#allocation3 + $0x158] sm:$0xff]  ;;  %vm1334_vm8 = vcmp.le.f32.partialorder %v15880_v28, 32.0  ;;  %v980_v2 = vfloor.f32 %v936_v46  ;;  %vm1156_vm11 = vcmp.lt.f32.partialorder %v15783_v44, 2312.0  ;;  %v5946_v60 = vld [vmem:[#allocation3 + $0x110] sm:$0xff]  ;;  %vm15968_vm12 = vmand %vm15932_vm10, %vm1417_vm14 }
 0x246   : > { %6030 = vst.msk [vmem:[#allocation3 + $0xf0] sm:$0xff] %vm18984_vm6, %v5986_v24  ;;  %v5987_v47 = vadd.f32 %v12761_v9, %v5943_v50  ;;  %5533 = vst.msk [vmem:[#allocation3 + $0x128] sm:$0xff] %vm18984_vm6, %v5489_v8  ;;  %v5852_v3 = vpop.f32.mrb[167].mxu1  ;;  %v15959_v21 = vfloor.f32 %v719_v43  ;;  %v672_v59 = vadd.f32 0.5, %v15938_v30  ;;  %v586_v8 = vcvt.s32.f32 %v15911_v45  ;;  %v5944_v9 = vld [vmem:[#allocation3 + $0x100] sm:$0xff]  ;;  %v5945_v51 = vld [vmem:[#allocation3 + $0x108] sm:$0xff] }
 0x247   : > { %6028 = vst.msk [vmem:[#allocation3 + $0xe0] sm:$0xff] %vm18984_vm6, %v5984_v39  ;;  %v5985_v49 = vadd.f32 %v5941_v62, %v5852_v3  ;;  %v1024_v14 = vmul.f32 34.0, %v980_v2  ;;  %v5947_v62 = vld [vmem:[#allocation3 + $0x118] sm:$0xff]  ;;  %v15979_v26 = vsel %vm15863_vm0, 1, %v13273_v22  ;;  %vm15985_vm14 = vmand %vm15944_vm5, %vm1334_vm8  ;;  %vm1422_vm15 = vcmp.ge.f32.partialorder %v15924_v23, 1.0  ;;  %v6554_v43 = vld [vmem:[#allocation3] sm:$0xff] }
 0x248   : > { %6031 = vst.msk [vmem:[#allocation3 + $0xf8] sm:$0xff] %vm18984_vm6, %v5987_v47  ;;  %v12726_v34 = vpop.f32.mrb[168].mxu0  ;;  %vm1510_vm0 = vcmp.le.f32.partialorder %v15924_v23, 32.0  ;;  %vm15999_vm1 = vmand %vm1112_vm13, %vm1156_vm11  ;;  %v16014_v44 = vadd.f32 %v14703_v33, %v586_v8  ;;  %vm1420_vm5 = vcmp.ge.f32.partialorder %v15973_v25, 1.0  ;;  %vm1115_vm11 = vcmp.ge.f32.partialorder %v15883_v7, 0.0  ;;  %v6555_v8 = vld [vmem:[#allocation3 + $0x8] sm:$0xff] }
 0x249   : > { %6029 = vst.msk [vmem:[#allocation3 + $0xe8] sm:$0xff] %vm18984_vm6, %v5985_v49  ;;  %v5494_v55 = vadd.f32 %v12726_v34, %v5450_v42  ;;  %v5393_v18 = vpop.f32.mrb[169].mxu0  ;;  %v895_v49 = vadd.f32 0.5, %v15959_v21  ;;  %v1068_v28 = vsub.f32 %v15868_v36, %v1024_v14  ;;  %v717_v34 = vmul.f32 0.029411765, %v672_v59  ;;  %vm16008_vm2 = vmand %vm15968_vm12, %vm1505_vm7 }
 0x24a   : > { %v5492_v27 = vadd.f32 %v5448_v12, %v5393_v18  ;;  %v12727_v29 = vpop.f32.mrb[170].mxu0  ;;  %v807_v36 = vmul.f32 34.0, %v15959_v21  ;;  %vm16021_vm10 = vmand %vm15985_vm14, %vm1422_vm15  ;;  %vm1159_vm12 = vcmp.lt.f32.partialorder %v15883_v7, 2312.0  ;;  %v16057_v57 = vadd.s32 160, %v14691_v41  ;;  %v16090_v24 = vld [vmem:[%s18949_s3] ss:$0 sm:$0xff] }
 0x24b   : > { %5538 = vst.msk [vmem:[#allocation3 + $0x150] sm:$0xff] %vm18984_vm6, %v5494_v55  ;;  %v12764_v53 = vpop.f32.mrb[168].mxu1  ;;  %v5495_v4 = vadd.f32 %v12727_v29, %v5451_v63  ;;  %v5396_v5 = vpop.f32.mrb[171].mxu0  ;;  %v939_v20 = vmul.f32 0.029411765, %v895_v49  ;;  %v6556_v55 = vld [vmem:[#allocation3 + $0x10] sm:$0xff]  ;;  %v16026_v18 = vfloor.f32 %v717_v34 }
 0x24c   : > { %v5990_v61 = vadd.f32 %v12764_v53, %v5946_v60  ;;  %5536 = vst.msk [vmem:[#allocation3 + $0x140] sm:$0xff] %vm18984_vm6, %v5492_v27  ;;  %v5865_v39 = vpop.f32.mrb[169].mxu1  ;;  %v5493_v50 = vadd.f32 %v5449_v11, %v5396_v5  ;;  %vm1244_vm7 = vcmp.ge.f32.partialorder %v1068_v28, 1.0  ;;  %vm1332_vm13 = vcmp.le.f32.partialorder %v1068_v28, 32.0  ;;  %v5950_v5 = vld [vmem:[#allocation3 + $0x130] sm:$0xff]  ;;  %v5948_v14 = vld [vmem:[#allocation3 + $0x120] sm:$0xff] }
 0x24d   : > { %v5988_v47 = vadd.f32 %v5944_v9, %v5865_v39  ;;  %5539 = vst.msk [vmem:[#allocation3 + $0x158] sm:$0xff] %vm18984_vm6, %v5495_v4  ;;  %v12765_v3 = vpop.f32.mrb[170].mxu1  ;;  %vm1288_vm8 = vmand %vm15999_vm1, %vm1244_vm7  ;;  %v983_v27 = vfloor.f32 %v939_v20  ;;  %v805_v2 = vmul.f32 34.0, %v16026_v18  ;;  %v893_v53 = vadd.f32 0.5, %v16026_v18 }
 0x24e   : > { %6034 = vst.msk [vmem:[#allocation3 + $0x110] sm:$0xff] %vm18984_vm6, %v5990_v61  ;;  %v5991_v0 = vadd.f32 %v12765_v3, %v5947_v62  ;;  %5537 = vst.msk [vmem:[#allocation3 + $0x148] sm:$0xff] %vm18984_vm6, %v5493_v50  ;;  %v5868_v52 = vpop.f32.mrb[171].mxu1  ;;  %v677_v60 = vadd.f32 0.5, %v16014_v44  ;;  %vm1508_vm1 = vcmp.le.f32.partialorder %v15973_v25, 32.0  ;;  %v16045_v39 = vsub.f32 %v15883_v7, %v807_v36 }
 0x24f   : > { %6032 = vst.msk [vmem:[#allocation3 + $0x100] sm:$0xff] %vm18984_vm6, %v5988_v47  ;;  %v5989_v42 = vadd.f32 %v5945_v51, %v5868_v52  ;;  %vm1376_vm14 = vmand %vm1288_vm8, %vm1332_vm13  ;;  %v1027_v9 = vmul.f32 34.0, %v983_v27  ;;  %v937_v62 = vmul.f32 0.029411765, %v893_v53  ;;  %v5951_v52 = vld [vmem:[#allocation3 + $0x138] sm:$0xff]  ;;  %v16064_v23 = vsub.f32 %v15938_v30, %v805_v2 }
 0x250   : > { %6035 = vst.msk [vmem:[#allocation3 + $0x118] sm:$0xff] %vm18984_vm6, %v5991_v0  ;;  %v12778_v46 = vpop.f32.mrb[172].mxu0  ;;  %vm16039_vm15 = vmand %vm1376_vm14, %vm1420_vm5  ;;  %v722_v28 = vmul.f32 0.029411765, %v677_v60  ;;  %v16072_v36 = vsel %vm15955_vm9, 1, %v13273_v22  ;;  %vm1113_vm9 = vcmp.ge.f32.partialorder %v15938_v30, 0.0  ;;  %v584_v2 = vcvt.s32.f32 %v16057_v57 }
 0x251   : > { %6033 = vst.msk [vmem:[#allocation3 + $0x108] sm:$0xff] %vm18984_vm6, %v5989_v42  ;;  %v6600_v12 = vadd.f32 %v12778_v46, %v6556_v55  ;;  %v6379_v58 = vpop.f32.mrb[173].mxu0  ;;  %vm16052_vm7 = vmand %vm16021_vm10, %vm1510_vm0  ;;  %v16061_v51 = vsub.f32 %v15959_v21, %v1027_v9  ;;  %vm6922_vm0 = vcmp.eq.s32.totalorder %v14902_v13, 1  ;;  %v5949_v42 = vld [vmem:[#allocation3 + $0x128] sm:$0xff]  ;;  %v16077_v21 = vsel %vm16008_vm2, 1, %v13273_v22 }
 0x252   : > { %v6598_v29 = vadd.f32 %v6554_v43, %v6379_v58  ;;  %v12779_v63 = vpop.f32.mrb[174].mxu0  ;;  %vm16083_vm10 = vmand %vm16039_vm15, %vm1508_vm1  ;;  %v981_v46 = vfloor.f32 %v937_v62  ;;  %v16096_v48 = vsel %vm16052_vm7, 1, %v13273_v22  ;;  %vm1157_vm2 = vcmp.lt.f32.partialorder %v15938_v30, 2312.0  ;;  %v16118_v27 = vld [vmem:[%s18951_s5] ss:$0 sm:$0xff] }
 0x253   : > { %v12768_v4 = vpop.f32.mrb[172].mxu1  ;;  %6644 = vst.msk [vmem:[#allocation3 + $0x10] sm:$0xff] %vm18984_vm6, %v6600_v12  ;;  %v6601_v11 = vadd.f32 %v12779_v63, %v6557_v40  ;;  %v6382_v59 = vpop.f32.mrb[175].mxu0  ;;  %vm6920_vm13 = vcmp.eq.s32.totalorder %v15001_v54, 1  ;;  %vm6923_vm5 = vcmp.eq.s32.totalorder %v15086_v10, 1  ;;  %vm16107_vm8 = vmand %vm1115_vm11, %vm1159_vm12  ;;  %vm1247_vm14 = vcmp.ge.f32.partialorder %v16061_v51, 1.0 }
 0x254   : > { %v5994_v50 = vadd.f32 %v12768_v4, %v5950_v5  ;;  %v5881_v35 = vpop.f32.mrb[173].mxu1  ;;  %6642 = vst.msk [vmem:[#allocation3] sm:$0xff] %vm18984_vm6, %v6598_v29  ;;  %v6599_v47 = vadd.f32 %v6555_v8, %v6382_v59  ;;  %vm1423_vm15 = vcmp.ge.f32.partialorder %v16045_v39, 1.0  ;;  %v1025_v58 = vmul.f32 34.0, %v981_v46  ;;  %v6558_v63 = vld [vmem:[#allocation3 + $0x20] sm:$0xff]  ;;  %v6561_v5 = vld [vmem:[#allocation3 + $0x38] sm:$0xff] }
 0x255   : > { %v5992_v49 = vadd.f32 %v5948_v14, %v5881_v35  ;;  %v12769_v0 = vpop.f32.mrb[174].mxu1  ;;  %6645 = vst.msk [vmem:[#allocation3 + $0x18] sm:$0xff] %vm18984_vm6, %v6601_v11  ;;  %v16113_v43 = vfloor.f32 %v722_v28  ;;  %vm6921_vm1 = vcmp.eq.s32.totalorder %v15174_v37, 1  ;;  %v16125_v40 = vsel %vm16083_vm10, 1, %v13273_v22  ;;  %v6559_v11 = vld [vmem:[#allocation3 + $0x28] sm:$0xff]  ;;  %vm16139_vm10 = vmand %vm16107_vm8, %vm1247_vm14 }
 0x256   : > { %6038 = vst.msk [vmem:[#allocation3 + $0x130] sm:$0xff] %vm18984_vm6, %v5994_v50  ;;  %v5995_v45 = vadd.f32 %v12769_v0, %v5951_v52  ;;  %v5884_v34 = vpop.f32.mrb[175].mxu1  ;;  %6643 = vst.msk [vmem:[#allocation3 + $0x8] sm:$0xff] %vm18984_vm6, %v6599_v47  ;;  %vm1421_vm12 = vcmp.ge.f32.partialorder %v16064_v23, 1.0  ;;  %vm1335_vm7 = vcmp.le.f32.partialorder %v16061_v51, 32.0  ;;  %v1069_v59 = vsub.f32 %v16026_v18, %v1025_v58  ;;  %v5954_v50 = vld [vmem:[#allocation3 + $0x150] sm:$0xff] }
 0x257   : > { %6036 = vst.msk [vmem:[#allocation3 + $0x120] sm:$0xff] %vm18984_vm6, %v5992_v49  ;;  %v5993_v55 = vadd.f32 %v5949_v42, %v5884_v34  ;;  %v16144_v18 = vadd.s32 184, %v14691_v41  ;;  %v16147_v3 = vadd.s32 168, %v14691_v41  ;;  %v5952_v52 = vld [vmem:[#allocation3 + $0x140] sm:$0xff]  ;;  %vm16155_vm8 = vmand %vm1113_vm9, %vm1157_vm2  ;;  %v898_v34 = vadd.f32 0.5, %v16113_v43 }
 0x258   : > { %6039 = vst.msk [vmem:[#allocation3 + $0x138] sm:$0xff] %vm18984_vm6, %v5995_v45  ;;  %v12782_v25 = vpop.f32.mrb[176].mxu0  ;;  %v16164_v12 = vadd.f32 %v14703_v33, %v584_v2  ;;  %vm16175_vm2 = vmand %vm16139_vm10, %vm1335_vm7  ;;  %vm1245_vm14 = vcmp.ge.f32.partialorder %v1069_v59, 1.0  ;;  %vm1333_vm3 = vcmp.le.f32.partialorder %v1069_v59, 32.0  ;;  %vm6927_vm7 = vcmp.eq.s32.totalorder %v15368_v32, 1  ;;  %v6565_v45 = vld [vmem:[#allocation3 + $0x58] sm:$0xff] }
 0x259   : > { %6037 = vst.msk [vmem:[#allocation3 + $0x128] sm:$0xff] %vm18984_vm6, %v5993_v55  ;;  %v6604_v7 = vadd.f32 %v12782_v25, %v6560_v38  ;;  %v6395_v29 = vpop.f32.mrb[177].mxu0  ;;  %v5955_v38 = vld [vmem:[#allocation3 + $0x158] sm:$0xff]  ;;  %vm1289_vm9 = vmand %vm16155_vm8, %vm1245_vm14  ;;  %vm1118_vm4 = vcmp.ge.f32.partialorder %v16014_v44, 0.0  ;;  %vm1162_vm11 = vcmp.lt.f32.partialorder %v16014_v44, 2312.0  ;;  %v16194_v59 = vadd.s32 208, %v14691_v41 }
 0x25a   : > { %v6688_v53 = vld [vmem:[#allocation3 + $0x10] sm:$0xff]  ;;  %v6602_v60 = vadd.f32 %v6558_v63, %v6395_v29  ;;  %v12783_v4 = vpop.f32.mrb[178].mxu0  ;;  %v5953_v63 = vld [vmem:[#allocation3 + $0x148] sm:$0xff]  ;;  %vm16187_vm10 = vmand %vm1289_vm9, %vm1333_vm3  ;;  %vm6925_vm8 = vcmp.eq.s32.totalorder %v15444_v19, 1  ;;  %vm6928_vm9 = vcmp.eq.s32.totalorder %v15661_v1, 1  ;;  %vm19214_vm14 = vcmp.eq.s32.totalorder %v15257_v56, 1 }
 0x25b   : > { %v6739_v8 = vmul.f32 %v16090_v24, %v6688_v53  ;;  %v6686_v61 = vld [vmem:[#allocation3] sm:$0xff]  ;;  %v12772_v9 = vpop.f32.mrb[176].mxu1  ;;  %6648 = vst.msk [vmem:[#allocation3 + $0x30] sm:$0xff] %vm18984_vm6, %v6604_v7  ;;  %v6605_v35 = vadd.f32 %v12783_v4, %v6561_v5  ;;  %v6398_v14 = vpop.f32.mrb[179].mxu0  ;;  %vm16204_vm3 = vmand %vm16175_vm2, %vm1423_vm15  ;;  %vm19211_vm15 = vcmp.le.f32.partialorder %v16064_v23, 32.0  ;;  %vm6931_vm2 = vcmp.eq.s32.totalorder %v15668_v31, 1 }
 0x25c   : > { %v6737_v62 = vmul.f32 %v16090_v24, %v6686_v61  ;;  %v6689_v57 = vld [vmem:[#allocation3 + $0x18] sm:$0xff]  ;;  %v5998_v49 = vadd.f32 %v12772_v9, %v5954_v50  ;;  %v5897_v0 = vpop.f32.mrb[177].mxu1  ;;  %6646 = vst.msk [vmem:[#allocation3 + $0x20] sm:$0xff] %vm18984_vm6, %v6602_v60  ;;  %v6603_v28 = vadd.f32 %v6559_v11, %v6398_v14  ;;  %v942_v9 = vmul.f32 0.029411765, %v898_v34 }
 0x25d   : > { %v6790_v42 = vadd.f32 %v16118_v27, %v6739_v8  ;;  %v6740_v20 = vmul.f32 %v16090_v24, %v6689_v57  ;;  %v6687_v46 = vld [vmem:[#allocation3 + $0x8] sm:$0xff]  ;;  %v5996_v55 = vadd.f32 %v5952_v52, %v5897_v0  ;;  %v12773_v25 = vpop.f32.mrb[178].mxu1  ;;  %6649 = vst.msk [vmem:[#allocation3 + $0x38] sm:$0xff] %vm18984_vm6, %v6605_v35  ;;  %v6564_v8 = vld [vmem:[#allocation3 + $0x50] sm:$0xff]  ;;  %v16256_v61 = vadd.s32 192, %v14691_v41 }
 0x25e   : > { %v6788_v30 = vadd.f32 %v16118_v27, %v6737_v62  ;;  %v6738_v58 = vmul.f32 %v16090_v24, %v6687_v46  ;;  %6042 = vst.msk [vmem:[#allocation3 + $0x150] sm:$0xff] %vm18984_vm6, %v5998_v49  ;;  %v5999_v7 = vadd.f32 %v12773_v25, %v5955_v38  ;;  %v5900_v29 = vpop.f32.mrb[179].mxu1  ;;  %6647 = vst.msk [vmem:[#allocation3 + $0x28] sm:$0xff] %vm18984_vm6, %v6603_v28  ;;  %v6562_v62 = vld [vmem:[#allocation3 + $0x40] sm:$0xff]  ;;  %v810_v49 = vmul.f32 34.0, %v16113_v43 }
 0x25f   : > { %v6834_v53 = vmax.f32 %v6790_v42, 0.0  ;;  %v6791_v60 = vadd.f32 %v16118_v27, %v6740_v20  ;;  %6040 = vst.msk [vmem:[#allocation3 + $0x140] sm:$0xff] %vm18984_vm6, %v5996_v55  ;;  %v5997_v4 = vadd.f32 %v5953_v63, %v5900_v29  ;;  %v986_v42 = vfloor.f32 %v942_v9 }
 0x260   : > { %v6832_v51 = vmax.f32 %v6788_v30, 0.0  ;;  %v6789_v5 = vadd.f32 %v16118_v27, %v6738_v58  ;;  %6043 = vst.msk [vmem:[#allocation3 + $0x158] sm:$0xff] %vm18984_vm6, %v5999_v7  ;;  %v12786_v11 = vpop.f32.mrb[180].mxu0  ;;  %v675_v20 = vadd.f32 0.5, %v16164_v12  ;;  %v6563_v7 = vld [vmem:[#allocation3 + $0x48] sm:$0xff] }
 0x261   : > { %v6966_v50 = vsel %vm6922_vm0, %v6834_v53, 0.0  ;;  %v6835_v35 = vmax.f32 %v6791_v60, 0.0  ;;  %6041 = vst.msk [vmem:[#allocation3 + $0x148] sm:$0xff] %vm18984_vm6, %v5997_v4  ;;  %v6608_v14 = vadd.f32 %v12786_v11, %v6564_v8  ;;  %v6411_v47 = vpop.f32.mrb[181].mxu0  ;;  %vm16213_vm0 = vmand %vm16187_vm10, %vm1421_vm12  ;;  %vm6930_vm12 = vcmp.eq.s32.totalorder %v15631_v16, 1 }
 0x262   : > { %v6833_v13 = vmax.f32 %v6789_v5, 0.0  ;;  %v6692_v0 = vld [vmem:[#allocation3 + $0x30] sm:$0xff]  ;;  %v6606_v52 = vadd.f32 %v6562_v62, %v6411_v47  ;;  %v12787_v28 = vpop.f32.mrb[182].mxu0  ;;  %v6964_v46 = vsel %vm6920_vm13, %v6832_v51, 0.0  ;;  %vm19208_vm13 = vcmp.le.f32.partialorder %v16045_v39, 32.0 }
 0x263   : > { %v6967_v55 = vsel %vm6923_vm5, %v6835_v35, 0.0  ;;  %v6743_v25 = vmul.f32 %v16090_v24, %v6692_v0  ;;  %v6690_v38 = vld [vmem:[#allocation3 + $0x20] sm:$0xff]  ;;  %6652 = vst.msk [vmem:[#allocation3 + $0x50] sm:$0xff] %vm18984_vm6, %v6608_v14  ;;  %v6609_v30 = vadd.f32 %v12787_v28, %v6565_v45  ;;  %v6414_v58 = vpop.f32.mrb[183].mxu0  ;;  %vm16232_vm5 = vmand %vm16204_vm3, %vm19208_vm13  ;;  %v16248_v5 = vsub.f32 %v16014_v44, %v810_v49  ;;  %v6568_v49 = vld [vmem:[#allocation3 + $0x70] sm:$0xff] }
 0x264   : > { %v7009_v29 = vpack.c.bf16 %v6967_v55, %v6966_v50  ;;  %v6965_v63 = vsel %vm6921_vm1, %v6833_v13, 0.0  ;;  %v6741_v2 = vmul.f32 %v16090_v24, %v6690_v38  ;;  %v6693_v53 = vld [vmem:[#allocation3 + $0x38] sm:$0xff]  ;;  %6650 = vst.msk [vmem:[#allocation3 + $0x40] sm:$0xff] %vm18984_vm6, %v6606_v52  ;;  %v6607_v54 = vadd.f32 %v6563_v7, %v6414_v58  ;;  %vm16243_vm1 = vmand %vm16213_vm0, %vm19211_vm15 }
 0x265   : > { %v6794_v60 = vadd.f32 %v16118_v27, %v6743_v25  ;;  %v6744_v4 = vmul.f32 %v16090_v24, %v6693_v53  ;;  %v6691_v37 = vld [vmem:[#allocation3 + $0x28] sm:$0xff]  ;;  %6653 = vst.msk [vmem:[#allocation3 + $0x58] sm:$0xff] %vm18984_vm6, %v6609_v30  ;;  %v7008_v39 = vpack.c.bf16 %v6965_v63, %v6964_v46  ;;  %v1030_v23 = vmul.f32 34.0, %v986_v42  ;;  %v6566_v42 = vld [vmem:[#allocation3 + $0x60] sm:$0xff]  ;;  %vm16292_vm13 = vmand %vm1118_vm4, %vm1162_vm11 }
 0x266   : > { %7031 = vst.msk [vmem:[#allocation5 + $0x10] sm:$0xff] %vm18984_vm6, %v7009_v29  ;;  %v6792_v11 = vadd.f32 %v16118_v27, %v6741_v2  ;;  %v6742_v8 = vmul.f32 %v16090_v24, %v6691_v37  ;;  %6651 = vst.msk [vmem:[#allocation3 + $0x48] sm:$0xff] %vm18984_vm6, %v6607_v54  ;;  %v16263_v35 = vsel %vm16232_vm5, 1, %v13273_v22  ;;  %v720_v14 = vmul.f32 0.029411765, %v675_v20  ;;  %v6567_v2 = vld [vmem:[#allocation3 + $0x68] sm:$0xff] }
 0x267   : > { %v6838_v9 = vmax.f32 %v6794_v60, 0.0  ;;  %v6795_v50 = vadd.f32 %v16118_v27, %v6744_v4  ;;  %7030 = vst.msk [vmem:[#allocation5 + $0x8] sm:$0xff] %vm18984_vm6, %v7008_v39  ;;  %v16271_v13 = vsel %vm16243_vm1, 1, %v13273_v22  ;;  %v16274_v0 = vsub.f32 %v16113_v43, %v1030_v23  ;;  %v6569_v43 = vld [vmem:[#allocation3 + $0x78] sm:$0xff] }
 0x268   : > { %v6836_v47 = vmax.f32 %v6792_v11, 0.0  ;;  %v6793_v62 = vadd.f32 %v16118_v27, %v6742_v8  ;;  %v12790_v57 = vpop.f32.mrb[184].mxu0  ;;  %vm6929_vm10 = vcmp.eq.s32.totalorder %v15729_v6, 1  ;;  %vm1426_vm3 = vcmp.ge.f32.partialorder %v16248_v5, 1.0 }
 0x269   : > { %v6970_v52 = vsel %vm19214_vm14, %v6838_v9, 0.0  ;;  %v6839_v28 = vmax.f32 %v6795_v50, 0.0  ;;  %v6612_v45 = vadd.f32 %v12790_v57, %v6568_v49  ;;  %v6427_v34 = vpop.f32.mrb[185].mxu0  ;;  %vm19215_vm0 = vcmp.eq.s32.totalorder %v15301_v17, 1  ;;  %v6573_v17 = vld [vmem:[#allocation3 + $0x98] sm:$0xff] }
 0x26a   : > { %v6968_v20 = vsel %vm19215_vm0, %v6836_v47, 0.0  ;;  %v6837_v46 = vmax.f32 %v6793_v62, 0.0  ;;  %v6696_v55 = vld [vmem:[#allocation3 + $0x50] sm:$0xff]  ;;  %v6610_v25 = vadd.f32 %v6566_v42, %v6427_v34  ;;  %v12791_v38 = vpop.f32.mrb[186].mxu0  ;;  %v16282_v30 = vfloor.f32 %v720_v14 }
 0x26b   : > { %v6971_v56 = vsel %vm6927_vm7, %v6839_v28, 0.0  ;;  %v6747_v58 = vmul.f32 %v16090_v24, %v6696_v55  ;;  %v6694_v7 = vld [vmem:[#allocation3 + $0x40] sm:$0xff]  ;;  %6656 = vst.msk [vmem:[#allocation3 + $0x70] sm:$0xff] %vm18984_vm6, %v6612_v45  ;;  %v6613_v29 = vadd.f32 %v12791_v38, %v6569_v43  ;;  %v6430_v63 = vpop.f32.mrb[187].mxu0  ;;  %vm1250_vm5 = vcmp.ge.f32.partialorder %v16274_v0, 1.0  ;;  %v6572_v34 = vld [vmem:[#allocation3 + $0x90] sm:$0xff] }
 0x26c   : > { %v7011_v32 = vpack.c.bf16 %v6971_v56, %v6970_v52  ;;  %v6969_v53 = vsel %vm6925_vm8, %v6837_v46, 0.0  ;;  %v6745_v54 = vmul.f32 %v16090_v24, %v6694_v7  ;;  %v6697_v10 = vld [vmem:[#allocation3 + $0x58] sm:$0xff]  ;;  %6654 = vst.msk [vmem:[#allocation3 + $0x60] sm:$0xff] %vm18984_vm6, %v6610_v25  ;;  %v6611_v60 = vadd.f32 %v6567_v2, %v6430_v63  ;;  %vm16318_vm11 = vmand %vm16292_vm13, %vm1250_vm5  ;;  %v6570_v43 = vld [vmem:[#allocation3 + $0x80] sm:$0xff] }
 0x26d   : > { %vm1514_vm7 = vcmp.le.f32.partialorder %v16248_v5, 32.0  ;;  %v7010_v4 = vpack.c.bf16 %v6969_v53, %v6968_v20  ;;  %v6798_v44 = vadd.f32 %v16118_v27, %v6747_v58  ;;  %v6748_v37 = vmul.f32 %v16090_v24, %v6697_v10  ;;  %v6695_v51 = vld [vmem:[#allocation3 + $0x48] sm:$0xff]  ;;  %6657 = vst.msk [vmem:[#allocation3 + $0x78] sm:$0xff] %vm18984_vm6, %v6613_v29  ;;  %v16305_v39 = vld [vmem:[#allocation5 + $0x10] sm:$0xff] }
 0x26e   : > { %vm1338_vm4 = vcmp.le.f32.partialorder %v16274_v0, 32.0  ;;  %7033 = vst.msk [vmem:[#allocation5 + $0x20] sm:$0xff] %vm18984_vm6, %v7011_v32  ;;  %v6796_v19 = vadd.f32 %v16118_v27, %v6745_v54  ;;  %v6746_v11 = vmul.f32 %v16090_v24, %v6695_v51  ;;  %6655 = vst.msk [vmem:[#allocation3 + $0x68] sm:$0xff] %vm18984_vm6, %v6611_v60  ;;  %v7899_v8 = vld [vmem:[#allocation5 + $0x8] sm:$0x80]  ;;  %v7930_v23 = vshrl.u32 %v16305_v39, 16 }
 0x26f   : > { %v7933_v9 = vshll.u32 %v16305_v39, 16  ;;  %v7052_v50 = vld [vmem:[#allocation5 + $0x8] sm:$0xc0]  ;;  %7032 = vst.msk [vmem:[#allocation5 + $0x18] sm:$0xff] %vm18984_vm6, %v7010_v4  ;;  %v6842_v47 = vmax.f32 %v6798_v44, 0.0  ;;  %v6799_v62 = vadd.f32 %v16118_v27, %v6748_v37  ;;  %vm6934_vm8 = vcmp.eq.s32.totalorder %v15789_v15, 1  ;;  %vm16337_vm0 = vmand %vm16318_vm11, %vm1338_vm4 }
 0x270   : > { %v7926_v57 = vshrl.u32 %v7899_v8, 16  ;;  %v7078_v49 = vshrl.u32 %v7052_v50, 16  ;;  %v6840_v52 = vmax.f32 %v6796_v19, 0.0  ;;  %v6797_v28 = vadd.f32 %v16118_v27, %v6746_v11  ;;  %v12794_v45 = vpop.f32.mrb[188].mxu0  ;;  %v6571_v60 = vld [vmem:[#allocation3 + $0x88] sm:$0xff] }
 0x271   : > { %vm6932_vm15 = vcmp.eq.s32.totalorder %v15979_v26, 1  ;;  %vm6935_vm1 = vcmp.eq.s32.totalorder %v16072_v36, 1  ;;  %v16328_v42 = vrot.slane %v7930_v23, 7  ;;  %v7081_v20 = vshll.u32 %v7052_v50, 16  ;;  %v6443_v38 = vpop.f32.mrb[189].mxu0 }
 0x272   : > { %v6974_v46 = vsel %vm6930_vm12, %v6842_v47, 0.0  ;;  %v6843_v55 = vmax.f32 %v6799_v62, 0.0  ;;  %vm6933_vm14 = vcmp.eq.s32.totalorder %v16077_v21, 1  ;;  %v6616_v25 = vadd.f32 %v12794_v45, %v6572_v34  ;;  %v6700_v29 = vld [vmem:[#allocation3 + $0x70] sm:$0xff]  ;;  %v12795_v2 = vpop.f32.mrb[190].mxu0  ;;  %vm16358_vm12 = vmand %vm16337_vm0, %vm1426_vm3 }
 0x273   : > { %v7928_v56 = vrot.slane %v7926_v57, 7  ;;  %v6972_v7 = vsel %vm6928_vm9, %v6840_v52, 0.0  ;;  %v6841_v16 = vmax.f32 %v6797_v28, 0.0  ;;  %v6614_v63 = vadd.f32 %v6570_v43, %v6443_v38  ;;  %v6698_v54 = vld [vmem:[#allocation3 + $0x60] sm:$0xff]  ;;  %v6446_v1 = vpop.f32.mrb[191].mxu0  ;;  %vm16381_vm3 = vmand %vm16358_vm12, %vm1514_vm7  ;;  %v6576_v43 = vld [vmem:[#allocation3 + $0xb0] sm:$0xff] }
 0x274   : > { %v7935_v32 = vor.u32 %v7933_v9, %v16328_v42  ;;  %v6975_v0 = vsel %vm6931_vm2, %v6843_v55, 0.0  ;;  %v6751_v53 = vmul.f32 %v16090_v24, %v6700_v29  ;;  %6660 = vst.msk [vmem:[#allocation3 + $0x90] sm:$0xff] %vm18984_vm6, %v6616_v25  ;;  %v6617_v10 = vadd.f32 %v12795_v2, %v6573_v17  ;;  %v6701_v19 = vld [vmem:[#allocation3 + $0x78] sm:$0xff] }
 0x275   : > { %v7080_v4 = vrot.slane %v7078_v49, 6  ;;  %v7013_v44 = vpack.c.bf16 %v6975_v0, %v6974_v46  ;;  %v6973_v37 = vsel %vm6929_vm10, %v6841_v16, 0.0  ;;  %v6749_v51 = vmul.f32 %v16090_v24, %v6698_v54  ;;  %6658 = vst.msk [vmem:[#allocation3 + $0x80] sm:$0xff] %vm18984_vm6, %v6614_v63  ;;  %v6699_v14 = vld [vmem:[#allocation3 + $0x68] sm:$0xff] }
 0x276   : > { %v6615_v31 = vadd.f32 %v6571_v60, %v6446_v1  ;;  %v7012_v8 = vpack.c.bf16 %v6973_v37, %v6972_v7  ;;  %v6802_v50 = vadd.f32 %v16118_v27, %v6751_v53  ;;  %v6752_v6 = vmul.f32 %v16090_v24, %v6701_v19  ;;  %6661 = vst.msk [vmem:[#allocation3 + $0x98] sm:$0xff] %vm18984_vm6, %v6617_v10 }
 0x277   : > { %vm19224_vm9 = vsmask.f32 256  ;;  %7035 = vst.msk [vmem:[#allocation5 + $0x30] sm:$0xff] %vm18984_vm6, %v7013_v44  ;;  %v6800_v62 = vadd.f32 %v16118_v27, %v6749_v51  ;;  %v6750_v57 = vmul.f32 %v16090_v24, %v6699_v14  ;;  %v7083_v49 = vrot.slane %v7081_v20, 7 }
 0x278   : > { %v7936_v47 = vsel %vm19224_vm9, %v7928_v56, %v7935_v32  ;;  %6659 = vst.msk [vmem:[#allocation3 + $0x88] sm:$0xff] %vm18984_vm6, %v6615_v31  ;;  %v7088_v52 = vrot.slane %v7930_v23, 6  ;;  %7034 = vst.msk [vmem:[#allocation5 + $0x28] sm:$0xff] %vm18984_vm6, %v7012_v8  ;;  %v6846_v28 = vmax.f32 %v6802_v50, 0.0  ;;  %v6803_v45 = vadd.f32 %v16118_v27, %v6752_v6  ;;  %v12798_v38 = vpop.f32.mrb[192].mxu0  ;;  %v6574_v8 = vld [vmem:[#allocation3 + $0xa0] sm:$0xff] }
 0x279   : > { %12908 = vmatprep.mubr.msk.bf16.mxu0 %vm18984_vm6, %v7936_v47  ;;  %vm6938_vm2 = vcmp.eq.s32.totalorder %v16096_v48, 1  ;;  %vm6936_vm10 = vcmp.eq.s32.totalorder %v16125_v40, 1  ;;  %v7091_v34 = vrot.slane %v7933_v9, 7  ;;  %v587_v23 = vcvt.s32.f32 %v16144_v18  ;;  %v6459_v58 = vpop.f32.mrb[193].mxu0 }
 0x27a   : > { %v6844_v20 = vmax.f32 %v6800_v62, 0.0  ;;  %v6801_v55 = vadd.f32 %v16118_v27, %v6750_v57  ;;  %vm6939_vm13 = vcmp.eq.s32.totalorder %v16263_v35, 1  ;;  %v7084_v25 = vor.u32 %v7083_v49, %v7080_v4  ;;  %v12799_v2 = vpop.f32.mrb[194].mxu0  ;;  %v6577_v62 = vld [vmem:[#allocation3 + $0xb8] sm:$0xff] }
 0x27b   : > { %vm1116_vm5 = vcmp.ge.f32.partialorder %v16164_v12, 0.0  ;;  %v6847_v39 = vmax.f32 %v6803_v45, 0.0  ;;  %vm6937_vm4 = vcmp.eq.s32.totalorder %v16271_v13, 1  ;;  %v16390_v5 = vor.u32 %v7091_v34, %v7088_v52  ;;  %v6704_v16 = vld [vmem:[#allocation3 + $0x90] sm:$0xff]  ;;  %v6462_v54 = vpop.f32.mrb[195].mxu0 }
 0x27c   : > { %v6620_v9 = vadd.f32 %v12798_v38, %v6576_v43  ;;  %v808_v56 = vmul.f32 34.0, %v16282_v30  ;;  %v6978_v18 = vsel %vm6934_vm8, %v6846_v28, 0.0  ;;  %v6845_v7 = vmax.f32 %v6801_v55, 0.0  ;;  %v6702_v15 = vld [vmem:[#allocation3 + $0x80] sm:$0xff] }
 0x27d   : > { %v16398_v29 = vsel %vm16381_vm3, 1, %v13273_v22  ;;  %v896_v63 = vadd.f32 0.5, %v16282_v30  ;;  %v6976_v17 = vsel %vm6932_vm15, %v6844_v20, 0.0  ;;  %v6979_v32 = vsel %vm6935_vm1, %v6847_v39, 0.0  ;;  %v6705_v26 = vld [vmem:[#allocation3 + $0x98] sm:$0xff] }
 0x27e   : > { %v6755_v0 = vmul.f32 %v16090_v24, %v6704_v16  ;;  %vm19227_vm7 = vsmask.f32 1280  ;;  %6664 = vst.msk [vmem:[#allocation3 + $0xb0] sm:$0xff] %vm18984_vm6, %v6620_v9  ;;  %v7015_v10 = vpack.c.bf16 %v6979_v32, %v6978_v18  ;;  %v6977_v1 = vsel %vm6933_vm14, %v6845_v7, 0.0 }
 0x27f   : > { %v7093_v53 = vsel %vm19227_vm7, %v7084_v25, %v16390_v5  ;;  %v6753_v60 = vmul.f32 %v16090_v24, %v6702_v15  ;;  %v940_v36 = vmul.f32 0.029411765, %v896_v63  ;;  %v7014_v4 = vpack.c.bf16 %v6977_v1, %v6976_v17  ;;  %v6703_v51 = vld [vmem:[#allocation3 + $0x88] sm:$0xff] }
 0x280   : > { %12828 = vmatprep.mubr.msk.bf16.mxu1 %vm18984_vm6, %v7093_v53  ;;  %v6806_v44 = vadd.f32 %v16118_v27, %v6755_v0  ;;  %v6756_v37 = vmul.f32 %v16090_v24, %v6705_v26  ;;  %v852_v19 = vsub.f32 %v16164_v12, %v808_v56  ;;  %7037 = vst.msk [vmem:[#allocation5 + $0x40] sm:$0xff] %vm18984_vm6, %v7015_v10  ;;  %vm1160_vm11 = vcmp.lt.f32.partialorder %v16164_v12, 2312.0  ;;  %v16426_v45 = vpop.f32.mrb[196].mxu0  ;;  %v7055_v0 = vld [vmem:[#allocation5 + $0x20] sm:$0xff] }
 0x281   : > { %v6804_v31 = vadd.f32 %v16118_v27, %v6753_v60  ;;  %v6754_v21 = vmul.f32 %v16090_v24, %v6703_v51  ;;  %v984_v11 = vfloor.f32 %v940_v36  ;;  %7036 = vst.msk [vmem:[#allocation5 + $0x38] sm:$0xff] %vm18984_vm6, %v7014_v4  ;;  %v6618_v14 = vadd.f32 %v6574_v8, %v6459_v58  ;;  %v16430_v20 = vpop.f32.mrb[197].mxu0  ;;  %vm16441_vm1 = vmand %vm1116_vm5, %vm1160_vm11  ;;  %v16452_v58 = vld [vmem:[#allocation5 + $0x18] sm:$0xff] }
 0x282   : > { %v6850_v50 = vmax.f32 %v6806_v44, 0.0  ;;  %v6807_v6 = vadd.f32 %v16118_v27, %v6756_v37  ;;  %v16423_v47 = vadd.f32 %v14703_v33, %v587_v23  ;;  %v6621_v28 = vadd.f32 %v12799_v2, %v6577_v62  ;;  %v16446_v9 = vpop.f32.mrb[198].mxu0 }
 0x283   : > { %v6848_v57 = vmax.f32 %v6804_v31, 0.0  ;;  %v6805_v49 = vadd.f32 %v16118_v27, %v6754_v21  ;;  %v1028_v52 = vmul.f32 34.0, %v984_v11  ;;  %vm1424_vm8 = vcmp.ge.f32.partialorder %v852_v19, 1.0  ;;  %6662 = vst.msk [vmem:[#allocation3 + $0xa0] sm:$0xff] %vm18984_vm6, %v6618_v14  ;;  %v16454_v18 = vpop.f32.mrb[199].mxu0 }
 0x284   : > { %v6851_v34 = vmax.f32 %v6807_v6, 0.0  ;;  %vm1512_vm15 = vcmp.le.f32.partialorder %v852_v19, 32.0  ;;  %v678_v46 = vadd.f32 0.5, %v16423_v47  ;;  %v6982_v23 = vsel %vm6938_vm2, %v6850_v50, 0.0  ;;  %6665 = vst.msk [vmem:[#allocation3 + $0xb8] sm:$0xff] %vm18984_vm6, %v6621_v28 }
 0x285   : > { %v6980_v55 = vsel %vm6936_vm10, %v6848_v57, 0.0  ;;  %v6849_v25 = vmax.f32 %v6805_v49, 0.0  ;;  %v6708_v38 = vld [vmem:[#allocation3 + $0xb0] sm:$0xff]  ;;  %v1072_v43 = vsub.f32 %v16282_v30, %v1028_v52  ;;  %v585_v30 = vcvt.s32.f32 %v16147_v3  ;;  %v6575_v3 = vld [vmem:[#allocation3 + $0xa8] sm:$0xff] }
 0x286   : > { %v6983_v48 = vsel %vm6939_vm13, %v6851_v34, 0.0  ;;  %v6759_v40 = vmul.f32 %v16090_v24, %v6708_v38  ;;  %v723_v56 = vmul.f32 0.029411765, %v678_v46  ;;  %vm6942_vm9 = vcmp.eq.s32.totalorder %v16398_v29, 1  ;;  %v13229_v34 = vld [vmem:[%s18948_s2 + $0x28] sm:$0xff]  }
 0x287   : > { %v7017_v12 = vpack.c.bf16 %v6983_v48, %v6982_v23  ;;  %v6981_v7 = vsel %vm6937_vm4, %v6849_v25, 0.0  ;;  %vm1248_vm14 = vcmp.ge.f32.partialorder %v1072_v43, 1.0  ;;  %vm1336_vm0 = vcmp.le.f32.partialorder %v1072_v43, 32.0 }
 0x288   : > { %v7016_v16 = vpack.c.bf16 %v6981_v7, %v6980_v55  ;;  %v6810_v63 = vadd.f32 %v16118_v27, %v6759_v40  ;;  %vm1292_vm12 = vmand %vm16441_vm1, %vm1248_vm14  ;;  %v767_v35 = vfloor.f32 %v723_v56  ;;  %v16462_v2 = vadd.f32 %v14703_v33, %v585_v30  ;;  %v16475_v36 = vpop.f32.mrb[200].mxu0  ;;  %v13256_v40 = vld [vmem:[%s18948_s2 + $0x20] sm:$0xff]  }
 0x289   : > { %7039 = vst.msk [vmem:[#allocation5 + $0x50] sm:$0xff] %vm18984_vm6, %v7017_v12  ;;  %vm1380_vm2 = vmand %vm1292_vm12, %vm1336_vm0  ;;  %v6619_v13 = vadd.f32 %v6575_v3, %v6462_v54  ;;  %v7095_v17 = vshrl.u32 %v16452_v58, 16  ;;  %v7098_v32 = vshll.u32 %v16452_v58, 16  ;;  %vm1119_vm13 = vcmp.ge.f32.partialorder %v16423_v47, 0.0  ;;  %v16482_v31 = vpop.f32.mrb[201].mxu0 }
 0x28a   : > { %7038 = vst.msk [vmem:[#allocation5 + $0x48] sm:$0xff] %vm18984_vm6, %v7016_v16  ;;  %v6854_v15 = vmax.f32 %v6810_v63, 0.0  ;;  %vm1468_vm10 = vmand %vm1380_vm2, %vm1424_vm8  ;;  %v811_v53 = vmul.f32 34.0, %v767_v35  ;;  %v899_v10 = vadd.f32 0.5, %v767_v35  ;;  %v676_v1 = vadd.f32 0.5, %v16462_v2  ;;  %v6706_v60 = vld [vmem:[#allocation3 + $0xa0] sm:$0xff] }
 0x28b   : > { %vm1556_vm3 = vmand %vm1468_vm10, %vm1512_vm15  ;;  %vm1163_vm5 = vcmp.lt.f32.partialorder %v16423_v47, 2312.0  ;;  %6663 = vst.msk [vmem:[#allocation3 + $0xa8] sm:$0xff] %vm18984_vm6, %v6619_v13  ;;  %v7097_v54 = vrot.slane %v7095_v17, 6  ;;  %v7100_v26 = vrot.slane %v7098_v32, 7  ;;  %v6757_v4 = vmul.f32 %v16090_v24, %v6706_v60  ;;  %v6709_v51 = vld [vmem:[#allocation3 + $0xb8] sm:$0xff]  ;;  %v16486_v50 = vpop.f32.mrb[202].mxu0 }
 0x28c   : > { %v6896_v44 = vsel %vm1556_vm3, 1, %v13273_v22  ;;  %v16480_v37 = vsub.f32 %v16423_v47, %v811_v53  ;;  %v7104_v19 = vshrl.u32 %v7055_v0, 16  ;;  %v943_v21 = vmul.f32 0.029411765, %v899_v10  ;;  %v16494_v57 = vpop.f32.mrb[203].mxu0  ;;  %vm16519_vm1 = vmand %vm1119_vm13, %vm1163_vm5  ;;  %v6580_v60 = vld [vmem:[#allocation3 + $0xd0] sm:$0xff] }
 0x28d   : > { %v6760_v11 = vmul.f32 %v16090_v24, %v6709_v51  ;;  %v721_v8 = vmul.f32 0.029411765, %v676_v1  ;;  %vm1117_vm4 = vcmp.ge.f32.partialorder %v16462_v2, 0.0  ;;  %v16490_v6 = vsel %vm6942_vm9, %v6854_v15, 0.0 }
 0x28e   : > { %v6808_v14 = vadd.f32 %v16118_v27, %v6757_v4  ;;  %vm1161_vm7 = vcmp.lt.f32.partialorder %v16462_v2, 2312.0  ;;  %v7101_v62 = vor.u32 %v7100_v26, %v7097_v54  ;;  %vm6940_vm11 = vcmp.eq.s32.totalorder %v6896_v44, 1 }
 0x28f   : > { %v987_v49 = vfloor.f32 %v943_v21  ;;  %v16496_v52 = vfloor.f32 %v721_v8  ;;  %v7940_v28 = vrot.slane %v7095_v17, 7  ;;  %vm1427_vm8 = vcmp.ge.f32.partialorder %v16480_v37, 1.0  ;;  %vm16545_vm2 = vmand %vm1117_vm4, %vm1161_vm7  ;;  %v6581_v21 = vld [vmem:[#allocation3 + $0xd8] sm:$0xff] }
 0x290   : > { %vm19230_vm15 = vsmask.f32 1280  ;;  %v7106_v46 = vrot.slane %v7104_v19, 6  ;;  %v7107_v23 = vshll.u32 %v7055_v0, 16  ;;  %v16505_v25 = vadd.f32 %v16118_v27, %v6760_v11  ;;  %v16525_v63 = vpop.f32.mrb[204].mxu0 }
 0x291   : > { %v7102_v29 = vsel %vm19230_vm15, %v16390_v5, %v7101_v62  ;;  %v1031_v55 = vmul.f32 34.0, %v987_v49  ;;  %v809_v38 = vmul.f32 34.0, %v16496_v52  ;;  %v897_v43 = vadd.f32 0.5, %v16496_v52  ;;  %v16533_v17 = vpop.f32.mrb[205].mxu0  ;;  %vm19236_vm3 = vmmov %vm19230_vm15 }
 0x292   : > { %12829 = vmatmul.mubr.msk.bf16.vlgmr.msra.gmra.mrb[180].mxu1 %vm18984_vm6, %v7102_v29  ;;  %v6852_v39 = vmax.f32 %v6808_v14, 0.0  ;;  %v6707_v48 = vld [vmem:[#allocation3 + $0xa8] sm:$0xff]  ;;  %v7943_v5 = vor.u32 %v7940_v28, %v7098_v32  ;;  %v7109_v56 = vrot.slane %v7107_v23, 7  ;;  %v16513_v30 = vrot.slane %v7104_v19, 7  ;;  %v13230_v32 = vld [vmem:[%s18948_s2 + $0x30] sm:$0xff]   ;;  %v6578_v19 = vld [vmem:[#allocation3 + $0xc0] sm:$0xff] }
 0x293   : > { %12861 = vmatpush3.bf16.msra.mxu1 %v13256_v40  ;;  %v1075_v58 = vsub.f32 %v767_v35, %v1031_v55  ;;  %vm1515_vm14 = vcmp.le.f32.partialorder %v16480_v37, 32.0  ;;  %v941_v7 = vmul.f32 0.029411765, %v897_v43  ;;  %v6758_v16 = vmul.f32 %v16090_v24, %v6707_v48  ;;  %v6579_v48 = vld [vmem:[#allocation3 + $0xc8] sm:$0xff] }
 0x294   : > { %12862 = vmatprep.subr.bf16.mxu1 %v13229_v34  ;;  %vm19233_vm0 = vsmask.f32 256  ;;  %v16529_v35 = vor.u32 %v7109_v56, %v7106_v46  ;;  %v7951_v13 = vor.u32 %v16513_v30, %v7107_v23  ;;  %v590_v47 = vcvt.s32.f32 %v16194_v59  ;;  %v16550_v59 = vpop.f32.mrb[206].mxu0  ;;  %v16596_v23 = vld [vmem:[#allocation5 + $0x28] sm:$0xff] }
 0x295   : > { %v7944_v3 = vsel %vm19233_vm0, %v16328_v42, %v7943_v5  ;;  %vm1251_vm12 = vcmp.ge.f32.partialorder %v1075_v58, 1.0  ;;  %vm1339_vm9 = vcmp.le.f32.partialorder %v1075_v58, 32.0  ;;  %v16539_v0 = vsub.f32 %v16462_v2, %v809_v38  ;;  %vm19237_vm13 = vmmov %vm19233_vm0  ;;  %v16561_v54 = vpop.f32.mrb[207].mxu0 }
 0x296   : > { %v985_v15 = vfloor.f32 %v941_v7  ;;  %12909 = vmatmul.mubr.msk.bf16.vlgmr.msra.gmra.mrb[216].mxu0 %vm18984_vm6, %v7944_v3  ;;  %v16553_v53 = vsel %vm6940_vm11, %v6852_v39, 0.0  ;;  %vm1295_vm10 = vmand %vm16519_vm1, %vm1251_vm12  ;;  %v6855_v10 = vmax.f32 %v16505_v25, 0.0  ;;  %v7111_v1 = vsel %vm19236_vm3, %v7101_v62, %v16529_v35 }
 0x297   : > { %v7952_v2 = vsel %vm19237_vm13, %v7940_v28, %v7951_v13  ;;  %12863 = vmatpush3.bf16.msra.mxu1 %v13229_v34  ;;  %vm1383_vm5 = vmand %vm1295_vm10, %vm1339_vm9  ;;  %12832 = vmatprep.mubr.msk.bf16.mxu1 %vm18984_vm6, %v7111_v1  ;;  %v16566_v4 = vadd.f32 %v14703_v33, %v590_v47  ;;  %v6624_v44 = vadd.f32 %v16426_v45, %v6580_v60  ;;  %v588_v51 = vcvt.s32.f32 %v16256_v61 }
 0x298   : > { %v1029_v26 = vmul.f32 34.0, %v985_v15  ;;  %12912 = vmatprep.mubr.msk.bf16.mxu0 %vm18984_vm6, %v7952_v2  ;;  %vm1471_vm4 = vmand %vm1383_vm5, %vm1427_vm8  ;;  %v6809_v11 = vadd.f32 %v16118_v27, %v6758_v16  ;;  %v6622_v8 = vadd.f32 %v6578_v19, %v16430_v20  ;;  %v547_v14 = vadd.s32 216, %v14691_v41  ;;  %12864 = vmatprep.subr.bf16.mxu1 %v13230_v32  ;;  %v16590_v28 = vpop.f32.mrb[208].mxu0 }
 0x299   : > { %v6625_v62 = vadd.f32 %v16446_v9, %v6581_v21  ;;  %vm1559_vm7 = vmand %vm1471_vm4, %vm1515_vm14  ;;  %vm1425_vm11 = vcmp.ge.f32.partialorder %v16539_v0, 1.0  ;;  %vm1513_vm15 = vcmp.le.f32.partialorder %v16539_v0, 32.0  ;;  %v681_v61 = vadd.f32 0.5, %v16566_v4  ;;  %6668 = vst.msk [vmem:[#allocation3 + $0xd0] sm:$0xff] %vm18984_vm6, %v6624_v44  ;;  %v16598_v55 = vpop.f32.mrb[209].mxu0 }
 0x29a   : > { %v1073_v45 = vsub.f32 %v16496_v52, %v1029_v26  ;;  %v6899_v20 = vsel %vm1559_vm7, 1, %v13273_v22  ;;  %v16585_v49 = vadd.f32 %v14703_v33, %v588_v51  ;;  %6666 = vst.msk [vmem:[#allocation3 + $0xc0] sm:$0xff] %vm18984_vm6, %v6622_v8  ;;  %v591_v9 = vcvt.s32.f32 %v547_v14  ;;  %v16604_v40 = vpop.f32.mrb[210].mxu0 }
 0x29b   : > { %6669 = vst.msk [vmem:[#allocation3 + $0xd8] sm:$0xff] %vm18984_vm6, %v6625_v62  ;;  %v545_v37 = vadd.s32 200, %v14691_v41  ;;  %12865 = vmatpush3.bf16.msra.mxu1 %v13230_v32  ;;  %vm6943_vm8 = vcmp.eq.s32.totalorder %v6899_v20, 1  ;;  %v726_v52 = vmul.f32 0.029411765, %v681_v61  ;;  %v6853_v29 = vmax.f32 %v6809_v11, 0.0 }
 0x29c   : > { %vm1249_vm1 = vcmp.ge.f32.partialorder %v1073_v45, 1.0  ;;  %vm1337_vm14 = vcmp.le.f32.partialorder %v1073_v45, 32.0  ;;  %v6987_v34 = vsel %vm6943_vm8, %v6855_v10, 0.0  ;;  %vm1122_vm12 = vcmp.ge.f32.partialorder %v16566_v4, 0.0  ;;  %v16647_v45 = vld [vmem:[%s18949_s3] ss:$0 sm:$0xff] }
 0x29d   : > { %vm1293_vm0 = vmand %vm16545_vm2, %vm1249_vm1  ;;  %v679_v46 = vadd.f32 0.5, %v16585_v49  ;;  %v7019_v25 = vpack.c.bf16 %v6987_v34, %v16490_v6  ;;  %v770_v38 = vfloor.f32 %v726_v52  ;;  %v16602_v43 = vadd.f32 %v14703_v33, %v591_v9  ;;  %v16611_v6 = vpop.f32.mrb[211].mxu0 }
 0x29e   : > { %vm1381_vm9 = vmand %vm1293_vm0, %vm1337_vm14  ;;  %v589_v39 = vcvt.s32.f32 %v545_v37  ;;  %vm1166_vm10 = vcmp.lt.f32.partialorder %v16566_v4, 2312.0  ;;  %vm1120_vm3 = vcmp.ge.f32.partialorder %v16585_v49, 0.0  ;;  %v6623_v56 = vadd.f32 %v6579_v48, %v16454_v18 }
 0x29f   : > { %vm1469_vm2 = vmand %vm1381_vm9, %vm1425_vm11  ;;  %v724_v5 = vmul.f32 0.029411765, %v679_v46  ;;  %7041 = vst.msk [vmem:[#allocation5 + $0x60] sm:$0xff] %vm18984_vm6, %v7019_v25  ;;  %v814_v58 = vmul.f32 34.0, %v770_v38  ;;  %v902_v12 = vadd.f32 0.5, %v770_v38  ;;  %vm1164_vm5 = vcmp.lt.f32.partialorder %v16585_v49, 2312.0 }
 0x2a0   : > { %vm1557_vm13 = vmand %vm1469_vm2, %vm1513_vm15  ;;  %v7113_v7 = vshrl.u32 %v16596_v23, 16  ;;  %v6712_v3 = vld [vmem:[#allocation3 + $0xd0] sm:$0xff]  ;;  %v682_v47 = vadd.f32 0.5, %v16602_v43  ;;  %v16621_v18 = vadd.f32 %v14703_v33, %v589_v39  ;;  %6667 = vst.msk [vmem:[#allocation3 + $0xc8] sm:$0xff] %vm18984_vm6, %v6623_v56  ;;  %vm1123_vm7 = vcmp.ge.f32.partialorder %v16602_v43, 0.0  ;;  %v16632_v21 = vpop.f32.mrb[212].mxu0 }
 0x2a1   : > { %v6897_v16 = vsel %vm1557_vm13, 1, %v13273_v22  ;;  %v768_v13 = vfloor.f32 %v724_v5  ;;  %v16625_v32 = vsub.f32 %v16566_v4, %v814_v58  ;;  %v946_v0 = vmul.f32 0.029411765, %v902_v12  ;;  %v6710_v42 = vld [vmem:[#allocation3 + $0xc0] sm:$0xff]  ;;  %vm16664_vm1 = vmand %vm1122_vm12, %vm1166_vm10 }
 0x2a2   : > { %vm6941_vm4 = vcmp.eq.s32.totalorder %v6897_v16, 1  ;;  %v6763_v15 = vmul.f32 %v16090_v24, %v6712_v3  ;;  %v6761_v60 = vmul.f32 %v16090_v24, %v6710_v42  ;;  %v6713_v26 = vld [vmem:[#allocation3 + $0xd8] sm:$0xff]  ;;  %v7116_v19 = vshll.u32 %v16596_v23, 16  ;;  %v16641_v24 = vpop.f32.mrb[213].mxu0  ;;  %vm16674_vm0 = vmand %vm1120_vm3, %vm1164_vm5  ;;  %v16682_v4 = vld [vmem:[%s18951_s5] ss:$0 sm:$0xff] }
 0x2a3   : > { %v6985_v10 = vsel %vm6941_vm4, %v6853_v29, 0.0  ;;  %v812_v1 = vmul.f32 34.0, %v768_v13  ;;  %v900_v2 = vadd.f32 0.5, %v768_v13  ;;  %v990_v51 = vfloor.f32 %v946_v0  ;;  %v16651_v9 = vpop.f32.mrb[214].mxu0 }
 0x2a4   : > { %v7018_v44 = vpack.c.bf16 %v6985_v10, %v16553_v53  ;;  %v16635_v11 = vadd.f32 %v16118_v27, %v6763_v15  ;;  %vm1167_vm11 = vcmp.lt.f32.partialorder %v16602_v43, 2312.0  ;;  %v727_v62 = vmul.f32 0.029411765, %v682_v47  ;;  %v16658_v34 = vpop.f32.mrb[215].mxu0 }
 0x2a5   : > { %v16638_v8 = vsub.f32 %v16585_v49, %v812_v1  ;;  %v944_v14 = vmul.f32 0.029411765, %v900_v2  ;;  %v1034_v53 = vmul.f32 34.0, %v990_v51  ;;  %v6764_v61 = vmul.f32 %v16647_v45, %v6713_v26  ;;  %vm16691_vm10 = vmand %vm1123_vm7, %vm1167_vm11  ;;  %v13236_v49 = vld [vmem:[%s18948_s2 + $0x60] sm:$0xff]  }
 0x2a6   : > { %7040 = vst.msk [vmem:[#allocation5 + $0x58] sm:$0xff] %vm18984_vm6, %v7018_v44  ;;  %v680_v20 = vadd.f32 0.5, %v16621_v18  ;;  %vm1430_vm15 = vcmp.ge.f32.partialorder %v16625_v32, 1.0  ;;  %vm1518_vm8 = vcmp.le.f32.partialorder %v16625_v32, 32.0  ;;  %v16656_v52 = vadd.f32 %v16118_v27, %v6761_v60  ;;  %v7057_v32 = vld [vmem:[#allocation5 + $0x30] sm:$0xff] }
 0x2a7   : > { %v988_v37 = vfloor.f32 %v944_v14  ;;  %v1078_v29 = vsub.f32 %v770_v38, %v1034_v53  ;;  %v6858_v25 = vmax.f32 %v16635_v11, 0.0  ;;  %vm1428_vm14 = vcmp.ge.f32.partialorder %v16638_v8, 1.0  ;;  %v6711_v48 = vld [vmem:[#allocation3 + $0xc8] sm:$0xff] }
 0x2a8   : > { %v771_v39 = vfloor.f32 %v727_v62  ;;  %vm1516_vm12 = vcmp.le.f32.partialorder %v16638_v8, 32.0  ;;  %v16685_v38 = vadd.f32 %v16682_v4, %v6764_v61  ;;  %v725_v56 = vmul.f32 0.029411765, %v680_v20  ;;  %v13232_v61 = vld [vmem:[%s18948_s2 + $0x80] sm:$0xff]   ;;  %v13233_v8 = vld [vmem:[%s18948_s2 + $0x88] sm:$0xff]  }
 0x2a9   : > { %v1032_v5 = vmul.f32 34.0, %v988_v37  ;;  %vm1254_vm9 = vcmp.ge.f32.partialorder %v1078_v29, 1.0  ;;  %vm1342_vm2 = vcmp.le.f32.partialorder %v1078_v29, 32.0  ;;  %v6856_v3 = vmax.f32 %v16656_v52, 0.0  ;;  %12980 = vmatprep.subr.bf16.mxu0 %v13232_v61 }
 0x2aa   : > { %v815_v58 = vmul.f32 34.0, %v771_v39  ;;  %v903_v12 = vadd.f32 0.5, %v771_v39  ;;  %vm1298_vm3 = vmand %vm16664_vm1, %vm1254_vm9  ;;  %v769_v47 = vfloor.f32 %v725_v56  ;;  %v6762_v0 = vmul.f32 %v16647_v45, %v6711_v48  ;;  %12981 = vmatpush3.bf16.msra.mxu0 %v13232_v61 }
 0x2ab   : > { %v1076_v16 = vsub.f32 %v768_v13, %v1032_v5  ;;  %vm1386_vm13 = vmand %vm1298_vm3, %vm1342_vm2  ;;  %v7115_v10 = vrot.slane %v7113_v7, 6  ;;  %v7118_v1 = vrot.slane %v7116_v19, 7  ;;  %vm1121_vm1 = vcmp.ge.f32.partialorder %v16621_v18, 0.0  ;;  %v13231_v5 = vld [vmem:[%s18948_s2 + $0x38] sm:$0xff]   ;;  %12982 = vmatprep.subr.bf16.mxu0 %v13233_v8 }
 0x2ac   : > { %v16700_v15 = vsub.f32 %v16602_v43, %v815_v58  ;;  %v947_v42 = vmul.f32 0.029411765, %v903_v12  ;;  %vm1474_vm5 = vmand %vm1386_vm13, %vm1430_vm15  ;;  %v813_v13 = vmul.f32 34.0, %v769_v47  ;;  %v901_v2 = vadd.f32 0.5, %v769_v47  ;;  %12866 = vmatprep.subr.bf16.mxu1 %v13231_v5  ;;  %v13234_v58 = vld [vmem:[%s18948_s2 + $0x90] sm:$0xff]  }
 0x2ad   : > { %vm1252_vm4 = vcmp.ge.f32.partialorder %v1076_v16, 1.0  ;;  %vm1340_vm7 = vcmp.le.f32.partialorder %v1076_v16, 32.0  ;;  %vm1562_vm11 = vmand %vm1474_vm5, %vm1518_vm8  ;;  %v6859_v43 = vmax.f32 %v16685_v38, 0.0  ;;  %vm1165_vm9 = vcmp.lt.f32.partialorder %v16621_v18, 2312.0  ;;  %12867 = vmatpush3.bf16.msra.mxu1 %v13231_v5 }
 0x2ae   : > { %v991_v60 = vfloor.f32 %v947_v42  ;;  %v16714_v26 = vsel %vm1562_vm11, 1, %v13273_v22  ;;  %vm1296_vm15 = vmand %vm16674_vm0, %vm1252_vm4  ;;  %v16719_v44 = vsub.f32 %v16621_v18, %v813_v13  ;;  %v945_v51 = vmul.f32 0.029411765, %v901_v2  ;;  %v6582_v13 = vld [vmem:[#allocation3 + $0xe0] sm:$0xff]  ;;  %12983 = vmatpush3.bf16.msra.mxu0 %v13233_v8  ;;  %12940 = vmatprep.subr.bf16.mxu1 %v13236_v49 }
 0x2af   : > { %v16721_v14 = vor.u32 %v7118_v1, %v7115_v10  ;;  %vm1384_vm8 = vmand %vm1296_vm15, %vm1340_vm7  ;;  %vm1431_vm2 = vcmp.ge.f32.partialorder %v16700_v15, 1.0  ;;  %vm1519_vm3 = vcmp.le.f32.partialorder %v16700_v15, 32.0  ;;  %v16727_v62 = vrot.slane %v7113_v7, 7  ;;  %12984 = vmatprep.subr.bf16.mxu0 %v13234_v58 }
 0x2b0   : > { %v1035_v53 = vmul.f32 34.0, %v991_v60  ;;  %vm6946_vm0 = vcmp.eq.s32.totalorder %v16714_v26, 1  ;;  %vm1472_vm13 = vmand %vm1384_vm8, %vm1428_vm14  ;;  %v989_v20 = vfloor.f32 %v945_v51  ;;  %vm1429_vm5 = vcmp.ge.f32.partialorder %v16719_v44, 1.0 }
 0x2b1   : > { %v16737_v37 = vadd.f32 %v16682_v4, %v6762_v0  ;;  %vm1560_vm4 = vmand %vm1472_vm13, %vm1516_vm12  ;;  %vm19244_vm7 = vsmask.f32 1280  ;;  %v7959_v46 = vor.u32 %v16727_v62, %v7116_v19  ;;  %v7122_v48 = vshrl.u32 %v7057_v32, 16  ;;  %v6584_v0 = vld [vmem:[#allocation3 + $0xf0] sm:$0xff] }
 0x2b2   : > { %v1079_v7 = vsub.f32 %v771_v39, %v1035_v53  ;;  %v7120_v29 = vsel %vm19244_vm7, %v16529_v35, %v16721_v14  ;;  %v16754_v39 = vsel %vm1560_vm4, 1, %v13273_v22  ;;  %v1033_v27 = vmul.f32 34.0, %v989_v20  ;;  %vm16762_vm11 = vmand %vm1121_vm1, %vm1165_vm9  ;;  %v6585_v53 = vld [vmem:[#allocation3 + $0xf8] sm:$0xff]  ;;  %12985 = vmatpush3.bf16.msra.mxu0 %v13234_v58 }
 0x2b3   : > { %12833 = vmatmul.mubr.msk.bf16.gmra.mrb[184].mxu1 %vm18984_vm6, %v7120_v29  ;;  %v7125_v35 = vshll.u32 %v7057_v32, 16  ;;  %v550_v23 = vadd.s32 240, %v14691_v41  ;;  %vm1517_vm15 = vcmp.le.f32.partialorder %v16719_v44, 32.0  ;;  %vm19247_vm8 = vsmask.f32 256  ;;  %v16843_v44 = vld [vmem:[#allocation5 + $0x38] sm:$0xff] }
 0x2b4   : > { %vm1255_vm14 = vcmp.ge.f32.partialorder %v1079_v7, 1.0  ;;  %vm1343_vm12 = vcmp.le.f32.partialorder %v1079_v7, 32.0  ;;  %v7960_v56 = vsel %vm19247_vm8, %v16513_v30, %v7959_v46  ;;  %vm6944_vm13 = vcmp.eq.s32.totalorder %v16754_v39, 1 }
 0x2b5   : > { %vm1299_vm4 = vmand %vm16691_vm10, %vm1255_vm14  ;;  %v1077_v18 = vsub.f32 %v769_v47, %v1033_v27  ;;  %12913 = vmatmul.mubr.msk.bf16.gmra.mrb[220].mxu0 %vm18984_vm6, %v7960_v56  ;;  %v7124_v12 = vrot.slane %v7122_v48, 6  ;;  %v7127_v16 = vrot.slane %v7125_v35, 7  ;;  %v16777_v30 = vrot.slane %v7122_v48, 7 }
 0x2b6   : > { %vm1387_vm1 = vmand %vm1299_vm4, %vm1343_vm12  ;;  %v594_v42 = vcvt.s32.f32 %v550_v23  ;;  %v6628_v10 = vadd.f32 %v16475_v36, %v6584_v0  ;;  %v548_v1 = vadd.s32 224, %v14691_v41  ;;  %v6626_v2 = vadd.f32 %v6582_v13, %v16482_v31  ;;  %v13235_v31 = vld [vmem:[%s18948_s2 + $0x98] sm:$0xff]  }
 0x2b7   : > { %vm1475_vm10 = vmand %vm1387_vm1, %vm1431_vm2  ;;  %vm1253_vm9 = vcmp.ge.f32.partialorder %v1077_v18, 1.0  ;;  %vm1341_vm7 = vcmp.le.f32.partialorder %v1077_v18, 32.0  ;;  %v16786_v47 = vor.u32 %v7127_v16, %v7124_v12  ;;  %v7967_v36 = vor.u32 %v16777_v30, %v7125_v35  ;;  %12986 = vmatprep.subr.bf16.mxu0 %v13235_v31 }
 0x2b8   : > { %vm1563_vm14 = vmand %vm1475_vm10, %vm1519_vm3  ;;  %v16793_v60 = vadd.f32 %v14703_v33, %v594_v42  ;;  %6672 = vst.msk [vmem:[#allocation3 + $0xf0] sm:$0xff] %vm18984_vm6, %v6628_v10  ;;  %v592_v51 = vcvt.s32.f32 %v548_v1  ;;  %v551_v32 = vadd.s32 248, %v14691_v41  ;;  %vm19248_vm3 = vsmask.f32 1280  ;;  %12987 = vmatpush3.bf16.msra.mxu0 %v13235_v31 }
 0x2b9   : > { %v6903_v15 = vsel %vm1563_vm14, 1, %v13273_v22  ;;  %vm1297_vm2 = vmand %vm16762_vm11, %vm1253_vm9  ;;  %v7129_v61 = vsel %vm19248_vm3, %v16721_v14, %v16786_v47  ;;  %6670 = vst.msk [vmem:[#allocation3 + $0xe0] sm:$0xff] %vm18984_vm6, %v6626_v2  ;;  %v6629_v20 = vadd.f32 %v16486_v50, %v6585_v53  ;;  %v549_v7 = vadd.s32 232, %v14691_v41 }
 0x2ba   : > { %vm6947_vm12 = vcmp.eq.s32.totalorder %v6903_v15, 1  ;;  %vm1385_vm8 = vmand %vm1297_vm2, %vm1341_vm7  ;;  %v6857_v29 = vmax.f32 %v16737_v37, 0.0  ;;  %12836 = vmatprep.mubr.msk.bf16.mxu1 %vm18984_vm6, %v7129_v61  ;;  %vm19249_vm4 = vsmask.f32 256  ;;  %v685_v48 = vadd.f32 0.5, %v16793_v60 }
 0x2bb   : > { %v7968_v46 = vsel %vm19249_vm4, %v16727_v62, %v7967_v36  ;;  %v6990_v14 = vsel %vm6946_vm0, %v6858_v25, 0.0  ;;  %v6991_v50 = vsel %vm6947_vm12, %v6859_v43, 0.0  ;;  %vm1473_vm11 = vmand %vm1385_vm8, %vm1429_vm5  ;;  %v16826_v37 = vadd.f32 %v14703_v33, %v592_v51  ;;  %6673 = vst.msk [vmem:[#allocation3 + $0xf8] sm:$0xff] %vm18984_vm6, %v6629_v20  ;;  %v6583_v62 = vld [vmem:[#allocation3 + $0xe8] sm:$0xff] }
 0x2bc   : > { %12916 = vmatprep.mubr.msk.bf16.mxu0 %vm18984_vm6, %v7968_v46  ;;  %v595_v5 = vcvt.s32.f32 %v551_v32  ;;  %v6988_v11 = vsel %vm6944_vm13, %v6856_v3, 0.0  ;;  %v7021_v25 = vpack.c.bf16 %v6991_v50, %v6990_v14  ;;  %vm1561_vm0 = vmand %vm1473_vm11, %vm1517_vm15  ;;  %v730_v38 = vmul.f32 0.029411765, %v685_v48 }
 0x2bd   : > { %v6627_v43 = vadd.f32 %v6583_v62, %v16494_v57  ;;  %v6901_v26 = vsel %vm1561_vm0, 1, %v13273_v22  ;;  %vm1126_vm5 = vcmp.ge.f32.partialorder %v16793_v60, 0.0  ;;  %v683_v8 = vadd.f32 0.5, %v16826_v37 }
 0x2be   : > { %v593_v27 = vcvt.s32.f32 %v549_v7  ;;  %7043 = vst.msk [vmem:[#allocation5 + $0x70] sm:$0xff] %vm18984_vm6, %v7021_v25  ;;  %vm6945_vm1 = vcmp.eq.s32.totalorder %v6901_v26, 1  ;;  %v774_v52 = vfloor.f32 %v730_v38  ;;  %vm1170_vm13 = vcmp.lt.f32.partialorder %v16793_v60, 2312.0 }
 0x2bf   : > { %v642_v3 = vadd.f32 %v14703_v33, %v595_v5  ;;  %6671 = vst.msk [vmem:[#allocation3 + $0xe8] sm:$0xff] %vm18984_vm6, %v6627_v43  ;;  %v6989_v57 = vsel %vm6945_vm1, %v6857_v29, 0.0  ;;  %v6716_v39 = vld [vmem:[#allocation3 + $0xf0] sm:$0xff]  ;;  %v728_v35 = vmul.f32 0.029411765, %v683_v8  ;;  %vm1124_vm15 = vcmp.ge.f32.partialorder %v16826_v37, 0.0  ;;  %vm16873_vm3 = vmand %vm1126_vm5, %vm1170_vm13 }
 0x2c0   : > { %vm1168_vm10 = vcmp.lt.f32.partialorder %v16826_v37, 2312.0  ;;  %v7020_v23 = vpack.c.bf16 %v6989_v57, %v6988_v11  ;;  %v818_v19 = vmul.f32 34.0, %v774_v52  ;;  %v906_v56 = vadd.f32 0.5, %v774_v52  ;;  %v6714_v18 = vld [vmem:[#allocation3 + $0xe0] sm:$0xff] }
 0x2c1   : > { %v6767_v58 = vmul.f32 %v16647_v45, %v6716_v39  ;;  %v772_v12 = vfloor.f32 %v728_v35  ;;  %v6765_v16 = vmul.f32 %v16647_v45, %v6714_v18  ;;  %v686_v0 = vadd.f32 0.5, %v642_v3  ;;  %vm16884_vm12 = vmand %vm1124_vm15, %vm1168_vm10 }
 0x2c2   : > { %v16850_v42 = vadd.f32 %v14703_v33, %v593_v27  ;;  %7042 = vst.msk [vmem:[#allocation5 + $0x68] sm:$0xff] %vm18984_vm6, %v7020_v23  ;;  %v862_v10 = vsub.f32 %v16793_v60, %v818_v19  ;;  %v950_v1 = vmul.f32 0.029411765, %v906_v56  ;;  %v7131_v49 = vshrl.u32 %v16843_v44, 16  ;;  %v6717_v53 = vld [vmem:[#allocation3 + $0xf8] sm:$0xff] }
 0x2c3   : > { %v16855_v13 = vadd.f32 %v16682_v4, %v6767_v58  ;;  %v816_v2 = vmul.f32 34.0, %v772_v12  ;;  %v904_v36 = vadd.f32 0.5, %v772_v12  ;;  %v16859_v51 = vadd.f32 %v16682_v4, %v6765_v16  ;;  %v7059_v58 = vld [vmem:[#allocation5 + $0x40] sm:$0xff] }
 0x2c4   : > { %v731_v32 = vmul.f32 0.029411765, %v686_v0  ;;  %v994_v31 = vfloor.f32 %v950_v1  ;;  %vm1127_vm9 = vcmp.ge.f32.partialorder %v642_v3, 0.0  ;;  %vm1171_vm7 = vcmp.lt.f32.partialorder %v642_v3, 2312.0 }
 0x2c5   : > { %v7134_v15 = vshll.u32 %v16843_v44, 16  ;;  %vm1434_vm14 = vcmp.ge.f32.partialorder %v862_v10, 1.0  ;;  %v16863_v61 = vsub.f32 %v16826_v37, %v816_v2  ;;  %v948_v20 = vmul.f32 0.029411765, %v904_v36  ;;  %vm16894_vm5 = vmand %vm1127_vm9, %vm1171_vm7 }
 0x2c6   : > { %v775_v7 = vfloor.f32 %v731_v32  ;;  %v1038_v29 = vmul.f32 34.0, %v994_v31  ;;  %vm1522_vm2 = vcmp.le.f32.partialorder %v862_v10, 32.0  ;;  %v6768_v46 = vmul.f32 %v16647_v45, %v6717_v53  ;;  %v6715_v8 = vld [vmem:[#allocation3 + $0xe8] sm:$0xff] }
 0x2c7   : > { %v684_v48 = vadd.f32 0.5, %v16850_v42  ;;  %v6862_v14 = vmax.f32 %v16855_v13, 0.0  ;;  %v992_v50 = vfloor.f32 %v948_v20  ;;  %v6860_v5 = vmax.f32 %v16859_v51, 0.0 }
 0x2c8   : > { %v819_v62 = vmul.f32 34.0, %v775_v7  ;;  %v1082_v11 = vsub.f32 %v774_v52, %v1038_v29  ;;  %v907_v38 = vadd.f32 0.5, %v775_v7  ;;  %v16878_v43 = vadd.f32 %v16682_v4, %v6768_v46  ;;  %v6587_v52 = vld [vmem:[#allocation3 + $0x108] sm:$0xff] }
 0x2c9   : > { %v729_v26 = vmul.f32 0.029411765, %v684_v48  ;;  %v1036_v27 = vmul.f32 34.0, %v992_v50  ;;  %vm1432_vm8 = vcmp.ge.f32.partialorder %v16863_v61, 1.0  ;;  %vm1125_vm4 = vcmp.ge.f32.partialorder %v16850_v42, 0.0  ;;  %v6586_v50 = vld [vmem:[#allocation3 + $0x100] sm:$0xff] }
 0x2ca   : > { %v16889_v60 = vsub.f32 %v642_v3, %v819_v62  ;;  %vm1258_vm11 = vcmp.ge.f32.partialorder %v1082_v11, 1.0  ;;  %vm1346_vm0 = vcmp.le.f32.partialorder %v1082_v11, 32.0  ;;  %v951_v44 = vmul.f32 0.029411765, %v907_v38 }
 0x2cb   : > { %vm1169_vm1 = vcmp.lt.f32.partialorder %v16850_v42, 2312.0  ;;  %vm1302_vm13 = vmand %vm16873_vm3, %vm1258_vm11  ;;  %v1080_v37 = vsub.f32 %v772_v12, %v1036_v27  ;;  %vm1520_vm15 = vcmp.le.f32.partialorder %v16863_v61, 32.0  ;;  %v773_v39 = vfloor.f32 %v729_v26  ;;  %v6589_v27 = vld [vmem:[#allocation3 + $0x118] sm:$0xff] }
 0x2cc   : > { %v6766_v35 = vmul.f32 %v16647_v45, %v6715_v8  ;;  %vm1390_vm10 = vmand %vm1302_vm13, %vm1346_vm0  ;;  %v995_v23 = vfloor.f32 %v951_v44  ;;  %v6863_v19 = vmax.f32 %v16878_v43, 0.0  ;;  %v7133_v3 = vrot.slane %v7131_v49, 6 }
 0x2cd   : > { %v7136_v56 = vrot.slane %v7134_v15, 7  ;;  %vm1478_vm9 = vmand %vm1390_vm10, %vm1434_vm14  ;;  %vm1256_vm7 = vcmp.ge.f32.partialorder %v1080_v37, 1.0  ;;  %vm1344_vm6 = vcmp.le.f32.partialorder %v1080_v37, 32.0  ;;  %v817_v18 = vmul.f32 34.0, %v773_v39  ;;  %v7060_v37 = vld [vmem:[#allocation5 + $0x48] sm:$0xff] }
 0x2ce   : > { %v905_v16 = vadd.f32 0.5, %v773_v39  ;;  %vm16909_vm3 = vmand %vm1125_vm4, %vm1169_vm1  ;;  %v1039_v0 = vmul.f32 34.0, %v995_v23  ;;  %vm1435_vm0 = vcmp.ge.f32.partialorder %v16889_v60, 1.0  ;;  %v7972_v13 = vrot.slane %v7131_v49, 7 }
 0x2cf   : > { %vm1566_vm11 = vmand %vm1478_vm9, %vm1522_vm2  ;;  %v16915_v1 = vor.u32 %v7136_v56, %v7133_v3  ;;  %v16921_v36 = vsub.f32 %v16850_v42, %v817_v18  ;;  %v7140_v53 = vshrl.u32 %v7059_v58, 16  ;;  %vm19258_vm2 = vsmask.f32 1280 }
 0x2d0   : > { %v6906_v2 = vsel %vm1566_vm11, 1, %v13273_v22  ;;  %vm1300_vm14 = vmand %vm16884_vm12, %vm1256_vm7  ;;  %v949_v32 = vmul.f32 0.029411765, %v905_v16  ;;  %v1083_v10 = vsub.f32 %v775_v7, %v1039_v0  ;;  %v7975_v20 = vor.u32 %v7972_v13, %v7134_v15 }
 0x2d1   : > { %vm6950_vm4 = vcmp.eq.s32.totalorder %v6906_v2, 1  ;;  %vm1388_vm1 = vmand %vm1300_vm14, %vm1344_vm6  ;;  %v7138_v31 = vsel %vm19258_vm2, %v16786_v47, %v16915_v1  ;;  %vm1523_vm12 = vcmp.le.f32.partialorder %v16889_v60, 32.0  ;;  %v16933_v29 = vadd.f32 %v16682_v4, %v6766_v35 }
 0x2d2   : > { %v16927_v49 = vsel %vm6950_vm4, %v6862_v14, 0.0  ;;  %vm1476_vm13 = vmand %vm1388_vm1, %vm1432_vm8  ;;  %v993_v42 = vfloor.f32 %v949_v32  ;;  %vm19259_vm10 = vcmask 523264   ;;  %vm1259_vm9 = vcmp.ge.f32.partialorder %v1083_v10, 1.0  ;;  %v6588_v14 = vld [vmem:[#allocation3 + $0x110] sm:$0xff] }
 0x2d3   : > { %12837 = vmatmul.mubr.msk.bf16.gmra.mrb[188].mxu1 %vm19259_vm10, %v7138_v31  ;;  %vm16938_vm6 = vmand %vm1476_vm13, %vm1520_vm15  ;;  %vm1347_vm7 = vcmp.le.f32.partialorder %v1083_v10, 32.0  ;;  %vm1433_vm11 = vcmp.ge.f32.partialorder %v16921_v36, 1.0  ;;  %vm19262_vm8 = vsmask.f32 256  ;;  %v7142_v46 = vrot.slane %v7140_v53, 6  ;;  %v7061_v10 = vld [vmem:[#allocation5 + $0x50] sm:$0xff] }
 0x2d4   : > { %v7976_v47 = vsel %vm19262_vm8, %v16777_v30, %v7975_v20  ;;  %vm1303_vm14 = vmand %vm16894_vm5, %vm1259_vm9  ;;  %v1037_v15 = vmul.f32 34.0, %v993_v42  ;;  %v7143_v48 = vshll.u32 %v7059_v58, 16  ;;  %v16948_v61 = vrot.slane %v7140_v53, 7 }
 0x2d5   : > { %vm19263_vm4 = vmmov %vm19259_vm10  ;;  %vm1521_vm1 = vcmp.le.f32.partialorder %v16921_v36, 32.0  ;;  %v6632_v62 = vadd.f32 %v16525_v63, %v6588_v14  ;;  %v552_v11 = vadd.s32 256, %v14691_v41  ;;  %v6630_v30 = vadd.f32 %v6586_v50, %v16533_v17 }
 0x2d6   : > { %12917 = vmatmul.mubr.msk.bf16.gmra.mrb[224].mxu0 %vm19263_vm4, %v7976_v47  ;;  %vm1391_vm15 = vmand %vm1303_vm14, %vm1347_vm7  ;;  %v6904_v25 = vsel %vm16938_vm6, 1, %v13273_v22  ;;  %v1081_v38 = vsub.f32 %v773_v39, %v1037_v15  ;;  %v7145_v26 = vrot.slane %v7143_v48, 7  ;;  %v7983_v8 = vor.u32 %v16948_v61, %v7143_v48 }
 0x2d7   : > { %vm1479_vm5 = vmand %vm1391_vm15, %vm1435_vm0  ;;  %v596_v63 = vcvt.s32.f32 %v552_v11  ;;  %v6633_v17 = vadd.f32 %v16550_v59, %v6589_v27  ;;  %v553_v44 = vadd.s32 264, %v14691_v41  ;;  %v6631_v57 = vadd.f32 %v6587_v52, %v16561_v54 }
 0x2d8   : > { %vm1567_vm2 = vmand %vm1479_vm5, %vm1523_vm12  ;;  %vm1257_vm0 = vcmp.ge.f32.partialorder %v1081_v38, 1.0  ;;  %vm1345_vm6 = vcmp.le.f32.partialorder %v1081_v38, 32.0  ;;  %v7146_v35 = vor.u32 %v7145_v26, %v7142_v46  ;;  %vm19269_vm15 = vsmask.f32 1280 }
 0x2d9   : > { %vm19264_vm13 = vmmov %vm19263_vm4  ;;  %v6907_v39 = vsel %vm1567_vm2, 1, %v13273_v22  ;;  %v16972_v23 = vadd.f32 %v14703_v33, %v596_v63  ;;  %v597_v59 = vcvt.s32.f32 %v553_v44  ;;  %v7149_v56 = vshrl.u32 %v7060_v37, 16 }
 0x2da   : > { %6676 = vst.msk [vmem:[#allocation3 + $0x110] sm:$0xff] %vm19264_vm13, %v6632_v62  ;;  %vm19265_vm10 = vmmov %vm19263_vm4  ;;  %vm6951_vm9 = vcmp.eq.s32.totalorder %v6907_v39, 1  ;;  %v7147_v3 = vsel %vm19269_vm15, %v16915_v1, %v7146_v35  ;;  %v7152_v58 = vshll.u32 %v7060_v37, 16  ;;  %v6861_v16 = vmax.f32 %v16933_v29, 0.0 }
 0x2db   : > { %6674 = vst.msk [vmem:[#allocation3 + $0x100] sm:$0xff] %vm19265_vm10, %v6630_v30  ;;  %vm1301_vm12 = vmand %vm16909_vm3, %vm1257_vm0  ;;  %v6995_v54 = vsel %vm6951_vm9, %v6863_v19, 0.0  ;;  %vm6948_vm3 = vcmp.eq.s32.totalorder %v6904_v25, 1  ;;  %v687_v43 = vadd.f32 0.5, %v16972_v23  ;;  %v16990_v19 = vadd.f32 %v14703_v33, %v597_v59 }
 0x2dc   : > { %vm19266_vm7 = vmmov %vm19262_vm8  ;;  %v7023_v18 = vpack.c.bf16 %v6995_v54, %v16927_v49  ;;  %v7151_v12 = vrot.slane %v7149_v56, 6  ;;  %v7154_v0 = vrot.slane %v7152_v58, 7  ;;  %v16992_v1 = vrot.slane %v7149_v56, 7 }
 0x2dd   : > { %v7984_v60 = vsel %vm19266_vm7, %v7972_v13, %v7983_v8  ;;  %vm19267_vm8 = vmmov %vm19263_vm4  ;;  %v732_v2 = vmul.f32 0.029411765, %v687_v43  ;;  %v688_v53 = vadd.f32 0.5, %v16990_v19  ;;  %v6992_v36 = vsel %vm6948_vm3, %v6860_v5, 0.0 }
 0x2de   : > { %6677 = vst.msk [vmem:[#allocation3 + $0x118] sm:$0xff] %vm19267_vm8, %v6633_v17  ;;  %vm19268_vm14 = vmmov %vm19263_vm4  ;;  %v7155_v29 = vor.u32 %v7154_v0, %v7151_v12  ;;  %v7991_v7 = vor.u32 %v16992_v1, %v7152_v58  ;;  %v7158_v48 = vshrl.u32 %v7061_v10, 16  ;;  %v7161_v51 = vshll.u32 %v7061_v10, 16  ;;  %v6592_v17 = vld [vmem:[#allocation3 + $0x130] sm:$0xff] }
 0x2df   : > { %6675 = vst.msk [vmem:[#allocation3 + $0x108] sm:$0xff] %vm19268_vm14, %v6631_v57  ;;  %vm1389_vm4 = vmand %vm1301_vm12, %vm1345_vm6  ;;  %v776_v20 = vfloor.f32 %v732_v2  ;;  %v733_v42 = vmul.f32 0.029411765, %v688_v53  ;;  %vm1128_vm9 = vcmp.ge.f32.partialorder %v16972_v23, 0.0  ;;  %vm1129_vm14 = vcmp.ge.f32.partialorder %v16990_v19, 0.0 }
 0x2e0   : > { %vm19270_vm5 = vmmov %vm19267_vm8  ;;  %v7992_v30 = vsel %vm19266_vm7, %v16948_v61, %v7991_v7  ;;  %vm1172_vm8 = vcmp.lt.f32.partialorder %v16972_v23, 2312.0  ;;  %v7160_v27 = vrot.slane %v7158_v48, 6  ;;  %v7163_v63 = vrot.slane %v7161_v51, 7 }
 0x2e1   : > { %12920 = vmatprep.mubr.msk.bf16.mxu0 %vm19270_vm5, %v7984_v60  ;;  %vm1477_vm2 = vmand %vm1389_vm4, %vm1433_vm11  ;;  %v820_v47 = vmul.f32 34.0, %v776_v20  ;;  %v908_v15 = vadd.f32 0.5, %v776_v20  ;;  %v777_v14 = vfloor.f32 %v733_v42  ;;  %v17020_v57 = vrot.slane %v7158_v48, 7  ;;  %v6591_v42 = vld [vmem:[#allocation3 + $0x128] sm:$0xff] }
 0x2e2   : > { %vm19271_vm13 = vmmov %vm19270_vm5  ;;  %v6718_v32 = vld [vmem:[#allocation3 + $0x100] sm:$0xff]  ;;  %v558_v37 = vadd.s32 304, %v14691_v41  ;;  %v6636_v39 = vadd.f32 %v16590_v28, %v6592_v17  ;;  %v17028_v59 = vor.u32 %v7163_v63, %v7160_v27  ;;  %v556_v58 = vadd.s32 288, %v14691_v41 }
 0x2e3   : > { %12840 = vmatprep.mubr.msk.bf16.mxu1 %vm19271_vm13, %v7147_v3  ;;  %vm1565_vm10 = vmand %vm1477_vm2, %vm1521_vm1  ;;  %v6769_v46 = vmul.f32 %v16647_v45, %v6718_v32  ;;  %v17005_v5 = vsub.f32 %v16972_v23, %v820_v47  ;;  %v952_v62 = vmul.f32 0.029411765, %v908_v15  ;;  %v821_v25 = vmul.f32 34.0, %v777_v14 }
 0x2e4   : > { %vm19272_vm0 = vmmov %vm19270_vm5  ;;  %v6905_v13 = vsel %vm1565_vm10, 1, %v13273_v22  ;;  %v909_v38 = vadd.f32 0.5, %v777_v14  ;;  %v7999_v56 = vor.u32 %v17020_v57, %v7161_v51  ;;  %v602_v28 = vcvt.s32.f32 %v558_v37 }
 0x2e5   : > { %7045 = vst.msk [vmem:[#allocation5 + $0x80] sm:$0xff] %vm19272_vm0, %v7023_v18  ;;  %vm6949_vm11 = vcmp.eq.s32.totalorder %v6905_v13, 1  ;;  %vm19273_vm1 = vmmov %vm19272_vm0  ;;  %v996_v26 = vfloor.f32 %v952_v62  ;;  %v17015_v8 = vadd.f32 %v16682_v4, %v6769_v46  ;;  %vm1436_vm5 = vcmp.ge.f32.partialorder %v17005_v5, 1.0  ;;  %v6590_v18 = vld [vmem:[#allocation3 + $0x120] sm:$0xff] }
 0x2e6   : > { %v6993_v31 = vsel %vm6949_vm11, %v6861_v16, 0.0  ;;  %vm19274_vm6 = vmmov %vm19269_vm15  ;;  %v6719_v11 = vld [vmem:[#allocation3 + $0x108] sm:$0xff]  ;;  %vm1173_vm15 = vcmp.lt.f32.partialorder %v16990_v19, 2312.0  ;;  %v953_v52 = vmul.f32 0.029411765, %v909_v38  ;;  %vm1524_vm3 = vcmp.le.f32.partialorder %v17005_v5, 32.0 }
 0x2e7   : > { %v7022_v49 = vpack.c.bf16 %v6993_v31, %v6992_v36  ;;  %v7156_v50 = vsel %vm19274_vm6, %v7146_v35, %v7155_v29  ;;  %vm19275_vm12 = vmmov %vm19272_vm0  ;;  %v6770_v61 = vmul.f32 %v16647_v45, %v6719_v11  ;;  %v1040_v44 = vmul.f32 34.0, %v996_v26 }
 0x2e8   : > { %12841 = vmatmul.mubr.msk.bf16.gmra.mrb[192].mxu1 %vm19275_vm12, %v7156_v50  ;;  %vm19276_vm4 = vmmov %vm19272_vm0  ;;  %v17026_v35 = vsub.f32 %v16990_v19, %v821_v25  ;;  %v997_v60 = vfloor.f32 %v953_v52  ;;  %v6634_v12 = vadd.f32 %v6590_v18, %v16598_v55  ;;  %v559_v23 = vadd.s32 312, %v14691_v41  ;;  %v6593_v55 = vld [vmem:[#allocation3 + $0x138] sm:$0xff] }
 0x2e9   : > { %7044 = vst.msk [vmem:[#allocation5 + $0x78] sm:$0xff] %vm19273_vm1, %v7022_v49  ;;  %12921 = vmatmul.mubr.msk.bf16.gmra.mrb[228].mxu0 %vm19276_vm4, %v7992_v30  ;;  %v1084_v54 = vsub.f32 %v776_v20, %v1040_v44  ;;  %vm17034_vm2 = vmand %vm1128_vm9, %vm1172_vm8  ;;  %v17057_v2 = vadd.f32 %v14703_v33, %v602_v28  ;;  %v600_v19 = vcvt.s32.f32 %v556_v58  ;;  %v6637_v10 = vadd.f32 %v16604_v40, %v6593_v55  ;;  %v17070_v20 = vld [vmem:[%s18948_s2 + $0xc0] sm:$0xff]   ;;  %v17092_v50 = vld [vmem:[#allocation5 + $0x58] sm:$0xff] }
 0x2ea   : > { %vm19279_vm13 = vmmov %vm19272_vm0  ;;  %v1041_v16 = vmul.f32 34.0, %v997_v60  ;;  %v603_v53 = vcvt.s32.f32 %v559_v23  ;;  %v6821_v36 = vadd.f32 %v16682_v4, %v6770_v61  ;;  %v557_v31 = vadd.s32 296, %v14691_v41  ;;  %13060 = vmatprep.subr.bf16.mxu0 %v17070_v20 }
 0x2eb   : > { %6680 = vst.msk [vmem:[#allocation3 + $0x130] sm:$0xff] %vm19279_vm13, %v6636_v39  ;;  %vm19280_vm10 = vmmov %vm19274_vm6  ;;  %vm1260_vm0 = vcmp.ge.f32.partialorder %v1084_v54, 1.0  ;;  %vm1348_vm11 = vcmp.le.f32.partialorder %v1084_v54, 32.0  ;;  %v17075_v49 = vadd.f32 %v14703_v33, %v600_v19  ;;  %v6635_v47 = vadd.f32 %v6591_v42, %v16611_v6 }
 0x2ec   : > { %v7165_v43 = vsel %vm19280_vm10, %v7155_v29, %v17028_v59  ;;  %vm17049_vm1 = vmand %vm1129_vm14, %vm1173_vm15  ;;  %v1085_v32 = vsub.f32 %v777_v14, %v1041_v16  ;;  %v17078_v40 = vadd.f32 %v14703_v33, %v603_v53  ;;  %v6864_v29 = vmax.f32 %v17015_v8, 0.0 }
 0x2ed   : > { %vm19283_vm6 = vmmov %vm19276_vm4  ;;  %v691_v48 = vadd.f32 0.5, %v17075_v49  ;;  %v601_v14 = vcvt.s32.f32 %v557_v31  ;;  %v6865_v62 = vmax.f32 %v6821_v36, 0.0  ;;  %v7167_v8 = vshrl.u32 %v17092_v50, 16 }
 0x2ee   : > { %12844 = vmatprep.mubr.msk.bf16.mxu1 %vm19283_vm6, %v7165_v43  ;;  %vm19284_vm9 = vmmov %vm19266_vm7  ;;  %vm1261_vm15 = vcmp.ge.f32.partialorder %v1085_v32, 1.0  ;;  %v694_v5 = vadd.f32 0.5, %v17078_v40 }
 0x2ef   : > { %v8000_v13 = vsel %vm19284_vm9, %v16992_v1, %v7999_v56  ;;  %vm1304_vm12 = vmand %vm17034_vm2, %vm1260_vm0  ;;  %v693_v1 = vadd.f32 0.5, %v17057_v2  ;;  %vm1349_vm2 = vcmp.le.f32.partialorder %v1085_v32, 32.0  ;;  %vm1437_vm0 = vcmp.ge.f32.partialorder %v17026_v35, 1.0 }
 0x2f0   : > { %vm19285_vm7 = vmmov %vm19276_vm4  ;;  %v736_v11 = vmul.f32 0.029411765, %v691_v48  ;;  %v739_v63 = vmul.f32 0.029411765, %v694_v5  ;;  %v17111_v37 = vadd.f32 %v14703_v33, %v601_v14  ;;  %v7170_v48 = vshll.u32 %v17092_v50, 16  ;;  %v17159_v14 = vld [vmem:[#allocation5 + $0x60] sm:$0xff] }
 0x2f1   : > { %12924 = vmatprep.mubr.msk.bf16.mxu0 %vm19285_vm7, %v8000_v13  ;;  %vm19286_vm8 = vmmov %vm19276_vm4  ;;  %v738_v7 = vmul.f32 0.029411765, %v693_v1 }
 0x2f2   : > { %6678 = vst.msk [vmem:[#allocation3 + $0x120] sm:$0xff] %vm19286_vm8, %v6634_v12  ;;  %vm1392_vm14 = vmand %vm1304_vm12, %vm1348_vm11  ;;  %vm1525_vm11 = vcmp.le.f32.partialorder %v17026_v35, 32.0  ;;  %v6724_v46 = vld [vmem:[#allocation3 + $0x130] sm:$0xff]  ;;  %vm1134_vm12 = vcmp.ge.f32.partialorder %v17057_v2, 0.0  ;;  %v780_v61 = vfloor.f32 %v736_v11  ;;  %v783_v16 = vfloor.f32 %v739_v63 }
 0x2f3   : > { %vm1480_vm4 = vmand %vm1392_vm14, %vm1436_vm5  ;;  %v782_v51 = vfloor.f32 %v738_v7  ;;  %v6775_v6 = vmul.f32 %v16647_v45, %v6724_v46  ;;  %v692_v23 = vadd.f32 0.5, %v17111_v37  ;;  %v7169_v46 = vrot.slane %v7167_v8, 6 }
 0x2f4   : > { %vm19287_vm13 = vmmov %vm19283_vm6  ;;  %v824_v60 = vmul.f32 34.0, %v780_v61  ;;  %v912_v54 = vadd.f32 0.5, %v780_v61  ;;  %v827_v19 = vmul.f32 34.0, %v783_v16  ;;  %v915_v53 = vadd.f32 0.5, %v783_v16 }
 0x2f5   : > { %6681 = vst.msk [vmem:[#allocation3 + $0x138] sm:$0xff] %vm19287_vm13, %v6637_v10  ;;  %vm1568_vm10 = vmand %vm1480_vm4, %vm1524_vm3  ;;  %v826_v25 = vmul.f32 34.0, %v782_v51  ;;  %v914_v38 = vadd.f32 0.5, %v782_v51  ;;  %v17107_v52 = vadd.f32 %v16682_v4, %v6775_v6  ;;  %vm1132_vm4 = vcmp.ge.f32.partialorder %v17075_v49, 0.0 }
 0x2f6   : > { %v6908_v15 = vsel %vm1568_vm10, 1, %v13273_v22  ;;  %vm1305_vm5 = vmand %vm17049_vm1, %vm1261_vm15  ;;  %vm1176_vm15 = vcmp.lt.f32.partialorder %v17075_v49, 2312.0  ;;  %v17117_v58 = vsub.f32 %v17075_v49, %v824_v60  ;;  %v956_v18 = vmul.f32 0.029411765, %v912_v54 }
 0x2f7   : > { %vm6952_vm3 = vcmp.eq.s32.totalorder %v6908_v15, 1  ;;  %vm1393_vm6 = vmand %vm1305_vm5, %vm1349_vm2  ;;  %v958_v17 = vmul.f32 0.029411765, %v914_v38  ;;  %v870_v35 = vsub.f32 %v17057_v2, %v826_v25  ;;  %vm1135_vm2 = vcmp.ge.f32.partialorder %v17078_v40, 0.0 }
 0x2f8   : > { %vm19288_vm9 = vmmov %vm19285_vm7  ;;  %vm1178_vm7 = vcmp.lt.f32.partialorder %v17057_v2, 2312.0  ;;  %v6996_v30 = vsel %vm6952_vm3, %v6864_v29, 0.0  ;;  %v6870_v12 = vmax.f32 %v17107_v52, 0.0  ;;  %vm1179_vm10 = vcmp.lt.f32.partialorder %v17078_v40, 2312.0 }
 0x2f9   : > { %6679 = vst.msk [vmem:[#allocation3 + $0x128] sm:$0xff] %vm19288_vm9, %v6635_v47  ;;  %vm1481_vm1 = vmand %vm1393_vm6, %vm1437_vm0  ;;  %v6722_v26 = vld [vmem:[#allocation3 + $0x120] sm:$0xff]  ;;  %v1002_v56 = vfloor.f32 %v958_v17  ;;  %vm1442_vm0 = vcmp.ge.f32.partialorder %v870_v35, 1.0  ;;  %v1000_v0 = vfloor.f32 %v956_v18  ;;  %v737_v10 = vmul.f32 0.029411765, %v692_v23 }
 0x2fa   : > { %vm1569_vm8 = vmand %vm1481_vm1, %vm1525_vm11  ;;  %v6773_v44 = vmul.f32 %v16647_v45, %v6722_v26  ;;  %vm1530_vm11 = vcmp.le.f32.partialorder %v870_v35, 32.0  ;;  %vm1440_vm6 = vcmp.ge.f32.partialorder %v17117_v58, 1.0  ;;  %v959_v2 = vmul.f32 0.029411765, %v915_v53 }
 0x2fb   : > { %v6909_v27 = vsel %vm1569_vm8, 1, %v13273_v22  ;;  %vm19289_vm13 = vmmov %vm19288_vm9  ;;  %v1046_v43 = vmul.f32 34.0, %v1002_v56  ;;  %v1044_v36 = vmul.f32 34.0, %v1000_v0  ;;  %vm1133_vm9 = vcmp.ge.f32.partialorder %v17111_v37, 0.0  ;;  %v6596_v56 = vld [vmem:[#allocation3 + $0x150] sm:$0xff] }
 0x2fc   : > { %vm6953_vm14 = vcmp.eq.s32.totalorder %v6909_v27, 1  ;;  %v6725_v28 = vld [vmem:[#allocation3 + $0x138] sm:$0xff]  ;;  %v17125_v13 = vadd.f32 %v16682_v4, %v6773_v44  ;;  %vm1222_vm5 = vmand %vm1134_vm12, %vm1178_vm7  ;;  %vm1177_vm7 = vcmp.lt.f32.partialorder %v17111_v37, 2312.0  ;;  %v781_v29 = vfloor.f32 %v737_v10 }
 0x2fd   : > { %v6997_v39 = vsel %vm6953_vm14, %v6865_v62, 0.0  ;;  %v6776_v55 = vmul.f32 %v16647_v45, %v6725_v28  ;;  %v1090_v32 = vsub.f32 %v782_v51, %v1046_v43  ;;  %vm17136_vm3 = vmand %vm1132_vm4, %vm1176_vm15  ;;  %v1088_v49 = vsub.f32 %v780_v61, %v1044_v36 }
 0x2fe   : > { %v7024_v3 = vpack.c.bf16 %v6997_v39, %v6996_v30  ;;  %vm17146_vm12 = vmand %vm1135_vm2, %vm1179_vm10  ;;  %vm1528_vm4 = vcmp.le.f32.partialorder %v17117_v58, 32.0  ;;  %v871_v47 = vsub.f32 %v17078_v40, %v827_v19  ;;  %v1003_v15 = vfloor.f32 %v959_v2  ;;  %v6597_v19 = vld [vmem:[#allocation3 + $0x158] sm:$0xff] }
 0x2ff   : > { %vm1266_vm1 = vcmp.ge.f32.partialorder %v1090_v32, 1.0  ;;  %vm1354_vm8 = vcmp.le.f32.partialorder %v1090_v32, 32.0  ;;  %v17153_v42 = vadd.f32 %v16682_v4, %v6776_v55  ;;  %vm1352_vm10 = vcmp.le.f32.partialorder %v1088_v49, 32.0 }
 0x300   : > { %7046 = vst.msk [vmem:[#allocation5 + $0x88] sm:$0xff] %vm19289_vm13, %v7024_v3  ;;  %vm1310_vm14 = vmand %vm1222_vm5, %vm1266_vm1  ;;  %v6723_v7 = vld [vmem:[#allocation3 + $0x128] sm:$0xff]  ;;  %vm1264_vm13 = vcmp.ge.f32.partialorder %v1088_v49, 1.0  ;;  %v825_v51 = vmul.f32 34.0, %v781_v29  ;;  %v913_v6 = vadd.f32 0.5, %v781_v29  ;;  %v1047_v5 = vmul.f32 34.0, %v1003_v15 }
 0x301   : > { %vm1398_vm15 = vmand %vm1310_vm14, %vm1354_vm8  ;;  %v6774_v62 = vmul.f32 %v16647_v45, %v6723_v7  ;;  %v7172_v11 = vrot.slane %v7170_v48, 7  ;;  %v8004_v30 = vrot.slane %v7167_v8, 7  ;;  %v6871_v38 = vmax.f32 %v17153_v42, 0.0 }
 0x302   : > { %vm1486_vm2 = vmand %vm1398_vm15, %vm1442_vm0  ;;  %v957_v26 = vmul.f32 0.029411765, %v913_v6  ;;  %v7176_v27 = vshrl.u32 %v17159_v14, 16  ;;  %v1091_v61 = vsub.f32 %v783_v16, %v1047_v5  ;;  %vm1531_vm14 = vcmp.le.f32.partialorder %v871_v47, 32.0  ;;  %v6594_v16 = vld [vmem:[#allocation3 + $0x140] sm:$0xff] }
 0x303   : > { %vm17166_vm5 = vmand %vm1133_vm9, %vm1177_vm7  ;;  %v7173_v63 = vor.u32 %v7172_v11, %v7169_v46  ;;  %v8007_v17 = vor.u32 %v8004_v30, %v7170_v48  ;;  %v869_v45 = vsub.f32 %v17111_v37, %v825_v51  ;;  %v6825_v37 = vadd.f32 %v16682_v4, %v6774_v62 }
 0x304   : > { %vm1574_vm1 = vmand %vm1486_vm2, %vm1530_vm11  ;;  %vm1443_vm11 = vcmp.ge.f32.partialorder %v871_v47, 1.0  ;;  %v1001_v8 = vfloor.f32 %v957_v26  ;;  %vm1267_vm15 = vcmp.ge.f32.partialorder %v1091_v61, 1.0  ;;  %vm1355_vm2 = vcmp.le.f32.partialorder %v1091_v61, 32.0 }
 0x305   : > { %v6914_v25 = vsel %vm1574_vm1, 1, %v13273_v22  ;;  %vm1308_vm0 = vmand %vm17136_vm3, %vm1264_vm13  ;;  %vm19298_vm13 = vsmask.f32 1280  ;;  %vm19300_vm1 = vcmask 523264   ;;  %v7178_v54 = vrot.slane %v7176_v27, 6 }
 0x306   : > { %vm1396_vm9 = vmand %vm1308_vm0, %vm1352_vm10  ;;  %vm6958_vm8 = vcmp.eq.s32.totalorder %v6914_v25, 1  ;;  %v7174_v39 = vsel %vm19298_vm13, %v17028_v59, %v7173_v63  ;;  %vm19299_vm10 = vsmask.f32 256  ;;  %v1045_v60 = vmul.f32 34.0, %v1001_v8  ;;  %v17241_v25 = vld [vmem:[#allocation5 + $0x68] sm:$0xff] }
 0x307   : > { %vm1484_vm7 = vmand %vm1396_vm9, %vm1440_vm6  ;;  %v8008_v35 = vsel %vm19299_vm10, %v17020_v57, %v8007_v17  ;;  %12845 = vmatmul.mubr.msk.bf16.gmra.mrb[196].mxu1 %vm19300_vm1, %v7174_v39  ;;  %v7179_v3 = vshll.u32 %v17159_v14, 16  ;;  %v7002_v59 = vsel %vm6958_vm8, %v6870_v12, 0.0  ;;  %v17201_v57 = vrot.slane %v7176_v27, 7  ;;  %v17253_v39 = vld [vmem:[%s18949_s3] ss:$0 sm:$0xff] }
 0x308   : > { %vm17184_vm3 = vmand %vm1484_vm7, %vm1528_vm4  ;;  %v562_v28 = vadd.s32 336, %v14691_v41  ;;  %v6640_v58 = vadd.f32 %v16632_v21, %v6596_v56  ;;  %v1089_v4 = vsub.f32 %v781_v29, %v1045_v60  ;;  %vm1441_vm9 = vcmp.ge.f32.partialorder %v869_v45, 1.0  ;;  %v6595_v29 = vld [vmem:[#allocation3 + $0x148] sm:$0xff] }
 0x309   : > { %vm1311_vm6 = vmand %vm17146_vm12, %vm1267_vm15  ;;  %vm1529_vm7 = vcmp.le.f32.partialorder %v869_v45, 32.0  ;;  %v7181_v18 = vrot.slane %v7179_v3, 7  ;;  %v8015_v52 = vor.u32 %v17201_v57, %v7179_v3  ;;  %v6638_v12 = vadd.f32 %v6594_v16, %v16641_v24  ;;  %v17266_v16 = vld [vmem:[%s18951_s5] ss:$0 sm:$0xff] }
 0x30a   : > { %vm19301_vm4 = vmmov %vm19300_vm1  ;;  %v606_v43 = vcvt.s32.f32 %v562_v28  ;;  %v563_v23 = vadd.s32 344, %v14691_v41  ;;  %v6912_v55 = vsel %vm17184_vm3, 1, %v13273_v22  ;;  %v6641_v1 = vadd.f32 %v16651_v9, %v6597_v19  ;;  %v17261_v28 = vld [vmem:[#allocation5 + $0x70] sm:$0xff] }
 0x30b   : > { %12925 = vmatmul.mubr.msk.bf16.gmra.mrb[232].mxu0 %vm19301_vm4, %v8008_v35  ;;  %vm1399_vm0 = vmand %vm1311_vm6, %vm1355_vm2  ;;  %vm1265_vm2 = vcmp.ge.f32.partialorder %v1089_v4, 1.0  ;;  %v17212_v0 = vor.u32 %v7181_v18, %v7178_v54  ;;  %v8016_v32 = vsel %vm19299_vm10, %v8004_v30, %v8015_v52  ;;  %vm19304_vm4 = vsmask.f32 1280 }
 0x30c   : > { %vm1487_vm12 = vmand %vm1399_vm0, %vm1443_vm11  ;;  %vm1353_vm11 = vcmp.le.f32.partialorder %v1089_v4, 32.0  ;;  %v653_v24 = vadd.f32 %v14703_v33, %v606_v43  ;;  %v607_v36 = vcvt.s32.f32 %v563_v23  ;;  %v6868_v2 = vmax.f32 %v17125_v13, 0.0 }
 0x30d   : > { %vm1575_vm15 = vmand %vm1487_vm12, %vm1531_vm14  ;;  %v7183_v10 = vsel %vm19304_vm4, %v7173_v63, %v17212_v0  ;;  %v6869_v49 = vmax.f32 %v6825_v37, 0.0  ;;  %vm6956_vm12 = vcmp.eq.s32.totalorder %v6912_v55, 1  ;;  %v560_v7 = vadd.s32 320, %v14691_v41 }
 0x30e   : > { %vm19302_vm8 = vmmov %vm19300_vm1  ;;  %v6915_v21 = vsel %vm1575_vm15, 1, %v13273_v22  ;;  %v697_v42 = vadd.f32 0.5, %v653_v24  ;;  %v17232_v47 = vadd.f32 %v14703_v33, %v607_v36  ;;  %v6639_v9 = vadd.f32 %v6595_v29, %v16658_v34 }
 0x30f   : > { %6684 = vst.msk [vmem:[#allocation3 + $0x150] sm:$0xff] %vm19302_vm8, %v6640_v58  ;;  %vm6959_vm14 = vcmp.eq.s32.totalorder %v6915_v21, 1  ;;  %vm1309_vm13 = vmand %vm17166_vm5, %vm1265_vm2  ;;  %v7000_v46 = vsel %vm6956_vm12, %v6868_v2, 0.0  ;;  %v604_v5 = vcvt.s32.f32 %v560_v7  ;;  %v561_v27 = vadd.s32 328, %v14691_v41 }
 0x310   : > { %vm19303_vm6 = vmmov %vm19300_vm1  ;;  %v7003_v53 = vsel %vm6959_vm14, %v6871_v38, 0.0  ;;  %v742_v15 = vmul.f32 0.029411765, %v697_v42  ;;  %v698_v6 = vadd.f32 0.5, %v17232_v47  ;;  %vm1138_vm14 = vcmp.ge.f32.partialorder %v653_v24, 0.0  ;;  %v17294_v42 = vld [vmem:[#allocation5 + $0x78] sm:$0xff] }
 0x311   : > { %6682 = vst.msk [vmem:[#allocation3 + $0x140] sm:$0xff] %vm19303_vm6, %v6638_v12  ;;  %vm1397_vm1 = vmand %vm1309_vm13, %vm1353_vm11  ;;  %v7027_v31 = vpack.c.bf16 %v7003_v53, %v7002_v59  ;;  %v17244_v38 = vadd.f32 %v14703_v33, %v604_v5  ;;  %vm1182_vm13 = vcmp.lt.f32.partialorder %v653_v24, 2312.0  ;;  %v17248_v8 = vshrl.u32 %v17241_v25, 16 }
 0x312   : > { %vm19305_vm0 = vmmov %vm19303_vm6  ;;  %v786_v51 = vfloor.f32 %v742_v15  ;;  %v743_v34 = vmul.f32 0.029411765, %v698_v6  ;;  %v605_v37 = vcvt.s32.f32 %v561_v27  ;;  %v17258_v54 = vshll.u32 %v17241_v25, 16 }
 0x313   : > { %12928 = vmatprep.mubr.msk.bf16.mxu0 %vm19305_vm0, %v8016_v32  ;;  %vm1485_vm5 = vmand %vm1397_vm1, %vm1441_vm9  ;;  %v695_v60 = vadd.f32 0.5, %v17244_v38  ;;  %v7187_v59 = vrot.slane %v17248_v8, 6  ;;  %v8020_v55 = vrot.slane %v17248_v8, 7  ;;  %v17277_v32 = vshrl.u32 %v17261_v28, 16 }
 0x314   : > { %vm19306_vm3 = vmmov %vm19305_vm0  ;;  %v918_v62 = vadd.f32 0.5, %v786_v51  ;;  %v830_v11 = vmul.f32 34.0, %v786_v51  ;;  %v787_v26 = vfloor.f32 %v743_v34  ;;  %v17272_v12 = vadd.f32 %v14703_v33, %v605_v37  ;;  %v7068_v34 = vld [vmem:[#allocation5 + $0x88] sm:$0x7f] }
 0x315   : > { %12848 = vmatprep.mubr.msk.bf16.mxu1 %vm19306_vm3, %v7183_v10  ;;  %vm1573_vm15 = vmand %vm1485_vm5, %vm1529_vm7  ;;  %v740_v43 = vmul.f32 0.029411765, %v695_v60  ;;  %v7190_v23 = vrot.slane %v17258_v54, 7  ;;  %v17285_v36 = vor.u32 %v8020_v55, %v17258_v54  ;;  %v17314_v6 = vshll.u32 %v17294_v42, 16 }
 0x316   : > { %vm19307_vm8 = vmmov %vm19305_vm0  ;;  %v6913_v13 = vsel %vm1573_vm15, 1, %v13273_v22  ;;  %v962_v30 = vmul.f32 0.029411765, %v918_v62  ;;  %v6728_v63 = vld [vmem:[#allocation3 + $0x150] sm:$0xff]  ;;  %v874_v17 = vsub.f32 %v653_v24, %v830_v11  ;;  %v919_v45 = vadd.f32 0.5, %v787_v26 }
 0x317   : > { %6685 = vst.msk [vmem:[#allocation3 + $0x158] sm:$0xff] %vm19307_vm8, %v6641_v1  ;;  %vm19308_vm2 = vmmov %vm19305_vm0  ;;  %vm6957_vm9 = vcmp.eq.s32.totalorder %v6913_v13, 1  ;;  %v6779_v35 = vmul.f32 %v17253_v39, %v6728_v63  ;;  %v831_v58 = vmul.f32 34.0, %v787_v26  ;;  %vm1139_vm15 = vcmp.ge.f32.partialorder %v17232_v47, 0.0 }
 0x318   : > { %7049 = vst.msk [vmem:[#allocation5 + $0xa0] sm:$0xff] %vm19308_vm2, %v7027_v31  ;;  %vm19309_vm11 = vmmov %vm19305_vm0  ;;  %v7001_v48 = vsel %vm6957_vm9, %v6869_v49, 0.0  ;;  %v1006_v61 = vfloor.f32 %v962_v30  ;;  %v963_v56 = vmul.f32 0.029411765, %v919_v45  ;;  %vm1446_vm6 = vcmp.ge.f32.partialorder %v874_v17, 1.0 }
 0x319   : > { %6683 = vst.msk [vmem:[#allocation3 + $0x148] sm:$0xff] %vm19309_vm11, %v6639_v9  ;;  %v7026_v40 = vpack.c.bf16 %v7001_v48, %v7000_v46  ;;  %vm19310_vm7 = vmmov %vm19305_vm0  ;;  %v17269_v52 = vadd.f32 %v17266_v16, %v6779_v35  ;;  %vm1534_vm3 = vcmp.le.f32.partialorder %v874_v17, 32.0  ;;  %vm1183_vm8 = vcmp.lt.f32.partialorder %v17232_v47, 2312.0 }
 0x31a   : > { %v1050_v44 = vmul.f32 34.0, %v1006_v61  ;;  %vm1226_vm10 = vmand %vm1138_vm14, %vm1182_vm13  ;;  %v1007_v4 = vfloor.f32 %v963_v56  ;;  %v7191_v19 = vor.u32 %v7190_v23, %v7187_v59  ;;  %v875_v53 = vsub.f32 %v17232_v47, %v831_v58  ;;  %v17348_v58 = vld [vmem:[#allocation5 + $0x88] sm:$0xff] }
 0x31b   : > { %7048 = vst.msk [vmem:[#allocation5 + $0x98] sm:$0xff] %vm19310_vm7, %v7026_v40  ;;  %v696_v1 = vadd.f32 0.5, %v17272_v12  ;;  %vm19311_vm9 = vsmask.f32 1280  ;;  %v7196_v31 = vrot.slane %v17277_v32, 6  ;;  %v17292_v49 = vshll.u32 %v17261_v28, 16  ;;  %vm1227_vm11 = vmand %vm1139_vm15, %vm1183_vm8 }
 0x31c   : > { %v1094_v3 = vsub.f32 %v786_v51, %v1050_v44  ;;  %v1051_v21 = vmul.f32 34.0, %v1007_v4  ;;  %v7192_v2 = vsel %vm19311_vm9, %v17212_v0, %v7191_v19  ;;  %v6874_v29 = vmax.f32 %v17269_v52, 0.0  ;;  %vm19315_vm15 = vmmov %vm19311_vm9 }
 0x31d   : > { %v17297_v7 = vfloor.f32 %v740_v43  ;;  %vm19312_vm14 = vcmask 523264   ;;  %v7199_v13 = vrot.slane %v17292_v49, 7  ;;  %v8028_v47 = vrot.slane %v17277_v32, 7 }
 0x31e   : > { %vm1270_vm1 = vcmp.ge.f32.partialorder %v1094_v3, 1.0  ;;  %vm1358_vm4 = vcmp.le.f32.partialorder %v1094_v3, 32.0  ;;  %v6729_v18 = vld [vmem:[#allocation3 + $0x158] sm:$0xff]  ;;  %v1095_v10 = vsub.f32 %v787_v26, %v1051_v21  ;;  %12849 = vmatmul.mubr.msk.bf16.gmra.mrb[200].mxu1 %vm19312_vm14, %v7192_v2  ;;  %v17311_v46 = vshrl.u32 %v17294_v42, 16  ;;  %v7495_v2 = vld [vmem:[#allocation5 + $0x10] sm:$0xff] }
 0x31f   : > { %vm1314_vm0 = vmand %vm1226_vm10, %vm1270_vm1  ;;  %v6780_v24 = vmul.f32 %v17253_v39, %v6729_v18  ;;  %vm19313_vm10 = vsmask.f32 256  ;;  %v741_v48 = vmul.f32 0.029411765, %v696_v1  ;;  %v7200_v51 = vor.u32 %v7199_v13, %v7196_v31 }
 0x320   : > { %vm1402_vm5 = vmand %vm1314_vm0, %vm1358_vm4  ;;  %vm1271_vm7 = vcmp.ge.f32.partialorder %v1095_v10, 1.0  ;;  %vm1359_vm13 = vcmp.le.f32.partialorder %v1095_v10, 32.0  ;;  %v8024_v9 = vsel %vm19313_vm10, %v17201_v57, %v17285_v36  ;;  %vm1535_vm0 = vcmp.le.f32.partialorder %v875_v53, 32.0  ;;  %v17316_v57 = vld [vmem:[#allocation5 + $0x80] sm:$0xff] }
 0x321   : > { %vm1490_vm12 = vmand %vm1402_vm5, %vm1446_vm6  ;;  %v6831_v0 = vadd.f32 %v17266_v16, %v6780_v24  ;;  %vm1447_vm6 = vcmp.ge.f32.partialorder %v875_v53, 1.0  ;;  %v916_v40 = vadd.f32 0.5, %v17297_v7  ;;  %v8031_v5 = vor.u32 %v8028_v47, %v17292_v49  ;;  %v7494_v24 = vld [vmem:[#allocation5 + $0x8] sm:$0x80] }
 0x322   : > { %vm1578_vm2 = vmand %vm1490_vm12, %vm1534_vm3  ;;  %v7205_v62 = vrot.slane %v17311_v46, 6  ;;  %v8036_v11 = vrot.slane %v17311_v46, 7  ;;  %v7201_v26 = vsel %vm19315_vm15, %v7191_v19, %v7200_v51  ;;  %v7208_v27 = vrot.slane %v17314_v6, 7 }
 0x323   : > { %v6918_v15 = vsel %vm1578_vm2, 1, %v13273_v22  ;;  %vm19314_vm1 = vmmov %vm19312_vm14  ;;  %v6875_v30 = vmax.f32 %v6831_v0, 0.0  ;;  %v17333_v17 = vshrl.u32 %v17316_v57, 16  ;;  %v17336_v45 = vshll.u32 %v17316_v57, 16 }
 0x324   : > { %12929 = vmatmul.mubr.msk.bf16.gmra.mrb[236].mxu0 %vm19314_vm1, %v8024_v9  ;;  %vm1315_vm4 = vmand %vm1227_vm11, %vm1271_vm7  ;;  %vm6962_vm3 = vcmp.eq.s32.totalorder %v6918_v15, 1  ;;  %v8039_v63 = vor.u32 %v8036_v11, %v17314_v6  ;;  %v17339_v35 = vfloor.f32 %v741_v48  ;;  %v7209_v60 = vor.u32 %v7208_v27, %v7205_v62  ;;  %v7496_v27 = vld [vmem:[#allocation5 + $0x18] sm:$0xff] }
 0x325   : > { %vm1403_vm5 = vmand %vm1315_vm4, %vm1359_vm13  ;;  %v7221_v37 = vshrl.u32 %v7068_v34, 16  ;;  %v7214_v56 = vrot.slane %v17333_v17, 6  ;;  %v7217_v59 = vrot.slane %v17336_v45, 7  ;;  %v7006_v4 = vsel %vm6962_vm3, %v6874_v29, 0.0 }
 0x326   : > { %vm1491_vm12 = vmand %vm1403_vm5, %vm1447_vm6  ;;  %v960_v43 = vmul.f32 0.029411765, %v916_v40  ;;  %v917_v19 = vadd.f32 0.5, %v17339_v35  ;;  %v7224_v10 = vshll.u32 %v7068_v34, 16  ;;  %v8050_v1 = vshrl.u32 %v17348_v58, 16 }
 0x327   : > { %vm1579_vm8 = vmand %vm1491_vm12, %vm1535_vm0  ;;  %v7218_v21 = vor.u32 %v7217_v59, %v7214_v56  ;;  %v7223_v53 = vrot.slane %v7221_v37, 6  ;;  %v8053_v13 = vshll.u32 %v17348_v58, 16  ;;  %v7538_v48 = vrot.slane %v7495_v2, 7  ;;  %v17412_v2 = vld [vmem:[#allocation5 + $0x28] sm:$0xff] }
 0x328   : > { %vm19316_vm2 = vmmov %vm19314_vm1  ;;  %v6919_v44 = vsel %vm1579_vm8, 1, %v13273_v22  ;;  %v7226_v0 = vrot.slane %v7224_v10, 7  ;;  %v17364_v9 = vrot.slane %v8050_v1, 7  ;;  %v961_v40 = vmul.f32 0.029411765, %v917_v19  ;;  %v13237_v19 = vld [vmem:[%s18948_s2 + $0x68] sm:$0xff]  }
 0x329   : > { %12852 = vmatprep.mubr.msk.bf16.mxu1 %vm19316_vm2, %v7201_v26  ;;  %vm19317_vm9 = vmmov %vm19313_vm10  ;;  %vm6963_vm7 = vcmp.eq.s32.totalorder %v6919_v44, 1  ;;  %v17383_v26 = vld [vmem:[#allocation5 + $0x20] sm:$0xff]  ;;  %v7564_v37 = vrot.slane %v17294_v42, 7  ;;  %v7540_v56 = vrot.slane %v7496_v27, 7  ;;  %v7566_v59 = vrot.slane %v17316_v57, 7 }
 0x32a   : > { %v17329_v61 = vsel %vm19317_vm9, %v8020_v55, %v8031_v5  ;;  %vm19318_vm11 = vmmov %vm19314_vm1  ;;  %v7007_v18 = vsel %vm6963_vm7, %v6875_v30, 0.0  ;;  %v8044_v55 = vrot.slane %v17333_v17, 7  ;;  %v7227_v5 = vor.u32 %v7226_v0, %v7223_v53 }
 0x32b   : > { %12932 = vmatprep.mubr.msk.bf16.mxu0 %vm19318_vm11, %v17329_v61  ;;  %vm19319_vm14 = vmmov %vm19317_vm9  ;;  %v7029_v23 = vpack.c.bf16 %v7007_v18, %v7006_v4  ;;  %v8055_v62 = vor.u32 %v8053_v13, %v17364_v9  ;;  %v1005_v44 = vfloor.f32 %v961_v40  ;;  %v554_v4 = vadd.s32 272, %v14691_v41 }
 0x32c   : > { %v17344_v3 = vsel %vm19319_vm14, %v8028_v47, %v8039_v63  ;;  %vm19320_vm13 = vmmov %vm19315_vm15  ;;  %v8047_v29 = vor.u32 %v8044_v55, %v17336_v45  ;;  %v7537_v47 = vrot.slane %v7494_v24, 7  ;;  %v7542_v18 = vrot.slane %v17383_v26, 7 }
 0x32d   : > { %v7210_v52 = vsel %vm19320_vm13, %v7200_v51, %v7209_v60  ;;  %vm19321_vm10 = vmmov %vm19314_vm1  ;;  %7051 = vst.msk [vmem:[#allocation5 + $0xb0] sm:$0xff] %vm19314_vm1, %v7029_v23  ;;  %v1004_v51 = vfloor.f32 %v960_v43  ;;  %v555_v43 = vadd.s32 280, %v14691_v41  ;;  %v598_v24 = vcvt.s32.f32 %v554_v4 }
 0x32e   : > { %12853 = vmatmul.mubr.msk.bf16.gmra.mrb[204].mxu1 %vm19321_vm10, %v7210_v52  ;;  %vm19322_vm6 = vmmov %vm19314_vm1  ;;  %vm1136_vm10 = vcmp.ge.f32.partialorder %v17244_v38, 0.0  ;;  %v828_v41 = vmul.f32 34.0, %v17297_v7  ;;  %v7544_v27 = vrot.slane %v17412_v2, 7 }
 0x32f   : > { %12933 = vmatmul.mubr.msk.bf16.gmra.mrb[240].mxu0 %vm19322_vm6, %v17344_v3  ;;  %vm19323_vm4 = vmmov %vm19320_vm13  ;;  %v1048_v63 = vmul.f32 34.0, %v1004_v51  ;;  %vm1180_vm6 = vcmp.lt.f32.partialorder %v17244_v38, 2312.0  ;;  %v599_v53 = vcvt.s32.f32 %v555_v43  ;;  %v13261_v51 = vld [vmem:[%s18948_s2 + $0x60] sm:$0xff]   ;;  %v17468_v43 = vld [vmem:[#allocation5 + $0x38] sm:$0xff] }
 0x330   : > { %v7219_v31 = vsel %vm19323_vm4, %v7209_v60, %v7218_v21  ;;  %vm19324_vm0 = vmmov %vm19314_vm1  ;;  %v7562_v60 = vrot.slane %v17261_v28, 7 }
 0x331   : > { %12856 = vmatprep.mubr.msk.bf16.mxu1 %vm19324_vm0, %v7219_v31  ;;  %vm19325_vm5 = vmmov %vm19317_vm9  ;;  %vm19331_vm9 = vcmask 1040384   ;;  %v1092_v23 = vsub.f32 %v17297_v7, %v1048_v63  ;;  %v17415_v31 = vadd.f32 %v14703_v33, %v598_v24  ;;  %v17422_v0 = vadd.f32 %v14703_v33, %v599_v53  ;;  %v13241_v7 = vld [vmem:[%s18948_s2 + $0xc8] sm:$0xff]   ;;  %v17436_v33 = vld [vmem:[#allocation5 + $0x30] sm:$0xff] }
 0x332   : > { %v17368_v15 = vsel %vm19325_vm5, %v8036_v11, %v8047_v29  ;;  %vm19326_vm3 = vmmov %vm19324_vm0  ;;  %v7539_v11 = vsel %vm19331_vm9, %v7537_v47, %v7538_v48  ;;  %v13239_v53 = vld [vmem:[%s18948_s2 + $0x78] sm:$0xff]  }
 0x333   : > { %12936 = vmatprep.mubr.msk.bf16.mxu0 %vm19326_vm3, %v17368_v15  ;;  %vm19327_vm12 = vmmov %vm19323_vm4  ;;  %v689_v40 = vadd.f32 0.5, %v17415_v31  ;;  %v13243_v47 = vld [vmem:[%s18948_s2 + $0xd8] sm:$0xff]  }
 0x334   : > { %v7228_v34 = vsel %vm19327_vm12, %v7218_v21, %v7227_v5  ;;  %vm19328_vm15 = vmmov %vm19325_vm5  ;;  %v1049_v21 = vmul.f32 34.0, %v1005_v44  ;;  %vm1268_vm12 = vcmp.ge.f32.partialorder %v1092_v23, 1.0  ;;  %v829_v5 = vmul.f32 34.0, %v17339_v35 }
 0x335   : > { %v17377_v30 = vsel %vm19328_vm15, %v8044_v55, %v8055_v62  ;;  %vm19329_vm8 = vmmov %vm19324_vm0  ;;  %v13238_v62 = vld [vmem:[%s18948_s2 + $0x70] sm:$0xff]   ;;  %v734_v63 = vmul.f32 0.029411765, %v689_v40  ;;  %v7546_v44 = vrot.slane %v17436_v33, 7 }
 0x336   : > { %12857 = vmatmul.mubr.msk.bf16.gmra.mrb[208].mxu1 %vm19329_vm8, %v7228_v34  ;;  %vm19330_vm2 = vmmov %vm19324_vm0  ;;  %vm1137_vm8 = vcmp.ge.f32.partialorder %v17272_v12, 0.0  ;;  %v690_v34 = vadd.f32 0.5, %v17422_v0  ;;  %v17466_v4 = vsub.f32 %v17272_v12, %v829_v5  ;;  %v17558_v5 = vld [vmem:[%s18948_s2 + $0x100] sm:$0xff]  }
 0x337   : > { %12937 = vmatmul.mubr.msk.bf16.gmra.mrb[244].mxu0 %vm19330_vm2, %v17377_v30  ;;  %vm19332_vm11 = vmmov %vm19324_vm0  ;;  %vm1181_vm2 = vcmp.lt.f32.partialorder %v17272_v12, 2312.0 }
 0x338   : > { %12868 = vmatprep.mubr.msk.bf16.mxu1 %vm19332_vm11, %v7539_v11  ;;  %vm19333_vm7 = vmmov %vm19324_vm0  ;;  %v872_v11 = vsub.f32 %v17244_v38, %v828_v41  ;;  %v7548_v38 = vrot.slane %v17468_v43, 7 }
 0x339   : > { %12988 = vmatprep.mubr.msk.bf16.mxu0 %vm19333_vm7, %v17383_v26  ;;  %vm19334_vm14 = vmmov %vm19331_vm9  ;;  %vm1356_vm7 = vcmp.le.f32.partialorder %v1092_v23, 32.0 }
 0x33a   : > { %v17396_v52 = vsel %vm19334_vm14, %v7562_v60, %v7564_v37  ;;  %vm19335_vm13 = vmmov %vm19331_vm9 }
 0x33b   : > { %v17403_v55 = vsel %vm19335_vm13, %v7564_v37, %v7566_v59  ;;  %vm19336_vm1 = vmmov %vm19331_vm9  ;;  %v735_v37 = vmul.f32 0.029411765, %v690_v34 }
 0x33c   : > { %v7541_v10 = vsel %vm19336_vm1, %v7538_v48, %v7540_v56  ;;  %vm19337_vm4 = vmmov %vm19324_vm0  ;;  %v1093_v48 = vsub.f32 %v17339_v35, %v1049_v21  ;;  %v13242_v21 = vld [vmem:[%s18948_s2 + $0xd0] sm:$0xff]   ;;  %v7545_v12 = vsel %vm19336_vm1, %v7542_v18, %v7544_v27  ;;  %v6721_v35 = vld [vmem:[#allocation3 + $0x118] sm:$0xff] }
 0x33d   : > { %vm19338_vm5 = vmmov %vm19336_vm1  ;;  %v17470_v23 = vfloor.f32 %v735_v37  ;;  %v8428_v37 = vshll.u32 %v17412_v2, 16 }
 0x33e   : > { %12869 = vmatmul.mubr.msk.bf16.vlgmr.msra.gmra.mrb[212].mxu1 %vm19337_vm4, %v7541_v10  ;;  %v7543_v29 = vsel %vm19338_vm5, %v7540_v56, %v7542_v18  ;;  %vm17427_vm3 = vmand %vm1136_vm10, %vm1180_vm6  ;;  %vm1269_vm13 = vcmp.ge.f32.partialorder %v1093_v48, 1.0  ;;  %v6720_v56 = vld [vmem:[#allocation3 + $0x110] sm:$0xff]  ;;  %vm1444_vm6 = vcmp.ge.f32.partialorder %v872_v11, 1.0 }
 0x33f   : > { %12989 = vmatmul.mubr.msk.bf16.vlgmr.msra.gmra.mrb[248].mxu0 %vm19324_vm0, %v17412_v2  ;;  %12941 = vmatpush3.bf16.msra.mxu1 %v13261_v51  ;;  %vm19341_vm15 = vmmov %vm19324_vm0  ;;  %v6771_v51 = vmul.f32 %v17253_v39, %v6720_v56 }
 0x340   : > { %12872 = vmatprep.mubr.msk.bf16.mxu1 %vm19341_vm15, %v7543_v29  ;;  %vm19342_vm9 = vmmov %vm19324_vm0  ;;  %12942 = vmatprep.subr.bf16.mxu1 %v13237_v19  ;;  %vm1357_vm0 = vcmp.le.f32.partialorder %v1093_v48, 32.0  ;;  %v17498_v29 = vld [vmem:[#allocation5 + $0x40] sm:$0xff]  ;;  %v823_v48 = vmul.f32 34.0, %v17470_v23 }
 0x341   : > { %12992 = vmatprep.mubr.msk.bf16.mxu0 %vm19342_vm9, %v17436_v33  ;;  %13061 = vmatpush3.bf16.msra.mxu0 %v17070_v20  ;;  %vm17454_vm11 = vmand %vm17427_vm3, %vm1268_vm12  ;;  %v778_v20 = vfloor.f32 %v734_v63  ;;  %v7550_v56 = vrot.slane %v17498_v29, 7 }
 0x342   : > { %13062 = vmatprep.subr.bf16.mxu0 %v13241_v7  ;;  %vm17461_vm14 = vmand %vm1137_vm8, %vm1181_vm2 }
 0x343   : > { %12943 = vmatpush3.bf16.msra.mxu1 %v13237_v19  ;;  %vm17477_vm10 = vmand %vm17454_vm11, %vm1356_vm7  ;;  %v6726_v19 = vld [vmem:[#allocation3 + $0x140] sm:$0xff]  ;;  %v910_v41 = vadd.f32 0.5, %v778_v20  ;;  %vm1445_vm11 = vcmp.ge.f32.partialorder %v17466_v4, 1.0  ;;  %v822_v24 = vmul.f32 34.0, %v778_v20 }
 0x344   : > { %12944 = vmatprep.subr.bf16.mxu1 %v13238_v62  ;;  %vm17488_vm4 = vmand %vm17461_vm14, %vm1269_vm13  ;;  %v6777_v34 = vmul.f32 %v17253_v39, %v6726_v19  ;;  %vm1130_vm14 = vcmp.ge.f32.partialorder %v17415_v31, 0.0  ;;  %vm1174_vm13 = vcmp.lt.f32.partialorder %v17415_v31, 2312.0 }
 0x345   : > { %13063 = vmatpush3.bf16.msra.mxu0 %v13241_v7  ;;  %vm19351_vm5 = vmmov %vm19342_vm9  ;;  %v911_v7 = vadd.f32 0.5, %v17470_v23  ;;  %v954_v40 = vmul.f32 0.029411765, %v910_v41  ;;  %vm1532_vm9 = vcmp.le.f32.partialorder %v872_v11, 32.0 }
 0x346   : > { %12873 = vmatmul.mubr.msk.bf16.gmra.mrb[216].mxu1 %vm19351_vm5, %v7545_v12  ;;  %vm19352_vm3 = vmmov %vm19351_vm5  ;;  %13064 = vmatprep.subr.bf16.mxu0 %v13242_v21 }
 0x347   : > { %12993 = vmatmul.mubr.msk.bf16.gmra.mrb[252].mxu0 %vm19352_vm3, %v17468_v43  ;;  %vm19353_vm12 = vmmov %vm19336_vm1  ;;  %12945 = vmatpush3.bf16.msra.mxu1 %v13238_v62  ;;  %v955_v63 = vmul.f32 0.029411765, %v911_v7  ;;  %v998_v19 = vfloor.f32 %v954_v40  ;;  %v17529_v62 = vld [vmem:[%s18948_s2 + $0xa0] sm:$0xff]   ;;  %vm1175_vm1 = vcmp.lt.f32.partialorder %v17422_v0, 2312.0  ;;  %v6828_v7 = vadd.f32 %v17266_v16, %v6777_v34 }
 0x348   : > { %v7547_v18 = vsel %vm19353_vm12, %v7544_v27, %v7546_v44  ;;  %vm19354_vm15 = vmmov %vm19352_vm3  ;;  %v6727_v27 = vld [vmem:[#allocation3 + $0x148] sm:$0xff]  ;;  %12946 = vmatprep.subr.bf16.mxu1 %v13239_v53  ;;  %v866_v34 = vsub.f32 %v17415_v31, %v822_v24 }
 0x349   : > { %12876 = vmatprep.mubr.msk.bf16.mxu1 %vm19354_vm15, %v7547_v18  ;;  %vm19355_vm8 = vmmov %vm19352_vm3  ;;  %13065 = vmatpush3.bf16.msra.mxu0 %v13242_v21  ;;  %v999_v12 = vfloor.f32 %v955_v63  ;;  %v6778_v21 = vmul.f32 %v17253_v39, %v6727_v27  ;;  %v1042_v10 = vmul.f32 34.0, %v998_v19  ;;  %v6772_v18 = vmul.f32 %v17253_v39, %v6721_v35 }
 0x34a   : > { %12996 = vmatprep.mubr.msk.bf16.mxu0 %vm19355_vm8, %v17498_v29  ;;  %vm17511_vm2 = vmand %vm17477_vm10, %vm1444_vm6  ;;  %13066 = vmatprep.subr.bf16.mxu0 %v13243_v47  ;;  %vm1131_vm6 = vcmp.ge.f32.partialorder %v17422_v0, 0.0  ;;  %v6872_v24 = vmax.f32 %v6828_v7, 0.0  ;;  %v7556_v7 = vrot.slane %v17092_v50, 7 }
 0x34b   : > { %vm17520_vm7 = vmand %vm17488_vm4, %vm1357_vm0  ;;  %vm1533_vm0 = vcmp.le.f32.partialorder %v17466_v4, 32.0  ;;  %12947 = vmatpush3.bf16.msra.mxu1 %v13239_v53  ;;  %v1043_v40 = vmul.f32 34.0, %v999_v12  ;;  %v1086_v27 = vsub.f32 %v778_v20, %v1042_v10  ;;  %v867_v20 = vsub.f32 %v17422_v0, %v823_v48 }
 0x34c   : > { %vm17537_vm10 = vmand %vm17511_vm2, %vm1532_vm9  ;;  %13020 = vmatprep.subr.bf16.mxu1 %v17529_v62  ;;  %v6822_v0 = vadd.f32 %v17266_v16, %v6771_v51  ;;  %v6823_v4 = vadd.f32 %v17266_v16, %v6772_v18  ;;  %v18988_v12 = vrot.slane %v17258_v54, 1 }
 0x34d   : > { %vm17550_vm4 = vmand %vm17520_vm7, %vm1445_vm11  ;;  %13067 = vmatpush3.bf16.msra.mxu0 %v13243_v47  ;;  %v6916_v53 = vsel %vm17537_vm10, 1, %v13273_v22  ;;  %v1087_v35 = vsub.f32 %v17470_v23, %v1043_v40  ;;  %v13263_v23 = vld [vmem:[#allocation5 + $0x50] sm:$0xff]  ;;  %v9830_v47 = vrot.slane %v8053_v13, 1 }
 0x34e   : > { %vm19364_vm5 = vmmov %vm19353_vm12  ;;  %13140 = vmatprep.subr.bf16.mxu0 %v17558_v5  ;;  %v7554_v48 = vrot.slane %v13263_v23, 7  ;;  %v9802_v10 = vor.u32 %v18988_v12, %v17248_v8  ;;  %v6866_v11 = vmax.f32 %v6822_v0, 0.0  ;;  %v6867_v40 = vmax.f32 %v6823_v4, 0.0 }
 0x34f   : > { %v7549_v39 = vsel %vm19364_vm5, %v7546_v44, %v7548_v38  ;;  %vm17568_vm3 = vmand %vm1130_vm14, %vm1174_vm13  ;;  %v13262_v44 = vld [vmem:[#allocation5 + $0x48] sm:$0xff]  ;;  %vm1262_vm14 = vcmp.ge.f32.partialorder %v1086_v27, 1.0  ;;  %vm1350_vm13 = vcmp.le.f32.partialorder %v1086_v27, 32.0  ;;  %vm1263_vm10 = vcmp.ge.f32.partialorder %v1087_v35, 1.0 }
 0x350   : > { %vm19367_vm12 = vmmov %vm19355_vm8  ;;  %v7552_v19 = vrot.slane %v13262_v44, 7  ;;  %v8425_v0 = vshrl.u32 %v17412_v2, 16 }
 0x351   : > { %12877 = vmatmul.mubr.msk.bf16.gmra.mrb[220].mxu1 %vm19367_vm12, %v7549_v39  ;;  %vm19368_vm15 = vmmov %vm19355_vm8  ;;  %v9814_v39 = vrot.slane %v17314_v6, 1 }
 0x352   : > { %12997 = vmatmul.mubr.msk.bf16.gmra.mrb[0].mxu0 %vm19368_vm15, %v13262_v44  ;;  %vm19369_vm8 = vmmov %vm19364_vm5  ;;  %vm1438_vm5 = vcmp.ge.f32.partialorder %v866_v34, 1.0  ;;  %vm1439_vm15 = vcmp.ge.f32.partialorder %v867_v20, 1.0 }
 0x353   : > { %v7551_v31 = vsel %vm19369_vm8, %v7548_v38, %v7550_v56  ;;  %vm17587_vm2 = vmand %vm1131_vm6, %vm1175_vm1  ;;  %v6829_v38 = vadd.f32 %v17266_v16, %v6778_v21  ;;  %vm1351_vm1 = vcmp.le.f32.partialorder %v1087_v35, 32.0  ;;  %vm1526_vm8 = vcmp.le.f32.partialorder %v866_v34, 32.0 }
 0x354   : > { %vm17595_vm9 = vmand %vm17550_vm4, %vm1533_vm0  ;;  %vm6960_vm4 = vcmp.eq.s32.totalorder %v6916_v53, 1  ;;  %v9806_v16 = vrot.slane %v17292_v49, 1  ;;  %v9818_v6 = vor.u32 %v9814_v39, %v17311_v46 }
 0x355   : > { %vm19374_vm11 = vmmov %vm19367_vm12  ;;  %v6917_v51 = vsel %vm17595_vm9, 1, %v13273_v22  ;;  %v6873_v41 = vmax.f32 %v6829_v38, 0.0  ;;  %v7004_v21 = vsel %vm6960_vm4, %v6872_v24, 0.0  ;;  %vm19376_vm9 = vcmask 1040384  }
 0x356   : > { %12880 = vmatprep.mubr.msk.bf16.mxu1 %vm19374_vm11, %v7551_v31  ;;  %vm19375_vm7 = vmmov %vm19374_vm11  ;;  %v7553_v18 = vsel %vm19376_vm9, %v7550_v56, %v7552_v19  ;;  %vm19380_vm4 = vsmask.f32 7424  ;;  %v7558_v56 = vrot.slane %v17159_v14, 7  ;;  %v9810_v34 = vor.u32 %v9806_v16, %v17277_v32 }
 0x357   : > { %13000 = vmatprep.mubr.msk.bf16.mxu0 %vm19375_vm7, %v13263_v23  ;;  %vm1306_vm6 = vmand %vm17568_vm3, %vm1262_vm14  ;;  %vm1527_vm7 = vcmp.le.f32.partialorder %v867_v20, 32.0  ;;  %v17626_v8 = vsel %vm19380_vm4, %v9802_v10, %v9806_v16  ;;  %v9822_v20 = vrot.slane %v17336_v45, 1  ;;  %v17655_v38 = vor.u32 %v9830_v47, %v8050_v1 }
 0x358   : > { %vm1307_vm0 = vmand %vm17587_vm2, %vm1263_vm10  ;;  %vm6961_vm2 = vcmp.eq.s32.totalorder %v6917_v51, 1  ;;  %v9743_v45 = vshll.u32 %v17436_v33, 16  ;;  %v17668_v23 = vshll.u32 %v17468_v43, 16  ;;  %v7560_v1 = vrot.slane %v17241_v25, 7 }
 0x359   : > { %vm1394_vm12 = vmand %vm1306_vm6, %vm1350_vm13  ;;  %vm19377_vm13 = vcmask 523264   ;;  %v7005_v27 = vsel %vm6961_vm2, %v6873_v41, 0.0  ;;  %v9826_v46 = vor.u32 %v9822_v20, %v17333_v17  ;;  %v17675_v24 = vrot.slane %v8428_v37, 1 }
 0x35a   : > { %vm1395_vm3 = vmand %vm1307_vm0, %vm1351_vm1  ;;  %12881 = vmatmul.mubr.msk.bf16.gmra.mrb[224].mxu1 %vm19377_vm13, %v7553_v18  ;;  %v7028_v17 = vpack.c.bf16 %v7005_v27, %v7004_v21  ;;  %v9745_v4 = vrot.slane %v9743_v45, 1  ;;  %v9741_v51 = vshrl.u32 %v17436_v33, 16 }
 0x35b   : > { %vm1482_vm11 = vmand %vm1394_vm12, %vm1438_vm5 }
 0x35c   : > { %vm1483_vm14 = vmand %vm1395_vm3, %vm1439_vm15  ;;  %v9275_v21 = vor.u32 %v9745_v4, %v9741_v51 }
 0x35d   : > { %vm19378_vm10 = vmmov %vm19377_vm13 }
 0x35e   : > { %13001 = vmatmul.mubr.msk.bf16.gmra.mrb[4].mxu0 %vm19378_vm10, %v17092_v50  ;;  %vm19379_vm6 = vmmov %vm19376_vm9 }
 0x35f   : > { %v7555_v49 = vsel %vm19379_vm6, %v7552_v19, %v7554_v48  ;;  %vm1570_vm1 = vmand %vm1482_vm11, %vm1526_vm8  ;;  %v9267_v19 = vor.u32 %v17675_v24, %v8425_v0 }
 0x360   : > { %vm19381_vm0 = vmmov %vm19378_vm10  ;;  %v6910_v50 = vsel %vm1570_vm1, 1, %v13273_v22 }
 0x361   : > { %12884 = vmatprep.mubr.msk.bf16.mxu1 %vm19381_vm0, %v7555_v49  ;;  %vm19382_vm5 = vmmov %vm19381_vm0  ;;  %vm6954_vm15 = vcmp.eq.s32.totalorder %v6910_v50, 1  ;;  %v7510_v50 = vld [vmem:[#allocation5 + $0x88] sm:$0x7f] }
 0x362   : > { %13004 = vmatprep.mubr.msk.bf16.mxu0 %vm19382_vm5, %v17159_v14  ;;  %vm1571_vm12 = vmand %vm1483_vm14, %vm1527_vm7  ;;  %v6998_v44 = vsel %vm6954_vm15, %v6866_v11, 0.0  ;;  %v8386_v11 = vld [vmem:[#allocation5 + $0x18] sm:$0x80] }
 0x363   : > { %v6911_v63 = vsel %vm1571_vm12, 1, %v13273_v22  ;;  %vm19383_vm3 = vmmov %vm19379_vm6 }
 0x364   : > { %v7557_v53 = vsel %vm19383_vm3, %v7554_v48, %v7556_v7  ;;  %vm6955_vm8 = vcmp.eq.s32.totalorder %v6911_v63, 1  ;;  %vm19384_vm11 = vmmov %vm19380_vm4  ;;  %v9750_v48 = vrot.slane %v17668_v23, 1 }
 0x365   : > { %v17641_v31 = vsel %vm19384_vm11, %v9810_v34, %v9814_v39  ;;  %v6999_v14 = vsel %vm6955_vm8, %v6867_v40, 0.0  ;;  %vm19385_vm7 = vmmov %vm19383_vm3  ;;  %v12830_v10 = vpop.f32.mrb[180].mxu1  ;;  %v8413_v34 = vshrl.u32 %v8386_v11, 16  ;;  %v13246_v11 = vld [vmem:[%s18948_s2 + $0xb0] sm:$0xff]  }
 0x366   : > { %v7559_v35 = vsel %vm19385_vm7, %v7556_v7, %v7558_v56  ;;  %v7025_v32 = vpack.c.bf16 %v6999_v14, %v6998_v44  ;;  %vm19386_vm2 = vmmov %vm19380_vm4  ;;  %v7335_v7 = vpop.f32.mrb[181].mxu1  ;;  %v9717_v44 = vld [vmem:[#allocation5 + $0x48] sm:$0xff] }
 0x367   : > { %v17648_v22 = vsel %vm19386_vm2, %v9818_v6, %v9822_v20  ;;  %vm19387_vm9 = vmmov %vm19381_vm0  ;;  %v7568_v6 = vrot.slane %v7510_v50, 7  ;;  %v17729_v20 = vld [vmem:[#allocation5 + $0x98] sm:$0xff] }
 0x368   : > { %7047 = vst.msk [vmem:[#allocation5 + $0x90] sm:$0xff] %vm19387_vm9, %v7025_v32  ;;  %vm19388_vm14 = vmmov %vm19381_vm0 }
 0x369   : > { %12885 = vmatmul.mubr.msk.bf16.gmra.mrb[228].mxu1 %vm19388_vm14, %v7557_v53  ;;  %vm19389_vm13 = vmmov %vm19381_vm0  ;;  %v17702_v49 = vpop.f32.mrb[216].mxu0  ;;  %v8415_v53 = vrot.slane %v8413_v34, 7  ;;  %v9720_v34 = vld [vmem:[#allocation5 + $0x60] sm:$0xff] }
 0x36a   : > { %13005 = vmatmul.mubr.msk.bf16.gmra.mrb[8].mxu0 %vm19389_vm13, %v17241_v25  ;;  %vm19390_vm10 = vmmov %vm19386_vm2  ;;  %v17705_v40 = vpop.f32.mrb[217].mxu0  ;;  %v17870_v12 = vshrl.u32 %v9720_v34, 16 }
 0x36b   : > { %v17662_v13 = vsel %vm19390_vm10, %v9826_v46, %v9830_v47  ;;  %vm19391_vm6 = vmmov %vm19381_vm0  ;;  %v17707_v39 = vpop.f32.mrb[218].mxu0  ;;  %v8435_v47 = vrot.slane %v9741_v51, 7  ;;  %v9719_v51 = vld [vmem:[#allocation5 + $0x58] sm:$0xff] }
 0x36c   : > { %12888 = vmatprep.mubr.msk.bf16.mxu1 %vm19391_vm6, %v7559_v35  ;;  %vm19392_vm1 = vmmov %vm19381_vm0  ;;  %v17717_v63 = vpop.f32.mrb[219].mxu0  ;;  %v17732_v35 = vshll.u32 %v17498_v29, 16 }
 0x36d   : > { %13008 = vmatprep.mubr.msk.bf16.mxu0 %vm19392_vm1, %v17261_v28  ;;  %vm19393_vm4 = vmmov %vm19381_vm0  ;;  %v18985_v28 = vshrl.u32 %v17383_v26, 16  ;;  %19408 = vst [vmem:[#allocation6_spill] sm:$0xff] %v17717_v63 }
 0x36e   : > { %7050 = vst.msk [vmem:[#allocation5 + $0xa8] sm:$0xff] %vm19393_vm4, %v7028_v17  ;;  %vm19394_vm0 = vmmov %vm19383_vm3  ;;  %v9758_v17 = vrot.slane %v17732_v35, 1 }
 0x36f   : > { %v7561_v41 = vsel %vm19394_vm0, %v7558_v56, %v7560_v1  ;;  %vm19395_vm5 = vmmov %vm19386_vm2  ;;  %v17713_v56 = vld [vmem:[#allocation5 + $0x90] sm:$0xff]  ;;  %v8419_v27 = vrot.slane %v18985_v28, 7  ;;  %v7569_v14 = vsel %vm19394_vm0, %v7566_v59, %v7568_v6  ;;  %v17744_v59 = vshll.u32 %v9717_v44, 16  ;;  %v17855_v28 = vld [vmem:[%s18948_s2 + $0xe0] sm:$0xff]  }
 0x370   : > { %v17684_v25 = vsel %vm19395_vm5, %v9267_v19, %v9745_v4  ;;  %vm19396_vm12 = vmmov %vm19392_vm1  ;;  %v8438_v4 = vor.u32 %v9743_v45, %v8435_v47  ;;  %v17753_v19 = vshrl.u32 %v17498_v29, 16 }
 0x371   : > { %12889 = vmatmul.mubr.msk.bf16.gmra.mrb[232].mxu1 %vm19396_vm12, %v7561_v41  ;;  %vm19397_vm15 = vmmov %vm19392_vm1 }
 0x372   : > { %13009 = vmatmul.mubr.msk.bf16.gmra.mrb[12].mxu0 %vm19397_vm15, %v17294_v42  ;;  %vm19398_vm3 = vmmov %vm19394_vm0  ;;  %v12831_v42 = vpop.f32.mrb[182].mxu1  ;;  %vm19412_vm15 = vsmask.f32 256  ;;  %v9762_v33 = vor.u32 %v17753_v19, %v9758_v17  ;;  %v18989_v45 = vrot.slane %v17753_v19, 7 }
 0x373   : > { %v7563_v16 = vsel %vm19398_vm3, %v7560_v1, %v7562_v60  ;;  %vm19399_vm8 = vmmov %vm19392_vm1  ;;  %v7338_v60 = vpop.f32.mrb[183].mxu1 }
 0x374   : > { %12892 = vmatprep.mubr.msk.bf16.mxu1 %vm19399_vm8, %v7563_v16  ;;  %vm19400_vm11 = vmmov %vm19392_vm1  ;;  %v8454_v6 = vor.u32 %v17732_v35, %v18989_v45 }
 0x375   : > { %13012 = vmatprep.mubr.msk.bf16.mxu0 %vm19400_vm11, %v17316_v57  ;;  %vm19401_vm7 = vmmov %vm19386_vm2  ;;  %v17740_v57 = vshrl.u32 %v17468_v43, 16  ;;  %v9766_v43 = vrot.slane %v17744_v59, 1 }
 0x376   : > { %v17696_v18 = vsel %vm19401_vm7, %v9275_v21, %v9750_v48  ;;  %vm19402_vm2 = vmmov %vm19392_vm1  ;;  %v17772_v21 = vshll.u32 %v9719_v51, 16 }
 0x377   : > { %7464 = vst.msk [vmem:[#allocation4 + $0x10] sm:$0xff] %vm19402_vm2, %v12830_v10  ;;  %vm19403_vm9 = vmmov %vm19392_vm1  ;;  %v9754_v46 = vor.u32 %v17740_v57, %v9750_v48  ;;  %v13245_v48 = vld [vmem:[%s18948_s2 + $0xa8] sm:$0xff]  }
 0x378   : > { %7462 = vst.msk [vmem:[#allocation4] sm:$0xff] %vm19403_vm9, %v7335_v7  ;;  %vm19404_vm14 = vmmov %vm19392_vm1  ;;  %v13249_v10 = vld [vmem:[%s18948_s2 + $0x108] sm:$0xff]  }
 0x379   : > { %7465 = vst.msk [vmem:[#allocation4 + $0x18] sm:$0xff] %vm19404_vm14, %v12831_v42  ;;  %vm19405_vm13 = vmmov %vm19392_vm1  ;;  %v17782_v42 = vshrl.u32 %v9717_v44, 16  ;;  %v17801_v44 = vld [vmem:[#allocation5 + $0x70] sm:$0xff] }
 0x37a   : > { %7463 = vst.msk [vmem:[#allocation4 + $0x8] sm:$0xff] %vm19405_vm13, %v7338_v60  ;;  %vm19406_vm10 = vmmov %vm19392_vm1 }
 0x37b   : > { %12893 = vmatmul.mubr.msk.bf16.gmra.mrb[236].mxu1 %vm19406_vm10, %v17396_v52  ;;  %vm19407_vm6 = vmmov %vm19392_vm1  ;;  %v18986_v52 = vshll.u32 %v17383_v26, 16  ;;  %v9770_v50 = vor.u32 %v17782_v42, %v9766_v43 }
 0x37c   : > { %13013 = vmatmul.mubr.msk.bf16.gmra.mrb[16].mxu0 %vm19407_vm6, %v17348_v58  ;;  %12896 = vmatprep.mubr.msk.bf16.mxu1 %vm19392_vm1, %v17403_v55  ;;  %vm19409_vm4 = vmmov %vm19392_vm1  ;;  %v8427_v55 = vrot.slane %v8425_v0, 7  ;;  %v9718_v0 = vld [vmem:[#allocation5 + $0x50] sm:$0xff] }
 0x37d   : > { %13016 = vmatprep.mubr.msk.bf16.mxu0 %vm19409_vm4, %v17713_v56  ;;  %v8422_v58 = vor.u32 %v18986_v52, %v8419_v27  ;;  %vm19410_vm5 = vmmov %vm19392_vm1  ;;  %v17756_v41 = vshll.u32 %v9718_v0, 16 }
 0x37e   : > { %vm19411_vm12 = vmmov %vm19392_vm1  ;;  %v8430_v1 = vor.u32 %v8428_v37, %v8427_v55  ;;  %v8443_v37 = vrot.slane %v17740_v57, 7 }
 0x37f   : > { %v8423_v32 = vsel %vm19412_vm15, %v8415_v53, %v8422_v58  ;;  %vm19413_vm3 = vmmov %vm19392_vm1  ;;  %v9774_v60 = vrot.slane %v17756_v41, 1  ;;  %v17798_v53 = vshrl.u32 %v9718_v0, 16  ;;  %v9782_v58 = vrot.slane %v17772_v21, 1 }
 0x380   : > { %vm19414_vm8 = vmmov %vm19392_vm1 }
 0x381   : > { %vm19415_vm11 = vmmov %vm19401_vm7 }
 0x382   : > { %v17762_v16 = vsel %vm19415_vm11, %v9754_v46, %v9758_v17  ;;  %vm19416_vm7 = vmmov %vm19412_vm15  ;;  %v13250_v46 = vld [vmem:[%s18948_s2 + $0x110] sm:$0xff]   ;;  %v17812_v17 = vld [vmem:[#allocation5 + $0x78] sm:$0xff] }
 0x383   : > { %12897 = vmatmul.mubr.msk.bf16.gmra.mrb[240].mxu1 %vm19410_vm5, %v7569_v14  ;;  %v8431_v2 = vsel %vm19416_vm7, %v8419_v27, %v8430_v1  ;;  %vm19417_vm2 = vmmov %vm19392_vm1  ;;  %v17793_v27 = vld [vmem:[#allocation5 + $0x68] sm:$0xff]  ;;  %v17803_v14 = vld [vmem:[#allocation5 + $0x80] sm:$0xff] }
 0x384   : > { %13017 = vmatmul.mubr.msk.bf16.gmra.mrb[20].mxu0 %vm19411_vm12, %v17729_v20  ;;  %12948 = vmatprep.mubr.msk.bf16.mxu1 %vm19413_vm3, %v8423_v32  ;;  %vm19418_vm9 = vmmov %vm19392_vm1  ;;  %v17806_v32 = vshll.u32 %v9720_v34, 16  ;;  %v17814_v1 = vld [vmem:[#allocation5 + $0x88] sm:$0xff]  ;;  %v18987_v0 = vrot.slane %v17793_v27, 1 }
 0x385   : > { %13068 = vmatprep.mubr.msk.bf16.mxu0 %vm19414_vm8, %v17696_v18  ;;  %vm19419_vm14 = vmmov %vm19416_vm7 }
 0x386   : > { %v8439_v29 = vsel %vm19419_vm14, %v8427_v55, %v8438_v4  ;;  %vm19420_vm13 = vmmov %vm19392_vm1  ;;  %v9778_v55 = vor.u32 %v17798_v53, %v9774_v60 }
 0x387   : > { %vm19421_vm10 = vmmov %vm19415_vm11  ;;  %vm19431_vm11 = vcmask 1046528  }
 0x388   : > { %v17780_v7 = vsel %vm19421_vm10, %v9762_v33, %v9766_v43  ;;  %vm19422_vm6 = vmmov %vm19392_vm1  ;;  %v17872_v45 = vpop.f32.mrb[220].mxu0 }
 0x389   : > { %vm19423_vm1 = vmmov %vm19421_vm10 }
 0x38a   : > { %v17818_v4 = vsel %vm19423_vm1, %v9770_v50, %v9774_v60  ;;  %vm19424_vm4 = vmmov %vm19416_vm7  ;;  %v8467_v60 = vrot.slane %v17798_v53, 7  ;;  %v18990_v50 = vrot.slane %v17814_v1, 1 }
 0x38b   : > { %12949 = vmatmul.mubr.msk.bf16.vlgmr.msra.gmra.mrb[244].mxu1 %vm19417_vm2, %v8431_v2  ;;  %v13247_v2 = vld [vmem:[%s18948_s2 + $0xb8] sm:$0xff]   ;;  %vm19425_vm0 = vmmov %vm19417_vm2 }
 0x38c   : > { %13069 = vmatmul.mubr.msk.bf16.vlgmr.msra.gmra.mrb[24].mxu0 %vm19418_vm9, %v17762_v16  ;;  %13021 = vmatpush3.bf16.msra.mxu1 %v17529_v62  ;;  %v8446_v62 = vor.u32 %v17668_v23, %v8443_v37  ;;  %vm19426_vm5 = vmmov %vm19425_vm0 }
 0x38d   : > { %12952 = vmatprep.mubr.msk.bf16.mxu1 %vm19420_vm13, %v8439_v29  ;;  %13072 = vmatprep.mubr.msk.bf16.mxu0 %vm19422_vm6, %v17780_v7  ;;  %vm19427_vm12 = vmmov %vm19424_vm4 }
 0x38e   : > { %13022 = vmatprep.subr.bf16.mxu1 %v13245_v48  ;;  %13141 = vmatpush3.bf16.msra.mxu0 %v17558_v5  ;;  %v8459_v5 = vrot.slane %v17782_v42, 7  ;;  %v8447_v43 = vsel %vm19424_vm4, %v8435_v47, %v8446_v62  ;;  %v8455_v33 = vsel %vm19427_vm12, %v8443_v37, %v8454_v6  ;;  %vm19428_vm15 = vmmov %vm19423_vm1  ;;  %v13251_v47 = vld [vmem:[%s18948_s2 + $0x118] sm:$0xff]   ;;  %v10263_v37 = vrot.slane %v17803_v14, 1 }
 0x38f   : > { %13142 = vmatprep.subr.bf16.mxu0 %v13249_v10  ;;  %v17831_v29 = vsel %vm19428_vm15, %v9778_v55, %v9782_v58  ;;  %vm19429_vm3 = vmmov %vm19425_vm0  ;;  %v9790_v6 = vrot.slane %v17806_v32, 1 }
 0x390   : > { %13023 = vmatpush3.bf16.msra.mxu1 %v13245_v48  ;;  %v17821_v48 = vshrl.u32 %v9719_v51, 16  ;;  %v10259_v51 = vrot.slane %v17801_v44, 1  ;;  %vm19430_vm8 = vmmov %vm19425_vm0  ;;  %v8462_v55 = vor.u32 %v17744_v59, %v8459_v5 }
 0x391   : > { %13024 = vmatprep.subr.bf16.mxu1 %v13246_v11  ;;  %vm19432_vm7 = vmmov %vm19425_vm0  ;;  %v17879_v63 = vor.u32 %v17870_v12, %v9790_v6 }
 0x392   : > { %13143 = vmatpush3.bf16.msra.mxu0 %v13249_v10  ;;  %v10261_v10 = vrot.slane %v17812_v17, 1  ;;  %v9786_v62 = vor.u32 %v17821_v48, %v9782_v58  ;;  %vm19433_vm2 = vmmov %vm19431_vm11 }
 0x393   : > { %12953 = vmatmul.mubr.msk.bf16.gmra.mrb[248].mxu1 %vm19425_vm0, %v8447_v43  ;;  %13144 = vmatprep.subr.bf16.mxu0 %v13250_v46  ;;  %v12834_v43 = vpop.f32.mrb[184].mxu1  ;;  %vm19434_vm9 = vmmov %vm19433_vm2 }
 0x394   : > { %13073 = vmatmul.mubr.msk.bf16.gmra.mrb[28].mxu0 %vm19426_vm5, %v17818_v4  ;;  %12956 = vmatprep.mubr.msk.bf16.mxu1 %vm19429_vm3, %v8455_v33  ;;  %v17850_v33 = vsel %vm19431_vm11, %v18987_v0, %v10259_v51  ;;  %7468 = vst.msk [vmem:[#allocation4 + $0x30] sm:$0xff] %vm19432_vm7, %v12834_v43  ;;  %v7351_v58 = vpop.f32.mrb[185].mxu1  ;;  %v17859_v52 = vsel %vm19433_vm2, %v10259_v51, %v10261_v10  ;;  %vm19435_vm14 = vmmov %vm19433_vm2  ;;  %v17875_v51 = vpop.f32.mrb[221].mxu0 }
 0x395   : > { %13076 = vmatprep.mubr.msk.bf16.mxu0 %vm19430_vm8, %v17831_v29  ;;  %13025 = vmatpush3.bf16.msra.mxu1 %v13246_v11  ;;  %v17862_v11 = vsel %vm19434_vm9, %v10261_v10, %v10263_v37  ;;  %v17867_v0 = vsel %vm19435_vm14, %v10263_v37, %v18990_v50  ;;  %vm19436_vm13 = vmmov %vm19425_vm0  ;;  %v12835_v43 = vpop.f32.mrb[186].mxu1  ;;  %19437 = vst [vmem:[#allocation7_spill] sm:$0xff] %v17875_v51  ;;  %v17881_v37 = vpop.f32.mrb[222].mxu0  ;;  %v19440_v50 = vrot.slane %v17753_v19, 7  ;;  %v8475_v51 = vrot.slane %v17821_v48, 7 }
 0x396   : > { %13026 = vmatprep.subr.bf16.mxu1 %v13247_v2  ;;  %13145 = vmatpush3.bf16.msra.mxu0 %v13250_v46  ;;  %v8470_v46 = vor.u32 %v17756_v41, %v8467_v60  ;;  %7466 = vst.msk [vmem:[#allocation4 + $0x20] sm:$0xff] %vm19436_vm13, %v7351_v58  ;;  %vm19438_vm10 = vmmov %vm19425_vm0  ;;  %v7354_v10 = vpop.f32.mrb[187].mxu1  ;;  %v17885_v34 = vsel %vm19423_vm1, %v9786_v62, %v9790_v6  ;;  %v19443_v62 = vrot.slane %v17258_v54, 1 }
 0x397   : > { %13146 = vmatprep.subr.bf16.mxu0 %v13251_v47  ;;  %7469 = vst.msk [vmem:[#allocation4 + $0x38] sm:$0xff] %vm19438_vm10, %v12835_v43  ;;  %vm19439_vm6 = vmmov %vm19425_vm0  ;;  %v8463_v58 = vsel %vm19424_vm4, %v19440_v50, %v8462_v55  ;;  %v17892_v43 = vpop.f32.mrb[223].mxu0  ;;  %v8483_v50 = vrot.slane %v17870_v12, 7 }
 0x398   : > { %7467 = vst.msk [vmem:[#allocation4 + $0x28] sm:$0xff] %vm19439_vm6, %v7354_v10  ;;  %vm19441_vm5 = vmmov %vm19425_vm0 }
 0x399   : > { %13027 = vmatpush3.bf16.msra.mxu1 %v13247_v2  ;;  %vm19442_vm12 = vmmov %vm19424_vm4  ;;  %v8486_v55 = vor.u32 %v17806_v32, %v8483_v50 }
 0x39a   : > { %13147 = vmatpush3.bf16.msra.mxu0 %v13251_v47  ;;  %13100 = vmatprep.subr.bf16.mxu1 %v17855_v28  ;;  %v8471_v2 = vsel %vm19442_vm12, %v8459_v5, %v8470_v46  ;;  %vm19444_vm15 = vmmov %vm19423_vm1  ;;  %v8478_v47 = vor.u32 %v17772_v21, %v8475_v51  ;;  %v17916_v5 = vshll.u32 %v17713_v56, 16 }
 0x39b   : > { %12957 = vmatmul.mubr.msk.bf16.gmra.mrb[252].mxu1 %vm19425_vm0, %v8463_v58  ;;  %v9799_v6 = vsel %vm19444_vm15, %v17879_v63, %v19443_v62  ;;  %vm19445_vm3 = vmmov %vm19425_vm0  ;;  %v17934_v58 = vld [vmem:[#allocation5 + $0xa8] sm:$0xff] }
 0x39c   : > { %13077 = vmatmul.mubr.msk.bf16.gmra.mrb[32].mxu0 %vm19441_vm5, %v17885_v34  ;;  %12960 = vmatprep.mubr.msk.bf16.mxu1 %vm19445_vm3, %v8471_v2  ;;  %vm19446_vm8 = vmmov %vm19425_vm0  ;;  %v18992_v62 = vshll.u32 %v17934_v58, 16 }
 0x39d   : > { %13080 = vmatprep.mubr.msk.bf16.mxu0 %vm19446_vm8, %v9799_v6  ;;  %vm19447_vm11 = vmmov %vm19424_vm4 }
 0x39e   : > { %v8479_v10 = vsel %vm19447_vm11, %v8467_v60, %v8478_v47  ;;  %vm19448_vm7 = vmmov %vm19425_vm0  ;;  %v17929_v60 = vld [vmem:[#allocation5 + $0xa0] sm:$0xff] }
 0x39f   : > { %vm19449_vm2 = vmmov %vm19425_vm0  ;;  %v18991_v2 = vshll.u32 %v17929_v60, 16 }
 0x3a0   : > { %vm19450_vm9 = vmmov %vm19424_vm4 }
 0x3a1   : > { %v8487_v54 = vsel %vm19450_vm9, %v8475_v51, %v8486_v55  ;;  %vm19451_vm14 = vmmov %vm19425_vm0  ;;  %v17932_v51 = vshrl.u32 %v17713_v56, 16 }
 0x3a2   : > { %vm19452_vm13 = vmmov %vm19425_vm0 }
 0x3a3   : > { %12961 = vmatmul.mubr.msk.bf16.gmra.mrb[0].mxu1 %vm19448_vm7, %v8479_v10  ;;  %vm19453_vm10 = vmmov %vm19424_vm4  ;;  %v8531_v56 = vrot.slane %v17932_v51, 7 }
 0x3a4   : > { %13081 = vmatmul.mubr.msk.bf16.gmra.mrb[36].mxu0 %vm19449_vm2, %v17626_v8  ;;  %12964 = vmatprep.mubr.msk.bf16.mxu1 %vm19451_vm14, %v8487_v54  ;;  %v8495_v46 = vsel %vm19453_vm10, %v8483_v50, %v17285_v36  ;;  %vm19454_vm6 = vmmov %vm19425_vm0  ;;  %v9844_v8 = vshll.u32 %v17729_v20, 16  ;;  %v9848_v50 = vshrl.u32 %v17729_v20, 16  ;;  %v10606_v54 = vld [vmem:[#allocation5 + $0x30] sm:$0xfe] }
 0x3a5   : > { %13084 = vmatprep.mubr.msk.bf16.mxu0 %vm19452_vm13, %v17641_v31  ;;  %vm19455_vm1 = vmmov %vm19425_vm0  ;;  %v9838_v31 = vrot.slane %v17916_v5, 1  ;;  %v8534_v20 = vor.u32 %v17916_v5, %v8531_v56 }
 0x3a6   : > { %vm19456_vm4 = vmmov %vm19425_vm0  ;;  %v9846_v36 = vrot.slane %v9844_v8, 1  ;;  %v12838_v6 = vpop.f32.mrb[188].mxu1 }
 0x3a7   : > { %vm19457_vm5 = vmmov %vm19444_vm15 }
 0x3a8   : > { %vm19458_vm12 = vmmov %vm19425_vm0  ;;  %v9850_v10 = vor.u32 %v9848_v50, %v9846_v36 }
 0x3a9   : > { %vm19459_vm15 = vmmov %vm19425_vm0  ;;  %v17953_v47 = vpop.f32.mrb[224].mxu0 }
 0x3aa   : > { %vm19460_vm3 = vmmov %vm19457_vm5  ;;  %19464 = vst [vmem:[#allocation8_spill] sm:$0xff] %v17953_v47 }
 0x3ab   : > { %12965 = vmatmul.mubr.msk.bf16.gmra.mrb[4].mxu1 %vm19454_vm6, %v8495_v46  ;;  %vm19461_vm8 = vmmov %vm19425_vm0  ;;  %v17956_v46 = vpop.f32.mrb[225].mxu0 }
 0x3ac   : > { %13085 = vmatmul.mubr.msk.bf16.gmra.mrb[40].mxu0 %vm19455_vm1, %v17648_v22  ;;  %12968 = vmatprep.mubr.msk.bf16.mxu1 %vm19456_vm4, %v17329_v61  ;;  %v9842_v22 = vor.u32 %v17932_v51, %v9838_v31  ;;  %v9839_v61 = vsel %vm19457_vm5, %v17655_v38, %v9838_v31  ;;  %vm19462_vm11 = vmmov %vm19425_vm0  ;;  %v7367_v38 = vpop.f32.mrb[189].mxu1  ;;  %19466 = vst [vmem:[#allocation9_spill] sm:$0xff] %v17956_v46  ;;  %v18993_v31 = vshrl.u32 %v17929_v60, 16  ;;  %v8539_v46 = vrot.slane %v9848_v50, 7 }
 0x3ad   : > { %13088 = vmatprep.mubr.msk.bf16.mxu0 %vm19425_vm0, %v17662_v13  ;;  %vm19463_vm7 = vmmov %vm19425_vm0  ;;  %v12839_v55 = vpop.f32.mrb[190].mxu1  ;;  %vm19474_vm1 = vsmask.f32 256 }
 0x3ae   : > { %v9847_v13 = vsel %vm19460_vm3, %v9842_v22, %v9846_v36  ;;  %7472 = vst.msk [vmem:[#allocation4 + $0x50] sm:$0xff] %vm19463_vm7, %v12838_v6  ;;  %vm19465_vm2 = vmmov %vm19425_vm0  ;;  %v9862_v22 = vrot.slane %v18992_v62, 1  ;;  %v9730_v36 = vld [vmem:[#allocation5 + $0xb0] sm:$0x1]  ;;  %v8535_v62 = vsel %vm19474_vm1, %v17364_v9, %v8534_v20  ;;  %vm19484_vm7 = vsmask.f32 6400 }
 0x3af   : > { %7470 = vst.msk [vmem:[#allocation4 + $0x40] sm:$0xff] %vm19465_vm2, %v7367_v38  ;;  %vm19467_vm9 = vmmov %vm19425_vm0  ;;  %v10633_v38 = vshrl.u32 %v10606_v54, 16 }
 0x3b0   : > { %7473 = vst.msk [vmem:[#allocation4 + $0x58] sm:$0xff] %vm19467_vm9, %v12839_v55  ;;  %vm19469_vm14 = vmmov %vm19425_vm0  ;;  %v10636_v55 = vshll.u32 %v10606_v54, 16  ;;  %v9864_v54 = vshrl.u32 %v17934_v58, 16 }
 0x3b1   : > { %vm19471_vm13 = vmmov %vm19460_vm3 }
 0x3b2   : > { %vm19472_vm10 = vmmov %vm19425_vm0  ;;  %v9866_v9 = vor.u32 %v9864_v54, %v9862_v22 }
 0x3b3   : > { %12969 = vmatmul.mubr.msk.bf16.gmra.mrb[8].mxu1 %vm19458_vm12, %v17344_v3  ;;  %v9854_v3 = vrot.slane %v18991_v2, 1  ;;  %vm19473_vm6 = vmmov %vm19425_vm0 }
 0x3b4   : > { %13089 = vmatmul.mubr.msk.bf16.gmra.mrb[44].mxu0 %vm19459_vm15, %v9839_v61  ;;  %12972 = vmatprep.mubr.msk.bf16.mxu1 %vm19461_vm8, %v17368_v15  ;;  %v7370_v15 = vpop.f32.mrb[191].mxu1  ;;  %v17963_v61 = vpop.f32.mrb[226].mxu0  ;;  %vm19475_vm4 = vmmov %vm19460_vm3 }
 0x3b5   : > { %13092 = vmatprep.mubr.msk.bf16.mxu0 %vm19462_vm11, %v9847_v13  ;;  %19468 = vst [vmem:[#allocation10_spill] sm:$0xff] %v17963_v61  ;;  %7471 = vst.msk [vmem:[#allocation4 + $0x48] sm:$0xff] %vm19469_vm14, %v7370_v15  ;;  %v17966_v13 = vpop.f32.mrb[227].mxu0  ;;  %v9858_v6 = vor.u32 %v18993_v31, %v9854_v3  ;;  %v9855_v2 = vsel %vm19471_vm13, %v9850_v10, %v9854_v3  ;;  %v10646_v61 = vrot.slane %v17668_v23, 2  ;;  %v9868_v3 = vshll.u32 %v9730_v36, 16 }
 0x3b6   : > { %19470 = vst [vmem:[#allocation11_spill] sm:$0xff] %v17966_v13  ;;  %v10643_v13 = vrot.slane %v17740_v57, 1  ;;  %vm19476_vm5 = vmmov %vm19425_vm0  ;;  %v10638_v10 = vrot.slane %v10636_v55, 2  ;;  %v8542_v31 = vor.u32 %v9844_v8, %v8539_v46  ;;  %v19478_v23 = vshrl.u32 %v17383_v26, 16 }
 0x3b7   : > { %v9863_v15 = vsel %vm19475_vm4, %v9858_v6, %v9862_v22  ;;  %v9870_v57 = vrot.slane %v9868_v3, 1  ;;  %vm19479_vm12 = vmmov %vm19474_vm1  ;;  %v10670_v3 = vrot.slane %v17798_v53, 1 }
 0x3b8   : > { %v10647_v20 = vor.u32 %v10646_v61, %v10643_v13  ;;  %v8543_v47 = vsel %vm19479_vm12, %v8531_v56, %v8542_v31  ;;  %vm19480_vm15 = vmmov %vm19460_vm3  ;;  %v10664_v56 = vrot.slane %v17744_v59, 2 }
 0x3b9   : > { %v9871_v36 = vsel %vm19480_vm15, %v9866_v9, %v9870_v57  ;;  %vm19481_vm3 = vmmov %vm19425_vm0  ;;  %v13255_v57 = vld [vmem:[%s18948_s2 + $0xf8] sm:$0xff]  }
 0x3ba   : > { %vm19482_vm8 = vmmov %vm19425_vm0 }
 0x3bb   : > { %12973 = vmatmul.mubr.msk.bf16.gmra.mrb[12].mxu1 %vm19472_vm10, %v17377_v30  ;;  %v19477_v30 = vshll.u32 %v17383_v26, 16  ;;  %vm19483_vm11 = vmmov %vm19475_vm4  ;;  %v10661_v26 = vrot.slane %v17782_v42, 1 }
 0x3bc   : > { %13093 = vmatmul.mubr.msk.bf16.gmra.mrb[48].mxu0 %vm19473_vm6, %v9855_v2  ;;  %12976 = vmatprep.mubr.msk.bf16.mxu1 %vm19425_vm0, %v8535_v62  ;;  %v10635_v2 = vrot.slane %v10633_v38, 1  ;;  %vm19485_vm2 = vmmov %vm19425_vm0  ;;  %v13253_v38 = vld [vmem:[%s18948_s2 + $0xe8] sm:$0xff]  }
 0x3bd   : > { %13096 = vmatprep.mubr.msk.bf16.mxu0 %vm19476_vm5, %v9863_v15  ;;  %v9258_v50 = vrot.slane %v19477_v30, 1  ;;  %v10652_v15 = vrot.slane %v17753_v19, 1  ;;  %v10655_v30 = vrot.slane %v17732_v35, 2  ;;  %vm19486_vm9 = vmmov %vm19425_vm0  ;;  %v12842_v19 = vpop.f32.mrb[192].mxu1  ;;  %v18002_v35 = vpop.f32.mrb[228].mxu0  ;;  %v10665_v42 = vor.u32 %v10664_v56, %v10661_v26 }
 0x3be   : > { %v10639_v62 = vor.u32 %v10638_v10, %v10635_v2  ;;  %vm19487_vm14 = vmmov %vm19425_vm0  ;;  %v10679_v2 = vrot.slane %v17821_v48, 1  ;;  %v10682_v10 = vrot.slane %v17772_v21, 2  ;;  %v10695_v48 = vshrl.u32 %v17793_v27, 16 }
 0x3bf   : > { %v9259_v6 = vor.u32 %v9258_v50, %v19478_v23  ;;  %7476 = vst.msk [vmem:[#allocation4 + $0x70] sm:$0xff] %vm19487_vm14, %v12842_v19  ;;  %v10656_v31 = vor.u32 %v10655_v30, %v10652_v15  ;;  %vm19488_vm13 = vmmov %vm19425_vm0  ;;  %v10673_v50 = vrot.slane %v17756_v41, 2  ;;  %v10698_v21 = vshll.u32 %v17793_v27, 16 }
 0x3c0   : > { %v10648_v46 = vsel %vm19484_vm7, %v10639_v62, %v10647_v20  ;;  %vm19489_vm10 = vmmov %vm19425_vm0  ;;  %v10683_v53 = vor.u32 %v10682_v10, %v10679_v2  ;;  %v10716_v30 = vshll.u32 %v17812_v17, 16  ;;  %v18076_v10 = vld [vmem:[#allocation5 + $0x98] sm:$0xff] }
 0x3c1   : > { %v9264_v8 = vsel %vm19483_vm11, %v9259_v6, %v17675_v24  ;;  %v18005_v24 = vpop.f32.mrb[229].mxu0  ;;  %vm19490_vm6 = vmmov %vm19425_vm0  ;;  %v10674_v41 = vor.u32 %v10673_v50, %v10670_v3  ;;  %v10697_v6 = vrot.slane %v10695_v48, 1  ;;  %v10700_v62 = vrot.slane %v10698_v21, 2 }
 0x3c2   : > { %v18008_v61 = vpop.f32.mrb[230].mxu0  ;;  %vm19491_vm1 = vmmov %vm19484_vm7  ;;  %v10718_v56 = vrot.slane %v10716_v30, 2 }
 0x3c3   : > { %12977 = vmatmul.mubr.msk.bf16.gmra.mrb[16].mxu1 %vm19481_vm3, %v8543_v47  ;;  %v7383_v47 = vpop.f32.mrb[193].mxu1  ;;  %v18011_v59 = vpop.f32.mrb[231].mxu0  ;;  %v10657_v55 = vsel %vm19491_vm1, %v10647_v20, %v10656_v31  ;;  %vm19492_vm4 = vmmov %vm19425_vm0  ;;  %v10691_v20 = vrot.slane %v17806_v32, 2  ;;  %v10704_v32 = vshrl.u32 %v17801_v44, 16  ;;  %v10701_v15 = vor.u32 %v10700_v62, %v10697_v6 }
 0x3c4   : > { %13097 = vmatmul.mubr.msk.bf16.gmra.mrb[52].mxu0 %vm19482_vm8, %v9871_v36  ;;  %13028 = vmatprep.mubr.msk.bf16.mxu1 %vm19485_vm2, %v9264_v8  ;;  %7474 = vst.msk [vmem:[#allocation4 + $0x60] sm:$0xff] %vm19488_vm13, %v7383_v47  ;;  %v12843_v22 = vpop.f32.mrb[194].mxu1  ;;  %vm19493_vm5 = vmmov %vm19425_vm0  ;;  %v10707_v36 = vshll.u32 %v17801_v44, 16  ;;  %v10722_v47 = vshrl.u32 %v17803_v14, 16 }
 0x3c5   : > { %13148 = vmatprep.mubr.msk.bf16.mxu0 %vm19486_vm9, %v10648_v46  ;;  %7477 = vst.msk [vmem:[#allocation4 + $0x78] sm:$0xff] %vm19489_vm10, %v12843_v22  ;;  %v7386_v13 = vpop.f32.mrb[195].mxu1  ;;  %vm19494_vm12 = vmmov %vm19491_vm1  ;;  %v10706_v46 = vrot.slane %v10704_v32, 1  ;;  %v9327_v22 = vrot.slane %v10698_v21, 1  ;;  %v10749_v21 = vshrl.u32 %v18076_v10, 16 }
 0x3c6   : > { %7475 = vst.msk [vmem:[#allocation4 + $0x68] sm:$0xff] %vm19490_vm6, %v7386_v13  ;;  %v10666_v9 = vsel %vm19494_vm12, %v10656_v31, %v10665_v42  ;;  %vm19495_vm15 = vmmov %vm19425_vm0  ;;  %v10709_v26 = vrot.slane %v10707_v36, 2  ;;  %v10725_v31 = vshll.u32 %v17803_v14, 16  ;;  %v10731_v13 = vshrl.u32 %v17814_v1, 16 }
 0x3c7   : > { %vm19496_vm3 = vmmov %vm19491_vm1 }
 0x3c8   : > { %vm19497_vm8 = vmmov %vm19425_vm0  ;;  %v10710_v19 = vor.u32 %v10709_v26, %v10706_v46  ;;  %v10727_v3 = vrot.slane %v10725_v31, 2  ;;  %v10733_v50 = vrot.slane %v10731_v13, 1  ;;  %v10751_v26 = vrot.slane %v10749_v21, 1 }
 0x3c9   : > { %vm19498_vm11 = vmmov %vm19425_vm0 }
 0x3ca   : > { %vm19499_vm7 = vmmov %vm19491_vm1 }
 0x3cb   : > { %13029 = vmatmul.mubr.msk.bf16.vlgmr.msra.gmra.mrb[20].mxu1 %vm19492_vm4, %v17684_v25  ;;  %v13254_v25 = vld [vmem:[%s18948_s2 + $0xf0] sm:$0xff]   ;;  %v10684_v23 = vsel %vm19499_vm7, %v10674_v41, %v10683_v53  ;;  %vm19500_vm2 = vmmov %vm19425_vm0 }
 0x3cc   : > { %13149 = vmatmul.mubr.msk.bf16.vlgmr.msra.gmra.mrb[56].mxu0 %vm19425_vm0, %v10657_v55  ;;  %13101 = vmatpush3.bf16.msra.mxu1 %v17855_v28  ;;  %v10675_v28 = vsel %vm19496_vm3, %v10665_v42, %v10674_v41  ;;  %vm19501_vm9 = vmmov %vm19425_vm0  ;;  %v10734_v42 = vshll.u32 %v17814_v1, 16  ;;  %v10724_v55 = vrot.slane %v10722_v47, 1  ;;  %v9343_v41 = vrot.slane %v10716_v30, 1 }
 0x3cd   : > { %13032 = vmatprep.mubr.msk.bf16.mxu1 %vm19493_vm5, %v17696_v18  ;;  %13152 = vmatprep.mubr.msk.bf16.mxu0 %vm19495_vm15, %v10666_v9  ;;  %v10688_v18 = vrot.slane %v17870_v12, 1  ;;  %vm19502_vm14 = vmmov %vm19491_vm1  ;;  %vm19511_vm15 = vsmask.f32 7424  ;;  %v9335_v9 = vrot.slane %v10707_v36, 1  ;;  %v10742_v36 = vrot.slane %v17932_v51, 1 }
 0x3ce   : > { %13102 = vmatprep.subr.bf16.mxu1 %v13253_v38  ;;  %vm19503_vm13 = vmmov %vm19425_vm0  ;;  %v10736_v2 = vrot.slane %v10734_v42, 2 }
 0x3cf   : > { %v10692_v12 = vor.u32 %v10691_v20, %v10688_v18  ;;  %vm19504_vm10 = vmmov %vm19425_vm0 }
 0x3d0   : > { %13103 = vmatpush3.bf16.msra.mxu1 %v13253_v38  ;;  %vm19505_vm6 = vmmov %vm19491_vm1 }
 0x3d1   : > { %13104 = vmatprep.subr.bf16.mxu1 %v13254_v25  ;;  %v10693_v8 = vsel %vm19502_vm14, %v10683_v53, %v10692_v12  ;;  %vm19506_vm1 = vmmov %vm19425_vm0  ;;  %v10737_v53 = vor.u32 %v10736_v2, %v10733_v50  ;;  %v19534_v2 = vshll.u32 %v17934_v58, 16 }
 0x3d2   : > { %vm19507_vm4 = vmmov %vm19425_vm0 }
 0x3d3   : > { %13033 = vmatmul.mubr.msk.bf16.gmra.mrb[24].mxu1 %vm19497_vm8, %v17762_v16  ;;  %v10713_v16 = vshrl.u32 %v17812_v17, 16  ;;  %vm19508_vm0 = vmmov %vm19496_vm3 }
 0x3d4   : > { %13153 = vmatmul.mubr.msk.bf16.gmra.mrb[60].mxu0 %vm19498_vm11, %v10675_v28  ;;  %13036 = vmatprep.mubr.msk.bf16.mxu1 %vm19500_vm2, %v17780_v7  ;;  %v10702_v7 = vsel %vm19505_vm6, %v10692_v12, %v10701_v15  ;;  %v10711_v38 = vsel %vm19508_vm0, %v10701_v15, %v10710_v19  ;;  %vm19509_vm5 = vmmov %vm19506_vm1  ;;  %v10745_v15 = vrot.slane %v17916_v5, 2  ;;  %v9351_v5 = vrot.slane %v10725_v31, 1 }
 0x3d5   : > { %13156 = vmatprep.mubr.msk.bf16.mxu0 %vm19501_vm9, %v10684_v23  ;;  %13105 = vmatpush3.bf16.msra.mxu1 %v13254_v25  ;;  %v10715_v44 = vrot.slane %v10713_v16, 1  ;;  %vm19510_vm12 = vmmov %vm19506_vm1  ;;  %v9331_v25 = vor.u32 %v10695_v48, %v9327_v22  ;;  %v9339_v23 = vor.u32 %v10704_v32, %v9335_v9  ;;  %v9347_v51 = vor.u32 %v10713_v16, %v9343_v41 }
 0x3d6   : > { %13106 = vmatprep.subr.bf16.mxu1 %v13255_v57  ;;  %vm19512_vm3 = vmmov %vm19508_vm0  ;;  %v19529_v31 = vshll.u32 %v17929_v60, 16 }
 0x3d7   : > { %vm19513_vm8 = vmmov %vm19506_vm1 }
 0x3d8   : > { %vm19514_vm11 = vmmov %vm19506_vm1  ;;  %v10763_v50 = vrot.slane %v19529_v31, 2 }
 0x3d9   : > { %13107 = vmatpush3.bf16.msra.mxu1 %v13255_v57  ;;  %vm19515_vm7 = vmmov %vm19506_vm1 }
 0x3da   : > { %v12846_v28 = vpop.f32.mrb[196].mxu1  ;;  %vm19516_vm2 = vmmov %vm19506_vm1 }
 0x3db   : > { %13037 = vmatmul.mubr.msk.bf16.gmra.mrb[28].mxu1 %vm19503_vm13, %v17818_v4  ;;  %v10719_v4 = vor.u32 %v10718_v56, %v10715_v44  ;;  %7480 = vst.msk [vmem:[#allocation4 + $0x90] sm:$0xff] %vm19515_vm7, %v12846_v28  ;;  %v7399_v20 = vpop.f32.mrb[197].mxu1  ;;  %vm19517_vm9 = vmmov %vm19511_vm15  ;;  %v10746_v44 = vor.u32 %v10745_v15, %v10742_v36  ;;  %v18106_v56 = vld [vmem:[#allocation5 + $0x90] sm:$0xff] }
 0x3dc   : > { %13157 = vmatmul.mubr.msk.bf16.gmra.mrb[64].mxu0 %vm19504_vm10, %v10693_v8  ;;  %13040 = vmatprep.mubr.msk.bf16.mxu1 %vm19506_vm1, %v17831_v29  ;;  %v9328_v29 = vsel %vm19511_vm15, %v17879_v63, %v9327_v22  ;;  %v10752_v63 = vshll.u32 %v18076_v10, 16  ;;  %7478 = vst.msk [vmem:[#allocation4 + $0x80] sm:$0xff] %vm19516_vm2, %v7399_v20  ;;  %v12847_v6 = vpop.f32.mrb[198].mxu1  ;;  %v9336_v62 = vsel %vm19517_vm9, %v9331_v25, %v9335_v9  ;;  %vm19518_vm14 = vmmov %vm19508_vm0  ;;  %v10772_v9 = vrot.slane %v19534_v2, 2  ;;  %v10205_v2 = vld [vmem:[#allocation5 + $0x50] sm:$0xff] }
 0x3dd   : > { %13160 = vmatprep.mubr.msk.bf16.mxu0 %vm19507_vm4, %v10702_v7  ;;  %v10720_v14 = vsel %vm19512_vm3, %v10710_v19, %v10719_v4  ;;  %vm19519_vm13 = vmmov %vm19506_vm1  ;;  %v7402_v30 = vpop.f32.mrb[199].mxu1  ;;  %v9359_v19 = vrot.slane %v10734_v42, 1  ;;  %v10769_v42 = vrot.slane %v9864_v54, 1  ;;  %v9369_v28 = vshrl.u32 %v18106_v56, 16 }
 0x3de   : > { %v18080_v18 = vpop.f32.mrb[232].mxu0  ;;  %7481 = vst.msk [vmem:[#allocation4 + $0x98] sm:$0xff] %vm19519_vm13, %v12847_v6  ;;  %vm19520_vm10 = vmmov %vm19506_vm1  ;;  %v10754_v7 = vrot.slane %v10752_v63, 2  ;;  %v9375_v20 = vrot.slane %v10752_v63, 1  ;;  %v9243_v6 = vld [vmem:[#allocation5 + $0xa0] sm:$0x1] }
 0x3df   : > { %v18083_v57 = vpop.f32.mrb[233].mxu0  ;;  %vm19521_vm6 = vmmov %vm19506_vm1  ;;  %v9363_v25 = vor.u32 %v10731_v13, %v9359_v19  ;;  %v10202_v63 = vld [vmem:[#allocation5 + $0x38] sm:$0xff] }
 0x3e0   : > { %v18086_v48 = vpop.f32.mrb[234].mxu0  ;;  %vm19522_vm1 = vmmov %vm19517_vm9  ;;  %v10755_v22 = vor.u32 %v10754_v7, %v10751_v26  ;;  %v10201_v26 = vld [vmem:[#allocation5 + $0x30] sm:$0xfe]  ;;  %v10245_v7 = vrot.slane %v10202_v63, 1 }
 0x3e1   : > { %v18093_v8 = vpop.f32.mrb[235].mxu0  ;;  %v9344_v32 = vsel %vm19522_vm1, %v9339_v23, %v9343_v41  ;;  %vm19523_vm4 = vmmov %vm19508_vm0  ;;  %v10773_v23 = vor.u32 %v10772_v9, %v10769_v42 }
 0x3e2   : > { %vm19524_vm0 = vmmov %vm19516_vm2 }
 0x3e3   : > { %13041 = vmatmul.mubr.msk.bf16.gmra.mrb[32].mxu1 %vm19509_vm5, %v17885_v34  ;;  %v10728_v34 = vor.u32 %v10727_v3, %v10724_v55  ;;  %7479 = vst.msk [vmem:[#allocation4 + $0x88] sm:$0xff] %vm19524_vm0, %v7402_v30  ;;  %vm19525_vm5 = vmmov %vm19524_vm0  ;;  %v10747_v3 = vsel %vm19512_vm3, %v10737_v53, %v10746_v44  ;;  %v9381_v30 = vshll.u32 %v9243_v6, 16 }
 0x3e4   : > { %13161 = vmatmul.mubr.msk.bf16.gmra.mrb[68].mxu0 %vm19510_vm12, %v10711_v38  ;;  %13044 = vmatprep.mubr.msk.bf16.mxu1 %vm19513_vm8, %v9328_v29  ;;  %vm19526_vm12 = vmmov %vm19524_vm0  ;;  %v9365_v38 = vshll.u32 %v18106_v56, 16  ;;  %v19528_v29 = vshrl.u32 %v17929_v60, 16 }
 0x3e5   : > { %13164 = vmatprep.mubr.msk.bf16.mxu0 %vm19514_vm11, %v10720_v14  ;;  %v10729_v12 = vsel %vm19518_vm14, %v10719_v4, %v10728_v34  ;;  %v10738_v46 = vsel %vm19523_vm4, %v10728_v34, %v10737_v53  ;;  %v9355_v4 = vor.u32 %v10722_v47, %v9351_v5  ;;  %vm19527_vm15 = vmmov %vm19522_vm1  ;;  %v10622_v47 = vld [vmem:[#allocation5 + $0xb0] sm:$0x3] }
 0x3e6   : > { %v9352_v55 = vsel %vm19527_vm15, %v9347_v51, %v9351_v5  ;;  %v10760_v14 = vrot.slane %v19528_v29, 1  ;;  %vm19530_vm8 = vmmov %vm19524_vm0  ;;  %v9367_v60 = vrot.slane %v9365_v38, 1  ;;  %v10776_v41 = vshrl.u32 %v10622_v47, 16 }
 0x3e7   : > { %vm19531_vm11 = vmmov %vm19524_vm0  ;;  %v10779_v53 = vshll.u32 %v10622_v47, 16  ;;  %v9383_v5 = vrot.slane %v9381_v30, 1  ;;  %v10244_v51 = vrot.slane %v10201_v26, 1 }
 0x3e8   : > { %vm19532_vm7 = vmmov %vm19522_vm1  ;;  %v10764_v34 = vor.u32 %v10763_v50, %v10760_v14  ;;  %v9371_v54 = vor.u32 %v9369_v28, %v9367_v60 }
 0x3e9   : > { %v9360_v17 = vsel %vm19532_vm7, %v9355_v4, %v9359_v19  ;;  %vm19533_vm2 = vmmov %vm19512_vm3  ;;  %v10781_v36 = vrot.slane %v10779_v53, 2 }
 0x3ea   : > { %v10756_v16 = vsel %vm19533_vm2, %v10746_v44, %v10755_v22  ;;  %vm19535_vm9 = vmmov %vm19524_vm0 }
 0x3eb   : > { %13045 = vmatmul.mubr.msk.bf16.gmra.mrb[36].mxu1 %vm19520_vm10, %v9336_v62  ;;  %vm19536_vm14 = vmmov %vm19524_vm0 }
 0x3ec   : > { %13165 = vmatmul.mubr.msk.bf16.gmra.mrb[72].mxu0 %vm19521_vm6, %v10729_v12  ;;  %13048 = vmatprep.mubr.msk.bf16.mxu1 %vm19525_vm5, %v9344_v32  ;;  %vm19537_vm13 = vmmov %vm19522_vm1  ;;  %v10778_v12 = vrot.slane %v10776_v41, 1  ;;  %v9379_v32 = vor.u32 %v10749_v21, %v9375_v20  ;;  %v10204_v21 = vld [vmem:[#allocation5 + $0x48] sm:$0xff] }
 0x3ed   : > { %13168 = vmatprep.mubr.msk.bf16.mxu0 %vm19526_vm12, %v10738_v46  ;;  %v9368_v58 = vsel %vm19537_vm13, %v9363_v25, %v9367_v60  ;;  %vm19538_vm10 = vmmov %vm19533_vm2  ;;  %v10206_v60 = vld [vmem:[#allocation5 + $0x58] sm:$0xff]  ;;  %v10251_v25 = vrot.slane %v10205_v2, 1 }
 0x3ee   : > { %v10765_v62 = vsel %vm19538_vm10, %v10755_v22, %v10764_v34  ;;  %vm19539_vm6 = vmmov %vm19524_vm0  ;;  %v10782_v46 = vor.u32 %v10781_v36, %v10778_v12  ;;  %v10203_v22 = vld [vmem:[#allocation5 + $0x40] sm:$0xff] }
 0x3ef   : > { %vm19540_vm1 = vmmov %vm19524_vm0  ;;  %v10207_v12 = vld [vmem:[#allocation5 + $0x60] sm:$0xff] }
 0x3f0   : > { %vm19541_vm4 = vmmov %vm19532_vm7  ;;  %vm19549_vm7 = vcmask 1046528  }
 0x3f1   : > { %v9376_v13 = vsel %vm19541_vm4, %v9371_v54, %v9375_v20  ;;  %vm19542_vm0 = vmmov %vm19533_vm2  ;;  %v10246_v4 = vsel %vm19549_vm7, %v10244_v51, %v10245_v7  ;;  %v12850_v38 = vpop.f32.mrb[200].mxu1  ;;  %v10253_v20 = vrot.slane %v10206_v60, 1  ;;  %v7804_v60 = vld [vmem:[#allocation4 + $0x8] sm:$0xff] }
 0x3f2   : > { %v10774_v15 = vsel %vm19542_vm0, %v10764_v34, %v10773_v23  ;;  %vm19543_vm5 = vmmov %vm19540_vm1 }
 0x3f3   : > { %13049 = vmatmul.mubr.msk.bf16.gmra.mrb[40].mxu1 %vm19530_vm8, %v9352_v55  ;;  %vm19544_vm12 = vmmov %vm19540_vm1  ;;  %v7415_v55 = vpop.f32.mrb[201].mxu1 }
 0x3f4   : > { %13169 = vmatmul.mubr.msk.bf16.gmra.mrb[76].mxu0 %vm19531_vm11, %v10747_v3  ;;  %13052 = vmatprep.mubr.msk.bf16.mxu1 %vm19535_vm9, %v9360_v17  ;;  %vm19545_vm15 = vmmov %vm19541_vm4  ;;  %v10247_v3 = vrot.slane %v10203_v22, 1  ;;  %v12851_v14 = vpop.f32.mrb[202].mxu1  ;;  %v10249_v17 = vrot.slane %v10204_v21, 1 }
 0x3f5   : > { %13172 = vmatprep.mubr.msk.bf16.mxu0 %vm19536_vm14, %v10756_v16  ;;  %v9384_v44 = vsel %vm19545_vm15, %v9379_v32, %v9383_v5  ;;  %vm19546_vm3 = vmmov %vm19542_vm0  ;;  %v7418_v50 = vpop.f32.mrb[203].mxu1 }
 0x3f6   : > { %v10783_v19 = vsel %vm19546_vm3, %v10773_v23, %v10782_v46  ;;  %vm19547_vm8 = vmmov %vm19540_vm1 }
 0x3f7   : > { %vm19548_vm11 = vmmov %vm19540_vm1  ;;  %v18145_v29 = vpop.f32.mrb[236].mxu0 }
 0x3f8   : > { %vm19550_vm2 = vmmov %vm19540_vm1  ;;  %v18148_v31 = vpop.f32.mrb[237].mxu0 }
 0x3f9   : > { %vm19551_vm9 = vmmov %vm19540_vm1  ;;  %v18151_v16 = vpop.f32.mrb[238].mxu0 }
 0x3fa   : > { %7484 = vst.msk [vmem:[#allocation4 + $0xb0] sm:$0xff] %vm19551_vm9, %v12850_v38  ;;  %vm19552_vm14 = vmmov %vm19540_vm1  ;;  %v18154_v47 = vpop.f32.mrb[239].mxu0 }
 0x3fb   : > { %13053 = vmatmul.mubr.msk.bf16.gmra.mrb[44].mxu1 %vm19539_vm6, %v9368_v58  ;;  %7482 = vst.msk [vmem:[#allocation4 + $0xa0] sm:$0xff] %vm19552_vm14, %v7415_v55  ;;  %vm19553_vm13 = vmmov %vm19540_vm1 }
 0x3fc   : > { %13173 = vmatmul.mubr.msk.bf16.gmra.mrb[80].mxu0 %vm19540_vm1, %v10765_v62  ;;  %13056 = vmatprep.mubr.msk.bf16.mxu1 %vm19543_vm5, %v9376_v13  ;;  %7485 = vst.msk [vmem:[#allocation4 + $0xb8] sm:$0xff] %vm19553_vm13, %v12851_v14  ;;  %vm19554_vm10 = vmmov %vm19540_vm1  ;;  %v10255_v13 = vrot.slane %v10207_v12, 1  ;;  %v7807_v12 = vld [vmem:[#allocation4 + $0x20] sm:$0xff] }
 0x3fd   : > { %13176 = vmatprep.mubr.msk.bf16.mxu0 %vm19544_vm12, %v10774_v15  ;;  %7483 = vst.msk [vmem:[#allocation4 + $0xa8] sm:$0xff] %vm19554_vm10, %v7418_v50  ;;  %vm19555_vm6 = vmmov %vm19549_vm7 }
 0x3fe   : > { %v10248_v42 = vsel %vm19555_vm6, %v10245_v7, %v10247_v3  ;;  %vm19556_vm4 = vmmov %vm19555_vm6 }
 0x3ff   : > { %v10250_v9 = vsel %vm19556_vm4, %v10247_v3, %v10249_v17  ;;  %vm19557_vm0 = vmmov %vm19540_vm1  ;;  %v7803_v3 = vld [vmem:[#allocation4] sm:$0xff] }
 0x400   : > { %vm19558_vm5 = vmmov %vm19557_vm0 }
 0x401   : > { %v12854_v34 = vpop.f32.mrb[204].mxu1  ;;  %vm19559_vm12 = vmmov %vm19557_vm0 }
 0x402   : > { %v18160_v41 = vpop.f32.mrb[240].mxu0  ;;  %7488 = vst.msk [vmem:[#allocation4 + $0xd0] sm:$0xff] %vm19558_vm5, %v12854_v34  ;;  %v7431_v53 = vpop.f32.mrb[205].mxu1  ;;  %vm19560_vm15 = vmmov %vm19557_vm0 }
 0x403   : > { %13057 = vmatmul.mubr.msk.bf16.gmra.mrb[48].mxu1 %vm19547_vm8, %v9384_v44  ;;  %v18163_v28 = vpop.f32.mrb[241].mxu0  ;;  %7486 = vst.msk [vmem:[#allocation4 + $0xc0] sm:$0xff] %vm19559_vm12, %v7431_v53  ;;  %v12855_v23 = vpop.f32.mrb[206].mxu1  ;;  %vm19561_vm3 = vmmov %vm19556_vm4  ;;  %v19572_v44 = vrot.slane %v17793_v27, 1 }
 0x404   : > { %13177 = vmatmul.mubr.msk.bf16.gmra.mrb[84].mxu0 %vm19548_vm11, %v10783_v19  ;;  %13108 = vmatprep.mubr.msk.bf16.mxu1 %vm19550_vm2, %v10246_v4  ;;  %v18166_v6 = vpop.f32.mrb[242].mxu0  ;;  %7489 = vst.msk [vmem:[#allocation4 + $0xd8] sm:$0xff] %vm19560_vm15, %v12855_v23  ;;  %v7434_v54 = vpop.f32.mrb[207].mxu1  ;;  %v10252_v62 = vsel %vm19561_vm3, %v10249_v17, %v10251_v25  ;;  %vm19562_vm8 = vmmov %vm19557_vm0  ;;  %v7805_v4 = vld [vmem:[#allocation4 + $0x10] sm:$0xff] }
 0x405   : > { %v18169_v58 = vpop.f32.mrb[243].mxu0  ;;  %7487 = vst.msk [vmem:[#allocation4 + $0xc8] sm:$0xff] %vm19562_vm8, %v7434_v54  ;;  %vm19563_vm11 = vmmov %vm19557_vm0 }
 0x406   : > { %vm19564_vm7 = vmmov %vm19561_vm3 }
 0x407   : > { %v10254_v36 = vsel %vm19564_vm7, %v10251_v25, %v10253_v20  ;;  %vm19565_vm2 = vmmov %vm19557_vm0 }
 0x408   : > { %vm19566_vm9 = vmmov %vm19557_vm0 }
 0x409   : > { %v12858_v15 = vpop.f32.mrb[208].mxu1  ;;  %vm19567_vm14 = vmmov %vm19557_vm0 }
 0x40a   : > { %v18176_v30 = vpop.f32.mrb[244].mxu0  ;;  %7492 = vst.msk [vmem:[#allocation4 + $0xf0] sm:$0xff] %vm19566_vm9, %v12858_v15  ;;  %v7447_v63 = vpop.f32.mrb[209].mxu1  ;;  %vm19568_vm13 = vmmov %vm19557_vm0 }
 0x40b   : > { %13109 = vmatmul.mubr.msk.bf16.vlgmr.msra.gmra.mrb[52].mxu1 %vm19540_vm1, %v10248_v42  ;;  %v18179_v32 = vpop.f32.mrb[245].mxu0  ;;  %7490 = vst.msk [vmem:[#allocation4 + $0xe0] sm:$0xff] %vm19567_vm14, %v7447_v63  ;;  %v12859_v46 = vpop.f32.mrb[210].mxu1  ;;  %vm19569_vm10 = vmmov %vm19561_vm3  ;;  %v7806_v42 = vld [vmem:[#allocation4 + $0x18] sm:$0xff] }
 0x40c   : > { %13112 = vmatprep.mubr.msk.bf16.mxu1 %vm19557_vm0, %v10250_v9  ;;  %v18182_v26 = vpop.f32.mrb[246].mxu0  ;;  %7493 = vst.msk [vmem:[#allocation4 + $0xf8] sm:$0xff] %vm19568_vm13, %v12859_v46  ;;  %v7450_v7 = vpop.f32.mrb[211].mxu1  ;;  %v10256_v51 = vsel %vm19569_vm10, %v10253_v20, %v10255_v13  ;;  %vm19570_vm6 = vmmov %vm19557_vm0  ;;  %v7809_v20 = vld [vmem:[#allocation4 + $0x30] sm:$0xff]  ;;  %v7810_v63 = vld [vmem:[#allocation4 + $0x38] sm:$0xff] }
 0x40d   : > { %v18185_v5 = vpop.f32.mrb[247].mxu0  ;;  %7491 = vst.msk [vmem:[#allocation4 + $0xe8] sm:$0xff] %vm19570_vm6, %v7450_v7  ;;  %vm19571_vm1 = vmmov %vm19557_vm0 }
 0x40e   : > { %vm19573_vm4 = vmmov %vm19561_vm3 }
 0x40f   : > { %v10258_v19 = vsel %vm19573_vm4, %v10255_v13, %v19572_v44  ;;  %vm19574_vm5 = vmmov %vm19557_vm0 }
 0x410   : > { %vm19575_vm12 = vmmov %vm19557_vm0 }
 0x411   : > { %v12870_v22 = vpop.f32.mrb[212].mxu1  ;;  %vm19576_vm15 = vmmov %vm19557_vm0 }
 0x412   : > { %v18194_v38 = vpop.f32.mrb[248].mxu0  ;;  %v7837_v21 = vadd.f32 %v12870_v22, %v7805_v4  ;;  %v7676_v55 = vpop.f32.mrb[213].mxu1  ;;  %vm19577_vm3 = vmmov %vm19557_vm0 }
 0x413   : > { %13113 = vmatmul.mubr.msk.bf16.gmra.mrb[56].mxu1 %vm19563_vm11, %v10252_v62  ;;  %v18196_v14 = vpop.f32.mrb[249].mxu0  ;;  %v7835_v50 = vadd.f32 %v7803_v3, %v7676_v55  ;;  %v12871_v17 = vpop.f32.mrb[214].mxu1  ;;  %vm19578_vm8 = vmmov %vm19557_vm0 }
 0x414   : > { %13116 = vmatprep.mubr.msk.bf16.mxu1 %vm19565_vm2, %v10254_v36  ;;  %v18198_v2 = vpop.f32.mrb[250].mxu0  ;;  %7869 = vst.msk [vmem:[#allocation4 + $0x10] sm:$0xff] %vm19574_vm5, %v7837_v21  ;;  %v7838_v27 = vadd.f32 %v12871_v17, %v7806_v42  ;;  %v7679_v9 = vpop.f32.mrb[215].mxu1  ;;  %vm19579_vm11 = vmmov %vm19557_vm0  ;;  %v10267_v17 = vrot.slane %v18106_v56, 1 }
 0x415   : > { %v18201_v25 = vpop.f32.mrb[251].mxu0  ;;  %7867 = vst.msk [vmem:[#allocation4] sm:$0xff] %vm19575_vm12, %v7835_v50  ;;  %v7836_v34 = vadd.f32 %v7804_v60, %v7679_v9  ;;  %vm19580_vm7 = vmmov %vm19557_vm0  ;;  %v7811_v60 = vld [vmem:[#allocation4 + $0x40] sm:$0xff]  ;;  %vm19592_vm12 = vcmask 1046528  }
 0x416   : > { %7870 = vst.msk [vmem:[#allocation4 + $0x18] sm:$0xff] %vm19576_vm15, %v7838_v27  ;;  %vm19581_vm2 = vmmov %vm19557_vm0 }
 0x417   : > { %7868 = vst.msk [vmem:[#allocation4 + $0x8] sm:$0xff] %vm19578_vm8, %v7836_v34  ;;  %vm19582_vm9 = vmmov %vm19557_vm0 }
 0x418   : > { %vm19583_vm14 = vmmov %vm19557_vm0 }
 0x419   : > { %v12874_v53 = vpop.f32.mrb[216].mxu1  ;;  %vm19584_vm13 = vmmov %vm19557_vm0 }
 0x41a   : > { %v18210_v23 = vpop.f32.mrb[252].mxu0  ;;  %v7841_v54 = vadd.f32 %v12874_v53, %v7809_v20  ;;  %v7692_v62 = vpop.f32.mrb[217].mxu1  ;;  %vm19585_vm10 = vmmov %vm19557_vm0 }
 0x41b   : > { %13117 = vmatmul.mubr.msk.bf16.gmra.mrb[60].mxu1 %vm19571_vm1, %v10256_v51  ;;  %v18212_v36 = vpop.f32.mrb[253].mxu0  ;;  %v7839_v13 = vadd.f32 %v7807_v12, %v7692_v62  ;;  %v12875_v15 = vpop.f32.mrb[218].mxu1  ;;  %vm19586_vm6 = vmmov %vm19557_vm0 }
 0x41c   : > { %13120 = vmatprep.mubr.msk.bf16.mxu1 %vm19557_vm0, %v10258_v19  ;;  %v18214_v46 = vpop.f32.mrb[254].mxu0  ;;  %7873 = vst.msk [vmem:[#allocation4 + $0x30] sm:$0xff] %vm19580_vm7, %v7841_v54  ;;  %v7842_v7 = vadd.f32 %v12875_v15, %v7810_v63  ;;  %v7695_v51 = vpop.f32.mrb[219].mxu1  ;;  %v8290_v22 = vld [vmem:[#allocation4] sm:$0xff]  ;;  %vm19587_vm1 = vmmov %vm19557_vm0  ;;  %v7814_v54 = vld [vmem:[#allocation4 + $0x58] sm:$0xff] }
 0x41d   : > { %v18217_v44 = vpop.f32.mrb[255].mxu0  ;;  %7871 = vst.msk [vmem:[#allocation4 + $0x20] sm:$0xff] %vm19581_vm2, %v7839_v13  ;;  %v8322_v21 = vadd.f32 %v8290_v22, %v17705_v40  ;;  %v8293_v55 = vld [vmem:[#allocation4 + $0x18] sm:$0xff]  ;;  %vm19589_vm4 = vmmov %vm19557_vm0  ;;  %v7812_v15 = vld [vmem:[#allocation4 + $0x48] sm:$0xff] }
 0x41e   : > { %7874 = vst.msk [vmem:[#allocation4 + $0x38] sm:$0xff] %vm19582_vm9, %v7842_v7  ;;  %v8325_v3 = vadd.f32 %v17707_v39, %v8293_v55  ;;  %v8291_v50 = vld [vmem:[#allocation4 + $0x8] sm:$0xff]  ;;  %vm19590_vm5 = vmmov %vm19557_vm0 }
 0x41f   : > { %8354 = vst.msk [vmem:[#allocation4] sm:$0xff] %vm19587_vm1, %v8322_v21  ;;  %vm19593_vm15 = vmmov %vm19557_vm0  ;;  %v10215_v21 = vld [vmem:[#allocation5 + $0xa0] sm:$0xff] }
 0x420   : > { %8357 = vst.msk [vmem:[#allocation4 + $0x18] sm:$0xff] %vm19589_vm4, %v8325_v3  ;;  %vm19596_vm8 = vmmov %vm19557_vm0  ;;  %v18258_v3 = vld [vmem:[#allocation5 + $0xa8] sm:$0xff] }
 0x421   : > { %vm19598_vm7 = vmmov %vm19557_vm0 }
 0x422   : > { %vm19599_vm2 = vmmov %vm19557_vm0 }
 0x423   : > { %13121 = vmatmul.mubr.msk.bf16.gmra.mrb[64].mxu1 %vm19577_vm3, %v17850_v33  ;;  %v8292_v33 = vld [vmem:[#allocation4 + $0x10] sm:$0xff]  ;;  %vm19595_vm3 = vmmov %vm19557_vm0 }
 0x424   : > { %13124 = vmatprep.mubr.msk.bf16.mxu1 %vm19579_vm11, %v17859_v52  ;;  %v7808_v52 = vld [vmem:[#allocation4 + $0x28] sm:$0xff]  ;;  %v8324_v19 = vadd.f32 %v17702_v49, %v8292_v33  ;;  %v19588_v49 = vld [vmem:[#allocation6_spill] sm:$0xff]  ;;  %v12878_v42 = vpop.f32.mrb[220].mxu1  ;;  %v8296_v12 = vld [vmem:[#allocation4 + $0x30] sm:$0xff] }
 0x425   : > { %v7840_v4 = vadd.f32 %v7808_v52, %v7695_v51  ;;  %v8323_v40 = vadd.f32 %v8291_v50, %v19588_v49  ;;  %v18234_v27 = vpop.f32.mrb[0].mxu0  ;;  %v7708_v9 = vpop.f32.mrb[221].mxu1  ;;  %v8328_v33 = vadd.f32 %v17872_v45, %v8296_v12  ;;  %v8294_v7 = vld [vmem:[#allocation4 + $0x20] sm:$0xff]  ;;  %v19591_v51 = vrot.slane %v17814_v1, 1  ;;  %vm19597_vm11 = vmmov %vm19592_vm12 }
 0x426   : > { %8356 = vst.msk [vmem:[#allocation4 + $0x10] sm:$0xff] %vm19584_vm13, %v8324_v19  ;;  %v18237_v34 = vpop.f32.mrb[1].mxu0  ;;  %v7843_v53 = vadd.f32 %v7811_v60, %v7708_v9  ;;  %v12879_v20 = vpop.f32.mrb[222].mxu1  ;;  %v19594_v19 = vld [vmem:[#allocation7_spill] sm:$0xff]  ;;  %vm19600_vm9 = vmmov %vm19557_vm0  ;;  %v10271_v49 = vrot.slane %v10215_v21, 1  ;;  %v10273_v60 = vrot.slane %v18258_v3, 1 }
 0x427   : > { %7872 = vst.msk [vmem:[#allocation4 + $0x28] sm:$0xff] %vm19585_vm10, %v7840_v4  ;;  %v18240_v62 = vpop.f32.mrb[2].mxu0  ;;  %v7846_v56 = vadd.f32 %v12879_v20, %v7814_v54  ;;  %v7711_v13 = vpop.f32.mrb[223].mxu1  ;;  %v8326_v22 = vadd.f32 %v8294_v7, %v19594_v19  ;;  %v8297_v4 = vld [vmem:[#allocation4 + $0x38] sm:$0xff]  ;;  %vm19602_vm13 = vmmov %vm19557_vm0  ;;  %v19605_v7 = vld [vmem:[#allocation8_spill] sm:$0xff] }
 0x428   : > { %8355 = vst.msk [vmem:[#allocation4 + $0x8] sm:$0xff] %vm19557_vm0, %v8323_v40  ;;  %v18243_v63 = vpop.f32.mrb[3].mxu0  ;;  %v7844_v52 = vadd.f32 %v7812_v15, %v7711_v13  ;;  %v8329_v45 = vadd.f32 %v17881_v37, %v8297_v4  ;;  %vm19603_vm10 = vmmov %vm19557_vm0  ;;  %v7818_v54 = vld [vmem:[#allocation4 + $0x78] sm:$0xff]  ;;  %v7816_v15 = vld [vmem:[#allocation4 + $0x68] sm:$0xff] }
 0x429   : > { %7875 = vst.msk [vmem:[#allocation4 + $0x40] sm:$0xff] %vm19593_vm15, %v7843_v53  ;;  %vm19606_vm1 = vmmov %vm19597_vm11 }
 0x42a   : > { %7878 = vst.msk [vmem:[#allocation4 + $0x58] sm:$0xff] %vm19595_vm3, %v7846_v56  ;;  %vm19607_vm4 = vmmov %vm19557_vm0 }
 0x42b   : > { %13125 = vmatmul.mubr.msk.bf16.gmra.mrb[68].mxu1 %vm19583_vm14, %v17862_v11  ;;  %v7813_v11 = vld [vmem:[#allocation4 + $0x50] sm:$0xff]  ;;  %8360 = vst.msk [vmem:[#allocation4 + $0x30] sm:$0xff] %vm19598_vm7, %v8328_v33  ;;  %vm19601_vm14 = vmmov %vm19557_vm0 }
 0x42c   : > { %13128 = vmatprep.mubr.msk.bf16.mxu1 %vm19586_vm6, %v17867_v0  ;;  %v7845_v39 = vadd.f32 %v12878_v42, %v7813_v11  ;;  %v10269_v0 = vrot.slane %v18076_v10, 1  ;;  %v10268_v10 = vsel %vm19592_vm12, %v19591_v51, %v10267_v17  ;;  %7876 = vst.msk [vmem:[#allocation4 + $0x48] sm:$0xff] %vm19599_vm2, %v7844_v52  ;;  %vm19604_vm6 = vmmov %vm19557_vm0 }
 0x42d   : > { %8358 = vst.msk [vmem:[#allocation4 + $0x20] sm:$0xff] %vm19601_vm14, %v8326_v22  ;;  %v12882_v40 = vpop.f32.mrb[224].mxu1  ;;  %v19608_v22 = vld [vmem:[#allocation9_spill] sm:$0xff]  ;;  %vm19610_vm12 = vmmov %vm19606_vm1 }
 0x42e   : > { %7877 = vst.msk [vmem:[#allocation4 + $0x50] sm:$0xff] %vm19590_vm5, %v7845_v39  ;;  %v10270_v55 = vsel %vm19597_vm11, %v10267_v17, %v10269_v0  ;;  %v8295_v1 = vld [vmem:[#allocation4 + $0x28] sm:$0xff]  ;;  %v7817_v17 = vld [vmem:[#allocation4 + $0x70] sm:$0xff]  ;;  %v7724_v11 = vpop.f32.mrb[225].mxu1  ;;  %v7815_v39 = vld [vmem:[#allocation4 + $0x60] sm:$0xff]  ;;  %v10272_v52 = vsel %vm19606_vm1, %v10269_v0, %v10271_v49 }
 0x42f   : > { %v8327_v50 = vadd.f32 %v8295_v1, %v17892_v43  ;;  %8361 = vst.msk [vmem:[#allocation4 + $0x38] sm:$0xff] %vm19602_vm13, %v8329_v45  ;;  %v7849_v37 = vadd.f32 %v12882_v40, %v7817_v17  ;;  %v7847_v53 = vadd.f32 %v7815_v39, %v7724_v11  ;;  %v12883_v20 = vpop.f32.mrb[226].mxu1  ;;  %vm19609_vm5 = vmmov %vm19557_vm0  ;;  %v10274_v45 = vsel %vm19610_vm12, %v10271_v49, %v10273_v60  ;;  %v19612_v1 = vld [vmem:[#allocation10_spill] sm:$0xff]  ;;  %v19616_v0 = vld [vmem:[#allocation11_spill] sm:$0xff] }
 0x430   : > { %v7850_v56 = vadd.f32 %v12883_v20, %v7818_v54  ;;  %v7727_v13 = vpop.f32.mrb[227].mxu1  ;;  %vm19611_vm15 = vmmov %vm19557_vm0  ;;  %v7821_v11 = vld [vmem:[#allocation4 + $0x90] sm:$0xff]  ;;  %v7819_v20 = vld [vmem:[#allocation4 + $0x80] sm:$0xff] }
 0x431   : > { %v18263_v42 = vpop.f32.mrb[4].mxu0  ;;  %8359 = vst.msk [vmem:[#allocation4 + $0x28] sm:$0xff] %vm19603_vm10, %v8327_v50  ;;  %v7848_v19 = vadd.f32 %v7816_v15, %v7727_v13  ;;  %v8301_v21 = vld [vmem:[#allocation4 + $0x58] sm:$0xff]  ;;  %vm19613_vm3 = vmmov %vm19557_vm0 }
 0x432   : > { %v18266_v9 = vpop.f32.mrb[5].mxu0  ;;  %7881 = vst.msk [vmem:[#allocation4 + $0x70] sm:$0xff] %vm19604_vm6, %v7849_v37  ;;  %v8333_v3 = vadd.f32 %v19612_v1, %v8301_v21  ;;  %vm19615_vm11 = vmmov %vm19557_vm0  ;;  %v7822_v13 = vld [vmem:[#allocation4 + $0x98] sm:$0xff] }
 0x433   : > { %13129 = vmatmul.mubr.msk.bf16.gmra.mrb[72].mxu1 %vm19596_vm8, %v10268_v10  ;;  %v18269_v43 = vpop.f32.mrb[6].mxu0  ;;  %v8298_v10 = vld [vmem:[#allocation4 + $0x40] sm:$0xff]  ;;  %7879 = vst.msk [vmem:[#allocation4 + $0x60] sm:$0xff] %vm19607_vm4, %v7847_v53  ;;  %v8299_v50 = vld [vmem:[#allocation4 + $0x48] sm:$0xff]  ;;  %vm19614_vm8 = vmmov %vm19557_vm0 }
 0x434   : > { %13132 = vmatprep.mubr.msk.bf16.mxu1 %vm19600_vm9, %v10270_v55  ;;  %v18272_v33 = vpop.f32.mrb[7].mxu0  ;;  %v8330_v4 = vadd.f32 %v8298_v10, %v19608_v22  ;;  %7882 = vst.msk [vmem:[#allocation4 + $0x78] sm:$0xff] %vm19557_vm0, %v7850_v56  ;;  %v10217_v55 = vld [vmem:[#allocation5 + $0xb0] sm:$0x1]  ;;  %v8331_v40 = vadd.f32 %v8299_v50, %v19616_v0  ;;  %vm19617_vm7 = vmmov %vm19557_vm0 }
 0x435   : > { %v8300_v12 = vld [vmem:[#allocation4 + $0x50] sm:$0xff]  ;;  %7880 = vst.msk [vmem:[#allocation4 + $0x68] sm:$0xff] %vm19613_vm3, %v7848_v19  ;;  %v10275_v17 = vrot.slane %v10217_v55, 1  ;;  %vm19618_vm2 = vmmov %vm19557_vm0 }
 0x436   : > { %v8332_v51 = vadd.f32 %v19605_v7, %v8300_v12  ;;  %8362 = vst.msk [vmem:[#allocation4 + $0x40] sm:$0xff] %vm19615_vm11, %v8330_v4  ;;  %vm19619_vm9 = vmmov %vm19557_vm0 }
 0x437   : > { %8365 = vst.msk [vmem:[#allocation4 + $0x58] sm:$0xff] %vm19617_vm7, %v8333_v3  ;;  %vm19620_vm14 = vmmov %vm19606_vm1 }
 0x438   : > { %8364 = vst.msk [vmem:[#allocation4 + $0x50] sm:$0xff] %vm19611_vm15, %v8332_v51  ;;  %v10276_v21 = vsel %vm19620_vm14, %v10273_v60, %v10275_v17  ;;  %vm19621_vm13 = vmmov %vm19557_vm0 }
 0x439   : > { %8363 = vst.msk [vmem:[#allocation4 + $0x48] sm:$0xff] %vm19618_vm2, %v8331_v40  ;;  %v8304_v7 = vld [vmem:[#allocation4 + $0x70] sm:$0xff]  ;;  %vm19622_vm10 = vmmov %vm19557_vm0 }
 0x43a   : > { %v8336_v22 = vadd.f32 %v18002_v35, %v8304_v7  ;;  %v8302_v4 = vld [vmem:[#allocation4 + $0x60] sm:$0xff]  ;;  %vm19623_vm6 = vmmov %vm19557_vm0 }
 0x43b   : > { %13133 = vmatmul.mubr.msk.bf16.gmra.mrb[76].mxu1 %vm19609_vm5, %v10272_v52  ;;  %v7820_v52 = vld [vmem:[#allocation4 + $0x88] sm:$0xff]  ;;  %v8305_v1 = vld [vmem:[#allocation4 + $0x78] sm:$0xff]  ;;  %vm19624_vm1 = vmmov %vm19557_vm0 }
 0x43c   : > { %13136 = vmatprep.mubr.msk.bf16.mxu1 %vm19614_vm8, %v10274_v45  ;;  %v12886_v37 = vpop.f32.mrb[228].mxu1  ;;  %v8334_v45 = vadd.f32 %v8302_v4, %v18005_v24  ;;  %8368 = vst.msk [vmem:[#allocation4 + $0x70] sm:$0xff] %vm19624_vm1, %v8336_v22  ;;  %v8337_v3 = vadd.f32 %v18008_v61, %v8305_v1  ;;  %v8303_v50 = vld [vmem:[#allocation4 + $0x68] sm:$0xff]  ;;  %vm19625_vm4 = vmmov %vm19557_vm0  ;;  %v7825_v24 = vld [vmem:[#allocation4 + $0xb0] sm:$0xff] }
 0x43d   : > { %v18288_v39 = vpop.f32.mrb[8].mxu0  ;;  %v7853_v49 = vadd.f32 %v12886_v37, %v7821_v11  ;;  %v7740_v53 = vpop.f32.mrb[229].mxu1  ;;  %v8335_v35 = vadd.f32 %v8303_v50, %v18011_v59  ;;  %vm19626_vm5 = vmmov %vm19557_vm0  ;;  %v7823_v37 = vld [vmem:[#allocation4 + $0xa0] sm:$0xff]  ;;  %v7829_v1 = vld [vmem:[#allocation4 + $0xd0] sm:$0xff] }
 0x43e   : > { %v18291_v54 = vpop.f32.mrb[9].mxu0  ;;  %v7851_v12 = vadd.f32 %v7819_v20, %v7740_v53  ;;  %v12887_v56 = vpop.f32.mrb[230].mxu1  ;;  %8366 = vst.msk [vmem:[#allocation4 + $0x60] sm:$0xff] %vm19557_vm0, %v8334_v45  ;;  %vm19627_vm12 = vmmov %vm19557_vm0  ;;  %v7826_v53 = vld [vmem:[#allocation4 + $0xb8] sm:$0xff] }
 0x43f   : > { %v18293_v15 = vpop.f32.mrb[10].mxu0  ;;  %7885 = vst.msk [vmem:[#allocation4 + $0x90] sm:$0xff] %vm19619_vm9, %v7853_v49  ;;  %v7854_v51 = vadd.f32 %v12887_v56, %v7822_v13  ;;  %v7743_v10 = vpop.f32.mrb[231].mxu1  ;;  %vm19628_vm15 = vmmov %vm19557_vm0  ;;  %v7824_v13 = vld [vmem:[#allocation4 + $0xa8] sm:$0xff] }
 0x440   : > { %v18296_v19 = vpop.f32.mrb[11].mxu0  ;;  %7883 = vst.msk [vmem:[#allocation4 + $0x80] sm:$0xff] %vm19621_vm13, %v7851_v12  ;;  %v7852_v55 = vadd.f32 %v7820_v52, %v7743_v10  ;;  %vm19629_vm3 = vmmov %vm19557_vm0 }
 0x441   : > { %7886 = vst.msk [vmem:[#allocation4 + $0x98] sm:$0xff] %vm19622_vm10, %v7854_v51  ;;  %vm19630_vm8 = vmmov %vm19557_vm0 }
 0x442   : > { %7884 = vst.msk [vmem:[#allocation4 + $0x88] sm:$0xff] %vm19625_vm4, %v7852_v55  ;;  %vm19631_vm11 = vmmov %vm19557_vm0 }
 0x443   : > { %13137 = vmatmul.mubr.msk.bf16.gmra.mrb[80].mxu1 %vm19623_vm6, %v10276_v21  ;;  %8369 = vst.msk [vmem:[#allocation4 + $0x78] sm:$0xff] %vm19626_vm5, %v8337_v3  ;;  %vm19632_vm7 = vmmov %vm19557_vm0 }
 0x444   : > { %v12890_v60 = vpop.f32.mrb[232].mxu1  ;;  %8367 = vst.msk [vmem:[#allocation4 + $0x68] sm:$0xff] %vm19627_vm12, %v8335_v35  ;;  %vm19633_vm2 = vmmov %vm19557_vm0  ;;  %v7827_v35 = vld [vmem:[#allocation4 + $0xc0] sm:$0xff] }
 0x445   : > { %v18310_v0 = vpop.f32.mrb[12].mxu0  ;;  %v7857_v40 = vadd.f32 %v12890_v60, %v7825_v24  ;;  %v7756_v17 = vpop.f32.mrb[233].mxu1  ;;  %vm19634_vm9 = vmmov %vm19557_vm0 }
 0x446   : > { %v18313_v11 = vpop.f32.mrb[13].mxu0  ;;  %v7855_v61 = vadd.f32 %v7823_v37, %v7756_v17  ;;  %v12891_v49 = vpop.f32.mrb[234].mxu1  ;;  %v8308_v12 = vld [vmem:[#allocation4 + $0x90] sm:$0xff]  ;;  %vm19635_vm14 = vmmov %vm19557_vm0 }
 0x447   : > { %v18315_v20 = vpop.f32.mrb[14].mxu0  ;;  %7889 = vst.msk [vmem:[#allocation4 + $0xb0] sm:$0xff] %vm19628_vm15, %v7857_v40  ;;  %v7858_v59 = vadd.f32 %v12891_v49, %v7826_v53  ;;  %v7759_v56 = vpop.f32.mrb[235].mxu1  ;;  %v8340_v51 = vadd.f32 %v18080_v18, %v8308_v12  ;;  %v8306_v10 = vld [vmem:[#allocation4 + $0x80] sm:$0xff]  ;;  %v7830_v40 = vld [vmem:[#allocation4 + $0xd8] sm:$0xff]  ;;  %vm19636_vm13 = vmmov %vm19557_vm0 }
 0x448   : > { %v18318_v7 = vpop.f32.mrb[15].mxu0  ;;  %7887 = vst.msk [vmem:[#allocation4 + $0xa0] sm:$0xff] %vm19629_vm3, %v7855_v61  ;;  %v7856_v52 = vadd.f32 %v7824_v13, %v7759_v56  ;;  %v8338_v22 = vadd.f32 %v8306_v10, %v18083_v57  ;;  %v8309_v4 = vld [vmem:[#allocation4 + $0x98] sm:$0xff]  ;;  %v7828_v49 = vld [vmem:[#allocation4 + $0xc8] sm:$0xff]  ;;  %vm19637_vm10 = vmmov %vm19557_vm0 }
 0x449   : > { %7890 = vst.msk [vmem:[#allocation4 + $0xb8] sm:$0xff] %vm19630_vm8, %v7858_v59  ;;  %v8341_v21 = vadd.f32 %v18086_v48, %v8309_v4  ;;  %v8307_v55 = vld [vmem:[#allocation4 + $0x88] sm:$0xff]  ;;  %vm19638_vm6 = vmmov %vm19557_vm0  ;;  %v7833_v4 = vld [vmem:[#allocation4 + $0xf0] sm:$0xff] }
 0x44a   : > { %8372 = vst.msk [vmem:[#allocation4 + $0x90] sm:$0xff] %vm19631_vm11, %v8340_v51  ;;  %v8339_v18 = vadd.f32 %v8307_v55, %v18093_v8  ;;  %vm19639_vm1 = vmmov %vm19557_vm0 }
 0x44b   : > { %7888 = vst.msk [vmem:[#allocation4 + $0xa8] sm:$0xff] %vm19632_vm7, %v7856_v52  ;;  %vm19640_vm4 = vmmov %vm19557_vm0 }
 0x44c   : > { %8370 = vst.msk [vmem:[#allocation4 + $0x80] sm:$0xff] %vm19633_vm2, %v8338_v22  ;;  %vm19641_vm5 = vmmov %vm19557_vm0 }
 0x44d   : > { %8373 = vst.msk [vmem:[#allocation4 + $0x98] sm:$0xff] %vm19634_vm9, %v8341_v21  ;;  %vm19642_vm12 = vmmov %vm19557_vm0 }
 0x44e   : > { %v12894_v45 = vpop.f32.mrb[236].mxu1  ;;  %8371 = vst.msk [vmem:[#allocation4 + $0x88] sm:$0xff] %vm19635_vm14, %v8339_v18  ;;  %v8312_v37 = vld [vmem:[#allocation4 + $0xb0] sm:$0xff]  ;;  %v7831_v18 = vld [vmem:[#allocation4 + $0xe0] sm:$0xff]  ;;  %vm19643_vm15 = vmmov %vm19557_vm0 }
 0x44f   : > { %v18330_v3 = vpop.f32.mrb[16].mxu0  ;;  %v7861_v57 = vadd.f32 %v12894_v45, %v7829_v1  ;;  %v7772_v50 = vpop.f32.mrb[237].mxu1  ;;  %v8344_v12 = vadd.f32 %v18145_v29, %v8312_v37  ;;  %v8310_v59 = vld [vmem:[#allocation4 + $0xa0] sm:$0xff]  ;;  %vm19644_vm3 = vmmov %vm19557_vm0 }
 0x450   : > { %v18333_v60 = vpop.f32.mrb[17].mxu0  ;;  %v7859_v48 = vadd.f32 %v7827_v35, %v7772_v50  ;;  %v12895_v24 = vpop.f32.mrb[238].mxu1  ;;  %v8342_v13 = vadd.f32 %v8310_v59, %v18148_v31  ;;  %v8313_v51 = vld [vmem:[#allocation4 + $0xb8] sm:$0xff]  ;;  %vm19645_vm8 = vmmov %vm19557_vm0 }
 0x451   : > { %v18335_v17 = vpop.f32.mrb[18].mxu0  ;;  %7893 = vst.msk [vmem:[#allocation4 + $0xd0] sm:$0xff] %vm19636_vm13, %v7861_v57  ;;  %v7862_v8 = vadd.f32 %v12895_v24, %v7830_v40  ;;  %v7775_v61 = vpop.f32.mrb[239].mxu1  ;;  %v8345_v10 = vadd.f32 %v18151_v16, %v8313_v51  ;;  %v7834_v57 = vld [vmem:[#allocation4 + $0xf8] sm:$0xff]  ;;  %v7832_v24 = vld [vmem:[#allocation4 + $0xe8] sm:$0xff]  ;;  %vm19646_vm11 = vmmov %vm19557_vm0 }
 0x452   : > { %v18338_v53 = vpop.f32.mrb[19].mxu0  ;;  %7891 = vst.msk [vmem:[#allocation4 + $0xc0] sm:$0xff] %vm19637_vm10, %v7859_v48  ;;  %v7860_v56 = vadd.f32 %v7828_v49, %v7775_v61  ;;  %v8311_v52 = vld [vmem:[#allocation4 + $0xa8] sm:$0xff]  ;;  %vm19647_vm7 = vmmov %vm19557_vm0  ;;  %v8779_v51 = vld [vmem:[#allocation4 + $0x10] sm:$0xff] }
 0x453   : > { %7894 = vst.msk [vmem:[#allocation4 + $0xd8] sm:$0xff] %vm19638_vm6, %v7862_v8  ;;  %v8343_v29 = vadd.f32 %v8311_v52, %v18154_v47  ;;  %vm19648_vm2 = vmmov %vm19557_vm0 }
 0x454   : > { %8376 = vst.msk [vmem:[#allocation4 + $0xb0] sm:$0xff] %vm19639_vm1, %v8344_v12  ;;  %vm19649_vm9 = vmmov %vm19557_vm0 }
 0x455   : > { %7892 = vst.msk [vmem:[#allocation4 + $0xc8] sm:$0xff] %vm19640_vm4, %v7860_v56  ;;  %vm19650_vm14 = vmmov %vm19557_vm0 }
 0x456   : > { %8374 = vst.msk [vmem:[#allocation4 + $0xa0] sm:$0xff] %vm19557_vm0, %v8342_v13  ;;  %v12898_v22 = vpop.f32.mrb[240].mxu1  ;;  %vm19651_vm13 = vmmov %vm19557_vm0 }
 0x457   : > { %8377 = vst.msk [vmem:[#allocation4 + $0xb8] sm:$0xff] %vm19641_vm5, %v8345_v10  ;;  %v18350_v21 = vpop.f32.mrb[20].mxu0  ;;  %v7865_v31 = vadd.f32 %v12898_v22, %v7833_v4  ;;  %v7788_v55 = vpop.f32.mrb[241].mxu1  ;;  %vm19652_vm10 = vmmov %vm19557_vm0 }
 0x458   : > { %8375 = vst.msk [vmem:[#allocation4 + $0xa8] sm:$0xff] %vm19642_vm12, %v8343_v29  ;;  %v18353_v45 = vpop.f32.mrb[21].mxu0  ;;  %v7863_v16 = vadd.f32 %v7831_v18, %v7788_v55  ;;  %v12899_v1 = vpop.f32.mrb[242].mxu1  ;;  %v8316_v35 = vld [vmem:[#allocation4 + $0xd0] sm:$0xff]  ;;  %v8777_v29 = vld [vmem:[#allocation4] sm:$0xff]  ;;  %vm19653_vm6 = vmmov %vm19557_vm0 }
 0x459   : > { %v18355_v50 = vpop.f32.mrb[22].mxu0  ;;  %7897 = vst.msk [vmem:[#allocation4 + $0xf0] sm:$0xff] %vm19643_vm15, %v7865_v31  ;;  %v7866_v47 = vadd.f32 %v12899_v1, %v7834_v57  ;;  %v7791_v48 = vpop.f32.mrb[243].mxu1  ;;  %v8348_v37 = vadd.f32 %v18160_v41, %v8316_v35  ;;  %v8314_v8 = vld [vmem:[#allocation4 + $0xc0] sm:$0xff]  ;;  %v8780_v31 = vld [vmem:[#allocation4 + $0x18] sm:$0xff]  ;;  %v8778_v1 = vld [vmem:[#allocation4 + $0x8] sm:$0xff] }
 0x45a   : > { %v18358_v40 = vpop.f32.mrb[23].mxu0  ;;  %7895 = vst.msk [vmem:[#allocation4 + $0xe0] sm:$0xff] %vm19644_vm3, %v7863_v16  ;;  %v7864_v61 = vadd.f32 %v7832_v24, %v7791_v48  ;;  %v8346_v49 = vadd.f32 %v8314_v8, %v18163_v28  ;;  %v8317_v12 = vld [vmem:[#allocation4 + $0xd8] sm:$0xff]  ;;  %vm19654_vm1 = vmmov %vm19557_vm0 }
 0x45b   : > { %7898 = vst.msk [vmem:[#allocation4 + $0xf8] sm:$0xff] %vm19645_vm8, %v7866_v47  ;;  %v8349_v59 = vadd.f32 %v18166_v6, %v8317_v12  ;;  %vm19655_vm4 = vmmov %vm19557_vm0  ;;  %v8783_v12 = vld [vmem:[#allocation4 + $0x30] sm:$0xff] }
 0x45c   : > { %8380 = vst.msk [vmem:[#allocation4 + $0xd0] sm:$0xff] %vm19646_vm11, %v8348_v37  ;;  %v8315_v56 = vld [vmem:[#allocation4 + $0xc8] sm:$0xff]  ;;  %vm19656_vm5 = vmmov %vm19557_vm0 }
 0x45d   : > { %7896 = vst.msk [vmem:[#allocation4 + $0xe8] sm:$0xff] %vm19647_vm7, %v7864_v61  ;;  %v8347_v41 = vadd.f32 %v8315_v56, %v18169_v58  ;;  %vm19657_vm12 = vmmov %vm19557_vm0 }
 0x45e   : > { %8378 = vst.msk [vmem:[#allocation4 + $0xc0] sm:$0xff] %vm19648_vm2, %v8346_v49  ;;  %v12950_v13 = vpop.f32.mrb[244].mxu1  ;;  %vm19658_vm15 = vmmov %vm19557_vm0 }
 0x45f   : > { %8381 = vst.msk [vmem:[#allocation4 + $0xd8] sm:$0xff] %vm19649_vm9, %v8349_v59  ;;  %v18370_v10 = vpop.f32.mrb[24].mxu0  ;;  %v8811_v28 = vadd.f32 %v12950_v13, %v8779_v51  ;;  %v8650_v52 = vpop.f32.mrb[245].mxu1  ;;  %vm19659_vm3 = vmmov %vm19557_vm0 }
 0x460   : > { %8379 = vst.msk [vmem:[#allocation4 + $0xc8] sm:$0xff] %vm19650_vm14, %v8347_v41  ;;  %v18373_v22 = vpop.f32.mrb[25].mxu0  ;;  %v8809_v6 = vadd.f32 %v8777_v29, %v8650_v52  ;;  %v12951_v4 = vpop.f32.mrb[246].mxu1  ;;  %v8320_v18 = vld [vmem:[#allocation4 + $0xf0] sm:$0xff]  ;;  %v8781_v41 = vld [vmem:[#allocation4 + $0x20] sm:$0xff]  ;;  %vm19660_vm8 = vmmov %vm19557_vm0 }
 0x461   : > { %v18375_v55 = vpop.f32.mrb[26].mxu0  ;;  %8843 = vst.msk [vmem:[#allocation4 + $0x10] sm:$0xff] %vm19651_vm13, %v8811_v28  ;;  %v8812_v58 = vadd.f32 %v12951_v4, %v8780_v31  ;;  %v8653_v16 = vpop.f32.mrb[247].mxu1  ;;  %v8352_v35 = vadd.f32 %v18176_v30, %v8320_v18  ;;  %v8318_v47 = vld [vmem:[#allocation4 + $0xe0] sm:$0xff]  ;;  %v8784_v28 = vld [vmem:[#allocation4 + $0x38] sm:$0xff]  ;;  %v8782_v4 = vld [vmem:[#allocation4 + $0x28] sm:$0xff] }
 0x462   : > { %v18378_v57 = vpop.f32.mrb[27].mxu0  ;;  %8841 = vst.msk [vmem:[#allocation4] sm:$0xff] %vm19652_vm10, %v8809_v6  ;;  %v8810_v48 = vadd.f32 %v8778_v1, %v8653_v16  ;;  %v8350_v24 = vadd.f32 %v8318_v47, %v18179_v32  ;;  %v8321_v37 = vld [vmem:[#allocation4 + $0xf8] sm:$0xff]  ;;  %vm19661_vm11 = vmmov %vm19557_vm0 }
 0x463   : > { %8844 = vst.msk [vmem:[#allocation4 + $0x18] sm:$0xff] %vm19653_vm6, %v8812_v58  ;;  %v8353_v8 = vadd.f32 %v18182_v26, %v8321_v37  ;;  %vm19662_vm7 = vmmov %vm19557_vm0  ;;  %v8787_v37 = vld [vmem:[#allocation4 + $0x50] sm:$0xff] }
 0x464   : > { %8384 = vst.msk [vmem:[#allocation4 + $0xf0] sm:$0xff] %vm19654_vm1, %v8352_v35  ;;  %v8319_v61 = vld [vmem:[#allocation4 + $0xe8] sm:$0xff]  ;;  %vm19663_vm2 = vmmov %vm19557_vm0 }
 0x465   : > { %8842 = vst.msk [vmem:[#allocation4 + $0x8] sm:$0xff] %vm19655_vm4, %v8810_v48  ;;  %v8351_v30 = vadd.f32 %v8319_v61, %v18185_v5  ;;  %vm19664_vm9 = vmmov %vm19557_vm0 }
 0x466   : > { %8382 = vst.msk [vmem:[#allocation4 + $0xe0] sm:$0xff] %vm19557_vm0, %v8350_v24  ;;  %v12954_v49 = vpop.f32.mrb[248].mxu1  ;;  %vm19665_vm14 = vmmov %vm19557_vm0 }
 0x467   : > { %8385 = vst.msk [vmem:[#allocation4 + $0xf8] sm:$0xff] %vm19656_vm5, %v8353_v8  ;;  %v18390_v59 = vpop.f32.mrb[28].mxu0  ;;  %v8815_v32 = vadd.f32 %v12954_v49, %v8783_v12  ;;  %v8666_v56 = vpop.f32.mrb[249].mxu1  ;;  %vm19666_vm13 = vmmov %vm19557_vm0 }
 0x468   : > { %8383 = vst.msk [vmem:[#allocation4 + $0xe8] sm:$0xff] %vm19657_vm12, %v8351_v30  ;;  %v18393_v13 = vpop.f32.mrb[29].mxu0  ;;  %v8813_v26 = vadd.f32 %v8781_v41, %v8666_v56  ;;  %v12955_v51 = vpop.f32.mrb[250].mxu1  ;;  %v9133_v29 = vld [vmem:[#allocation4 + $0x10] sm:$0xff]  ;;  %v8785_v30 = vld [vmem:[#allocation4 + $0x40] sm:$0xff]  ;;  %vm19667_vm10 = vmmov %vm19557_vm0 }
 0x469   : > { %v18395_v52 = vpop.f32.mrb[30].mxu0  ;;  %8847 = vst.msk [vmem:[#allocation4 + $0x30] sm:$0xff] %vm19658_vm15, %v8815_v32  ;;  %v8816_v5 = vadd.f32 %v12955_v51, %v8784_v28  ;;  %v8669_v6 = vpop.f32.mrb[251].mxu1  ;;  %v9165_v18 = vadd.f32 %v18194_v38, %v9133_v29  ;;  %v9131_v58 = vld [vmem:[#allocation4] sm:$0xff]  ;;  %v8788_v32 = vld [vmem:[#allocation4 + $0x58] sm:$0xff]  ;;  %v8786_v51 = vld [vmem:[#allocation4 + $0x48] sm:$0xff] }
 0x46a   : > { %v18398_v31 = vpop.f32.mrb[31].mxu0  ;;  %8845 = vst.msk [vmem:[#allocation4 + $0x20] sm:$0xff] %vm19659_vm3, %v8813_v26  ;;  %v8814_v16 = vadd.f32 %v8782_v4, %v8669_v6  ;;  %v9163_v1 = vadd.f32 %v9131_v58, %v18196_v14  ;;  %v9134_v35 = vld [vmem:[#allocation4 + $0x18] sm:$0xff]  ;;  %vm19668_vm6 = vmmov %vm19557_vm0 }
 0x46b   : > { %8848 = vst.msk [vmem:[#allocation4 + $0x38] sm:$0xff] %vm19660_vm8, %v8816_v5  ;;  %v9166_v47 = vadd.f32 %v18198_v2, %v9134_v35  ;;  %vm19669_vm1 = vmmov %vm19557_vm0  ;;  %v8791_v35 = vld [vmem:[#allocation4 + $0x70] sm:$0xff] }
 0x46c   : > { %9197 = vst.msk [vmem:[#allocation4 + $0x10] sm:$0xff] %vm19661_vm11, %v9165_v18  ;;  %v9132_v48 = vld [vmem:[#allocation4 + $0x8] sm:$0xff]  ;;  %vm19670_vm4 = vmmov %vm19557_vm0 }
 0x46d   : > { %8846 = vst.msk [vmem:[#allocation4 + $0x28] sm:$0xff] %vm19662_vm7, %v8814_v16  ;;  %v9164_v38 = vadd.f32 %v9132_v48, %v18201_v25  ;;  %vm19671_vm5 = vmmov %vm19557_vm0 }
 0x46e   : > { %9195 = vst.msk [vmem:[#allocation4] sm:$0xff] %vm19663_vm2, %v9163_v1  ;;  %v12958_v24 = vpop.f32.mrb[252].mxu1  ;;  %vm19672_vm12 = vmmov %vm19557_vm0 }
 0x46f   : > { %9198 = vst.msk [vmem:[#allocation4 + $0x18] sm:$0xff] %vm19664_vm9, %v9166_v47  ;;  %v18410_v8 = vpop.f32.mrb[32].mxu0  ;;  %v8819_v14 = vadd.f32 %v12958_v24, %v8787_v37  ;;  %v8682_v61 = vpop.f32.mrb[253].mxu1  ;;  %vm19673_vm15 = vmmov %vm19557_vm0 }
 0x470   : > { %9196 = vst.msk [vmem:[#allocation4 + $0x8] sm:$0xff] %vm19665_vm14, %v9164_v38  ;;  %v18413_v49 = vpop.f32.mrb[33].mxu0  ;;  %v8817_v2 = vadd.f32 %v8785_v30, %v8682_v61  ;;  %v12959_v12 = vpop.f32.mrb[254].mxu1  ;;  %v9137_v41 = vld [vmem:[#allocation4 + $0x30] sm:$0xff]  ;;  %v8789_v38 = vld [vmem:[#allocation4 + $0x60] sm:$0xff]  ;;  %vm19674_vm3 = vmmov %vm19557_vm0 }
 0x471   : > { %v18415_v56 = vpop.f32.mrb[34].mxu0  ;;  %8851 = vst.msk [vmem:[#allocation4 + $0x50] sm:$0xff] %vm19666_vm13, %v8819_v14  ;;  %v8820_v25 = vadd.f32 %v12959_v12, %v8788_v32  ;;  %v8685_v26 = vpop.f32.mrb[255].mxu1  ;;  %v9169_v29 = vadd.f32 %v18210_v23, %v9137_v41  ;;  %v9135_v5 = vld [vmem:[#allocation4 + $0x20] sm:$0xff]  ;;  %v8792_v14 = vld [vmem:[#allocation4 + $0x78] sm:$0xff]  ;;  %v8790_v12 = vld [vmem:[#allocation4 + $0x68] sm:$0xff] }
 0x472   : > { %v18418_v28 = vpop.f32.mrb[35].mxu0  ;;  %8849 = vst.msk [vmem:[#allocation4 + $0x40] sm:$0xff] %vm19667_vm10, %v8817_v2  ;;  %v8818_v6 = vadd.f32 %v8786_v51, %v8685_v26  ;;  %v9167_v4 = vadd.f32 %v9135_v5, %v18212_v36  ;;  %v9138_v18 = vld [vmem:[#allocation4 + $0x38] sm:$0xff]  ;;  %vm19675_vm8 = vmmov %vm19557_vm0 }
 0x473   : > { %8852 = vst.msk [vmem:[#allocation4 + $0x58] sm:$0xff] %vm19668_vm6, %v8820_v25  ;;  %v9170_v58 = vadd.f32 %v18214_v46, %v9138_v18  ;;  %vm19676_vm11 = vmmov %vm19557_vm0  ;;  %v8795_v18 = vld [vmem:[#allocation4 + $0x90] sm:$0xff] }
 0x474   : > { %9201 = vst.msk [vmem:[#allocation4 + $0x30] sm:$0xff] %vm19669_vm1, %v9169_v29  ;;  %v9136_v16 = vld [vmem:[#allocation4 + $0x28] sm:$0xff]  ;;  %vm19677_vm7 = vmmov %vm19557_vm0 }
 0x475   : > { %8850 = vst.msk [vmem:[#allocation4 + $0x48] sm:$0xff] %vm19670_vm4, %v8818_v6  ;;  %v9168_v23 = vadd.f32 %v9136_v16, %v18217_v44  ;;  %vm19678_vm2 = vmmov %vm19557_vm0 }
 0x476   : > { %9199 = vst.msk [vmem:[#allocation4 + $0x20] sm:$0xff] %vm19557_vm0, %v9167_v4  ;;  %v12962_v1 = vpop.f32.mrb[0].mxu1  ;;  %vm19679_vm9 = vmmov %vm19557_vm0 }
 0x477   : > { %9202 = vst.msk [vmem:[#allocation4 + $0x38] sm:$0xff] %vm19671_vm5, %v9170_v58  ;;  %v18430_v47 = vpop.f32.mrb[36].mxu0  ;;  %v8823_v36 = vadd.f32 %v12962_v1, %v8791_v35  ;;  %v8698_v48 = vpop.f32.mrb[1].mxu1  ;;  %vm19680_vm14 = vmmov %vm19557_vm0 }
 0x478   : > { %9200 = vst.msk [vmem:[#allocation4 + $0x28] sm:$0xff] %vm19672_vm12, %v9168_v23  ;;  %v18433_v24 = vpop.f32.mrb[37].mxu0  ;;  %v8821_v46 = vadd.f32 %v8789_v38, %v8698_v48  ;;  %v12963_v37 = vpop.f32.mrb[2].mxu1  ;;  %v9141_v30 = vld [vmem:[#allocation4 + $0x50] sm:$0xff]  ;;  %v8793_v23 = vld [vmem:[#allocation4 + $0x80] sm:$0xff]  ;;  %vm19681_vm13 = vmmov %vm19557_vm0 }
 0x479   : > { %v18435_v61 = vpop.f32.mrb[38].mxu0  ;;  %8855 = vst.msk [vmem:[#allocation4 + $0x70] sm:$0xff] %vm19673_vm15, %v8823_v36  ;;  %v8824_v44 = vadd.f32 %v12963_v37, %v8792_v14  ;;  %v8701_v2 = vpop.f32.mrb[3].mxu1  ;;  %v9173_v41 = vadd.f32 %v18234_v27, %v9141_v30  ;;  %v9139_v25 = vld [vmem:[#allocation4 + $0x40] sm:$0xff]  ;;  %v8796_v36 = vld [vmem:[#allocation4 + $0x98] sm:$0xff]  ;;  %v8794_v37 = vld [vmem:[#allocation4 + $0x88] sm:$0xff] }
 0x47a   : > { %v18438_v32 = vpop.f32.mrb[39].mxu0  ;;  %8853 = vst.msk [vmem:[#allocation4 + $0x60] sm:$0xff] %vm19674_vm3, %v8821_v46  ;;  %v8822_v26 = vadd.f32 %v8790_v12, %v8701_v2  ;;  %v9171_v51 = vadd.f32 %v9139_v25, %v18237_v34  ;;  %v9142_v29 = vld [vmem:[#allocation4 + $0x58] sm:$0xff]  ;;  %vm19682_vm10 = vmmov %vm19557_vm0 }
 0x47b   : > { %8856 = vst.msk [vmem:[#allocation4 + $0x78] sm:$0xff] %vm19675_vm8, %v8824_v44  ;;  %v9174_v5 = vadd.f32 %v18240_v62, %v9142_v29  ;;  %vm19683_vm6 = vmmov %vm19557_vm0  ;;  %v8799_v29 = vld [vmem:[#allocation4 + $0xb0] sm:$0xff] }
 0x47c   : > { %9205 = vst.msk [vmem:[#allocation4 + $0x50] sm:$0xff] %vm19676_vm11, %v9173_v41  ;;  %v9140_v6 = vld [vmem:[#allocation4 + $0x48] sm:$0xff]  ;;  %vm19684_vm1 = vmmov %vm19557_vm0 }
 0x47d   : > { %8854 = vst.msk [vmem:[#allocation4 + $0x68] sm:$0xff] %vm19677_vm7, %v8822_v26  ;;  %v9172_v27 = vadd.f32 %v9140_v6, %v18243_v63  ;;  %vm19685_vm4 = vmmov %vm19557_vm0 }
 0x47e   : > { %9203 = vst.msk [vmem:[#allocation4 + $0x40] sm:$0xff] %vm19678_vm2, %v9171_v51  ;;  %v12966_v4 = vpop.f32.mrb[4].mxu1  ;;  %vm19686_vm5 = vmmov %vm19557_vm0 }
 0x47f   : > { %9206 = vst.msk [vmem:[#allocation4 + $0x58] sm:$0xff] %vm19679_vm9, %v9174_v5  ;;  %v18450_v58 = vpop.f32.mrb[40].mxu0  ;;  %v8827_v34 = vadd.f32 %v12966_v4, %v8795_v18  ;;  %v8714_v16 = vpop.f32.mrb[5].mxu1  ;;  %vm19687_vm12 = vmmov %vm19557_vm0 }
 0x480   : > { %9204 = vst.msk [vmem:[#allocation4 + $0x48] sm:$0xff] %vm19680_vm14, %v9172_v27  ;;  %v18453_v1 = vpop.f32.mrb[41].mxu0  ;;  %v8825_v62 = vadd.f32 %v8793_v23, %v8714_v16  ;;  %v12967_v35 = vpop.f32.mrb[6].mxu1  ;;  %v9145_v38 = vld [vmem:[#allocation4 + $0x70] sm:$0xff]  ;;  %v8797_v27 = vld [vmem:[#allocation4 + $0xa0] sm:$0xff]  ;;  %vm19688_vm15 = vmmov %vm19557_vm0 }
 0x481   : > { %v18455_v48 = vpop.f32.mrb[42].mxu0  ;;  %8859 = vst.msk [vmem:[#allocation4 + $0x90] sm:$0xff] %vm19681_vm13, %v8827_v34  ;;  %v8828_v63 = vadd.f32 %v12967_v35, %v8796_v36  ;;  %v8717_v46 = vpop.f32.mrb[7].mxu1  ;;  %v9177_v30 = vadd.f32 %v18263_v42, %v9145_v38  ;;  %v9143_v44 = vld [vmem:[#allocation4 + $0x60] sm:$0xff]  ;;  %v8800_v34 = vld [vmem:[#allocation4 + $0xb8] sm:$0xff]  ;;  %v8798_v35 = vld [vmem:[#allocation4 + $0xa8] sm:$0xff] }
 0x482   : > { %v18458_v14 = vpop.f32.mrb[43].mxu0  ;;  %8857 = vst.msk [vmem:[#allocation4 + $0x80] sm:$0xff] %vm19682_vm10, %v8825_v62  ;;  %v8826_v2 = vadd.f32 %v8794_v37, %v8717_v46  ;;  %v9175_v12 = vadd.f32 %v9143_v44, %v18266_v9  ;;  %v9146_v41 = vld [vmem:[#allocation4 + $0x78] sm:$0xff]  ;;  %vm19689_vm3 = vmmov %vm19557_vm0 }
 0x483   : > { %8860 = vst.msk [vmem:[#allocation4 + $0x98] sm:$0xff] %vm19683_vm6, %v8828_v63  ;;  %v9178_v25 = vadd.f32 %v18269_v43, %v9146_v41  ;;  %vm19690_vm8 = vmmov %vm19557_vm0  ;;  %v8803_v41 = vld [vmem:[#allocation4 + $0xd0] sm:$0xff] }
 0x484   : > { %9209 = vst.msk [vmem:[#allocation4 + $0x70] sm:$0xff] %vm19684_vm1, %v9177_v30  ;;  %v9144_v26 = vld [vmem:[#allocation4 + $0x68] sm:$0xff]  ;;  %vm19691_vm11 = vmmov %vm19557_vm0 }
 0x485   : > { %8858 = vst.msk [vmem:[#allocation4 + $0x88] sm:$0xff] %vm19685_vm4, %v8826_v2  ;;  %v9176_v42 = vadd.f32 %v9144_v26, %v18272_v33  ;;  %vm19692_vm7 = vmmov %vm19557_vm0 }
 0x486   : > { %9207 = vst.msk [vmem:[#allocation4 + $0x60] sm:$0xff] %vm19557_vm0, %v9175_v12  ;;  %v12970_v51 = vpop.f32.mrb[8].mxu1  ;;  %vm19693_vm2 = vmmov %vm19557_vm0 }
 0x487   : > { %9210 = vst.msk [vmem:[#allocation4 + $0x78] sm:$0xff] %vm19686_vm5, %v9178_v25  ;;  %v18470_v5 = vpop.f32.mrb[44].mxu0  ;;  %v8831_v9 = vadd.f32 %v12970_v51, %v8799_v29  ;;  %v8730_v6 = vpop.f32.mrb[9].mxu1  ;;  %vm19694_vm9 = vmmov %vm19557_vm0 }
 0x488   : > { %9208 = vst.msk [vmem:[#allocation4 + $0x68] sm:$0xff] %vm19687_vm12, %v9176_v42  ;;  %v18473_v4 = vpop.f32.mrb[45].mxu0  ;;  %v8829_v43 = vadd.f32 %v8797_v27, %v8730_v6  ;;  %v12971_v18 = vpop.f32.mrb[10].mxu1  ;;  %v9149_v23 = vld [vmem:[#allocation4 + $0x90] sm:$0xff]  ;;  %vm19695_vm14 = vmmov %vm19557_vm0  ;;  %v8801_v42 = vld [vmem:[#allocation4 + $0xc0] sm:$0xff] }
 0x489   : > { %v18475_v16 = vpop.f32.mrb[46].mxu0  ;;  %8863 = vst.msk [vmem:[#allocation4 + $0xb0] sm:$0xff] %vm19688_vm15, %v8831_v9  ;;  %v8832_v33 = vadd.f32 %v12971_v18, %v8800_v34  ;;  %v8733_v62 = vpop.f32.mrb[11].mxu1  ;;  %v9181_v38 = vadd.f32 %v18288_v39, %v9149_v23  ;;  %v9147_v63 = vld [vmem:[#allocation4 + $0x80] sm:$0xff]  ;;  %v8804_v9 = vld [vmem:[#allocation4 + $0xd8] sm:$0xff]  ;;  %vm19696_vm13 = vmmov %vm19557_vm0 }
 0x48a   : > { %v18478_v36 = vpop.f32.mrb[47].mxu0  ;;  %8861 = vst.msk [vmem:[#allocation4 + $0xa0] sm:$0xff] %vm19689_vm3, %v8829_v43  ;;  %v8830_v46 = vadd.f32 %v8798_v35, %v8733_v62  ;;  %v9179_v37 = vadd.f32 %v9147_v63, %v18291_v54  ;;  %v9150_v30 = vld [vmem:[#allocation4 + $0x98] sm:$0xff]  ;;  %v8802_v18 = vld [vmem:[#allocation4 + $0xc8] sm:$0xff]  ;;  %vm19697_vm10 = vmmov %vm19557_vm0 }
 0x48b   : > { %8864 = vst.msk [vmem:[#allocation4 + $0xb8] sm:$0xff] %vm19690_vm8, %v8832_v33  ;;  %v9182_v44 = vadd.f32 %v18293_v15, %v9150_v30  ;;  %vm19698_vm6 = vmmov %vm19557_vm0  ;;  %v8807_v30 = vld [vmem:[#allocation4 + $0xf0] sm:$0xff] }
 0x48c   : > { %9213 = vst.msk [vmem:[#allocation4 + $0x90] sm:$0xff] %vm19691_vm11, %v9181_v38  ;;  %v9148_v2 = vld [vmem:[#allocation4 + $0x88] sm:$0xff]  ;;  %vm19699_vm1 = vmmov %vm19557_vm0 }
 0x48d   : > { %8862 = vst.msk [vmem:[#allocation4 + $0xa8] sm:$0xff] %vm19692_vm7, %v8830_v46  ;;  %v9180_v39 = vadd.f32 %v9148_v2, %v18296_v19  ;;  %vm19700_vm4 = vmmov %vm19557_vm0 }
 0x48e   : > { %9211 = vst.msk [vmem:[#allocation4 + $0x80] sm:$0xff] %vm19693_vm2, %v9179_v37  ;;  %v12974_v12 = vpop.f32.mrb[12].mxu1  ;;  %vm19701_vm5 = vmmov %vm19557_vm0 }
 0x48f   : > { %9214 = vst.msk [vmem:[#allocation4 + $0x98] sm:$0xff] %vm19694_vm9, %v9182_v44  ;;  %v18490_v25 = vpop.f32.mrb[48].mxu0  ;;  %v8835_v54 = vadd.f32 %v12974_v12, %v8803_v41  ;;  %v8746_v26 = vpop.f32.mrb[13].mxu1  ;;  %vm19702_vm12 = vmmov %vm19557_vm0 }
 0x490   : > { %9212 = vst.msk [vmem:[#allocation4 + $0x88] sm:$0xff] %vm19695_vm14, %v9180_v39  ;;  %v18493_v51 = vpop.f32.mrb[49].mxu0  ;;  %v8833_v15 = vadd.f32 %v8801_v42, %v8746_v26  ;;  %v12975_v29 = vpop.f32.mrb[14].mxu1  ;;  %v9153_v27 = vld [vmem:[#allocation4 + $0xb0] sm:$0xff]  ;;  %v8805_v39 = vld [vmem:[#allocation4 + $0xe0] sm:$0xff]  ;;  %vm19703_vm15 = vmmov %vm19557_vm0 }
 0x491   : > { %v18495_v6 = vpop.f32.mrb[50].mxu0  ;;  %8867 = vst.msk [vmem:[#allocation4 + $0xd0] sm:$0xff] %vm19696_vm13, %v8835_v54  ;;  %v8836_v19 = vadd.f32 %v12975_v29, %v8804_v9  ;;  %v8749_v43 = vpop.f32.mrb[15].mxu1  ;;  %v9185_v23 = vadd.f32 %v18310_v0, %v9153_v27  ;;  %v9151_v33 = vld [vmem:[#allocation4 + $0xa0] sm:$0xff]  ;;  %v8808_v54 = vld [vmem:[#allocation4 + $0xf8] sm:$0xff]  ;;  %v8806_v29 = vld [vmem:[#allocation4 + $0xe8] sm:$0xff] }
 0x492   : > { %v18498_v34 = vpop.f32.mrb[51].mxu0  ;;  %8865 = vst.msk [vmem:[#allocation4 + $0xc0] sm:$0xff] %vm19697_vm10, %v8833_v15  ;;  %v8834_v62 = vadd.f32 %v8802_v18, %v8749_v43  ;;  %v9183_v35 = vadd.f32 %v9151_v33, %v18313_v11  ;;  %v9154_v38 = vld [vmem:[#allocation4 + $0xb8] sm:$0xff]  ;;  %vm19704_vm3 = vmmov %vm19557_vm0 }
 0x493   : > { %8868 = vst.msk [vmem:[#allocation4 + $0xd8] sm:$0xff] %vm19698_vm6, %v8836_v19  ;;  %v9186_v63 = vadd.f32 %v18315_v20, %v9154_v38  ;;  %vm19705_vm8 = vmmov %vm19557_vm0  ;;  %v9620_v38 = vld [vmem:[#allocation4 + $0x10] sm:$0xff] }
 0x494   : > { %9217 = vst.msk [vmem:[#allocation4 + $0xb0] sm:$0xff] %vm19699_vm1, %v9185_v23  ;;  %v9152_v46 = vld [vmem:[#allocation4 + $0xa8] sm:$0xff]  ;;  %vm19706_vm11 = vmmov %vm19557_vm0 }
 0x495   : > { %8866 = vst.msk [vmem:[#allocation4 + $0xc8] sm:$0xff] %vm19700_vm4, %v8834_v62  ;;  %v9184_v0 = vadd.f32 %v9152_v46, %v18318_v7  ;;  %vm19707_vm7 = vmmov %vm19557_vm0 }
 0x496   : > { %9215 = vst.msk [vmem:[#allocation4 + $0xa0] sm:$0xff] %vm19557_vm0, %v9183_v35  ;;  %v12978_v37 = vpop.f32.mrb[16].mxu1  ;;  %vm19708_vm2 = vmmov %vm19557_vm0 }
 0x497   : > { %9218 = vst.msk [vmem:[#allocation4 + $0xb8] sm:$0xff] %vm19701_vm5, %v9186_v63  ;;  %v18510_v44 = vpop.f32.mrb[52].mxu0  ;;  %v8839_v11 = vadd.f32 %v12978_v37, %v8807_v30  ;;  %v8762_v2 = vpop.f32.mrb[17].mxu1  ;;  %vm19709_vm9 = vmmov %vm19557_vm0 }
 0x498   : > { %9216 = vst.msk [vmem:[#allocation4 + $0xa8] sm:$0xff] %vm19702_vm12, %v9184_v0  ;;  %v18513_v12 = vpop.f32.mrb[53].mxu0  ;;  %v8837_v20 = vadd.f32 %v8805_v39, %v8762_v2  ;;  %v12979_v41 = vpop.f32.mrb[18].mxu1  ;;  %v9157_v42 = vld [vmem:[#allocation4 + $0xd0] sm:$0xff]  ;;  %vm19710_vm14 = vmmov %vm19557_vm0  ;;  %v9618_v0 = vld [vmem:[#allocation4] sm:$0xff] }
 0x499   : > { %v18515_v26 = vpop.f32.mrb[54].mxu0  ;;  %8871 = vst.msk [vmem:[#allocation4 + $0xf0] sm:$0xff] %vm19703_vm15, %v8839_v11  ;;  %v8840_v7 = vadd.f32 %v12979_v41, %v8808_v54  ;;  %v8765_v15 = vpop.f32.mrb[19].mxu1  ;;  %v9189_v27 = vadd.f32 %v18330_v3, %v9157_v42  ;;  %v9155_v19 = vld [vmem:[#allocation4 + $0xc0] sm:$0xff]  ;;  %v9621_v11 = vld [vmem:[#allocation4 + $0x18] sm:$0xff]  ;;  %vm19711_vm13 = vmmov %vm19557_vm0 }
 0x49a   : > { %v18518_v9 = vpop.f32.mrb[55].mxu0  ;;  %8869 = vst.msk [vmem:[#allocation4 + $0xe0] sm:$0xff] %vm19704_vm3, %v8837_v20  ;;  %v8838_v43 = vadd.f32 %v8806_v29, %v8765_v15  ;;  %v9187_v18 = vadd.f32 %v9155_v19, %v18333_v60  ;;  %v9158_v23 = vld [vmem:[#allocation4 + $0xd8] sm:$0xff]  ;;  %v9619_v41 = vld [vmem:[#allocation4 + $0x8] sm:$0xff]  ;;  %vm19712_vm10 = vmmov %vm19557_vm0 }
 0x49b   : > { %8872 = vst.msk [vmem:[#allocation4 + $0xf8] sm:$0xff] %vm19705_vm8, %v8840_v7  ;;  %v9190_v33 = vadd.f32 %v18335_v17, %v9158_v23  ;;  %vm19713_vm6 = vmmov %vm19557_vm0  ;;  %v9624_v23 = vld [vmem:[#allocation4 + $0x30] sm:$0xff] }
 0x49c   : > { %9221 = vst.msk [vmem:[#allocation4 + $0xd0] sm:$0xff] %vm19706_vm11, %v9189_v27  ;;  %v9156_v62 = vld [vmem:[#allocation4 + $0xc8] sm:$0xff]  ;;  %vm19714_vm1 = vmmov %vm19557_vm0 }
 0x49d   : > { %8870 = vst.msk [vmem:[#allocation4 + $0xe8] sm:$0xff] %vm19707_vm7, %v8838_v43  ;;  %v9188_v3 = vadd.f32 %v9156_v62, %v18338_v53  ;;  %vm19715_vm4 = vmmov %vm19557_vm0 }
 0x49e   : > { %9219 = vst.msk [vmem:[#allocation4 + $0xc0] sm:$0xff] %vm19708_vm2, %v9187_v18  ;;  %v13030_v35 = vpop.f32.mrb[20].mxu1  ;;  %vm19716_vm5 = vmmov %vm19557_vm0 }
 0x49f   : > { %9222 = vst.msk [vmem:[#allocation4 + $0xd8] sm:$0xff] %vm19709_vm9, %v9190_v33  ;;  %v18530_v63 = vpop.f32.mrb[56].mxu0  ;;  %v9652_v60 = vadd.f32 %v13030_v35, %v9620_v38  ;;  %v9491_v46 = vpop.f32.mrb[21].mxu1  ;;  %vm19717_vm12 = vmmov %vm19557_vm0 }
 0x4a0   : > { %9220 = vst.msk [vmem:[#allocation4 + $0xc8] sm:$0xff] %vm19710_vm14, %v9188_v3  ;;  %v18533_v37 = vpop.f32.mrb[57].mxu0  ;;  %v9650_v17 = vadd.f32 %v9618_v0, %v9491_v46  ;;  %v13031_v30 = vpop.f32.mrb[22].mxu1  ;;  %v9161_v39 = vld [vmem:[#allocation4 + $0xf0] sm:$0xff]  ;;  %v9622_v3 = vld [vmem:[#allocation4 + $0x20] sm:$0xff]  ;;  %vm19718_vm15 = vmmov %vm19557_vm0 }
 0x4a1   : > { %v18535_v2 = vpop.f32.mrb[58].mxu0  ;;  %9684 = vst.msk [vmem:[#allocation4 + $0x10] sm:$0xff] %vm19711_vm13, %v9652_v60  ;;  %v9653_v53 = vadd.f32 %v13031_v30, %v9621_v11  ;;  %v9494_v20 = vpop.f32.mrb[23].mxu1  ;;  %v9193_v42 = vadd.f32 %v18350_v21, %v9161_v39  ;;  %v9159_v7 = vld [vmem:[#allocation4 + $0xe0] sm:$0xff]  ;;  %v9625_v60 = vld [vmem:[#allocation4 + $0x38] sm:$0xff]  ;;  %v9623_v30 = vld [vmem:[#allocation4 + $0x28] sm:$0xff] }
 0x4a2   : > { %v18538_v54 = vpop.f32.mrb[59].mxu0  ;;  %9682 = vst.msk [vmem:[#allocation4] sm:$0xff] %vm19712_vm10, %v9650_v17  ;;  %v9651_v15 = vadd.f32 %v9619_v41, %v9494_v20  ;;  %v9191_v29 = vadd.f32 %v9159_v7, %v18353_v45  ;;  %v9162_v27 = vld [vmem:[#allocation4 + $0xf8] sm:$0xff]  ;;  %vm19719_vm3 = vmmov %vm19557_vm0 }
 0x4a3   : > { %9685 = vst.msk [vmem:[#allocation4 + $0x18] sm:$0xff] %vm19713_vm6, %v9653_v53  ;;  %v9194_v19 = vadd.f32 %v18355_v50, %v9162_v27  ;;  %vm19720_vm8 = vmmov %vm19557_vm0  ;;  %v9628_v27 = vld [vmem:[#allocation4 + $0x50] sm:$0xff] }
 0x4a4   : > { %9225 = vst.msk [vmem:[#allocation4 + $0xf0] sm:$0xff] %vm19714_vm1, %v9193_v42  ;;  %v9160_v43 = vld [vmem:[#allocation4 + $0xe8] sm:$0xff]  ;;  %vm19721_vm11 = vmmov %vm19557_vm0 }
 0x4a5   : > { %9683 = vst.msk [vmem:[#allocation4 + $0x8] sm:$0xff] %vm19715_vm4, %v9651_v15  ;;  %v9192_v21 = vadd.f32 %v9160_v43, %v18358_v40  ;;  %vm19722_vm7 = vmmov %vm19557_vm0 }
 0x4a6   : > { %9223 = vst.msk [vmem:[#allocation4 + $0xe0] sm:$0xff] %vm19557_vm0, %v9191_v29  ;;  %v13034_v18 = vpop.f32.mrb[24].mxu1  ;;  %vm19723_vm2 = vmmov %vm19557_vm0 }
 0x4a7   : > { %9226 = vst.msk [vmem:[#allocation4 + $0xf8] sm:$0xff] %vm19716_vm5, %v9194_v19  ;;  %v18550_v33 = vpop.f32.mrb[60].mxu0  ;;  %v9656_v45 = vadd.f32 %v13034_v18, %v9624_v23  ;;  %v9507_v62 = vpop.f32.mrb[25].mxu1  ;;  %vm19724_vm9 = vmmov %vm19557_vm0 }
 0x4a8   : > { %9224 = vst.msk [vmem:[#allocation4 + $0xe8] sm:$0xff] %vm19717_vm12, %v9192_v21  ;;  %v18553_v35 = vpop.f32.mrb[61].mxu0  ;;  %v9654_v50 = vadd.f32 %v9622_v3, %v9507_v62  ;;  %v13035_v38 = vpop.f32.mrb[26].mxu1  ;;  %v10107_v0 = vld [vmem:[#allocation4 + $0x10] sm:$0xff]  ;;  %vm19725_vm14 = vmmov %vm19557_vm0  ;;  %v9626_v21 = vld [vmem:[#allocation4 + $0x40] sm:$0xff] }
 0x4a9   : > { %v18555_v46 = vpop.f32.mrb[62].mxu0  ;;  %9688 = vst.msk [vmem:[#allocation4 + $0x30] sm:$0xff] %vm19718_vm15, %v9656_v45  ;;  %v9657_v40 = vadd.f32 %v13035_v38, %v9625_v60  ;;  %v9510_v17 = vpop.f32.mrb[27].mxu1  ;;  %v10139_v39 = vadd.f32 %v18370_v10, %v10107_v0  ;;  %v10105_v53 = vld [vmem:[#allocation4] sm:$0xff]  ;;  %v9629_v45 = vld [vmem:[#allocation4 + $0x58] sm:$0xff]  ;;  %vm19726_vm13 = vmmov %vm19557_vm0 }
 0x4aa   : > { %v18558_v11 = vpop.f32.mrb[63].mxu0  ;;  %9686 = vst.msk [vmem:[#allocation4 + $0x20] sm:$0xff] %vm19719_vm3, %v9654_v50  ;;  %v9655_v20 = vadd.f32 %v9623_v30, %v9510_v17  ;;  %v10137_v41 = vadd.f32 %v10105_v53, %v18373_v22  ;;  %v10108_v42 = vld [vmem:[#allocation4 + $0x18] sm:$0xff]  ;;  %v9627_v38 = vld [vmem:[#allocation4 + $0x48] sm:$0xff]  ;;  %vm19727_vm10 = vmmov %vm19557_vm0 }
 0x4ab   : > { %9689 = vst.msk [vmem:[#allocation4 + $0x38] sm:$0xff] %vm19720_vm8, %v9657_v40  ;;  %v10140_v7 = vadd.f32 %v18375_v55, %v10108_v42  ;;  %vm19728_vm6 = vmmov %vm19557_vm0  ;;  %v9632_v42 = vld [vmem:[#allocation4 + $0x70] sm:$0xff] }
 0x4ac   : > { %10171 = vst.msk [vmem:[#allocation4 + $0x10] sm:$0xff] %vm19721_vm11, %v10139_v39  ;;  %v10106_v15 = vld [vmem:[#allocation4 + $0x8] sm:$0xff]  ;;  %vm19729_vm1 = vmmov %vm19557_vm0 }
 0x4ad   : > { %9687 = vst.msk [vmem:[#allocation4 + $0x28] sm:$0xff] %vm19722_vm7, %v9655_v20  ;;  %v10138_v10 = vadd.f32 %v10106_v15, %v18378_v57  ;;  %vm19730_vm4 = vmmov %vm19557_vm0 }
 0x4ae   : > { %10169 = vst.msk [vmem:[#allocation4] sm:$0xff] %vm19723_vm2, %v10137_v41  ;;  %v13038_v29 = vpop.f32.mrb[28].mxu1  ;;  %vm19731_vm5 = vmmov %vm19557_vm0 }
 0x4af   : > { %10172 = vst.msk [vmem:[#allocation4 + $0x18] sm:$0xff] %vm19724_vm9, %v10140_v7  ;;  %v18570_v19 = vpop.f32.mrb[64].mxu0  ;;  %v9660_v22 = vadd.f32 %v13038_v29, %v9628_v27  ;;  %v9523_v43 = vpop.f32.mrb[29].mxu1  ;;  %vm19732_vm12 = vmmov %vm19557_vm0 }
 0x4b0   : > { %10170 = vst.msk [vmem:[#allocation4 + $0x8] sm:$0xff] %vm19725_vm14, %v10138_v10  ;;  %v18573_v18 = vpop.f32.mrb[65].mxu0  ;;  %v9658_v55 = vadd.f32 %v9626_v21, %v9523_v43  ;;  %v13039_v23 = vpop.f32.mrb[30].mxu1  ;;  %v10111_v3 = vld [vmem:[#allocation4 + $0x30] sm:$0xff]  ;;  %v9630_v10 = vld [vmem:[#allocation4 + $0x60] sm:$0xff]  ;;  %vm19733_vm15 = vmmov %vm19557_vm0 }
 0x4b1   : > { %v18575_v62 = vpop.f32.mrb[66].mxu0  ;;  %9692 = vst.msk [vmem:[#allocation4 + $0x50] sm:$0xff] %vm19726_vm13, %v9660_v22  ;;  %v9661_v57 = vadd.f32 %v13039_v23, %v9629_v45  ;;  %v9526_v50 = vpop.f32.mrb[31].mxu1  ;;  %v10143_v0 = vadd.f32 %v18390_v59, %v10111_v3  ;;  %v10109_v40 = vld [vmem:[#allocation4 + $0x20] sm:$0xff]  ;;  %v9633_v22 = vld [vmem:[#allocation4 + $0x78] sm:$0xff]  ;;  %v9631_v23 = vld [vmem:[#allocation4 + $0x68] sm:$0xff] }
 0x4b2   : > { %v18578_v60 = vpop.f32.mrb[67].mxu0  ;;  %9690 = vst.msk [vmem:[#allocation4 + $0x40] sm:$0xff] %vm19727_vm10, %v9658_v55  ;;  %v9659_v17 = vadd.f32 %v9627_v38, %v9526_v50  ;;  %v10141_v30 = vadd.f32 %v10109_v40, %v18393_v13  ;;  %v10112_v39 = vld [vmem:[#allocation4 + $0x38] sm:$0xff]  ;;  %vm19734_vm3 = vmmov %vm19557_vm0 }
 0x4b3   : > { %9693 = vst.msk [vmem:[#allocation4 + $0x58] sm:$0xff] %vm19728_vm6, %v9661_v57  ;;  %v10144_v53 = vadd.f32 %v18395_v52, %v10112_v39  ;;  %vm19735_vm8 = vmmov %vm19557_vm0  ;;  %v9636_v39 = vld [vmem:[#allocation4 + $0x90] sm:$0xff] }
 0x4b4   : > { %10175 = vst.msk [vmem:[#allocation4 + $0x30] sm:$0xff] %vm19729_vm1, %v10143_v0  ;;  %v10110_v20 = vld [vmem:[#allocation4 + $0x28] sm:$0xff]  ;;  %vm19736_vm11 = vmmov %vm19557_vm0 }
 0x4b5   : > { %9691 = vst.msk [vmem:[#allocation4 + $0x48] sm:$0xff] %vm19730_vm4, %v9659_v17  ;;  %v10142_v59 = vadd.f32 %v10110_v20, %v18398_v31  ;;  %vm19737_vm7 = vmmov %vm19557_vm0 }
 0x4b6   : > { %10173 = vst.msk [vmem:[#allocation4 + $0x20] sm:$0xff] %vm19557_vm0, %v10141_v30  ;;  %v13042_v41 = vpop.f32.mrb[32].mxu1  ;;  %vm19738_vm2 = vmmov %vm19557_vm0 }
 0x4b7   : > { %10176 = vst.msk [vmem:[#allocation4 + $0x38] sm:$0xff] %vm19731_vm5, %v10144_v53  ;;  %v18590_v7 = vpop.f32.mrb[68].mxu0  ;;  %v9664_v13 = vadd.f32 %v13042_v41, %v9632_v42  ;;  %v9539_v15 = vpop.f32.mrb[33].mxu1  ;;  %vm19739_vm9 = vmmov %vm19557_vm0 }
 0x4b8   : > { %10174 = vst.msk [vmem:[#allocation4 + $0x28] sm:$0xff] %vm19732_vm12, %v10142_v59  ;;  %v18593_v29 = vpop.f32.mrb[69].mxu0  ;;  %v9662_v52 = vadd.f32 %v9630_v10, %v9539_v15  ;;  %v13043_v27 = vpop.f32.mrb[34].mxu1  ;;  %v10115_v21 = vld [vmem:[#allocation4 + $0x50] sm:$0xff]  ;;  %vm19740_vm14 = vmmov %vm19557_vm0  ;;  %v9634_v59 = vld [vmem:[#allocation4 + $0x80] sm:$0xff] }
 0x4b9   : > { %v18595_v43 = vpop.f32.mrb[70].mxu0  ;;  %9696 = vst.msk [vmem:[#allocation4 + $0x70] sm:$0xff] %vm19733_vm15, %v9664_v13  ;;  %v9665_v31 = vadd.f32 %v13043_v27, %v9633_v22  ;;  %v9542_v55 = vpop.f32.mrb[35].mxu1  ;;  %v10147_v3 = vadd.f32 %v18410_v8, %v10115_v21  ;;  %v10113_v57 = vld [vmem:[#allocation4 + $0x40] sm:$0xff]  ;;  %v9637_v13 = vld [vmem:[#allocation4 + $0x98] sm:$0xff]  ;;  %vm19741_vm13 = vmmov %vm19557_vm0 }
 0x4ba   : > { %v18598_v45 = vpop.f32.mrb[71].mxu0  ;;  %9694 = vst.msk [vmem:[#allocation4 + $0x60] sm:$0xff] %vm19734_vm3, %v9662_v52  ;;  %v9663_v50 = vadd.f32 %v9631_v23, %v9542_v55  ;;  %v10145_v38 = vadd.f32 %v10113_v57, %v18413_v49  ;;  %v10116_v0 = vld [vmem:[#allocation4 + $0x58] sm:$0xff]  ;;  %v9635_v27 = vld [vmem:[#allocation4 + $0x88] sm:$0xff]  ;;  %vm19742_vm10 = vmmov %vm19557_vm0 }
 0x4bb   : > { %9697 = vst.msk [vmem:[#allocation4 + $0x78] sm:$0xff] %vm19735_vm8, %v9665_v31  ;;  %v10148_v40 = vadd.f32 %v18415_v56, %v10116_v0  ;;  %vm19743_vm6 = vmmov %vm19557_vm0  ;;  %v9640_v0 = vld [vmem:[#allocation4 + $0xb0] sm:$0xff] }
 0x4bc   : > { %10179 = vst.msk [vmem:[#allocation4 + $0x50] sm:$0xff] %vm19736_vm11, %v10147_v3  ;;  %v10114_v17 = vld [vmem:[#allocation4 + $0x48] sm:$0xff]  ;;  %vm19744_vm1 = vmmov %vm19557_vm0 }
 0x4bd   : > { %9695 = vst.msk [vmem:[#allocation4 + $0x68] sm:$0xff] %vm19737_vm7, %v9663_v50  ;;  %v10146_v8 = vadd.f32 %v10114_v17, %v18418_v28  ;;  %vm19745_vm4 = vmmov %vm19557_vm0 }
 0x4be   : > { %10177 = vst.msk [vmem:[#allocation4 + $0x40] sm:$0xff] %vm19738_vm2, %v10145_v38  ;;  %v13046_v30 = vpop.f32.mrb[36].mxu1  ;;  %vm19746_vm5 = vmmov %vm19557_vm0 }
 0x4bf   : > { %10180 = vst.msk [vmem:[#allocation4 + $0x58] sm:$0xff] %vm19739_vm9, %v10148_v40  ;;  %v18610_v53 = vpop.f32.mrb[72].mxu0  ;;  %v9668_v49 = vadd.f32 %v13046_v30, %v9636_v39  ;;  %v9555_v20 = vpop.f32.mrb[37].mxu1  ;;  %vm19747_vm12 = vmmov %vm19557_vm0 }
 0x4c0   : > { %10178 = vst.msk [vmem:[#allocation4 + $0x48] sm:$0xff] %vm19740_vm14, %v10146_v8  ;;  %v18613_v41 = vpop.f32.mrb[73].mxu0  ;;  %v9666_v56 = vadd.f32 %v9634_v59, %v9555_v20  ;;  %v13047_v42 = vpop.f32.mrb[38].mxu1  ;;  %v10119_v10 = vld [vmem:[#allocation4 + $0x70] sm:$0xff]  ;;  %v9638_v8 = vld [vmem:[#allocation4 + $0xa0] sm:$0xff]  ;;  %vm19748_vm15 = vmmov %vm19557_vm0 }
 0x4c1   : > { %v18615_v15 = vpop.f32.mrb[74].mxu0  ;;  %9700 = vst.msk [vmem:[#allocation4 + $0x90] sm:$0xff] %vm19741_vm13, %v9668_v49  ;;  %v9669_v28 = vadd.f32 %v13047_v42, %v9637_v13  ;;  %v9558_v52 = vpop.f32.mrb[39].mxu1  ;;  %v10151_v21 = vadd.f32 %v18430_v47, %v10119_v10  ;;  %v10117_v31 = vld [vmem:[#allocation4 + $0x60] sm:$0xff]  ;;  %v9641_v49 = vld [vmem:[#allocation4 + $0xb8] sm:$0xff]  ;;  %v9639_v42 = vld [vmem:[#allocation4 + $0xa8] sm:$0xff] }
 0x4c2   : > { %v18618_v22 = vpop.f32.mrb[75].mxu0  ;;  %9698 = vst.msk [vmem:[#allocation4 + $0x80] sm:$0xff] %vm19742_vm10, %v9666_v56  ;;  %v9667_v55 = vadd.f32 %v9635_v27, %v9558_v52  ;;  %v10149_v23 = vadd.f32 %v10117_v31, %v18433_v24  ;;  %v10120_v3 = vld [vmem:[#allocation4 + $0x78] sm:$0xff]  ;;  %vm19749_vm3 = vmmov %vm19557_vm0 }
 0x4c3   : > { %9701 = vst.msk [vmem:[#allocation4 + $0x98] sm:$0xff] %vm19743_vm6, %v9669_v28  ;;  %v10152_v57 = vadd.f32 %v18435_v61, %v10120_v3  ;;  %vm19750_vm8 = vmmov %vm19557_vm0  ;;  %v9644_v3 = vld [vmem:[#allocation4 + $0xd0] sm:$0xff] }
 0x4c4   : > { %10183 = vst.msk [vmem:[#allocation4 + $0x70] sm:$0xff] %vm19744_vm1, %v10151_v21  ;;  %v10118_v50 = vld [vmem:[#allocation4 + $0x68] sm:$0xff]  ;;  %vm19751_vm11 = vmmov %vm19557_vm0 }
 0x4c5   : > { %9699 = vst.msk [vmem:[#allocation4 + $0x88] sm:$0xff] %vm19745_vm4, %v9667_v55  ;;  %v10150_v47 = vadd.f32 %v10118_v50, %v18438_v32  ;;  %vm19752_vm7 = vmmov %vm19557_vm0 }
 0x4c6   : > { %10181 = vst.msk [vmem:[#allocation4 + $0x60] sm:$0xff] %vm19557_vm0, %v10149_v23  ;;  %v13050_v38 = vpop.f32.mrb[40].mxu1  ;;  %vm19753_vm2 = vmmov %vm19557_vm0 }
 0x4c7   : > { %10184 = vst.msk [vmem:[#allocation4 + $0x78] sm:$0xff] %vm19746_vm5, %v10152_v57  ;;  %v18630_v40 = vpop.f32.mrb[76].mxu0  ;;  %v9672_v24 = vadd.f32 %v13050_v38, %v9640_v0  ;;  %v9571_v17 = vpop.f32.mrb[41].mxu1  ;;  %vm19754_vm9 = vmmov %vm19557_vm0 }
 0x4c8   : > { %10182 = vst.msk [vmem:[#allocation4 + $0x68] sm:$0xff] %vm19747_vm12, %v10150_v47  ;;  %v18633_v30 = vpop.f32.mrb[77].mxu0  ;;  %v9670_v61 = vadd.f32 %v9638_v8, %v9571_v17  ;;  %v13051_v39 = vpop.f32.mrb[42].mxu1  ;;  %v10123_v59 = vld [vmem:[#allocation4 + $0x90] sm:$0xff]  ;;  %vm19755_vm14 = vmmov %vm19557_vm0  ;;  %v9642_v47 = vld [vmem:[#allocation4 + $0xc0] sm:$0xff] }
 0x4c9   : > { %v18635_v20 = vpop.f32.mrb[78].mxu0  ;;  %9704 = vst.msk [vmem:[#allocation4 + $0xb0] sm:$0xff] %vm19748_vm15, %v9672_v24  ;;  %v9673_v32 = vadd.f32 %v13051_v39, %v9641_v49  ;;  %v9574_v56 = vpop.f32.mrb[43].mxu1  ;;  %v10155_v10 = vadd.f32 %v18450_v58, %v10123_v59  ;;  %v10121_v28 = vld [vmem:[#allocation4 + $0x80] sm:$0xff]  ;;  %v9645_v24 = vld [vmem:[#allocation4 + $0xd8] sm:$0xff]  ;;  %vm19756_vm13 = vmmov %vm19557_vm0 }
 0x4ca   : > { %v18638_v13 = vpop.f32.mrb[79].mxu0  ;;  %9702 = vst.msk [vmem:[#allocation4 + $0xa0] sm:$0xff] %vm19749_vm3, %v9670_v61  ;;  %v9671_v52 = vadd.f32 %v9639_v42, %v9574_v56  ;;  %v10153_v27 = vadd.f32 %v10121_v28, %v18453_v1  ;;  %v10124_v21 = vld [vmem:[#allocation4 + $0x98] sm:$0xff]  ;;  %v9643_v39 = vld [vmem:[#allocation4 + $0xc8] sm:$0xff]  ;;  %vm19757_vm10 = vmmov %vm19557_vm0 }
 0x4cb   : > { %9705 = vst.msk [vmem:[#allocation4 + $0xb8] sm:$0xff] %vm19750_vm8, %v9673_v32  ;;  %v10156_v31 = vadd.f32 %v18455_v48, %v10124_v21  ;;  %vm19758_vm6 = vmmov %vm19557_vm0  ;;  %v9648_v21 = vld [vmem:[#allocation4 + $0xf0] sm:$0xff] }
 0x4cc   : > { %10187 = vst.msk [vmem:[#allocation4 + $0x90] sm:$0xff] %vm19751_vm11, %v10155_v10  ;;  %v10122_v55 = vld [vmem:[#allocation4 + $0x88] sm:$0xff]  ;;  %vm19759_vm1 = vmmov %vm19557_vm0 }
 0x4cd   : > { %9703 = vst.msk [vmem:[#allocation4 + $0xa8] sm:$0xff] %vm19752_vm7, %v9671_v52  ;;  %v10154_v58 = vadd.f32 %v10122_v55, %v18458_v14  ;;  %vm19760_vm4 = vmmov %vm19557_vm0 }
 0x4ce   : > { %10185 = vst.msk [vmem:[#allocation4 + $0x80] sm:$0xff] %vm19753_vm2, %v10153_v27  ;;  %v13054_v23 = vpop.f32.mrb[44].mxu1  ;;  %vm19761_vm5 = vmmov %vm19557_vm0 }
 0x4cf   : > { %10188 = vst.msk [vmem:[#allocation4 + $0x98] sm:$0xff] %vm19754_vm9, %v10156_v31  ;;  %v18650_v57 = vpop.f32.mrb[80].mxu0  ;;  %v9676_v1 = vadd.f32 %v13054_v23, %v9644_v3  ;;  %v9587_v50 = vpop.f32.mrb[45].mxu1  ;;  %vm19762_vm12 = vmmov %vm19557_vm0 }
 0x4d0   : > { %10186 = vst.msk [vmem:[#allocation4 + $0x88] sm:$0xff] %vm19755_vm14, %v10154_v58  ;;  %v18653_v38 = vpop.f32.mrb[81].mxu0  ;;  %v9674_v48 = vadd.f32 %v9642_v47, %v9587_v50  ;;  %v13055_v0 = vpop.f32.mrb[46].mxu1  ;;  %v10127_v8 = vld [vmem:[#allocation4 + $0xb0] sm:$0xff]  ;;  %v9646_v58 = vld [vmem:[#allocation4 + $0xe0] sm:$0xff]  ;;  %vm19763_vm15 = vmmov %vm19557_vm0 }
 0x4d1   : > { %v18655_v17 = vpop.f32.mrb[82].mxu0  ;;  %9708 = vst.msk [vmem:[#allocation4 + $0xd0] sm:$0xff] %vm19756_vm13, %v9676_v1  ;;  %v9677_v14 = vadd.f32 %v13055_v0, %v9645_v24  ;;  %v9590_v61 = vpop.f32.mrb[47].mxu1  ;;  %v10159_v59 = vadd.f32 %v18470_v5, %v10127_v8  ;;  %v10125_v32 = vld [vmem:[#allocation4 + $0xa0] sm:$0xff]  ;;  %v9649_v1 = vld [vmem:[#allocation4 + $0xf8] sm:$0xff]  ;;  %v9647_v0 = vld [vmem:[#allocation4 + $0xe8] sm:$0xff] }
 0x4d2   : > { %v18658_v49 = vpop.f32.mrb[83].mxu0  ;;  %9706 = vst.msk [vmem:[#allocation4 + $0xc0] sm:$0xff] %vm19757_vm10, %v9674_v48  ;;  %v9675_v56 = vadd.f32 %v9643_v39, %v9590_v61  ;;  %v10157_v42 = vadd.f32 %v10125_v32, %v18473_v4  ;;  %v10128_v10 = vld [vmem:[#allocation4 + $0xb8] sm:$0xff]  ;;  %vm19764_vm3 = vmmov %vm19557_vm0 }
 0x4d3   : > { %9709 = vst.msk [vmem:[#allocation4 + $0xd8] sm:$0xff] %vm19758_vm6, %v9677_v14  ;;  %v10160_v28 = vadd.f32 %v18475_v16, %v10128_v10  ;;  %vm19765_vm8 = vmmov %vm19557_vm0  ;;  %v10512_v10 = vld [vmem:[#allocation4 + $0x10] sm:$0xff] }
 0x4d4   : > { %10191 = vst.msk [vmem:[#allocation4 + $0xb0] sm:$0xff] %vm19759_vm1, %v10159_v59  ;;  %v10126_v52 = vld [vmem:[#allocation4 + $0xa8] sm:$0xff]  ;;  %vm19766_vm11 = vmmov %vm19557_vm0 }
 0x4d5   : > { %9707 = vst.msk [vmem:[#allocation4 + $0xc8] sm:$0xff] %vm19760_vm4, %v9675_v56  ;;  %v10158_v5 = vadd.f32 %v10126_v52, %v18478_v36  ;;  %vm19767_vm7 = vmmov %vm19557_vm0  ;;  %v10510_v52 = vld [vmem:[#allocation4] sm:$0xff] }
 0x4d6   : > { %10189 = vst.msk [vmem:[#allocation4 + $0xa0] sm:$0xff] %vm19557_vm0, %v10157_v42  ;;  %v13058_v27 = vpop.f32.mrb[48].mxu1  ;;  %vm19768_vm2 = vmmov %vm19557_vm0 }
 0x4d7   : > { %10192 = vst.msk [vmem:[#allocation4 + $0xb8] sm:$0xff] %vm19761_vm5, %v10160_v28  ;;  %v18670_v31 = vpop.f32.mrb[84].mxu0  ;;  %v9680_v4 = vadd.f32 %v13058_v27, %v9648_v21  ;;  %v9603_v55 = vpop.f32.mrb[49].mxu1  ;;  %vm19769_vm9 = vmmov %vm19557_vm0  ;;  %v10513_v21 = vld [vmem:[#allocation4 + $0x18] sm:$0xff] }
 0x4d8   : > { %10190 = vst.msk [vmem:[#allocation4 + $0xa8] sm:$0xff] %vm19762_vm12, %v10158_v5  ;;  %v18673_v23 = vpop.f32.mrb[85].mxu0  ;;  %v9678_v16 = vadd.f32 %v9646_v58, %v9603_v55  ;;  %v13059_v3 = vpop.f32.mrb[50].mxu1  ;;  %v10131_v47 = vld [vmem:[#allocation4 + $0xd0] sm:$0xff]  ;;  %vm19770_vm14 = vmmov %vm19557_vm0  ;;  %v10511_v58 = vld [vmem:[#allocation4 + $0x8] sm:$0xff] }
 0x4d9   : > { %v18675_v50 = vpop.f32.mrb[86].mxu0  ;;  %9712 = vst.msk [vmem:[#allocation4 + $0xf0] sm:$0xff] %vm19763_vm15, %v9680_v4  ;;  %v9681_v36 = vadd.f32 %v13059_v3, %v9649_v1  ;;  %v9606_v48 = vpop.f32.mrb[51].mxu1  ;;  %v10163_v8 = vadd.f32 %v18490_v25, %v10131_v47  ;;  %v10129_v14 = vld [vmem:[#allocation4 + $0xc0] sm:$0xff]  ;;  %vm19771_vm13 = vmmov %vm19557_vm0 }
 0x4da   : > { %v18678_v24 = vpop.f32.mrb[87].mxu0  ;;  %9710 = vst.msk [vmem:[#allocation4 + $0xe0] sm:$0xff] %vm19764_vm3, %v9678_v16  ;;  %v9679_v61 = vadd.f32 %v9647_v0, %v9606_v48  ;;  %v10161_v39 = vadd.f32 %v10129_v14, %v18493_v51  ;;  %v10132_v59 = vld [vmem:[#allocation4 + $0xd8] sm:$0xff]  ;;  %vm19772_vm10 = vmmov %vm19557_vm0 }
 0x4db   : > { %9713 = vst.msk [vmem:[#allocation4 + $0xf8] sm:$0xff] %vm19765_vm8, %v9681_v36  ;;  %v10164_v32 = vadd.f32 %v18495_v6, %v10132_v59  ;;  %vm19773_vm6 = vmmov %vm19557_vm0 }
 0x4dc   : > { %10195 = vst.msk [vmem:[#allocation4 + $0xd0] sm:$0xff] %vm19766_vm11, %v10163_v8  ;;  %v10130_v56 = vld [vmem:[#allocation4 + $0xc8] sm:$0xff]  ;;  %vm19774_vm1 = vmmov %vm19557_vm0  ;;  %v10516_v8 = vld [vmem:[#allocation4 + $0x30] sm:$0xff] }
 0x4dd   : > { %9711 = vst.msk [vmem:[#allocation4 + $0xe8] sm:$0xff] %vm19767_vm7, %v9679_v61  ;;  %v10162_v25 = vadd.f32 %v10130_v56, %v18498_v34  ;;  %vm19775_vm4 = vmmov %vm19557_vm0  ;;  %v10514_v61 = vld [vmem:[#allocation4 + $0x20] sm:$0xff] }
 0x4de   : > { %10193 = vst.msk [vmem:[#allocation4 + $0xc0] sm:$0xff] %vm19768_vm2, %v10161_v39  ;;  %v13110_v42 = vpop.f32.mrb[52].mxu1  ;;  %vm19776_vm5 = vmmov %vm19557_vm0 }
 0x4df   : > { %10196 = vst.msk [vmem:[#allocation4 + $0xd8] sm:$0xff] %vm19769_vm9, %v10164_v32  ;;  %v10544_v51 = vadd.f32 %v13110_v42, %v10512_v10  ;;  %v10383_v28 = vpop.f32.mrb[53].mxu1  ;;  %vm19777_vm12 = vmmov %vm19557_vm0  ;;  %v10517_v32 = vld [vmem:[#allocation4 + $0x38] sm:$0xff]  ;;  %v10515_v10 = vld [vmem:[#allocation4 + $0x28] sm:$0xff] }
 0x4e0   : > { %10194 = vst.msk [vmem:[#allocation4 + $0xc8] sm:$0xff] %vm19770_vm14, %v10162_v25  ;;  %v10542_v5 = vadd.f32 %v10510_v52, %v10383_v28  ;;  %v13111_v27 = vpop.f32.mrb[54].mxu1  ;;  %v10135_v6 = vld [vmem:[#allocation4 + $0xf0] sm:$0xff]  ;;  %vm19778_vm15 = vmmov %vm19557_vm0 }
 0x4e1   : > { %10576 = vst.msk [vmem:[#allocation4 + $0x10] sm:$0xff] %vm19771_vm13, %v10544_v51  ;;  %v10545_v4 = vadd.f32 %v13111_v27, %v10513_v21  ;;  %v10386_v55 = vpop.f32.mrb[55].mxu1  ;;  %v10167_v34 = vadd.f32 %v18510_v44, %v10135_v6  ;;  %v10133_v16 = vld [vmem:[#allocation4 + $0xe0] sm:$0xff]  ;;  %vm19779_vm3 = vmmov %vm19557_vm0  ;;  %v10520_v21 = vld [vmem:[#allocation4 + $0x50] sm:$0xff] }
 0x4e2   : > { %10574 = vst.msk [vmem:[#allocation4] sm:$0xff] %vm19772_vm10, %v10542_v5  ;;  %v10543_v3 = vadd.f32 %v10511_v58, %v10386_v55  ;;  %v10165_v1 = vadd.f32 %v10133_v16, %v18513_v12  ;;  %v10136_v47 = vld [vmem:[#allocation4 + $0xf8] sm:$0xff]  ;;  %vm19780_vm8 = vmmov %vm19557_vm0  ;;  %v10518_v55 = vld [vmem:[#allocation4 + $0x40] sm:$0xff] }
 0x4e3   : > { %10577 = vst.msk [vmem:[#allocation4 + $0x18] sm:$0xff] %vm19773_vm6, %v10545_v4  ;;  %v10168_v36 = vadd.f32 %v18515_v26, %v10136_v47  ;;  %vm19781_vm11 = vmmov %vm19557_vm0  ;;  %v10521_v16 = vld [vmem:[#allocation4 + $0x58] sm:$0xff] }
 0x4e4   : > { %10199 = vst.msk [vmem:[#allocation4 + $0xf0] sm:$0xff] %vm19774_vm1, %v10167_v34  ;;  %v10134_v48 = vld [vmem:[#allocation4 + $0xe8] sm:$0xff]  ;;  %vm19782_vm7 = vmmov %vm19557_vm0 }
 0x4e5   : > { %10575 = vst.msk [vmem:[#allocation4 + $0x8] sm:$0xff] %vm19775_vm4, %v10543_v3  ;;  %v10166_v44 = vadd.f32 %v10134_v48, %v18518_v9  ;;  %vm19783_vm2 = vmmov %vm19557_vm0  ;;  %v10519_v48 = vld [vmem:[#allocation4 + $0x48] sm:$0xff] }
 0x4e6   : > { %10197 = vst.msk [vmem:[#allocation4 + $0xe0] sm:$0xff] %vm19557_vm0, %v10165_v1  ;;  %v13114_v0 = vpop.f32.mrb[56].mxu1  ;;  %vm19784_vm9 = vmmov %vm19557_vm0 }
 0x4e7   : > { %10200 = vst.msk [vmem:[#allocation4 + $0xf8] sm:$0xff] %vm19776_vm5, %v10168_v36  ;;  %v10548_v12 = vadd.f32 %v13114_v0, %v10516_v8  ;;  %v10399_v14 = vpop.f32.mrb[57].mxu1  ;;  %vm19785_vm14 = vmmov %vm19557_vm0  ;;  %v18729_v0 = vld [vmem:[%s18952_s6] ss:$0 sm:$0xff] }
 0x4e8   : > { %10198 = vst.msk [vmem:[#allocation4 + $0xe8] sm:$0xff] %vm19777_vm12, %v10166_v44  ;;  %v11019_v39 = vld [vmem:[#allocation4 + $0x10] sm:$0xff]  ;;  %v10546_v59 = vadd.f32 %v10514_v61, %v10399_v14  ;;  %v13115_v26 = vpop.f32.mrb[58].mxu1  ;;  %vm19786_vm13 = vmmov %vm19557_vm0 }
 0x4e9   : > { %v11051_v56 = vadd.f32 %v18530_v63, %v11019_v39  ;;  %v11017_v25 = vld [vmem:[#allocation4] sm:$0xff]  ;;  %10580 = vst.msk [vmem:[#allocation4 + $0x30] sm:$0xff] %vm19778_vm15, %v10548_v12  ;;  %v10549_v9 = vadd.f32 %v13115_v26, %v10517_v32  ;;  %v10402_v42 = vpop.f32.mrb[59].mxu1  ;;  %vm19787_vm10 = vmmov %vm19557_vm0  ;;  %vm11383_vm15 = vcmask 519168  }
 0x4ea   : > { %v11049_v51 = vadd.f32 %v11017_v25, %v18533_v37  ;;  %v11020_v28 = vld [vmem:[#allocation4 + $0x18] sm:$0xff]  ;;  %10578 = vst.msk [vmem:[#allocation4 + $0x20] sm:$0xff] %vm19779_vm3, %v10546_v59  ;;  %v10547_v52 = vadd.f32 %v10515_v10, %v10402_v42  ;;  %vm19788_vm6 = vmmov %vm19557_vm0 }
 0x4eb   : > { %11083 = vst.msk [vmem:[#allocation4 + $0x10] sm:$0xff] %vm19780_vm8, %v11051_v56  ;;  %v11052_v5 = vadd.f32 %v18535_v2, %v11020_v28  ;;  %v18720_v2 = vld [vmem:[%s18950_s4] ss:$0 sm:$0xff]  ;;  %vm19789_vm1 = vmmov %vm19557_vm0 }
 0x4ec   : > { %v11018_v27 = vld [vmem:[#allocation4 + $0x8] sm:$0xff]  ;;  %10581 = vst.msk [vmem:[#allocation4 + $0x38] sm:$0xff] %vm19781_vm11, %v10549_v9  ;;  %vm19790_vm4 = vmmov %vm19557_vm0 }
 0x4ed   : > { %11081 = vst.msk [vmem:[#allocation4] sm:$0xff] %vm19782_vm7, %v11049_v51  ;;  %v11050_v63 = vadd.f32 %v11018_v27, %v18538_v54  ;;  %vm19791_vm5 = vmmov %vm19557_vm0  ;;  %v10524_v51 = vld [vmem:[#allocation4 + $0x70] sm:$0xff]  ;;  %v10522_v27 = vld [vmem:[#allocation4 + $0x60] sm:$0xff] }
 0x4ee   : > { %10579 = vst.msk [vmem:[#allocation4 + $0x28] sm:$0xff] %vm19783_vm2, %v10547_v52  ;;  %v13118_v37 = vpop.f32.mrb[60].mxu1  ;;  %vm19792_vm12 = vmmov %vm19557_vm0 }
 0x4ef   : > { %11084 = vst.msk [vmem:[#allocation4 + $0x18] sm:$0xff] %vm19784_vm9, %v11052_v5  ;;  %v10552_v6 = vadd.f32 %v13118_v37, %v10520_v21  ;;  %v10415_v4 = vpop.f32.mrb[61].mxu1  ;;  %vm19793_vm3 = vmmov %vm19557_vm0 }
 0x4f0   : > { %11082 = vst.msk [vmem:[#allocation4 + $0x8] sm:$0xff] %vm19785_vm14, %v11050_v63  ;;  %v11023_v58 = vld [vmem:[#allocation4 + $0x30] sm:$0xff]  ;;  %v10550_v34 = vadd.f32 %v10518_v55, %v10415_v4  ;;  %v13119_v54 = vpop.f32.mrb[62].mxu1  ;;  %v10525_v55 = vld [vmem:[#allocation4 + $0x78] sm:$0xff]  ;;  %vm19794_vm8 = vmmov %vm19557_vm0 }
 0x4f1   : > { %v11055_v3 = vadd.f32 %v18550_v33, %v11023_v58  ;;  %v11021_v1 = vld [vmem:[#allocation4 + $0x20] sm:$0xff]  ;;  %10584 = vst.msk [vmem:[#allocation4 + $0x50] sm:$0xff] %vm19786_vm13, %v10552_v6  ;;  %v10553_v47 = vadd.f32 %v13119_v54, %v10521_v16  ;;  %v10418_v36 = vpop.f32.mrb[63].mxu1  ;;  %vm19795_vm11 = vmmov %vm19557_vm0 }
 0x4f2   : > { %v11115_v44 = vld [vmem:[#allocation4 + $0x10] sm:$0xff]  ;;  %v11053_v8 = vadd.f32 %v11021_v1, %v18553_v35  ;;  %10582 = vst.msk [vmem:[#allocation4 + $0x40] sm:$0xff] %vm19787_vm10, %v10550_v34  ;;  %v10551_v14 = vadd.f32 %v10519_v48, %v10418_v36  ;;  %vm19796_vm7 = vmmov %vm19557_vm0 }
 0x4f3   : > { %v11024_v12 = vld [vmem:[#allocation4 + $0x38] sm:$0xff]  ;;  %v11154_v33 = vmul.f32 %v18720_v2, %v11115_v44  ;;  %11087 = vst.msk [vmem:[#allocation4 + $0x30] sm:$0xff] %vm19788_vm6, %v11055_v3  ;;  %vm19797_vm2 = vmmov %vm19557_vm0 }
 0x4f4   : > { %v11113_v61 = vld [vmem:[#allocation4] sm:$0xff]  ;;  %v11056_v39 = vadd.f32 %v18555_v46, %v11024_v12  ;;  %10585 = vst.msk [vmem:[#allocation4 + $0x58] sm:$0xff] %vm19789_vm1, %v10553_v47  ;;  %v10523_v47 = vld [vmem:[#allocation4 + $0x68] sm:$0xff]  ;;  %vm19798_vm9 = vmmov %vm19557_vm0 }
 0x4f5   : > { %v11022_v59 = vld [vmem:[#allocation4 + $0x28] sm:$0xff]  ;;  %v11152_v26 = vmul.f32 %v18720_v2, %v11113_v61  ;;  %11085 = vst.msk [vmem:[#allocation4 + $0x20] sm:$0xff] %vm19790_vm4, %v11053_v8  ;;  %v11193_v56 = vadd.f32 %v18729_v0, %v11154_v33  ;;  %vm19799_vm14 = vmmov %vm19557_vm0 }
 0x4f6   : > { %v11116_v32 = vld [vmem:[#allocation4 + $0x18] sm:$0xff]  ;;  %v11054_v35 = vadd.f32 %v11022_v59, %v18558_v11  ;;  %10583 = vst.msk [vmem:[#allocation4 + $0x48] sm:$0xff] %vm19557_vm0, %v10551_v14  ;;  %v13122_v10 = vpop.f32.mrb[64].mxu1  ;;  %vm19800_vm13 = vmmov %vm19557_vm0 }
 0x4f7   : > { %v11155_v25 = vmul.f32 %v18720_v2, %v11116_v32  ;;  %v11114_v9 = vld [vmem:[#allocation4 + $0x8] sm:$0xff]  ;;  %11088 = vst.msk [vmem:[#allocation4 + $0x38] sm:$0xff] %vm19791_vm5, %v11056_v39  ;;  %v11191_v46 = vadd.f32 %v18729_v0, %v11152_v26  ;;  %v11225_v28 = vmax.f32 %v11193_v56, 0.0  ;;  %v10556_v52 = vadd.f32 %v13122_v10, %v10524_v51  ;;  %v10431_v5 = vpop.f32.mrb[65].mxu1  ;;  %vm19801_vm10 = vmmov %vm19557_vm0 }
 0x4f8   : > { %v11153_v42 = vmul.f32 %v18720_v2, %v11114_v9  ;;  %11086 = vst.msk [vmem:[#allocation4 + $0x28] sm:$0xff] %vm19792_vm12, %v11054_v35  ;;  %v11027_v21 = vld [vmem:[#allocation4 + $0x50] sm:$0xff]  ;;  %v10554_v6 = vadd.f32 %v10522_v27, %v10431_v5  ;;  %v13123_v4 = vpop.f32.mrb[66].mxu1  ;;  %vm19802_vm6 = vmmov %vm19557_vm0 }
 0x4f9   : > { %v11194_v11 = vadd.f32 %v18729_v0, %v11155_v25  ;;  %v11223_v63 = vmax.f32 %v11191_v46, 0.0  ;;  %v11989_v58 = vpack.c.bf16 %v11225_v28, %v11225_v28  ;;  %v11059_v54 = vadd.f32 %v18570_v19, %v11027_v21  ;;  %v11025_v16 = vld [vmem:[#allocation4 + $0x40] sm:$0xff]  ;;  %10588 = vst.msk [vmem:[#allocation4 + $0x70] sm:$0xff] %vm19793_vm3, %v10556_v52  ;;  %v10434_v1 = vpop.f32.mrb[67].mxu1  ;;  %vm19803_vm1 = vmmov %vm19557_vm0 }
 0x4fa   : > { %v11192_v37 = vadd.f32 %v18729_v0, %v11153_v42  ;;  %v10557_v3 = vadd.f32 %v13123_v4, %v10525_v55  ;;  %v11119_v44 = vld [vmem:[#allocation4 + $0x30] sm:$0xff]  ;;  %v11057_v8 = vadd.f32 %v11025_v16, %v18573_v18  ;;  %10586 = vst.msk [vmem:[#allocation4 + $0x60] sm:$0xff] %vm19794_vm8, %v10554_v6  ;;  %v10555_v14 = vadd.f32 %v10523_v47, %v10434_v1  ;;  %v10526_v52 = vld [vmem:[#allocation4 + $0x80] sm:$0xff]  ;;  %v10529_v6 = vld [vmem:[#allocation4 + $0x98] sm:$0xff] }
 0x4fb   : > { %v11226_v34 = vmax.f32 %v11194_v11, 0.0  ;;  %v11987_v36 = vpack.c.bf16 %v11223_v63, %v11223_v63  ;;  %v11028_v12 = vld [vmem:[#allocation4 + $0x58] sm:$0xff]  ;;  %11386 = vst.msk [vmem:[%s18752_s19 + $0x8] sm:$0xf] %vm11383_vm15, %v11989_v58  ;;  %v11158_v33 = vmul.f32 %v18720_v2, %v11119_v44  ;;  %v10528_v42 = vld [vmem:[#allocation4 + $0x90] sm:$0xff]  ;;  %vm19804_vm4 = vmmov %vm19557_vm0 }
 0x4fc   : > { %v11224_v48 = vmax.f32 %v11192_v37, 0.0  ;;  %v11117_v61 = vld [vmem:[#allocation4 + $0x20] sm:$0xff]  ;;  %11091 = vst.msk [vmem:[#allocation4 + $0x50] sm:$0xff] %vm19795_vm11, %v11059_v54  ;;  %v11060_v39 = vadd.f32 %v18575_v62, %v11028_v12  ;;  %vm19805_vm5 = vmmov %vm19557_vm0 }
 0x4fd   : > { %v11990_v19 = vpack.c.bf16 %v11226_v34, %v11226_v34  ;;  %v11026_v59 = vld [vmem:[#allocation4 + $0x48] sm:$0xff]  ;;  %10589 = vst.msk [vmem:[#allocation4 + $0x78] sm:$0xff] %vm19796_vm7, %v10557_v3  ;;  %v11156_v26 = vmul.f32 %v18720_v2, %v11117_v61  ;;  %v11197_v56 = vadd.f32 %v18729_v0, %v11158_v33  ;;  %vm19806_vm12 = vmmov %vm19557_vm0 }
 0x4fe   : > { %11384 = vst.msk [vmem:[%s18752_s19] sm:$0xf] %vm11383_vm15, %v11987_v36  ;;  %v11988_v18 = vpack.c.bf16 %v11224_v48, %v11224_v48  ;;  %v11120_v32 = vld [vmem:[#allocation4 + $0x38] sm:$0xff]  ;;  %v11058_v35 = vadd.f32 %v11026_v59, %v18578_v60  ;;  %v13126_v60 = vpop.f32.mrb[68].mxu1  ;;  %v10527_v3 = vld [vmem:[#allocation4 + $0x88] sm:$0xff]  ;;  %vm19807_vm3 = vmmov %vm19557_vm0 }
 0x4ff   : > { %11089 = vst.msk [vmem:[#allocation4 + $0x40] sm:$0xff] %vm19797_vm2, %v11057_v8  ;;  %v11159_v62 = vmul.f32 %v18720_v2, %v11120_v32  ;;  %v11118_v25 = vld [vmem:[#allocation4 + $0x28] sm:$0xff]  ;;  %v11195_v9 = vadd.f32 %v18729_v0, %v11156_v26  ;;  %v11229_v10 = vmax.f32 %v11197_v56, 0.0  ;;  %v10560_v28 = vadd.f32 %v13126_v60, %v10528_v42  ;;  %v10447_v11 = vpop.f32.mrb[69].mxu1  ;;  %v10532_v56 = vld [vmem:[#allocation4 + $0xb0] sm:$0xff]  ;;  %v10530_v60 = vld [vmem:[#allocation4 + $0xa0] sm:$0xff] }
 0x500   : > { %10587 = vst.msk [vmem:[#allocation4 + $0x68] sm:$0xff] %vm19798_vm9, %v10555_v14  ;;  %v11157_v46 = vmul.f32 %v18720_v2, %v11118_v25  ;;  %v11031_v63 = vld [vmem:[#allocation4 + $0x70] sm:$0xff]  ;;  %v10558_v37 = vadd.f32 %v10526_v52, %v10447_v11  ;;  %v13127_v21 = vpop.f32.mrb[70].mxu1  ;;  %v10533_v52 = vld [vmem:[#allocation4 + $0xb8] sm:$0xff]  ;;  %vm19808_vm8 = vmmov %vm19557_vm0 }
 0x501   : > { %11387 = vst.msk [vmem:[%s18752_s19 + $0xc] sm:$0xf] %vm11383_vm15, %v11990_v19  ;;  %11385 = vst.msk [vmem:[%s18752_s19 + $0x4] sm:$0xf] %vm11383_vm15, %v11988_v18  ;;  %v11198_v51 = vadd.f32 %v18729_v0, %v11159_v62  ;;  %v11227_v5 = vmax.f32 %v11195_v9, 0.0  ;;  %v11993_v4 = vpack.c.bf16 %v11229_v10, %v11229_v10  ;;  %v11063_v58 = vadd.f32 %v18590_v7, %v11031_v63  ;;  %v11029_v34 = vld [vmem:[#allocation4 + $0x60] sm:$0xff] }
 0x502   : > { %11092 = vst.msk [vmem:[#allocation4 + $0x58] sm:$0xff] %vm19799_vm14, %v11060_v39  ;;  %v11196_v27 = vadd.f32 %v18729_v0, %v11157_v46  ;;  %v10561_v54 = vadd.f32 %v13127_v21, %v10529_v6  ;;  %v10450_v16 = vpop.f32.mrb[71].mxu1  ;;  %v11061_v48 = vadd.f32 %v11029_v34, %v18593_v29  ;;  %vm19809_vm11 = vmmov %vm19557_vm0 }
 0x503   : > { %11090 = vst.msk [vmem:[#allocation4 + $0x48] sm:$0xff] %vm19800_vm13, %v11058_v35  ;;  %v11230_v55 = vmax.f32 %v11198_v51, 0.0  ;;  %v11991_v1 = vpack.c.bf16 %v11227_v5, %v11227_v5  ;;  %v11123_v36 = vld [vmem:[#allocation4 + $0x50] sm:$0xff]  ;;  %v10559_v8 = vadd.f32 %v10527_v3, %v10450_v16  ;;  %vm19810_vm7 = vmmov %vm19557_vm0 }
 0x504   : > { %10592 = vst.msk [vmem:[#allocation4 + $0x90] sm:$0xff] %vm19801_vm10, %v10560_v28  ;;  %v11228_v47 = vmax.f32 %v11196_v27, 0.0  ;;  %v11032_v44 = vld [vmem:[#allocation4 + $0x78] sm:$0xff]  ;;  %v11162_v12 = vmul.f32 %v18720_v2, %v11123_v36  ;;  %vm19811_vm2 = vmmov %vm19557_vm0 }
 0x505   : > { %10590 = vst.msk [vmem:[#allocation4 + $0x80] sm:$0xff] %vm19802_vm6, %v10558_v37  ;;  %v11994_v7 = vpack.c.bf16 %v11230_v55, %v11230_v55  ;;  %v11064_v19 = vadd.f32 %v18595_v43, %v11032_v44  ;;  %vm19812_vm9 = vmmov %vm19557_vm0 }
 0x506   : > { %11390 = vst.msk [vmem:[%s18752_s19 + $0x18] sm:$0xf] %vm11383_vm15, %v11993_v4  ;;  %v11121_v14 = vld [vmem:[#allocation4 + $0x40] sm:$0xff]  ;;  %11388 = vst.msk [vmem:[%s18752_s19 + $0x10] sm:$0xf] %vm11383_vm15, %v11991_v1  ;;  %v11992_v29 = vpack.c.bf16 %v11228_v47, %v11228_v47  ;;  %v11201_v18 = vadd.f32 %v18729_v0, %v11162_v12  ;;  %v10531_v4 = vld [vmem:[#allocation4 + $0xa8] sm:$0xff] }
 0x507   : > { %11095 = vst.msk [vmem:[#allocation4 + $0x70] sm:$0xff] %vm19803_vm1, %v11063_v58  ;;  %v11030_v33 = vld [vmem:[#allocation4 + $0x68] sm:$0xff]  ;;  %v11160_v61 = vmul.f32 %v18720_v2, %v11121_v14  ;;  %vm19813_vm14 = vmmov %vm19557_vm0 }
 0x508   : > { %10593 = vst.msk [vmem:[#allocation4 + $0x98] sm:$0xff] %vm19804_vm4, %v10561_v54  ;;  %v11062_v59 = vadd.f32 %v11030_v33, %v18598_v45  ;;  %v13130_v45 = vpop.f32.mrb[72].mxu1  ;;  %v11233_v62 = vmax.f32 %v11201_v18, 0.0  ;;  %vm19814_vm13 = vmmov %vm19557_vm0 }
 0x509   : > { %v11124_v39 = vld [vmem:[#allocation4 + $0x58] sm:$0xff]  ;;  %11093 = vst.msk [vmem:[#allocation4 + $0x60] sm:$0xff] %vm19557_vm0, %v11061_v48  ;;  %v11199_v32 = vadd.f32 %v18729_v0, %v11160_v61  ;;  %v10564_v9 = vadd.f32 %v13130_v45, %v10532_v56  ;;  %v10463_v46 = vpop.f32.mrb[73].mxu1  ;;  %vm19815_vm10 = vmmov %vm19557_vm0 }
 0x50a   : > { %10591 = vst.msk [vmem:[#allocation4 + $0x88] sm:$0xff] %vm19805_vm5, %v10559_v8  ;;  %v11163_v43 = vmul.f32 %v18720_v2, %v11124_v39  ;;  %v11122_v26 = vld [vmem:[#allocation4 + $0x48] sm:$0xff]  ;;  %v10562_v28 = vadd.f32 %v10530_v60, %v10463_v46  ;;  %v13131_v11 = vpop.f32.mrb[74].mxu1  ;;  %v11997_v5 = vpack.c.bf16 %v11233_v62, %v11233_v62  ;;  %v10537_v62 = vld [vmem:[#allocation4 + $0xd8] sm:$0xff]  ;;  %vm19816_vm6 = vmmov %vm19557_vm0 }
 0x50b   : > { %11391 = vst.msk [vmem:[%s18752_s19 + $0x1c] sm:$0xf] %vm11383_vm15, %v11994_v7  ;;  %11389 = vst.msk [vmem:[%s18752_s19 + $0x14] sm:$0xf] %vm11383_vm15, %v11992_v29  ;;  %v11161_v35 = vmul.f32 %v18720_v2, %v11122_v26  ;;  %v11231_v42 = vmax.f32 %v11199_v32, 0.0  ;;  %v11035_v51 = vld [vmem:[#allocation4 + $0x90] sm:$0xff]  ;;  %v10565_v21 = vadd.f32 %v13131_v11, %v10533_v52 }
 0x50c   : > { %11096 = vst.msk [vmem:[#allocation4 + $0x78] sm:$0xff] %vm19806_vm12, %v11064_v19  ;;  %v11202_v25 = vadd.f32 %v18729_v0, %v11163_v43  ;;  %v11067_v63 = vadd.f32 %v18610_v53, %v11035_v51  ;;  %v11033_v37 = vld [vmem:[#allocation4 + $0x80] sm:$0xff]  ;;  %v10466_v6 = vpop.f32.mrb[75].mxu1  ;;  %v10536_v29 = vld [vmem:[#allocation4 + $0xd0] sm:$0xff]  ;;  %v10535_v51 = vld [vmem:[#allocation4 + $0xc8] sm:$0xff] }
 0x50d   : > { %11094 = vst.msk [vmem:[#allocation4 + $0x68] sm:$0xff] %vm19807_vm3, %v11062_v59  ;;  %v11200_v10 = vadd.f32 %v18729_v0, %v11161_v35  ;;  %v11995_v55 = vpack.c.bf16 %v11231_v42, %v11231_v42  ;;  %v11065_v54 = vadd.f32 %v11033_v37, %v18613_v41  ;;  %v10563_v3 = vadd.f32 %v10531_v4, %v10466_v6  ;;  %v10534_v43 = vld [vmem:[#allocation4 + $0xc0] sm:$0xff]  ;;  %vm19817_vm1 = vmmov %vm19557_vm0 }
 0x50e   : > { %v11234_v27 = vmax.f32 %v11202_v25, 0.0  ;;  %10596 = vst.msk [vmem:[#allocation4 + $0xb0] sm:$0xff] %vm19808_vm8, %v10564_v9  ;;  %v11127_v34 = vld [vmem:[#allocation4 + $0x70] sm:$0xff]  ;;  %vm19818_vm4 = vmmov %vm19557_vm0 }
 0x50f   : > { %v11232_v58 = vmax.f32 %v11200_v10, 0.0  ;;  %v11036_v16 = vld [vmem:[#allocation4 + $0x98] sm:$0xff]  ;;  %10594 = vst.msk [vmem:[#allocation4 + $0xa0] sm:$0xff] %vm19809_vm11, %v10562_v28  ;;  %v11166_v1 = vmul.f32 %v18720_v2, %v11127_v34  ;;  %vm19819_vm5 = vmmov %vm19557_vm0 }
 0x510   : > { %11394 = vst.msk [vmem:[%s18752_s19 + $0x28] sm:$0xf] %vm11383_vm15, %v11997_v5  ;;  %v11998_v53 = vpack.c.bf16 %v11234_v27, %v11234_v27  ;;  %v11125_v47 = vld [vmem:[#allocation4 + $0x60] sm:$0xff]  ;;  %v11068_v36 = vadd.f32 %v18615_v15, %v11036_v16  ;;  %11392 = vst.msk [vmem:[%s18752_s19 + $0x20] sm:$0xf] %vm11383_vm15, %v11995_v55 }
 0x511   : > { %11099 = vst.msk [vmem:[#allocation4 + $0x90] sm:$0xff] %vm19810_vm7, %v11067_v63  ;;  %v11034_v48 = vld [vmem:[#allocation4 + $0x88] sm:$0xff]  ;;  %v11996_v41 = vpack.c.bf16 %v11232_v58, %v11232_v58  ;;  %v11164_v44 = vmul.f32 %v18720_v2, %v11125_v47  ;;  %v11205_v12 = vadd.f32 %v18729_v0, %v11166_v1  ;;  %vm19820_vm12 = vmmov %vm19557_vm0  ;;  %v10540_v1 = vld [vmem:[#allocation4 + $0xf0] sm:$0xff] }
 0x512   : > { %10597 = vst.msk [vmem:[#allocation4 + $0xb8] sm:$0xff] %vm19811_vm2, %v10565_v21  ;;  %v11066_v7 = vadd.f32 %v11034_v48, %v18618_v22  ;;  %v13134_v22 = vpop.f32.mrb[76].mxu1  ;;  %vm19821_vm3 = vmmov %vm19557_vm0 }
 0x513   : > { %v11128_v8 = vld [vmem:[#allocation4 + $0x78] sm:$0xff]  ;;  %11097 = vst.msk [vmem:[#allocation4 + $0x80] sm:$0xff] %vm19812_vm9, %v11065_v54  ;;  %v11203_v19 = vadd.f32 %v18729_v0, %v11164_v44  ;;  %v11237_v61 = vmax.f32 %v11205_v12, 0.0  ;;  %v10568_v59 = vadd.f32 %v13134_v22, %v10536_v29  ;;  %v10479_v18 = vpop.f32.mrb[77].mxu1  ;;  %vm19822_vm8 = vmmov %vm19557_vm0  ;;  %v10538_v44 = vld [vmem:[#allocation4 + $0xe0] sm:$0xff] }
 0x514   : > { %10595 = vst.msk [vmem:[#allocation4 + $0xa8] sm:$0xff] %vm19813_vm14, %v10563_v3  ;;  %v11167_v15 = vmul.f32 %v18720_v2, %v11128_v8  ;;  %v11126_v14 = vld [vmem:[#allocation4 + $0x68] sm:$0xff]  ;;  %v10566_v45 = vadd.f32 %v10534_v43, %v10479_v18  ;;  %v13135_v56 = vpop.f32.mrb[78].mxu1  ;;  %vm19823_vm11 = vmmov %vm19557_vm0 }
 0x515   : > { %11395 = vst.msk [vmem:[%s18752_s19 + $0x2c] sm:$0xf] %vm11383_vm15, %v11998_v53  ;;  %11393 = vst.msk [vmem:[%s18752_s19 + $0x24] sm:$0xf] %vm11383_vm15, %v11996_v41  ;;  %v11165_v33 = vmul.f32 %v18720_v2, %v11126_v14  ;;  %v11235_v26 = vmax.f32 %v11203_v19, 0.0  ;;  %v11039_v35 = vld [vmem:[#allocation4 + $0xb0] sm:$0xff]  ;;  %v12001_v25 = vpack.c.bf16 %v11237_v61, %v11237_v61  ;;  %v10569_v42 = vadd.f32 %v13135_v56, %v10537_v62 }
 0x516   : > { %11100 = vst.msk [vmem:[#allocation4 + $0x98] sm:$0xff] %vm19814_vm13, %v11068_v36  ;;  %v11206_v39 = vadd.f32 %v18729_v0, %v11167_v15  ;;  %v11071_v46 = vadd.f32 %v18630_v40, %v11039_v35  ;;  %v11037_v60 = vld [vmem:[#allocation4 + $0xa0] sm:$0xff]  ;;  %v10482_v10 = vpop.f32.mrb[79].mxu1  ;;  %v10541_v19 = vld [vmem:[#allocation4 + $0xf8] sm:$0xff]  ;;  %v10539_v18 = vld [vmem:[#allocation4 + $0xe8] sm:$0xff] }
 0x517   : > { %11098 = vst.msk [vmem:[#allocation4 + $0x88] sm:$0xff] %vm19815_vm10, %v11066_v7  ;;  %v11204_v32 = vadd.f32 %v18729_v0, %v11165_v33  ;;  %v11999_v28 = vpack.c.bf16 %v11235_v26, %v11235_v26  ;;  %v11069_v5 = vadd.f32 %v11037_v60, %v18633_v30  ;;  %v10567_v63 = vadd.f32 %v10535_v51, %v10482_v10  ;;  %vm19824_vm7 = vmmov %vm19557_vm0 }
 0x518   : > { %v11238_v9 = vmax.f32 %v11206_v39, 0.0  ;;  %10600 = vst.msk [vmem:[#allocation4 + $0xd0] sm:$0xff] %vm19816_vm6, %v10568_v59  ;;  %v11131_v52 = vld [vmem:[#allocation4 + $0x90] sm:$0xff]  ;;  %vm19825_vm2 = vmmov %vm19557_vm0 }
 0x519   : > { %v11236_v11 = vmax.f32 %v11204_v32, 0.0  ;;  %v11040_v27 = vld [vmem:[#allocation4 + $0xb8] sm:$0xff]  ;;  %10598 = vst.msk [vmem:[#allocation4 + $0xc0] sm:$0xff] %vm19817_vm1, %v10566_v45  ;;  %v11170_v37 = vmul.f32 %v18720_v2, %v11131_v52  ;;  %vm19826_vm9 = vmmov %vm19557_vm0 }
 0x51a   : > { %11398 = vst.msk [vmem:[%s18752_s19 + $0x38] sm:$0xf] %vm11383_vm15, %v12001_v25  ;;  %v12002_v40 = vpack.c.bf16 %v11238_v9, %v11238_v9  ;;  %v11129_v21 = vld [vmem:[#allocation4 + $0x80] sm:$0xff]  ;;  %v11072_v6 = vadd.f32 %v18635_v20, %v11040_v27  ;;  %11396 = vst.msk [vmem:[%s18752_s19 + $0x30] sm:$0xf] %vm11383_vm15, %v11999_v28 }
 0x51b   : > { %11103 = vst.msk [vmem:[#allocation4 + $0xb0] sm:$0xff] %vm19818_vm4, %v11071_v46  ;;  %v11038_v4 = vld [vmem:[#allocation4 + $0xa8] sm:$0xff]  ;;  %v12000_v30 = vpack.c.bf16 %v11236_v11, %v11236_v11  ;;  %v11168_v55 = vmul.f32 %v18720_v2, %v11129_v21  ;;  %v11209_v54 = vadd.f32 %v18729_v0, %v11170_v37  ;;  %vm19827_vm14 = vmmov %vm19557_vm0 }
 0x51c   : > { %10601 = vst.msk [vmem:[#allocation4 + $0xd8] sm:$0xff] %vm19557_vm0, %v10569_v42  ;;  %v11070_v34 = vadd.f32 %v11038_v4, %v18638_v13  ;;  %v13138_v13 = vpop.f32.mrb[80].mxu1  ;;  %vm19828_vm13 = vmmov %vm19557_vm0 }
 0x51d   : > { %v11132_v58 = vld [vmem:[#allocation4 + $0x98] sm:$0xff]  ;;  %11101 = vst.msk [vmem:[#allocation4 + $0xa0] sm:$0xff] %vm19819_vm5, %v11069_v5  ;;  %v11207_v3 = vadd.f32 %v18729_v0, %v11168_v55  ;;  %v11241_v47 = vmax.f32 %v11209_v54, 0.0  ;;  %v10572_v48 = vadd.f32 %v13138_v13, %v10540_v1  ;;  %v10495_v41 = vpop.f32.mrb[81].mxu1  ;;  %vm19829_vm10 = vmmov %vm19557_vm0 }
 0x51e   : > { %10599 = vst.msk [vmem:[#allocation4 + $0xc8] sm:$0xff] %vm19820_vm12, %v10567_v63  ;;  %v11171_v20 = vmul.f32 %v18720_v2, %v11132_v58  ;;  %v11130_v16 = vld [vmem:[#allocation4 + $0x88] sm:$0xff]  ;;  %v10570_v15 = vadd.f32 %v10538_v44, %v10495_v41  ;;  %v13139_v14 = vpop.f32.mrb[82].mxu1  ;;  %vm19830_vm6 = vmmov %vm19557_vm0 }
 0x51f   : > { %11399 = vst.msk [vmem:[%s18752_s19 + $0x3c] sm:$0xf] %vm11383_vm15, %v12002_v40  ;;  %11397 = vst.msk [vmem:[%s18752_s19 + $0x34] sm:$0xf] %vm11383_vm15, %v12000_v30  ;;  %v11169_v53 = vmul.f32 %v18720_v2, %v11130_v16  ;;  %v11239_v8 = vmax.f32 %v11207_v3, 0.0  ;;  %v11043_v12 = vld [vmem:[#allocation4 + $0xd0] sm:$0xff]  ;;  %v12005_v33 = vpack.c.bf16 %v11241_v47, %v11241_v47  ;;  %v10573_v39 = vadd.f32 %v13139_v14, %v10541_v19 }
 0x520   : > { %11104 = vst.msk [vmem:[#allocation4 + $0xb8] sm:$0xff] %vm19821_vm3, %v11072_v6  ;;  %v11210_v36 = vadd.f32 %v18729_v0, %v11171_v20  ;;  %v11075_v29 = vadd.f32 %v18650_v57, %v11043_v12  ;;  %v11041_v61 = vld [vmem:[#allocation4 + $0xc0] sm:$0xff]  ;;  %v10498_v59 = vpop.f32.mrb[83].mxu1  ;;  %vm19831_vm1 = vmmov %vm19557_vm0 }
 0x521   : > { %11102 = vst.msk [vmem:[#allocation4 + $0xa8] sm:$0xff] %vm19822_vm8, %v11070_v34  ;;  %v11208_v7 = vadd.f32 %v18729_v0, %v11169_v53  ;;  %v12003_v43 = vpack.c.bf16 %v11239_v8, %v11239_v8  ;;  %v11073_v35 = vadd.f32 %v11041_v61, %v18653_v38  ;;  %v10571_v56 = vadd.f32 %v10539_v18, %v10498_v59  ;;  %vm19832_vm4 = vmmov %vm19557_vm0 }
 0x522   : > { %v11242_v22 = vmax.f32 %v11210_v36, 0.0  ;;  %10604 = vst.msk [vmem:[#allocation4 + $0xf0] sm:$0xff] %vm19823_vm11, %v10572_v48  ;;  %v11135_v32 = vld [vmem:[#allocation4 + $0xb0] sm:$0xff]  ;;  %vm19833_vm5 = vmmov %vm19557_vm0 }
 0x523   : > { %v11240_v26 = vmax.f32 %v11208_v7, 0.0  ;;  %v11044_v45 = vld [vmem:[#allocation4 + $0xd8] sm:$0xff]  ;;  %10602 = vst.msk [vmem:[#allocation4 + $0xe0] sm:$0xff] %vm19824_vm7, %v10570_v15  ;;  %v11174_v62 = vmul.f32 %v18720_v2, %v11135_v32 }
 0x524   : > { %11402 = vst.msk [vmem:[%s18752_s19 + $0x48] sm:$0xf] %vm11383_vm15, %v12005_v33  ;;  %v12006_v57 = vpack.c.bf16 %v11242_v22, %v11242_v22  ;;  %v11133_v25 = vld [vmem:[#allocation4 + $0xa0] sm:$0xff]  ;;  %v11076_v9 = vadd.f32 %v18655_v17, %v11044_v45  ;;  %11400 = vst.msk [vmem:[%s18752_s19 + $0x40] sm:$0xf] %vm11383_vm15, %v12003_v43 }
 0x525   : > { %11107 = vst.msk [vmem:[#allocation4 + $0xd0] sm:$0xff] %vm19825_vm2, %v11075_v29  ;;  %v11042_v46 = vld [vmem:[#allocation4 + $0xc8] sm:$0xff]  ;;  %v12004_v38 = vpack.c.bf16 %v11240_v26, %v11240_v26  ;;  %v11172_v60 = vmul.f32 %v18720_v2, %v11133_v25  ;;  %v11213_v51 = vadd.f32 %v18729_v0, %v11174_v62 }
 0x526   : > { %10605 = vst.msk [vmem:[#allocation4 + $0xf8] sm:$0xff] %vm19826_vm9, %v10573_v39  ;;  %v11074_v10 = vadd.f32 %v11042_v46, %v18658_v49 }
 0x527   : > { %v11136_v42 = vld [vmem:[#allocation4 + $0xb8] sm:$0xff]  ;;  %11105 = vst.msk [vmem:[#allocation4 + $0xc0] sm:$0xff] %vm19827_vm14, %v11073_v35  ;;  %v11211_v11 = vadd.f32 %v18729_v0, %v11172_v60  ;;  %v11245_v49 = vmax.f32 %v11213_v51, 0.0 }
 0x528   : > { %10603 = vst.msk [vmem:[#allocation4 + $0xe8] sm:$0xff] %vm19828_vm13, %v10571_v56  ;;  %v11175_v17 = vmul.f32 %v18720_v2, %v11136_v42  ;;  %v11134_v28 = vld [vmem:[#allocation4 + $0xa8] sm:$0xff] }
 0x529   : > { %11403 = vst.msk [vmem:[%s18752_s19 + $0x4c] sm:$0xf] %vm11383_vm15, %v12006_v57  ;;  %11401 = vst.msk [vmem:[%s18752_s19 + $0x44] sm:$0xf] %vm11383_vm15, %v12004_v38  ;;  %v11173_v52 = vmul.f32 %v18720_v2, %v11134_v28  ;;  %v11243_v27 = vmax.f32 %v11211_v11, 0.0  ;;  %v11047_v40 = vld [vmem:[#allocation4 + $0xf0] sm:$0xff]  ;;  %v12009_v37 = vpack.c.bf16 %v11245_v49, %v11245_v49 }
 0x52a   : > { %11108 = vst.msk [vmem:[#allocation4 + $0xd8] sm:$0xff] %vm19829_vm10, %v11076_v9  ;;  %v11214_v5 = vadd.f32 %v18729_v0, %v11175_v17  ;;  %v11079_v6 = vadd.f32 %v18670_v31, %v11047_v40  ;;  %v11045_v4 = vld [vmem:[#allocation4 + $0xe0] sm:$0xff] }
 0x52b   : > { %11106 = vst.msk [vmem:[#allocation4 + $0xc8] sm:$0xff] %vm19830_vm6, %v11074_v10  ;;  %v11212_v63 = vadd.f32 %v18729_v0, %v11173_v52  ;;  %v12007_v30 = vpack.c.bf16 %v11243_v27, %v11243_v27  ;;  %v11077_v34 = vadd.f32 %v11045_v4, %v18673_v23 }
 0x52c   : > { %v11246_v21 = vmax.f32 %v11214_v5, 0.0  ;;  %v11139_v58 = vld [vmem:[#allocation4 + $0xd0] sm:$0xff]  ;;  %11406 = vst.msk [vmem:[%s18752_s19 + $0x58] sm:$0xf] %vm11383_vm15, %v12009_v37 }
 0x52d   : > { %v11244_v55 = vmax.f32 %v11212_v63, 0.0  ;;  %v11048_v54 = vld [vmem:[#allocation4 + $0xf8] sm:$0xff]  ;;  %v11178_v16 = vmul.f32 %v18720_v2, %v11139_v58  ;;  %11111 = vst.msk [vmem:[#allocation4 + $0xf0] sm:$0xff] %vm19831_vm1, %v11079_v6 }
 0x52e   : > { %v12010_v20 = vpack.c.bf16 %v11246_v21, %v11246_v21  ;;  %v11137_v3 = vld [vmem:[#allocation4 + $0xc0] sm:$0xff]  ;;  %v11080_v53 = vadd.f32 %v18675_v50, %v11048_v54  ;;  %11404 = vst.msk [vmem:[%s18752_s19 + $0x50] sm:$0xf] %vm11383_vm15, %v12007_v30 }
 0x52f   : > { %v11046_v31 = vld [vmem:[#allocation4 + $0xe8] sm:$0xff]  ;;  %v12008_v13 = vpack.c.bf16 %v11244_v55, %v11244_v55  ;;  %v11176_v1 = vmul.f32 %v18720_v2, %v11137_v3  ;;  %11109 = vst.msk [vmem:[#allocation4 + $0xe0] sm:$0xff] %vm19832_vm4, %v11077_v34  ;;  %v11217_v36 = vadd.f32 %v18729_v0, %v11178_v16 }
 0x530   : > { %v11078_v23 = vadd.f32 %v11046_v31, %v18678_v24  ;;  %11407 = vst.msk [vmem:[%s18752_s19 + $0x5c] sm:$0xf] %vm11383_vm15, %v12010_v20 }
 0x531   : > { %v11140_v47 = vld [vmem:[#allocation4 + $0xd8] sm:$0xff]  ;;  %11112 = vst.msk [vmem:[#allocation4 + $0xf8] sm:$0xff] %vm19557_vm0, %v11080_v53  ;;  %v11215_v50 = vadd.f32 %v18729_v0, %v11176_v1  ;;  %v11249_v24 = vmax.f32 %v11217_v36, 0.0 }
 0x532   : > { %v11179_v48 = vmul.f32 %v18720_v2, %v11140_v47  ;;  %v11138_v41 = vld [vmem:[#allocation4 + $0xc8] sm:$0xff]  ;;  %11405 = vst.msk [vmem:[%s18752_s19 + $0x54] sm:$0xf] %vm11383_vm15, %v12008_v13 }
 0x533   : > { %v11177_v44 = vmul.f32 %v18720_v2, %v11138_v41  ;;  %11110 = vst.msk [vmem:[#allocation4 + $0xe8] sm:$0xff] %vm19833_vm5, %v11078_v23  ;;  %v11247_v7 = vmax.f32 %v11215_v50, 0.0  ;;  %v12013_v15 = vpack.c.bf16 %v11249_v24, %v11249_v24 }
 0x534   : > { %v11218_v8 = vadd.f32 %v18729_v0, %v11179_v48  ;;  %v11143_v22 = vld [vmem:[#allocation4 + $0xf0] sm:$0xff] }
 0x535   : > { %v11216_v12 = vadd.f32 %v18729_v0, %v11177_v44  ;;  %v12011_v19 = vpack.c.bf16 %v11247_v7, %v11247_v7  ;;  %11410 = vst.msk [vmem:[%s18752_s19 + $0x68] sm:$0xf] %vm11383_vm15, %v12013_v15  ;;  %v11182_v61 = vmul.f32 %v18720_v2, %v11143_v22 }
 0x536   : > { %v11250_v14 = vmax.f32 %v11218_v8, 0.0  ;;  %v11141_v39 = vld [vmem:[#allocation4 + $0xe0] sm:$0xff] }
 0x537   : > { %v11248_v33 = vmax.f32 %v11216_v12, 0.0  ;;  %11408 = vst.msk [vmem:[%s18752_s19 + $0x60] sm:$0xf] %vm11383_vm15, %v12011_v19  ;;  %v11180_v18 = vmul.f32 %v18720_v2, %v11141_v39  ;;  %v11221_v26 = vadd.f32 %v18729_v0, %v11182_v61 }
 0x538   : > { %v12014_v29 = vpack.c.bf16 %v11250_v14, %v11250_v14  ;;  %v11144_v43 = vld [vmem:[#allocation4 + $0xf8] sm:$0xff] }
 0x539   : > { %v12012_v59 = vpack.c.bf16 %v11248_v33, %v11248_v33  ;;  %v11183_v32 = vmul.f32 %v18720_v2, %v11144_v43  ;;  %v11219_v45 = vadd.f32 %v18729_v0, %v11180_v18  ;;  %v11253_v57 = vmax.f32 %v11221_v26, 0.0 }
 0x53a   : > { %11411 = vst.msk [vmem:[%s18752_s19 + $0x6c] sm:$0xf] %vm11383_vm15, %v12014_v29  ;;  %v11142_v35 = vld [vmem:[#allocation4 + $0xe8] sm:$0xff] }
 0x53b   : > { %11409 = vst.msk [vmem:[%s18752_s19 + $0x64] sm:$0xf] %vm11383_vm15, %v12012_v59  ;;  %v11181_v56 = vmul.f32 %v18720_v2, %v11142_v35  ;;  %v11222_v62 = vadd.f32 %v18729_v0, %v11183_v32  ;;  %v11251_v25 = vmax.f32 %v11219_v45, 0.0  ;;  %v12017_v46 = vpack.c.bf16 %v11253_v57, %v11253_v57 }
 0x53d   : > { %v11220_v9 = vadd.f32 %v18729_v0, %v11181_v56  ;;  %v11254_v38 = vmax.f32 %v11222_v62, 0.0  ;;  %v12015_v60 = vpack.c.bf16 %v11251_v25, %v11251_v25  ;;  %11414 = vst.msk [vmem:[%s18752_s19 + $0x78] sm:$0xf] %vm11383_vm15, %v12017_v46 }
 0x53f   : > { %v11252_v42 = vmax.f32 %v11220_v9, 0.0  ;;  %v12018_v10 = vpack.c.bf16 %v11254_v38, %v11254_v38  ;;  %11412 = vst.msk [vmem:[%s18752_s19 + $0x70] sm:$0xf] %vm11383_vm15, %v12015_v60 }
 0x541   : > { %v12016_v51 = vpack.c.bf16 %v11252_v42, %v11252_v42  ;;  %11415 = vst.msk [vmem:[%s18752_s19 + $0x7c] sm:$0xf] %vm11383_vm15, %v12018_v10 }
 0x543   : > { %11413 = vst.msk [vmem:[%s18752_s19 + $0x74] sm:$0xf] %vm11383_vm15, %v12016_v51 }
 0x544 PF: > { %s17_s24 = sadd.s32 1, %s13270_s24  }
 0x545   : > { %p14_p4 = scmp.ge.s32.totalorder %s17_s24, 12  }
 0x547   :  { %16 = sbr.rel (!%p14_p4) target bundleno = 1 (0x1), region = 92 }

</bundles_post_ra>
